<compile_context>
chip_gen: v6e
topology: v6e:2x2x1
jax: 0.10.0
libtpu: 0.0.40
codegen_flags: <defaults>
</compile_context>

<pallas_src>
import functools

import jax
import jax.numpy as jnp
from jax.experimental import pallas as pl
from jax.experimental.pallas import tpu as pltpu

# ---------------- configuration (phi = 'b0') ----------------
PHI = "b0"
CHANNELS = [32, 64, 160, 256]     # backbone feature channels c1..c4
EMBED = 256                       # embedding_dim for b0
NUM_CLASSES = 21
NUM_NEIGHBOR = 9
RATIO = 1                         # b0 -> ratio 1
HIDDEN = 64 * RATIO

TM = 256                          # matmul M-tile: M=512 -> grid (2,) "parallel"


def _round_up(v, m):
    return ((v + m - 1) // m) * m


# ---------------- Pallas kernels ----------------
def _matmul_kernel(x_ref, w_ref, b_ref, o_ref, *, relu):
    acc = jnp.dot(x_ref[...], w_ref[...], preferred_element_type=jnp.float32)
    acc = acc + b_ref[...]
    if relu:
        acc = jnp.maximum(acc, 0.0)
    o_ref[...] = acc.astype(o_ref.dtype)


def pallas_matmul(x, w, b=None, relu=False, out_dtype=jnp.float32, tm=TM):
    """(M, K) @ (K, N) + b with optional fused ReLU.

    bf16 MXU operands, f32 accumulate + f32 epilogue (v5e-safe).  N and K are zero-
    padded to multiples of 128 (lane-dense stores); rows tiled by `tm`.  Reserved for
    the hot GEMMs — tiny matmuls stay in plain XLA.
    """
    M, K = x.shape
    N = w.shape[1]
    Kp = _round_up(K, 128)
    Np = _round_up(N, 128)
    tm_eff = min(tm, _round_up(M, 8))
    Mp = _round_up(M, tm_eff)

    xb = x.astype(jnp.bfloat16)
    wb = w.astype(jnp.bfloat16)
    if (Mp, Kp) != (M, K):
        xb = jnp.pad(xb, ((0, Mp - M), (0, Kp - K)))
    if (Kp, Np) != (K, N):
        wb = jnp.pad(wb, ((0, Kp - K), (0, Np - N)))
    if b is None:
        bias = jnp.zeros((1, Np), jnp.float32)
    else:
        bias = jnp.pad(b.reshape(1, N).astype(jnp.float32), ((0, 0), (0, Np - N)))

    cost = pl.CostEstimate(
        flops=2 * Mp * Kp * Np,
        transcendentals=0,
        bytes_accessed=Mp * Kp * 2 + Kp * Np * 2 + Np * 4
        + Mp * Np * jnp.dtype(out_dtype).itemsize)

    out = pl.pallas_call(
        functools.partial(_matmul_kernel, relu=relu),
        out_shape=jax.ShapeDtypeStruct((Mp, Np), out_dtype),
        grid=(Mp // tm_eff,),
        in_specs=[
            pl.BlockSpec((tm_eff, Kp), lambda i: (i, 0)),
            pl.BlockSpec((Kp, Np), lambda i: (0, 0)),
            pl.BlockSpec((1, Np), lambda i: (0, 0)),
        ],
        out_specs=pl.BlockSpec((tm_eff, Np), lambda i: (i, 0)),
        compiler_params=pltpu.CompilerParams(dimension_semantics=("parallel",)),
        cost_estimate=cost,
    )(xb, wb, bias)
    if (Mp, Np) != (M, N):
        out = out[:M, :N]
    return out


def _connect_stage1_kernel(p_ref, w1_ref, b1_ref, w2_ref, b2_ref, conn_ref, seg_ref,
                           *, chunk):
    # Fused: three 3x3 convs (con | cd1 | seg share one im2col slab) + ReLU, then the
    # seg-branch 1x1 conv as a second in-kernel dot (the 64-wide seg hidden never
    # leaves VMEM).  Hidden column layout: [con 0:64 | cd1 64:128 | seg 128:192 | pad].
    # Rows are processed in `chunk`-sized pieces so the f32 hidden stays ~128 KiB
    # (limits spill) and the second MXU dot starts before the whole tile is done.
    tm = p_ref.shape[0]
    for c in range(tm // chunk):
        rows = pl.ds(c * chunk, chunk)
        h = jnp.dot(p_ref[rows, :], w1_ref[...], preferred_element_type=jnp.float32)
        h = jnp.maximum(h + b1_ref[...], 0.0)                       # (chunk, 256) f32
        conn_ref[rows, :] = h[:, :2 * HIDDEN].astype(conn_ref.dtype)  # [con(64)|cd1(64)]
        seg = jnp.dot(h.astype(jnp.bfloat16), w2_ref[...],
                      preferred_element_type=jnp.float32)
        seg_ref[rows, :] = (seg + b2_ref[...]).astype(seg_ref.dtype)


def _connect_stage2_kernel(p_ref, w_ref, b_ref, w1_ref, w2_ref, o_ref, *, hw):
    # Fused per-image: con (d=1) and cd1 (d=3) second-layer 3x3 convs as ONE
    # block-diagonal matmul -> lane-dense [con(9) | cd1(9) | zero-pad] slab, plus both
    # SE layers: spatial mean via a ones-vector MXU matmul, two tiny FC dots, sigmoid,
    # channel scale.  The 9-wide tensors never hit HBM.
    acc = jnp.dot(p_ref[...], w_ref[...], preferred_element_type=jnp.float32)
    acc = acc + b_ref[...]                                          # (HW, 128) f32
    pool = jnp.full((1, hw), 1.0 / hw, jnp.float32)
    y = jnp.dot(pool, acc, preferred_element_type=jnp.float32)      # (1, 128) mean
    h = jnp.maximum(jnp.dot(y, w1_ref[...], preferred_element_type=jnp.float32), 0.0)
    s = jax.nn.sigmoid(jnp.dot(h, w2_ref[...], preferred_element_type=jnp.float32))
    o_ref[...] = (acc * s).astype(o_ref.dtype)                      # padded lanes stay 0


# ---------------- glue (NHWC, plain XLA for the tiny ops) ----------------
def _im2col3x3_nhwc(x, dilation):
    # x: (B, H, W, C); stride 1, padding = dilation ('same' size), tap-major patches.
    B, H, W, C = x.shape
    p = dilation
    xp = jnp.pad(x, ((0, 0), (p, p), (p, p), (0, 0)))
    taps = [xp[:, i * dilation:i * dilation + H, j * dilation:j * dilation + W, :]
            for i in range(3) for j in range(3)]
    patches = jnp.stack(taps, axis=3)                  # (B, H, W, 9, C)
    return patches.reshape(B * H * W, 9 * C)


def _w3x3_to_mat(w):
    # (Cout, Cin, 3, 3) -> (9*Cin, Cout), tap-major to match _im2col3x3_nhwc.
    return jnp.transpose(w, (2, 3, 1, 0)).reshape(-1, w.shape[0])


def mlp_linear_nhwc(x, w, b):
    # MLP Linear embedding.  Tiny shapes (M<=512, K<=256): plain XLA, not worth a kernel.
    return jnp.dot(x.astype(jnp.float32), w) + b


def conv_module_1x1_bn_relu(x, weight, gamma, beta, mean, var, eps=1e-3):
    # ConvModule(k=1): 1x1 conv (no bias) + BatchNorm(eval, eps=1e-3 per reference
    # ConvModule) + ReLU, BN folded into the matmul.  bf16 output feeds the stage-1 im2col.
    B, H, W, C = x.shape
    scale = gamma / jnp.sqrt(var + eps)
    shift = beta - mean * scale
    w_fold = (weight * scale[:, None]).T                            # (Cin, Cout)
    out = pallas_matmul(x.reshape(B * H * W, C), w_fold, shift, relu=True,
                        out_dtype=jnp.bfloat16)
    return out.reshape(B, H, W, weight.shape[0])


def _interp_matrix(in_size, out_size, align_corners):
    # (out_size, in_size) bilinear interpolation matrix matching torch F.interpolate.
    if align_corners:
        if out_size == 1:
            src = jnp.zeros((1,), jnp.float32)
        else:
            src = jnp.arange(out_size, dtype=jnp.float32) * ((in_size - 1) / (out_size - 1))
    else:
        src = jnp.clip((jnp.arange(out_size, dtype=jnp.float32) + 0.5) * (in_size / out_size)
                       - 0.5, 0.0, in_size - 1.0)
    lo = jnp.floor(src).astype(jnp.int32)
    hi = jnp.minimum(lo + 1, in_size - 1)
    w_hi = src - lo.astype(jnp.float32)
    w_lo = 1.0 - w_hi
    return (w_lo[:, None] * jax.nn.one_hot(lo, in_size, dtype=jnp.float32)
            + w_hi[:, None] * jax.nn.one_hot(hi, in_size, dtype=jnp.float32))


def bilinear_resize_nhwc(x, out_h, out_w, align_corners):
    # Separable bilinear resize as two interpolation-matrix contractions (MXU via XLA).
    B, H, W, C = x.shape
    if (out_h, out_w) == (H, W):
        return x.astype(jnp.float32)
    ry = _interp_matrix(H, out_h, align_corners)     # (out_h, H)
    rx = _interp_matrix(W, out_w, align_corners)     # (out_w, W)
    y = jnp.einsum("oh,bhwc->bowc", ry, x.astype(jnp.float32))
    y = jnp.einsum("pw,bowc->bopc", rx, y)
    return y


# ---------------- Connect (fused Pallas stages) ----------------
def connect_stage1(xc, p):
    """Fused first stage of Connect on shared input xc (B, H, W, EMBED) bf16.

    Returns (seg_logits f32 (B,H,W,21), conn bf16 (B,H,W,128) = [con_mid(64)|cd1_mid(64)]).
    """
    B, H, W, C = xc.shape
    patches = _im2col3x3_nhwc(xc.astype(jnp.bfloat16), dilation=1)   # (M, 9*EMBED)
    M, K = patches.shape

    # Fused first-layer weight columns: [con(64) | cd1(64) | seg(64) | zero-pad(64)].
    w1 = jnp.concatenate(
        [_w3x3_to_mat(p["con_conv0_w"]), _w3x3_to_mat(p["cd1_conv0_w"]),
         _w3x3_to_mat(p["seg_conv0_w"]), jnp.zeros((K, 256 - 3 * HIDDEN), jnp.float32)],
        axis=1)                                                      # (K, 256)
    b1 = jnp.concatenate(
        [p["con_conv0_b"], p["cd1_conv0_b"], p["seg_conv0_b"],
         jnp.zeros((256 - 3 * HIDDEN,), jnp.float32)]).reshape(1, 256)
    # Seg 1x1 conv lifted onto the 256-wide hidden layout.  NOTE: rows 0:128 and 192:256
    # of w2 MUST stay exactly zero (con/cd1/pad hidden channels); any change to the
    # hidden column layout above must update this mapping in lockstep.
    w2 = jnp.zeros((256, 128), jnp.float32)
    w2 = w2.at[2 * HIDDEN:3 * HIDDEN, :NUM_CLASSES].set(p["seg_conv1_w"].T)
    b2 = jnp.zeros((1, 128), jnp.float32).at[0, :NUM_CLASSES].set(p["seg_conv1_b"])

    tm_eff = min(TM, _round_up(M, 8))
    Mp = _round_up(M, tm_eff)
    if Mp != M:
        patches = jnp.pad(patches, ((0, Mp - M), (0, 0)))
    chunk = 128 if tm_eff % 128 == 0 else tm_eff

    cost = pl.CostEstimate(
        flops=2 * Mp * K * 256 + 2 * Mp * 256 * 128,
        transcendentals=0,
        bytes_accessed=Mp * K * 2 + K * 256 * 2 + 256 * 128 * 2 + 256 * 4 + 128 * 4
        + Mp * 128 * 2 + Mp * 128 * 4)

    conn, seg = pl.pallas_call(
        functools.partial(_connect_stage1_kernel, chunk=chunk),
        out_shape=(jax.ShapeDtypeStruct((Mp, 2 * HIDDEN), jnp.bfloat16),
                   jax.ShapeDtypeStruct((Mp, 128), jnp.float32)),
        grid=(Mp // tm_eff,),
        in_specs=[
            pl.BlockSpec((tm_eff, K), lambda i: (i, 0)),
            pl.BlockSpec((K, 256), lambda i: (0, 0)),
            pl.BlockSpec((1, 256), lambda i: (0, 0)),
            pl.BlockSpec((256, 128), lambda i: (0, 0)),
            pl.BlockSpec((1, 128), lambda i: (0, 0)),
        ],
        out_specs=(pl.BlockSpec((tm_eff, 2 * HIDDEN), lambda i: (i, 0)),
                   pl.BlockSpec((tm_eff, 128), lambda i: (i, 0))),
        compiler_params=pltpu.CompilerParams(dimension_semantics=("parallel",)),
        cost_estimate=cost,
    )(patches, w1.astype(jnp.bfloat16), b1, w2.astype(jnp.bfloat16), b2)

    seg = seg[:M, :NUM_CLASSES].reshape(B, H, W, NUM_CLASSES)
    conn = conn[:M].reshape(B, H, W, 2 * HIDDEN)
    return seg, conn


def connect_stage2(conn, p):
    """Fused second stage: (con_conv1 3x3 d=1 + SE) and (cd1_conv1 3x3 d=3 + SE_d1)
    in a single per-image Pallas kernel.  Returns (B, H, W, 18) f32 = [con0(9)|con1(9)]."""
    B, H, W, _ = conn.shape
    HWt = H * W
    M = B * HWt
    pc = _im2col3x3_nhwc(conn[..., :HIDDEN], dilation=1)             # (M, 9*64)
    pd = _im2col3x3_nhwc(conn[..., HIDDEN:], dilation=3)             # (M, 9*64)
    patches = jnp.concatenate([pc, pd], axis=1)                      # (M, 1152) bf16
    K = patches.shape[1]

    # Block-diagonal conv weights -> lane-dense output [con(9) | cd1(9) | zero-pad].
    w = jnp.zeros((K, 128), jnp.float32)
    w = w.at[:K // 2, :NUM_NEIGHBOR].set(_w3x3_to_mat(p["con_conv1_w"]))
    w = w.at[K // 2:, NUM_NEIGHBOR:2 * NUM_NEIGHBOR].set(_w3x3_to_mat(p["cd1_conv1_w"]))
    b = jnp.zeros((1, 128), jnp.float32)
    b = b.at[0, :NUM_NEIGHBOR].set(p["con_conv1_b"])
    b = b.at[0, NUM_NEIGHBOR:2 * NUM_NEIGHBOR].set(p["cd1_conv1_b"])
    # Block-diagonal SE FC weights.  Padded lanes see sigmoid(0)=0.5 but carry exact zeros.
    r = NUM_NEIGHBOR // 3
    w1 = jnp.zeros((128, 128), jnp.float32)
    w1 = w1.at[:NUM_NEIGHBOR, :r].set(p["se_w1"])
    w1 = w1.at[NUM_NEIGHBOR:2 * NUM_NEIGHBOR, r:2 * r].set(p["se_d1_w1"])
    w2 = jnp.zeros((128, 128), jnp.float32)
    w2 = w2.at[:r, :NUM_NEIGHBOR].set(p["se_w2"])
    w2 = w2.at[r:2 * r, NUM_NEIGHBOR:2 * NUM_NEIGHBOR].set(p["se_d1_w2"])

    cost = pl.CostEstimate(
        flops=2 * M * K * 128 + 2 * M * 128 + 4 * B * 128 * 128,
        transcendentals=B * 128,
        bytes_accessed=M * K * 2 + K * 128 * 2 + 2 * 128 * 128 * 4 + 128 * 4 + M * 128 * 4)

    out = pl.pallas_call(
        functools.partial(_connect_stage2_kernel, hw=HWt),
        out_shape=jax.ShapeDtypeStruct((M, 128), jnp.float32),
        grid=(B,),
        in_specs=[
            pl.BlockSpec((HWt, K), lambda i: (i, 0)),
            pl.BlockSpec((K, 128), lambda i: (0, 0)),
            pl.BlockSpec((1, 128), lambda i: (0, 0)),
            pl.BlockSpec((128, 128), lambda i: (0, 0)),
            pl.BlockSpec((128, 128), lambda i: (0, 0)),
        ],
        out_specs=pl.BlockSpec((HWt, 128), lambda i: (i, 0)),
        compiler_params=pltpu.CompilerParams(dimension_semantics=("parallel",)),
        cost_estimate=cost,
    )(patches, w.astype(jnp.bfloat16), b, w1, w2)
    return out[:, :2 * NUM_NEIGHBOR].reshape(B, H, W, 2 * NUM_NEIGHBOR)


# ---------------- model forward ----------------
def backbone_stub(x_nhwc, p):
    # TODO(synk): mit_b0 (MixVisionTransformer) source not provided; replaced with a
    # deterministic pooled 1x1-projection stub producing same-shape stride-4/8/16/32 features.
    B, H, W, C = x_nhwc.shape
    feats = []
    for idx, stride in enumerate((4, 8, 16, 32)):
        hp, wp = H // stride, W // stride
        pooled = x_nhwc.reshape(B, hp, stride, wp, stride, C).mean(axis=(2, 4))
        # Tiny K=3 projection: plain XLA dot, not a pallas_call.
        feats.append(jnp.dot(pooled, p[f"bb{idx}_w"].T) + p[f"bb{idx}_b"])
    return feats


def head_forward(c1, c2, c3, c4, p):
    H1, W1 = c1.shape[1], c1.shape[2]
    # TODO(synk): DecoderBlock (strip_conv1..4) source not provided in the reference; treated as identity.
    _c4 = bilinear_resize_nhwc(mlp_linear_nhwc(c4, p["lc4_w"], p["lc4_b"]), H1, W1, False)
    _c3 = bilinear_resize_nhwc(mlp_linear_nhwc(c3, p["lc3_w"], p["lc3_b"]), H1, W1, False)
    _c2 = bilinear_resize_nhwc(mlp_linear_nhwc(c2, p["lc2_w"], p["lc2_b"]), H1, W1, False)
    _c1 = mlp_linear_nhwc(c1, p["lc1_w"], p["lc1_b"])
    # Concat already in bf16 so the fuse-conv wrapper's bf16 cast is a no-op.
    _c = jnp.concatenate([_c4.astype(jnp.bfloat16), _c3.astype(jnp.bfloat16),
                          _c2.astype(jnp.bfloat16), _c1.astype(jnp.bfloat16)], axis=-1)
    xc = conv_module_1x1_bn_relu(_c, p["fuse_w"], p["fuse_gamma"], p["fuse_beta"],
                                 p["fuse_mean"], p["fuse_var"])
    # Connect.  NOTE: Dropout2d(0.1) in the seg branch is identity in inference mode.
    seg, conn = connect_stage1(xc, p)
    con01 = connect_stage2(conn, p)                       # (B, H1, W1, 18)
    return seg, con01


def segformer_forward(x, p):
    # x is NCHW (PyTorch layout); convert to NHWC once, run NHWC internally,
    # convert the three outputs back to NCHW only at the model boundary.
    H, W = x.shape[2], x.shape[3]
    xn = jnp.transpose(x, (0, 2, 3, 1))
    c1, c2, c3, c4 = backbone_stub(xn, p)
    seg, con01 = head_forward(c1, c2, c3, c4, p)
    # One fused align_corners=True upsample over the channel-concat [seg | con0 | con1].
    fused = jnp.concatenate([seg, con01], axis=-1)        # (B, h, w, 21+9+9)
    up = bilinear_resize_nhwc(fused, H, W, align_corners=True)
    seg_o = up[..., :NUM_CLASSES]
    con0_o = up[..., NUM_CLASSES:NUM_CLASSES + NUM_NEIGHBOR]
    con1_o = up[..., NUM_CLASSES + NUM_NEIGHBOR:]
    to_nchw = lambda t: jnp.transpose(t, (0, 3, 1, 2)).astype(jnp.float32)
    return to_nchw(seg_o), to_nchw(con0_o), to_nchw(con1_o)


# ---------------- deterministic parameter init ----------------
def init_params(key):
    p = {}
    keys = iter(jax.random.split(key, 64))

    def kaiming(shape, fan_in):
        return jax.random.normal(next(keys), shape, jnp.float32) * jnp.sqrt(2.0 / fan_in)

    # backbone stub projections (3 -> Cs)
    for idx, cout in enumerate(CHANNELS):
        p[f"bb{idx}_w"] = kaiming((cout, 3), 3)
        p[f"bb{idx}_b"] = jnp.zeros((cout,), jnp.float32)
    # MLP linear embeddings (stored as (Cin, EMBED))
    for name, cin in (("lc1", CHANNELS[0]), ("lc2", CHANNELS[1]),
                      ("lc3", CHANNELS[2]), ("lc4", CHANNELS[3])):
        p[f"{name}_w"] = kaiming((cin, EMBED), cin)
        p[f"{name}_b"] = jnp.zeros((EMBED,), jnp.float32)
    # linear_fuse ConvModule: 1x1 conv (EMBED*4 -> EMBED, no bias) + BN(eval, eps=1e-3)
    p["fuse_w"] = kaiming((EMBED, EMBED * 4), EMBED * 4)
    p["fuse_gamma"] = jnp.ones((EMBED,), jnp.float32)
    p["fuse_beta"] = jnp.zeros((EMBED,), jnp.float32)
    p["fuse_mean"] = jnp.zeros((EMBED,), jnp.float32)
    p["fuse_var"] = jnp.ones((EMBED,), jnp.float32)
    # Connect
    p["seg_conv0_w"] = kaiming((HIDDEN, EMBED, 3, 3), EMBED * 9)
    p["seg_conv0_b"] = jnp.zeros((HIDDEN,), jnp.float32)
    p["seg_conv1_w"] = kaiming((NUM_CLASSES, HIDDEN), HIDDEN)
    p["seg_conv1_b"] = jnp.zeros((NUM_CLASSES,), jnp.float32)
    p["con_conv0_w"] = kaiming((HIDDEN, EMBED, 3, 3), EMBED * 9)
    p["con_conv0_b"] = jnp.zeros((HIDDEN,), jnp.float32)
    p["con_conv1_w"] = kaiming((NUM_NEIGHBOR, HIDDEN, 3, 3), HIDDEN * 9)
    p["con_conv1_b"] = jnp.zeros((NUM_NEIGHBOR,), jnp.float32)
    p["se_w1"] = kaiming((NUM_NEIGHBOR, NUM_NEIGHBOR // 3), NUM_NEIGHBOR)
    p["se_w2"] = kaiming((NUM_NEIGHBOR // 3, NUM_NEIGHBOR), NUM_NEIGHBOR // 3)
    p["cd1_conv0_w"] = kaiming((HIDDEN, EMBED, 3, 3), EMBED * 9)
    p["cd1_conv0_b"] = jnp.zeros((HIDDEN,), jnp.float32)
    p["cd1_conv1_w"] = kaiming((NUM_NEIGHBOR, HIDDEN, 3, 3), HIDDEN * 9)
    p["cd1_conv1_b"] = jnp.zeros((NUM_NEIGHBOR,), jnp.float32)
    p["se_d1_w1"] = kaiming((NUM_NEIGHBOR, NUM_NEIGHBOR // 3), NUM_NEIGHBOR)
    p["se_d1_w2"] = kaiming((NUM_NEIGHBOR // 3, NUM_NEIGHBOR), NUM_NEIGHBOR // 3)
    return p


if __name__ == "__main__":
    key = jax.random.PRNGKey(0)
    pkey, xkey = jax.random.split(key)
    params = init_params(pkey)
    x = jax.random.normal(xkey, (2, 3, 64, 64), jnp.float32)   # NCHW input

    fwd = jax.jit(segformer_forward)
    seg, con0, con1 = fwd(x, params)
    jax.block_until_ready((seg, con0, con1))

    assert seg.shape == (2, NUM_CLASSES, 64, 64)
    assert con0.shape == (2, NUM_NEIGHBOR, 64, 64)
    assert con1.shape == (2, NUM_NEIGHBOR, 64, 64)
    print("KERNEL_OK")
</pallas_src>

<mosaic_0001>
module attributes {stable_mosaic.version = 11 : i64} {
  func.func @_matmul_kernel(%arg0: i32, %arg1: memref<256x1024xbf16, #tpu.memory_space<vmem>>, %arg2: memref<1024x256xbf16, #tpu.memory_space<vmem>>, %arg3: memref<1x256xf32, #tpu.memory_space<vmem>>, %arg4: memref<256x256xbf16, #tpu.memory_space<vmem>>) attributes {dimension_semantics = [#tpu.dimension_semantics<parallel>], iteration_bounds = array<i64: 2>, scalar_prefetch = 0 : i64, scratch_operands = 0 : i64, tpu.core_type = #tpu.core_type<tc>, window_params = [{transform_indices = @transform_0, window_bounds = array<i64: 256, 1024>}, {pipeline_mode = #tpu.pipeline_mode<synchronous>, transform_indices = @transform_1, window_bounds = array<i64: 1024, 256>}, {pipeline_mode = #tpu.pipeline_mode<synchronous>, transform_indices = @transform_2, window_bounds = array<i64: 1, 256>}, {transform_indices = @transform_3, window_bounds = array<i64: 256, 256>}]} {
    %c0 = arith.constant 0 : index
    %c0_0 = arith.constant 0 : index
    %0 = vector.load %arg1[%c0, %c0_0] : memref<256x1024xbf16, #tpu.memory_space<vmem>>, vector<256x1024xbf16>
    %c0_1 = arith.constant 0 : index
    %c0_2 = arith.constant 0 : index
    %1 = vector.load %arg2[%c0_1, %c0_2] : memref<1024x256xbf16, #tpu.memory_space<vmem>>, vector<1024x256xbf16>
    %cst = arith.constant dense<0.000000e+00> : vector<256x256xf32>
    %2 = tpu.matmul %0, %1, %cst {dimension_numbers = #tpu.dot_dimension_numbers<[1], [0], [0], [1], [0, 0, 1, 1], [], []>} : vector<256x1024xbf16>, vector<1024x256xbf16>, vector<256x256xf32> -> vector<256x256xf32>
    %c0_3 = arith.constant 0 : index
    %c0_4 = arith.constant 0 : index
    %3 = vector.load %arg3[%c0_3, %c0_4] : memref<1x256xf32, #tpu.memory_space<vmem>>, vector<1x256xf32>
    %4 = vector.broadcast %3 : vector<1x256xf32> to vector<256x256xf32>
    %5 = arith.addf %2, %4 : vector<256x256xf32>
    %cst_5 = arith.constant 0.000000e+00 : f32
    %6 = vector.broadcast %cst_5 : f32 to vector<256x256xf32>
    %7 = arith.maximumf %5, %6 : vector<256x256xf32>
    %8 = arith.truncf %7 : vector<256x256xf32> to vector<256x256xbf16>
    %c0_6 = arith.constant 0 : index
    %c0_7 = arith.constant 0 : index
    %9 = vector.load %arg4[%c0_6, %c0_7] : memref<256x256xbf16, #tpu.memory_space<vmem>>, vector<256x256xbf16>
    tpu.vector_store %arg4[%c0_6, %c0_7], %8 {strides = array<i32>} : memref<256x256xbf16, #tpu.memory_space<vmem>>, vector<256x256xbf16>,
    return
  }
  func.func @transform_0(%arg0: i32) -> (i32, i32) {
    %c0_i32 = arith.constant 0 : i32
    %c0_i32_0 = arith.constant 0 : i32
    return %arg0, %c0_i32 : i32, i32
  }
  func.func @transform_1(%arg0: i32) -> (i32, i32) {
    %c0_i32 = arith.constant 0 : i32
    %c0_i32_0 = arith.constant 0 : i32
    %c0_i32_1 = arith.constant 0 : i32
    return %c0_i32, %c0_i32_0 : i32, i32
  }
  func.func @transform_2(%arg0: i32) -> (i32, i32) {
    %c0_i32 = arith.constant 0 : i32
    %c0_i32_0 = arith.constant 0 : i32
    %c0_i32_1 = arith.constant 0 : i32
    return %c0_i32, %c0_i32_0 : i32, i32
  }
  func.func @transform_3(%arg0: i32) -> (i32, i32) {
    %c0_i32 = arith.constant 0 : i32
    %c0_i32_0 = arith.constant 0 : i32
    return %arg0, %c0_i32 : i32, i32
  }
}

module attributes {stable_mosaic.version = 11 : i64} {
  func.func @_connect_stage1_kernel(%arg0: i32, %arg1: memref<256x2304xbf16, #tpu.memory_space<vmem>>, %arg2: memref<2304x256xbf16, #tpu.memory_space<vmem>>, %arg3: memref<1x256xf32, #tpu.memory_space<vmem>>, %arg4: memref<256x128xbf16, #tpu.memory_space<vmem>>, %arg5: memref<1x128xf32, #tpu.memory_space<vmem>>, %arg6: memref<256x128xbf16, #tpu.memory_space<vmem>>, %arg7: memref<256x128xf32, #tpu.memory_space<vmem>>) attributes {dimension_semantics = [#tpu.dimension_semantics<parallel>], iteration_bounds = array<i64: 2>, scalar_prefetch = 0 : i64, scratch_operands = 0 : i64, tpu.core_type = #tpu.core_type<tc>, window_params = [{transform_indices = @transform_0, window_bounds = array<i64: 256, 2304>}, {pipeline_mode = #tpu.pipeline_mode<synchronous>, transform_indices = @transform_1, window_bounds = array<i64: 2304, 256>}, {pipeline_mode = #tpu.pipeline_mode<synchronous>, transform_indices = @transform_2, window_bounds = array<i64: 1, 256>}, {pipeline_mode = #tpu.pipeline_mode<synchronous>, transform_indices = @transform_3, window_bounds = array<i64: 256, 128>}, {pipeline_mode = #tpu.pipeline_mode<synchronous>, transform_indices = @transform_4, window_bounds = array<i64: 1, 128>}, {transform_indices = @transform_5, window_bounds = array<i64: 256, 128>}, {transform_indices = @transform_6, window_bounds = array<i64: 256, 128>}]} {
    %c0 = arith.constant 0 : index
    %c0_0 = arith.constant 0 : index
    %0 = vector.load %arg1[%c0, %c0_0] : memref<256x2304xbf16, #tpu.memory_space<vmem>>, vector<128x2304xbf16>
    %c0_1 = arith.constant 0 : index
    %c0_2 = arith.constant 0 : index
    %1 = vector.load %arg2[%c0_1, %c0_2] : memref<2304x256xbf16, #tpu.memory_space<vmem>>, vector<2304x256xbf16>
    %cst = arith.constant dense<0.000000e+00> : vector<128x256xf32>
    %2 = tpu.matmul %0, %1, %cst {dimension_numbers = #tpu.dot_dimension_numbers<[1], [0], [0], [1], [0, 0, 1, 1], [], []>} : vector<128x2304xbf16>, vector<2304x256xbf16>, vector<128x256xf32> -> vector<128x256xf32>
    %c0_3 = arith.constant 0 : index
    %c0_4 = arith.constant 0 : index
    %3 = vector.load %arg3[%c0_3, %c0_4] : memref<1x256xf32, #tpu.memory_space<vmem>>, vector<1x256xf32>
    %4 = vector.broadcast %3 : vector<1x256xf32> to vector<128x256xf32>
    %5 = arith.addf %2, %4 : vector<128x256xf32>
    %cst_5 = arith.constant 0.000000e+00 : f32
    %6 = vector.broadcast %cst_5 : f32 to vector<128x256xf32>
    %7 = arith.maximumf %5, %6 : vector<128x256xf32>
    %8 = vector.extract_strided_slice %7 {offsets = [0, 0], sizes = [128, 128], strides = [1, 1]} : vector<128x256xf32> to vector<128x128xf32>
    %9 = arith.truncf %8 : vector<128x128xf32> to vector<128x128xbf16>
    %c0_6 = arith.constant 0 : index
    %c0_7 = arith.constant 0 : index
    %10 = vector.load %arg6[%c0_6, %c0_7] : memref<256x128xbf16, #tpu.memory_space<vmem>>, vector<128x128xbf16>
    tpu.vector_store %arg6[%c0_6, %c0_7], %9 {strides = array<i32>} : memref<256x128xbf16, #tpu.memory_space<vmem>>, vector<128x128xbf16>,
    %11 = arith.truncf %7 : vector<128x256xf32> to vector<128x256xbf16>
    %c0_8 = arith.constant 0 : index
    %c0_9 = arith.constant 0 : index
    %12 = vector.load %arg4[%c0_8, %c0_9] : memref<256x128xbf16, #tpu.memory_space<vmem>>, vector<256x128xbf16>
    %cst_10 = arith.constant dense<0.000000e+00> : vector<128x128xf32>
    %13 = tpu.matmul %11, %12, %cst_10 {dimension_numbers = #tpu.dot_dimension_numbers<[1], [0], [0], [1], [0, 0, 1, 1], [], []>} : vector<128x256xbf16>, vector<256x128xbf16>, vector<128x128xf32> -> vector<128x128xf32>
    %c0_11 = arith.constant 0 : index
    %c0_12 = arith.constant 0 : index
    %14 = vector.load %arg5[%c0_11, %c0_12] : memref<1x128xf32, #tpu.memory_space<vmem>>, vector<1x128xf32>
    %15 = vector.broadcast %14 : vector<1x128xf32> to vector<128x128xf32>
    %16 = arith.addf %13, %15 : vector<128x128xf32>
    %c0_13 = arith.constant 0 : index
    %c0_14 = arith.constant 0 : index
    %17 = vector.load %arg7[%c0_13, %c0_14] : memref<256x128xf32, #tpu.memory_space<vmem>>, vector<128x128xf32>
    tpu.vector_store %arg7[%c0_13, %c0_14], %16 {strides = array<i32>} : memref<256x128xf32, #tpu.memory_space<vmem>>, vector<128x128xf32>,
    %c128 = arith.constant 128 : index
    %c0_15 = arith.constant 0 : index
    %18 = vector.load %arg1[%c128, %c0_15] : memref<256x2304xbf16, #tpu.memory_space<vmem>>, vector<128x2304xbf16>
    %c0_16 = arith.constant 0 : index
    %c0_17 = arith.constant 0 : index
    %19 = vector.load %arg2[%c0_16, %c0_17] : memref<2304x256xbf16, #tpu.memory_space<vmem>>, vector<2304x256xbf16>
    %cst_18 = arith.constant dense<0.000000e+00> : vector<128x256xf32>
    %20 = tpu.matmul %18, %19, %cst_18 {dimension_numbers = #tpu.dot_dimension_numbers<[1], [0], [0], [1], [0, 0, 1, 1], [], []>} : vector<128x2304xbf16>, vector<2304x256xbf16>, vector<128x256xf32> -> vector<128x256xf32>
    %c0_19 = arith.constant 0 : index
    %c0_20 = arith.constant 0 : index
    %21 = vector.load %arg3[%c0_19, %c0_20] : memref<1x256xf32, #tpu.memory_space<vmem>>, vector<1x256xf32>
    %22 = vector.broadcast %21 : vector<1x256xf32> to vector<128x256xf32>
    %23 = arith.addf %20, %22 : vector<128x256xf32>
    %cst_21 = arith.constant 0.000000e+00 : f32
    %24 = vector.broadcast %cst_21 : f32 to vector<128x256xf32>
    %25 = arith.maximumf %23, %24 : vector<128x256xf32>
    %26 = vector.extract_strided_slice %25 {offsets = [0, 0], sizes = [128, 128], strides = [1, 1]} : vector<128x256xf32> to vector<128x128xf32>
    %27 = arith.truncf %26 : vector<128x128xf32> to vector<128x128xbf16>
    %c128_22 = arith.constant 128 : index
    %c0_23 = arith.constant 0 : index
    %28 = vector.load %arg6[%c128_22, %c0_23] : memref<256x128xbf16, #tpu.memory_space<vmem>>, vector<128x128xbf16>
    tpu.vector_store %arg6[%c128_22, %c0_23], %27 {strides = array<i32>} : memref<256x128xbf16, #tpu.memory_space<vmem>>, vector<128x128xbf16>,
    %29 = arith.truncf %25 : vector<128x256xf32> to vector<128x256xbf16>
    %c0_24 = arith.constant 0 : index
    %c0_25 = arith.constant 0 : index
    %30 = vector.load %arg4[%c0_24, %c0_25] : memref<256x128xbf16, #tpu.memory_space<vmem>>, vector<256x128xbf16>
    %cst_26 = arith.constant dense<0.000000e+00> : vector<128x128xf32>
    %31 = tpu.matmul %29, %30, %cst_26 {dimension_numbers = #tpu.dot_dimension_numbers<[1], [0], [0], [1], [0, 0, 1, 1], [], []>} : vector<128x256xbf16>, vector<256x128xbf16>, vector<128x128xf32> -> vector<128x128xf32>
    %c0_27 = arith.constant 0 : index
    %c0_28 = arith.constant 0 : index
    %32 = vector.load %arg5[%c0_27, %c0_28] : memref<1x128xf32, #tpu.memory_space<vmem>>, vector<1x128xf32>
    %33 = vector.broadcast %32 : vector<1x128xf32> to vector<128x128xf32>
    %34 = arith.addf %31, %33 : vector<128x128xf32>
    %c128_29 = arith.constant 128 : index
    %c0_30 = arith.constant 0 : index
    %35 = vector.load %arg7[%c128_29, %c0_30] : memref<256x128xf32, #tpu.memory_space<vmem>>, vector<128x128xf32>
    tpu.vector_store %arg7[%c128_29, %c0_30], %34 {strides = array<i32>} : memref<256x128xf32, #tpu.memory_space<vmem>>, vector<128x128xf32>,
    return
  }
  func.func @transform_0(%arg0: i32) -> (i32, i32) {
    %c0_i32 = arith.constant 0 : i32
    %c0_i32_0 = arith.constant 0 : i32
    return %arg0, %c0_i32 : i32, i32
  }
  func.func @transform_1(%arg0: i32) -> (i32, i32) {
    %c0_i32 = arith.constant 0 : i32
    %c0_i32_0 = arith.constant 0 : i32
    %c0_i32_1 = arith.constant 0 : i32
    return %c0_i32, %c0_i32_0 : i32, i32
  }
  func.func @transform_2(%arg0: i32) -> (i32, i32) {
    %c0_i32 = arith.constant 0 : i32
    %c0_i32_0 = arith.constant 0 : i32
    %c0_i32_1 = arith.constant 0 : i32
    return %c0_i32, %c0_i32_0 : i32, i32
  }
  func.func @transform_3(%arg0: i32) -> (i32, i32) {
    %c0_i32 = arith.constant 0 : i32
    %c0_i32_0 = arith.constant 0 : i32
    %c0_i32_1 = arith.constant 0 : i32
    return %c0_i32, %c0_i32_0 : i32, i32
  }
  func.func @transform_4(%arg0: i32) -> (i32, i32) {
    %c0_i32 = arith.constant 0 : i32
    %c0_i32_0 = arith.constant 0 : i32
    %c0_i32_1 = arith.constant 0 : i32
    return %c0_i32, %c0_i32_0 : i32, i32
  }
  func.func @transform_5(%arg0: i32) -> (i32, i32) {
    %c0_i32 = arith.constant 0 : i32
    %c0_i32_0 = arith.constant 0 : i32
    return %arg0, %c0_i32 : i32, i32
  }
  func.func @transform_6(%arg0: i32) -> (i32, i32) {
    %c0_i32 = arith.constant 0 : i32
    %c0_i32_0 = arith.constant 0 : i32
    return %arg0, %c0_i32 : i32, i32
  }
}

module attributes {stable_mosaic.version = 11 : i64} {
  func.func @_connect_stage2_kernel(%arg0: i32, %arg1: memref<256x1152xbf16, #tpu.memory_space<vmem>>, %arg2: memref<1152x128xbf16, #tpu.memory_space<vmem>>, %arg3: memref<1x128xf32, #tpu.memory_space<vmem>>, %arg4: memref<128x128xf32, #tpu.memory_space<vmem>>, %arg5: memref<128x128xf32, #tpu.memory_space<vmem>>, %arg6: memref<256x128xf32, #tpu.memory_space<vmem>>) attributes {dimension_semantics = [#tpu.dimension_semantics<parallel>], iteration_bounds = array<i64: 2>, scalar_prefetch = 0 : i64, scratch_operands = 0 : i64, tpu.core_type = #tpu.core_type<tc>, window_params = [{transform_indices = @transform_0, window_bounds = array<i64: 256, 1152>}, {pipeline_mode = #tpu.pipeline_mode<synchronous>, transform_indices = @transform_1, window_bounds = array<i64: 1152, 128>}, {pipeline_mode = #tpu.pipeline_mode<synchronous>, transform_indices = @transform_2, window_bounds = array<i64: 1, 128>}, {pipeline_mode = #tpu.pipeline_mode<synchronous>, transform_indices = @transform_3, window_bounds = array<i64: 128, 128>}, {pipeline_mode = #tpu.pipeline_mode<synchronous>, transform_indices = @transform_4, window_bounds = array<i64: 128, 128>}, {transform_indices = @transform_5, window_bounds = array<i64: 256, 128>}]} {
    %c0 = arith.constant 0 : index
    %c0_0 = arith.constant 0 : index
    %0 = vector.load %arg1[%c0, %c0_0] : memref<256x1152xbf16, #tpu.memory_space<vmem>>, vector<256x1152xbf16>
    %c0_1 = arith.constant 0 : index
    %c0_2 = arith.constant 0 : index
    %1 = vector.load %arg2[%c0_1, %c0_2] : memref<1152x128xbf16, #tpu.memory_space<vmem>>, vector<1152x128xbf16>
    %cst = arith.constant dense<0.000000e+00> : vector<256x128xf32>
    %2 = tpu.matmul %0, %1, %cst {dimension_numbers = #tpu.dot_dimension_numbers<[1], [0], [0], [1], [0, 0, 1, 1], [], []>} : vector<256x1152xbf16>, vector<1152x128xbf16>, vector<256x128xf32> -> vector<256x128xf32>
    %c0_3 = arith.constant 0 : index
    %c0_4 = arith.constant 0 : index
    %3 = vector.load %arg3[%c0_3, %c0_4] : memref<1x128xf32, #tpu.memory_space<vmem>>, vector<1x128xf32>
    %4 = vector.broadcast %3 : vector<1x128xf32> to vector<256x128xf32>
    %5 = arith.addf %2, %4 : vector<256x128xf32>
    %cst_5 = arith.constant 3.906250e-03 : f32
    %6 = vector.broadcast %cst_5 : f32 to vector<1x256xf32>
    %cst_6 = arith.constant dense<0.000000e+00> : vector<1x128xf32>
    %7 = tpu.matmul %6, %5, %cst_6 {dimension_numbers = #tpu.dot_dimension_numbers<[1], [0], [0], [1], [0, 0, 1, 1], [], []>} : vector<1x256xf32>, vector<256x128xf32>, vector<1x128xf32> -> vector<1x128xf32>
    %c0_7 = arith.constant 0 : index
    %c0_8 = arith.constant 0 : index
    %8 = vector.load %arg4[%c0_7, %c0_8] : memref<128x128xf32, #tpu.memory_space<vmem>>, vector<128x128xf32>
    %cst_9 = arith.constant dense<0.000000e+00> : vector<1x128xf32>
    %9 = tpu.matmul %7, %8, %cst_9 {dimension_numbers = #tpu.dot_dimension_numbers<[1], [0], [0], [1], [0, 0, 1, 1], [], []>} : vector<1x128xf32>, vector<128x128xf32>, vector<1x128xf32> -> vector<1x128xf32>
    %cst_10 = arith.constant 0.000000e+00 : f32
    %10 = vector.broadcast %cst_10 : f32 to vector<1x128xf32>
    %11 = arith.maximumf %9, %10 : vector<1x128xf32>
    %c0_11 = arith.constant 0 : index
    %c0_12 = arith.constant 0 : index
    %12 = vector.load %arg5[%c0_11, %c0_12] : memref<128x128xf32, #tpu.memory_space<vmem>>, vector<128x128xf32>
    %cst_13 = arith.constant dense<0.000000e+00> : vector<1x128xf32>
    %13 = tpu.matmul %11, %12, %cst_13 {dimension_numbers = #tpu.dot_dimension_numbers<[1], [0], [0], [1], [0, 0, 1, 1], [], []>} : vector<1x128xf32>, vector<128x128xf32>, vector<1x128xf32> -> vector<1x128xf32>
    %14 = arith.negf %13 : vector<1x128xf32>
    %15 = math.exp %14 : vector<1x128xf32>
    %cst_14 = arith.constant 1.000000e+00 : f32
    %16 = vector.broadcast %cst_14 : f32 to vector<1x128xf32>
    %17 = arith.addf %16, %15 : vector<1x128xf32>
    %18 = arith.divf %16, %17 : vector<1x128xf32>
    %19 = vector.broadcast %18 : vector<1x128xf32> to vector<256x128xf32>
    %20 = arith.mulf %5, %19 : vector<256x128xf32>
    %c0_15 = arith.constant 0 : index
    %c0_16 = arith.constant 0 : index
    %21 = vector.load %arg6[%c0_15, %c0_16] : memref<256x128xf32, #tpu.memory_space<vmem>>, vector<256x128xf32>
    tpu.vector_store %arg6[%c0_15, %c0_16], %20 {strides = array<i32>} : memref<256x128xf32, #tpu.memory_space<vmem>>, vector<256x128xf32>,
    return
  }
  func.func @transform_0(%arg0: i32) -> (i32, i32) {
    %c0_i32 = arith.constant 0 : i32
    %c0_i32_0 = arith.constant 0 : i32
    return %arg0, %c0_i32 : i32, i32
  }
  func.func @transform_1(%arg0: i32) -> (i32, i32) {
    %c0_i32 = arith.constant 0 : i32
    %c0_i32_0 = arith.constant 0 : i32
    %c0_i32_1 = arith.constant 0 : i32
    return %c0_i32, %c0_i32_0 : i32, i32
  }
  func.func @transform_2(%arg0: i32) -> (i32, i32) {
    %c0_i32 = arith.constant 0 : i32
    %c0_i32_0 = arith.constant 0 : i32
    %c0_i32_1 = arith.constant 0 : i32
    return %c0_i32, %c0_i32_0 : i32, i32
  }
  func.func @transform_3(%arg0: i32) -> (i32, i32) {
    %c0_i32 = arith.constant 0 : i32
    %c0_i32_0 = arith.constant 0 : i32
    %c0_i32_1 = arith.constant 0 : i32
    return %c0_i32, %c0_i32_0 : i32, i32
  }
  func.func @transform_4(%arg0: i32) -> (i32, i32) {
    %c0_i32 = arith.constant 0 : i32
    %c0_i32_0 = arith.constant 0 : i32
    %c0_i32_1 = arith.constant 0 : i32
    return %c0_i32, %c0_i32_0 : i32, i32
  }
  func.func @transform_5(%arg0: i32) -> (i32, i32) {
    %c0_i32 = arith.constant 0 : i32
    %c0_i32_0 = arith.constant 0 : i32
    return %arg0, %c0_i32 : i32, i32
  }
}

</mosaic_0001>

<bundles_post_ra>
// kernel: segformer_forward.3
= control target key start
LH: loop header
LB: loop body
LE: loop exit
PB: predicated region body
PF: predicated region fallthrough
CT: control target
= control target key end

     0   :  { %s3408_s12 = smov 0   ;;  %s4254_s0 = inlined_call_operand.vmem [shape: bf16[512,1024], index: 0, kind: input, shape index: {}]   ;;  %s4255_s1 = inlined_call_operand.vmem [shape: bf16[1024,256], index: 1, kind: input, shape index: {}]   ;;  %s4256_s2 = inlined_call_operand.vmem [shape: f32[1,256], index: 2, kind: input, shape index: {}]   ;;  %s4257_s3 = inlined_call_operand.vmem [shape: bf16[512,256], index: 3, kind: output, shape index: {}]  }
   0x1 LB: > { %s2845_s13 = sadd.s32 4294967295, %s3386_s12   ;;  %p2849_p0 = scmp.ge.s32.totalorder %s3386_s12, 1  ;;  %s3386_s12 = sphi %s3408_s12, %s13_s12  }
   0x2   : > { %p139_p1 = scmp.lt.s32.totalorder %s3386_s12, 3 }
   0x4   : > { %p140_p2 = pnand %p2849_p0, %p139_p1 }
   0x6   : > { %143 = sbr.rel (%p140_p2) target bundleno = 532 (0x214), region = 32 }
   0xb   : > { %v3188_v0 = vld [vmem:[%s4255_s1 + $0x74] ss:$8 sps:$4 sm:$0xff]   ;;  %v3192_v2 = vld [vmem:[%s4255_s1 + $0x70] ss:$8 sps:$4 sm:$0xff]   ;;  %v3194_v4 = vld [vmem:[%s4255_s1 + $0x64] ss:$8 sps:$4 sm:$0xff]  }
   0xc   : > { %v3190_v1 = vld [vmem:[%s4255_s1 + $0x174] ss:$8 sps:$4 sm:$0xff]   ;;  %1727 = vmatprep.subr.bf16.mxu0 %v3188_v0  ;;  %v3193_v3 = vld [vmem:[%s4255_s1 + $0x170] ss:$8 sps:$4 sm:$0xff]   ;;  %v3196_v5 = vld [vmem:[%s4255_s1 + $0x164] ss:$8 sps:$4 sm:$0xff]  }
   0xd   : > { %1920 = vmatprep.subr.bf16.mxu1 %v3190_v1  ;;  %1728 = vmatpush1.bf16.msra.mxu0 %v3192_v2  ;;  %v3198_v6 = vld [vmem:[%s4255_s1 + $0x60] ss:$8 sps:$4 sm:$0xff]   ;;  %v3200_v8 = vld [vmem:[%s4255_s1 + $0x54] ss:$8 sps:$4 sm:$0xff]   ;;  %v3204_v10 = vld [vmem:[%s4255_s1 + $0x50] ss:$8 sps:$4 sm:$0xff]  }
   0xe   : > { %1921 = vmatpush1.bf16.msra.mxu1 %v3193_v3  ;;  %1729 = vmatprep.subr.bf16.mxu0 %v3194_v4  ;;  %v3199_v7 = vld [vmem:[%s4255_s1 + $0x160] ss:$8 sps:$4 sm:$0xff]   ;;  %v3202_v9 = vld [vmem:[%s4255_s1 + $0x154] ss:$8 sps:$4 sm:$0xff]   ;;  %v3205_v11 = vld [vmem:[%s4255_s1 + $0x150] ss:$8 sps:$4 sm:$0xff]  }
   0xf   : > { %1922 = vmatprep.subr.bf16.mxu1 %v3196_v5  ;;  %v3206_v12 = vld [vmem:[%s4255_s1 + $0x44] ss:$8 sps:$4 sm:$0xff]   ;;  %v3210_v14 = vld [vmem:[%s4255_s1 + $0x40] ss:$8 sps:$4 sm:$0xff]   ;;  %v3212_v16 = vld [vmem:[%s4255_s1 + $0x34] ss:$8 sps:$4 sm:$0xff]  }
  0x10   : > { %v3208_v13 = vld [vmem:[%s4255_s1 + $0x144] ss:$8 sps:$4 sm:$0xff]   ;;  %v3211_v15 = vld [vmem:[%s4255_s1 + $0x140] ss:$8 sps:$4 sm:$0xff]   ;;  %v3214_v17 = vld [vmem:[%s4255_s1 + $0x134] ss:$8 sps:$4 sm:$0xff]  }
  0x11   : > { %1730 = vmatpush1.bf16.msra.mxu0 %v3198_v6  ;;  %v3216_v18 = vld [vmem:[%s4255_s1 + $0x30] ss:$8 sps:$4 sm:$0xff]   ;;  %v3218_v20 = vld [vmem:[%s4255_s1 + $0x24] ss:$8 sps:$4 sm:$0xff]   ;;  %v3222_v22 = vld [vmem:[%s4255_s1 + $0x20] ss:$8 sps:$4 sm:$0xff]  }
  0x12   : > { %1923 = vmatpush1.bf16.msra.mxu1 %v3199_v7  ;;  %1731 = vmatprep.subr.bf16.mxu0 %v3200_v8  ;;  %v3217_v19 = vld [vmem:[%s4255_s1 + $0x130] ss:$8 sps:$4 sm:$0xff]   ;;  %v3220_v21 = vld [vmem:[%s4255_s1 + $0x124] ss:$8 sps:$4 sm:$0xff]   ;;  %v3223_v23 = vld [vmem:[%s4255_s1 + $0x120] ss:$8 sps:$4 sm:$0xff]  }
  0x13   : > { %1924 = vmatprep.subr.bf16.mxu1 %v3202_v9  ;;  %v3224_v24 = vld [vmem:[%s4255_s1 + $0x14] ss:$8 sps:$4 sm:$0xff]   ;;  %v3228_v26 = vld [vmem:[%s4255_s1 + $0x10] ss:$8 sps:$4 sm:$0xff]   ;;  %v3230_v28 = vld [vmem:[%s4255_s1 + $0x4] ss:$8 sps:$4 sm:$0xff]  }
  0x14   : > { %v3226_v25 = vld [vmem:[%s4255_s1 + $0x114] ss:$8 sps:$4 sm:$0xff]   ;;  %v3229_v27 = vld [vmem:[%s4255_s1 + $0x110] ss:$8 sps:$4 sm:$0xff]   ;;  %v3232_v29 = vld [vmem:[%s4255_s1 + $0x104] ss:$8 sps:$4 sm:$0xff]  }
  0x15   : > { %1732 = vmatpush1.bf16.msra.mxu0 %v3204_v10  ;;  %s2850_s24 = sshll.u32 %s2845_s13, 5  ;;  %v3234_v30 = vld [vmem:[%s4255_s1] ss:$8 sps:$4 sm:$0xff]   ;;  %v3236_v32 = vld [vmem:[%s4255_s1 + $0xf4] ss:$8 sps:$4 sm:$0xff]  }
  0x16   : > { %1925 = vmatpush1.bf16.msra.mxu1 %v3205_v11  ;;  %1733 = vmatprep.subr.bf16.mxu0 %v3206_v12  ;;  %v3235_v31 = vld [vmem:[%s4255_s1 + $0x100] ss:$8 sps:$4 sm:$0xff]   ;;  %p166_p3 = scmp.lt.s32.totalorder %s2850_s24, 63  ;;  %v3238_v33 = vld [vmem:[%s4255_s1 + $0x1f4] ss:$8 sps:$4 sm:$0xff]  }
  0x17   : > { %1926 = vmatprep.subr.bf16.mxu1 %v3208_v13  ;;  %v3240_v34 = vld [vmem:[%s4255_s1 + $0xf0] ss:$8 sps:$4 sm:$0xff]   ;;  %v3242_v36 = vld [vmem:[%s4255_s1 + $0xe4] ss:$8 sps:$4 sm:$0xff]   ;;  %v3246_v38 = vld [vmem:[%s4255_s1 + $0xe0] ss:$8 sps:$4 sm:$0xff]  }
  0x18   : > { %v3241_v35 = vld [vmem:[%s4255_s1 + $0x1f0] ss:$8 sps:$4 sm:$0xff]   ;;  %s4295_s24 = smov (!%p166_p3, %s2850_s24), 63  ;;  %v3244_v37 = vld [vmem:[%s4255_s1 + $0x1e4] ss:$8 sps:$4 sm:$0xff]  }
  0x19   : > { %1734 = vmatpush1.bf16.msra.mxu0 %v3210_v14  ;;  %v3247_v39 = vld [vmem:[%s4255_s1 + $0x1e0] ss:$8 sps:$4 sm:$0xff]   ;;  %v3248_v40 = vld [vmem:[%s4255_s1 + $0xd4] ss:$8 sps:$4 sm:$0xff]   ;;  %s3146_s21 = sshll.u32 %s4295_s24, 5 }
  0x1a   : > { %1927 = vmatpush1.bf16.msra.mxu1 %v3211_v15  ;;  %1735 = vmatprep.subr.bf16.mxu0 %v3212_v16  ;;  %v3250_v41 = vld [vmem:[%s4255_s1 + $0x1d4] ss:$8 sps:$4 sm:$0xff]   ;;  %v3252_v42 = vld [vmem:[%s4255_s1 + $0xd0] ss:$8 sps:$4 sm:$0xff]   ;;  %s3556_s4 = scalar_lea.vmem %s4254_s0, %s3146_s21  ;;  %v3254_v44 = vld [vmem:[%s4255_s1 + $0xc4] ss:$8 sps:$4 sm:$0xff]  }
  0x1b   : > { %1928 = vmatprep.subr.bf16.mxu1 %v3214_v17  ;;  %v3253_v43 = vld [vmem:[%s4255_s1 + $0x1d0] ss:$8 sps:$4 sm:$0xff]   ;;  %v3256_v45 = vld [vmem:[%s4255_s1 + $0x1c4] ss:$8 sps:$4 sm:$0xff]   ;;  %v3258_v46 = vld [vmem:[%s4255_s1 + $0xc0] ss:$8 sps:$4 sm:$0xff]  }
  0x1c   : > { %v3259_v47 = vld [vmem:[%s4255_s1 + $0x1c0] ss:$8 sps:$4 sm:$0xff]   ;;  %v3260_v52 = vld [vmem:[%s4255_s1 + $0xb4] ss:$8 sps:$4 sm:$0xff]   ;;  %v3264_v56 = vld [vmem:[%s4255_s1 + $0xb0] ss:$8 sps:$4 sm:$0xff]  }
  0x1d   : > { %1736 = vmatpush1.bf16.msra.mxu0 %v3216_v18  ;;  %v3571_v48 = vld [vmem:[%s3556_s4] sm:$0xff]  ;;  %v3577_v50 = vld [vmem:[%s3556_s4 + $0x8] sm:$0xff]  ;;  %v3262_v54 = vld [vmem:[%s4255_s1 + $0x1b4] ss:$8 sps:$4 sm:$0xff]  }
  0x1e   : > { %1929 = vmatpush1.bf16.msra.mxu1 %v3217_v19  ;;  %1737 = vmatprep.subr.bf16.mxu0 %v3218_v20  ;;  %v3574_v49 = vld [vmem:[%s3556_s4 + $0x20] sm:$0xff]  ;;  %v184_v51 = vld [vmem:[%s3556_s4 + $0x28] sm:$0xff]  ;;  %v3265_v57 = vld [vmem:[%s4255_s1 + $0x1b0] ss:$8 sps:$4 sm:$0xff]  }
  0x1f   : > { %1930 = vmatprep.subr.bf16.mxu1 %v3220_v21  ;;  %v2857_v53 = vcombine.high %v3571_v48, %v3574_v49  ;;  %v2859_v55 = vcombine.high %v3577_v50, %v184_v51  ;;  %v3266_v58 = vld [vmem:[%s4255_s1 + $0xa4] ss:$8 sps:$4 sm:$0xff]   ;;  %v3270_v60 = vld [vmem:[%s4255_s1 + $0xa0] ss:$8 sps:$4 sm:$0xff]   ;;  %v3272_v62 = vld [vmem:[%s4255_s1 + $0x94] ss:$8 sps:$4 sm:$0xff]   ;;  %v2856_v12 = vcombine.low %v3571_v48, %v3574_v49  ;;  %v2858_v13 = vcombine.low %v3577_v50, %v184_v51 }
  0x20   : > { %v3268_v59 = vld [vmem:[%s4255_s1 + $0x1a4] ss:$8 sps:$4 sm:$0xff]   ;;  %v3271_v61 = vld [vmem:[%s4255_s1 + $0x1a0] ss:$8 sps:$4 sm:$0xff]   ;;  %v3274_v63 = vld [vmem:[%s4255_s1 + $0x194] ss:$8 sps:$4 sm:$0xff]  }
  0x21   : > { %1738 = vmatpush1.bf16.msra.mxu0 %v3222_v22  ;;  %1759 = vmatprep.mubr.bf16.mxu0 %v2857_v53  ;;  %v3276_v0 = vld [vmem:[%s4255_s1 + $0x90] ss:$8 sps:$4 sm:$0xff]   ;;  %v3278_v2 = vld [vmem:[%s4255_s1 + $0x84] ss:$8 sps:$4 sm:$0xff]   ;;  %v3282_v4 = vld [vmem:[%s4255_s1 + $0x80] ss:$8 sps:$4 sm:$0xff]  }
  0x22   : > { %1931 = vmatpush1.bf16.msra.mxu1 %v3223_v23  ;;  %1739 = vmatprep.subr.bf16.mxu0 %v3224_v24  ;;  %v3277_v1 = vld [vmem:[%s4255_s1 + $0x190] ss:$8 sps:$4 sm:$0xff]   ;;  %v3280_v3 = vld [vmem:[%s4255_s1 + $0x184] ss:$8 sps:$4 sm:$0xff]   ;;  %v3283_v5 = vld [vmem:[%s4255_s1 + $0x180] ss:$8 sps:$4 sm:$0xff]  }
  0x23   : > { %1932 = vmatprep.subr.bf16.mxu1 %v3226_v25  ;;  %1952 = vmatprep.mubr.bf16.mxu1 %v2859_v55  ;;  %v3286_v6 = vld [vmem:[%s4255_s1 + $0x274] ss:$8 sps:$4 sm:$0xff]   ;;  %v187_v8 = vld [vmem:[%s3556_s4 + $0x40] sm:$0xff]  ;;  %v188_v10 = vld [vmem:[%s3556_s4 + $0x48] sm:$0xff] }
  0x24   : > { %v3289_v7 = vld [vmem:[%s4255_s1 + $0x374] ss:$8 sps:$4 sm:$0xff]   ;;  %v191_v9 = vld [vmem:[%s3556_s4 + $0x60] sm:$0xff]  ;;  %v192_v11 = vld [vmem:[%s3556_s4 + $0x68] sm:$0xff] }
  0x25   : > { %1740 = vmatpush1.bf16.msra.mxu0 %v3228_v26  ;;  %v3284_v14 = vld [vmem:[%s4255_s1 + $0x270] ss:$8 sps:$4 sm:$0xff]   ;;  %v2865_v16 = vcombine.high %v187_v8, %v191_v9  ;;  %v2867_v17 = vcombine.high %v188_v10, %v192_v11  ;;  %v3290_v18 = vld [vmem:[%s4255_s1 + $0x260] ss:$8 sps:$4 sm:$0xff]   ;;  %v3292_v19 = vld [vmem:[%s4255_s1 + $0x264] ss:$8 sps:$4 sm:$0xff]  }
  0x26   : > { %1933 = vmatpush1.bf16.msra.mxu1 %v3229_v27  ;;  %1741 = vmatprep.subr.bf16.mxu0 %v3230_v28  ;;  %v3287_v15 = vld [vmem:[%s4255_s1 + $0x370] ss:$8 sps:$4 sm:$0xff]   ;;  %v3293_v20 = vld [vmem:[%s4255_s1 + $0x360] ss:$8 sps:$4 sm:$0xff]   ;;  %v3295_v21 = vld [vmem:[%s4255_s1 + $0x364] ss:$8 sps:$4 sm:$0xff]   ;;  %v2864_v28 = vcombine.low %v187_v8, %v191_v9 }
  0x27   : > { %1934 = vmatprep.subr.bf16.mxu1 %v3232_v29  ;;  %v195_v22 = vld [vmem:[%s3556_s4 + $0x80] sm:$0xff]  ;;  %v196_v24 = vld [vmem:[%s3556_s4 + $0x88] sm:$0xff]  ;;  %v3298_v26 = vld [vmem:[%s4255_s1 + $0x254] ss:$8 sps:$4 sm:$0xff]   ;;  %v2866_v29 = vcombine.low %v188_v10, %v192_v11 }
  0x28   : > { %v199_v23 = vld [vmem:[%s3556_s4 + $0xa0] sm:$0xff]  ;;  %v200_v25 = vld [vmem:[%s3556_s4 + $0xa8] sm:$0xff]  ;;  %v3301_v27 = vld [vmem:[%s4255_s1 + $0x354] ss:$8 sps:$4 sm:$0xff]  }
  0x29   : > { %1742 = vmatpush1.bf16.msra.mxu0 %v3234_v30  ;;  %v2873_v30 = vcombine.high %v195_v22, %v199_v23  ;;  %v3308_v48 = vld [vmem:[%s4255_s1 + $0x230] ss:$8 sps:$4 sm:$0xff]   ;;  %v3316_v50 = vld [vmem:[%s4255_s1 + $0x224] ss:$8 sps:$4 sm:$0xff]   ;;  %v3326_v8 = vld [vmem:[%s4255_s1 + $0x200] ss:$8 sps:$4 sm:$0xff]  }
  0x2a   : > { %1935 = vmatpush1.bf16.msra.mxu1 %v3235_v31  ;;  %1743 = vmatprep.subr.bf16.mxu0 %v3236_v32  ;;  %v2875_v31 = vcombine.high %v196_v24, %v200_v25  ;;  %v3296_v32 = vld [vmem:[%s4255_s1 + $0x250] ss:$8 sps:$4 sm:$0xff]   ;;  %v3319_v51 = vld [vmem:[%s4255_s1 + $0x324] ss:$8 sps:$4 sm:$0xff]   ;;  %v3329_v9 = vld [vmem:[%s4255_s1 + $0x300] ss:$8 sps:$4 sm:$0xff]  }
  0x2b   : > { %1936 = vmatprep.subr.bf16.mxu1 %v3238_v33  ;;  %v3299_v33 = vld [vmem:[%s4255_s1 + $0x350] ss:$8 sps:$4 sm:$0xff]   ;;  %v215_v53 = vld [vmem:[%s3556_s4 + $0x120] sm:$0xff]  ;;  %v216_v55 = vld [vmem:[%s3556_s4 + $0x128] sm:$0xff] }
  0x2c   : > { %v3311_v49 = vld [vmem:[%s4255_s1 + $0x330] ss:$8 sps:$4 sm:$0xff]   ;;  %v3334_v10 = vld [vmem:[%s4255_s1 + $0x2f4] ss:$8 sps:$4 sm:$0xff]  }
  0x2d   : > { %1744 = vmatpush2.bf16.msra.mxu0 %v3240_v34  ;;  %v3304_v34 = vld [vmem:[%s4255_s1 + $0x244] ss:$8 sps:$4 sm:$0xff]   ;;  %v3337_v11 = vld [vmem:[%s4255_s1 + $0x3f4] ss:$8 sps:$4 sm:$0xff]  }
  0x2e   : > { %1937 = vmatpush2.bf16.msra.mxu1 %v3241_v35  ;;  %1745 = vmatprep.subr.bf16.mxu0 %v3242_v36  ;;  %v3307_v35 = vld [vmem:[%s4255_s1 + $0x344] ss:$8 sps:$4 sm:$0xff]  }
  0x2f   : > { %1938 = vmatprep.subr.bf16.mxu1 %v3244_v37  ;;  %v203_v36 = vld [vmem:[%s3556_s4 + $0xc0] sm:$0xff] }
  0x30   : > { %v207_v37 = vld [vmem:[%s3556_s4 + $0xe0] sm:$0xff] }
  0x31   : > { %1746 = vmatpush2.bf16.msra.mxu0 %v3246_v38  ;;  %v204_v38 = vld [vmem:[%s3556_s4 + $0xc8] sm:$0xff] }
  0x32   : > { %1939 = vmatpush2.bf16.msra.mxu1 %v3247_v39  ;;  %1747 = vmatprep.subr.bf16.mxu0 %v3248_v40  ;;  %v208_v39 = vld [vmem:[%s3556_s4 + $0xe8] sm:$0xff] }
  0x33   : > { %1940 = vmatprep.subr.bf16.mxu1 %v3250_v41  ;;  %v3302_v40 = vld [vmem:[%s4255_s1 + $0x240] ss:$8 sps:$4 sm:$0xff]  }
  0x34   : > { %v3305_v41 = vld [vmem:[%s4255_s1 + $0x340] ss:$8 sps:$4 sm:$0xff]  }
  0x35   : > { %1748 = vmatpush2.bf16.msra.mxu0 %v3252_v42  ;;  %v3310_v42 = vld [vmem:[%s4255_s1 + $0x234] ss:$8 sps:$4 sm:$0xff]  }
  0x36   : > { %1941 = vmatpush2.bf16.msra.mxu1 %v3253_v43  ;;  %1749 = vmatprep.subr.bf16.mxu0 %v3254_v44  ;;  %v3313_v43 = vld [vmem:[%s4255_s1 + $0x334] ss:$8 sps:$4 sm:$0xff]   ;;  %v2872_v44 = vcombine.low %v195_v22, %v199_v23  ;;  %v228_v22 = vld [vmem:[%s3556_s4 + $0x188] sm:$0xff] }
  0x37   : > { %1942 = vmatprep.subr.bf16.mxu1 %v3256_v45  ;;  %v2874_v45 = vcombine.low %v196_v24, %v200_v25  ;;  %v232_v23 = vld [vmem:[%s3556_s4 + $0x1a8] sm:$0xff] }
  0x38   : > { %v3338_v24 = vld [vmem:[%s4255_s1 + $0x2e0] ss:$8 sps:$4 sm:$0xff]  }
  0x39   : > { %1750 = vmatpush2.bf16.msra.mxu0 %v3258_v46  ;;  %v2881_v46 = vcombine.high %v203_v36, %v207_v37  ;;  %v3341_v25 = vld [vmem:[%s4255_s1 + $0x3e0] ss:$8 sps:$4 sm:$0xff]  }
  0x3a   : > { %1943 = vmatpush2.bf16.msra.mxu1 %v3259_v47  ;;  %1751 = vmatprep.subr.bf16.mxu0 %v3260_v52  ;;  %v2883_v47 = vcombine.high %v204_v38, %v208_v39  ;;  %v211_v52 = vld [vmem:[%s3556_s4 + $0x100] sm:$0xff] }
  0x3b   : > { %1944 = vmatprep.subr.bf16.mxu1 %v3262_v54  ;;  %v212_v54 = vld [vmem:[%s3556_s4 + $0x108] sm:$0xff] }
  0x3d   : > { %1752 = vmatpush2.bf16.msra.mxu0 %v3264_v56  ;;  %v3314_v56 = vld [vmem:[%s4255_s1 + $0x220] ss:$8 sps:$4 sm:$0xff]  }
  0x3e   : > { %1945 = vmatpush2.bf16.msra.mxu1 %v3265_v57  ;;  %1753 = vmatprep.subr.bf16.mxu0 %v3266_v58  ;;  %v3317_v57 = vld [vmem:[%s4255_s1 + $0x320] ss:$8 sps:$4 sm:$0xff]   ;;  %v3322_v58 = vld [vmem:[%s4255_s1 + $0x214] ss:$8 sps:$4 sm:$0xff]  }
  0x3f   : > { %1946 = vmatprep.subr.bf16.mxu1 %v3268_v59  ;;  %v3325_v59 = vld [vmem:[%s4255_s1 + $0x314] ss:$8 sps:$4 sm:$0xff]  }
  0x41   : > { %1754 = vmatpush2.bf16.msra.mxu0 %v3270_v60  ;;  %v2880_v60 = vcombine.low %v203_v36, %v207_v37  ;;  %v235_v36 = vld [vmem:[%s3556_s4 + $0x1c0] sm:$0xff] }
  0x42   : > { %1947 = vmatpush2.bf16.msra.mxu1 %v3271_v61  ;;  %1755 = vmatprep.subr.bf16.mxu0 %v3272_v62  ;;  %v2882_v61 = vcombine.low %v204_v38, %v208_v39  ;;  %v2889_v62 = vcombine.high %v211_v52, %v215_v53  ;;  %v239_v37 = vld [vmem:[%s3556_s4 + $0x1e0] sm:$0xff]  ;;  %v236_v38 = vld [vmem:[%s3556_s4 + $0x1c8] sm:$0xff] }
  0x43   : > { %1948 = vmatprep.subr.bf16.mxu1 %v3274_v63  ;;  %v2891_v63 = vcombine.high %v212_v54, %v216_v55  ;;  %v240_v39 = vld [vmem:[%s3556_s4 + $0x1e8] sm:$0xff] }
  0x45   : > { %1756 = vmatpush2.bf16.msra.mxu0 %v3276_v0  ;;  %v3320_v0 = vld [vmem:[%s4255_s1 + $0x210] ss:$8 sps:$4 sm:$0xff]  }
  0x46   : > { %1949 = vmatpush2.bf16.msra.mxu1 %v3277_v1  ;;  %1757 = vmatprep.subr.bf16.mxu0 %v3278_v2  ;;  %v3323_v1 = vld [vmem:[%s4255_s1 + $0x310] ss:$8 sps:$4 sm:$0xff]   ;;  %v3328_v2 = vld [vmem:[%s4255_s1 + $0x204] ss:$8 sps:$4 sm:$0xff]  }
  0x47   : > { %1950 = vmatprep.subr.bf16.mxu1 %v3280_v3  ;;  %v3331_v3 = vld [vmem:[%s4255_s1 + $0x304] ss:$8 sps:$4 sm:$0xff]  }
  0x49   : > { %1758 = vmatpush2.bf16.msra.mxu0 %v3282_v4  ;;  %v219_v4 = vld [vmem:[%s3556_s4 + $0x140] sm:$0xff] }
  0x4a   : > { %1951 = vmatpush2.bf16.msra.mxu1 %v3283_v5  ;;  %2113 = vmatprep.subr.bf16.mxu0 %v3286_v6  ;;  %v223_v5 = vld [vmem:[%s3556_s4 + $0x160] sm:$0xff]  ;;  %v220_v6 = vld [vmem:[%s3556_s4 + $0x148] sm:$0xff] }
  0x4b   : > { %2306 = vmatprep.subr.bf16.mxu1 %v3289_v7  ;;  %v224_v7 = vld [vmem:[%s3556_s4 + $0x168] sm:$0xff] }
  0x4c   : > { %1760 = vmatmul.mubr.bf16.vlgmr.msra.gmra.mxu0 %v2856_v12  ;;  %v2888_v12 = vcombine.low %v211_v52, %v215_v53  ;;  %v243_v52 = vld [vmem:[%s3556_s4 + $0x200] sm:$0xff] }
  0x4d   : > { %1953 = vmatmul.mubr.bf16.vlgmr.msra.gmra.mxu1 %v2858_v13  ;;  %2114 = vmatpush1.bf16.msra.mxu0 %v3284_v14  ;;  %v2890_v13 = vcombine.low %v212_v54, %v216_v55  ;;  %v2897_v14 = vcombine.high %v219_v4, %v223_v5  ;;  %v247_v53 = vld [vmem:[%s3556_s4 + $0x220] sm:$0xff]  ;;  %v244_v54 = vld [vmem:[%s3556_s4 + $0x208] sm:$0xff] }
  0x4e   : > { %2307 = vmatpush1.bf16.msra.mxu1 %v3287_v15  ;;  %1769 = vmatprep.mubr.bf16.mxu0 %v2865_v16  ;;  %v2899_v15 = vcombine.high %v220_v6, %v224_v7  ;;  %v3332_v16 = vld [vmem:[%s4255_s1 + $0x2f0] ss:$8 sps:$4 sm:$0xff]   ;;  %v248_v55 = vld [vmem:[%s3556_s4 + $0x228] sm:$0xff] }
  0x4f   : > { %1962 = vmatprep.mubr.bf16.mxu1 %v2867_v17  ;;  %2115 = vmatprep.subr.bf16.mxu0 %v3292_v19  ;;  %v3335_v17 = vld [vmem:[%s4255_s1 + $0x3f0] ss:$8 sps:$4 sm:$0xff]   ;;  %v3343_v19 = vld [vmem:[%s4255_s1 + $0x3e4] ss:$8 sps:$4 sm:$0xff]  }
  0x50   : > { %2308 = vmatprep.subr.bf16.mxu1 %v3295_v21  ;;  %v231_v21 = vld [vmem:[%s3556_s4 + $0x1a0] sm:$0xff] }
  0x51   : > { %2116 = vmatpush1.bf16.msra.mxu0 %v3290_v18  ;;  %v3340_v18 = vld [vmem:[%s4255_s1 + $0x2e4] ss:$8 sps:$4 sm:$0xff]  }
  0x52   : > { %2309 = vmatpush1.bf16.msra.mxu1 %v3293_v20  ;;  %2117 = vmatprep.subr.bf16.mxu0 %v3298_v26  ;;  %v227_v20 = vld [vmem:[%s3556_s4 + $0x180] sm:$0xff]  ;;  %v3346_v26 = vld [vmem:[%s4255_s1 + $0x2d4] ss:$8 sps:$4 sm:$0xff]  }
  0x53   : > { %2310 = vmatprep.subr.bf16.mxu1 %v3301_v27  ;;  %v3349_v27 = vld [vmem:[%s4255_s1 + $0x3d4] ss:$8 sps:$4 sm:$0xff]  }
  0x54   : > { %1770 = vmatmul.mubr.bf16.gmra.mxu0 %v2864_v28  ;;  %v2896_v28 = vcombine.low %v219_v4, %v223_v5  ;;  %v251_v4 = vld [vmem:[%s3556_s4 + $0x240] sm:$0xff] }
  0x55   : > { %1963 = vmatmul.mubr.bf16.gmra.mxu1 %v2866_v29  ;;  %1779 = vmatprep.mubr.bf16.mxu0 %v2873_v30  ;;  %v2898_v29 = vcombine.low %v220_v6, %v224_v7  ;;  %v2905_v30 = vcombine.high %v227_v20, %v231_v21  ;;  %v255_v5 = vld [vmem:[%s3556_s4 + $0x260] sm:$0xff]  ;;  %v252_v6 = vld [vmem:[%s3556_s4 + $0x248] sm:$0xff] }
  0x56   : > { %1972 = vmatprep.mubr.bf16.mxu1 %v2875_v31  ;;  %2118 = vmatpush1.bf16.msra.mxu0 %v3296_v32  ;;  %v2907_v31 = vcombine.high %v228_v22, %v232_v23  ;;  %v3344_v32 = vld [vmem:[%s4255_s1 + $0x2d0] ss:$8 sps:$4 sm:$0xff]   ;;  %v256_v7 = vld [vmem:[%s3556_s4 + $0x268] sm:$0xff] }
  0x57   : > { %2311 = vmatpush1.bf16.msra.mxu1 %v3299_v33  ;;  %2119 = vmatprep.subr.bf16.mxu0 %v3304_v34  ;;  %v3347_v33 = vld [vmem:[%s4255_s1 + $0x3d0] ss:$8 sps:$4 sm:$0xff]   ;;  %v3352_v34 = vld [vmem:[%s4255_s1 + $0x2c4] ss:$8 sps:$4 sm:$0xff]  }
  0x58   : > { %2312 = vmatprep.subr.bf16.mxu1 %v3307_v35  ;;  %v3355_v35 = vld [vmem:[%s4255_s1 + $0x3c4] ss:$8 sps:$4 sm:$0xff]  }
  0x5a   : > { %2120 = vmatpush1.bf16.msra.mxu0 %v3302_v40  ;;  %v3350_v40 = vld [vmem:[%s4255_s1 + $0x2c0] ss:$8 sps:$4 sm:$0xff]  }
  0x5b   : > { %2313 = vmatpush1.bf16.msra.mxu1 %v3305_v41  ;;  %2121 = vmatprep.subr.bf16.mxu0 %v3310_v42  ;;  %v3353_v41 = vld [vmem:[%s4255_s1 + $0x3c0] ss:$8 sps:$4 sm:$0xff]   ;;  %v3358_v42 = vld [vmem:[%s4255_s1 + $0x2b4] ss:$8 sps:$4 sm:$0xff]  }
  0x5c   : > { %2314 = vmatprep.subr.bf16.mxu1 %v3313_v43  ;;  %1780 = vmatmul.mubr.bf16.gmra.mxu0 %v2872_v44  ;;  %v3361_v43 = vld [vmem:[%s4255_s1 + $0x3b4] ss:$8 sps:$4 sm:$0xff]   ;;  %v2904_v44 = vcombine.low %v227_v20, %v231_v21 }
  0x5d   : > { %1973 = vmatmul.mubr.bf16.gmra.mxu1 %v2874_v45  ;;  %1789 = vmatprep.mubr.bf16.mxu0 %v2881_v46  ;;  %v2906_v45 = vcombine.low %v228_v22, %v232_v23  ;;  %v2913_v46 = vcombine.high %v235_v36, %v239_v37  ;;  %v267_v22 = vld [vmem:[%s3556_s4 + $0x2c0] sm:$0xff] }
  0x5e   : > { %1982 = vmatprep.mubr.bf16.mxu1 %v2883_v47  ;;  %2122 = vmatpush1.bf16.msra.mxu0 %v3308_v48  ;;  %v2915_v47 = vcombine.high %v236_v38, %v240_v39  ;;  %v3356_v48 = vld [vmem:[%s4255_s1 + $0x2b0] ss:$8 sps:$4 sm:$0xff]   ;;  %v271_v23 = vld [vmem:[%s3556_s4 + $0x2e0] sm:$0xff] }
  0x5f   : > { %2315 = vmatpush1.bf16.msra.mxu1 %v3311_v49  ;;  %2123 = vmatprep.subr.bf16.mxu0 %v3316_v50  ;;  %v3359_v49 = vld [vmem:[%s4255_s1 + $0x3b0] ss:$8 sps:$4 sm:$0xff]   ;;  %v3364_v50 = vld [vmem:[%s4255_s1 + $0x2a4] ss:$8 sps:$4 sm:$0xff]  }
  0x60   : > { %2316 = vmatprep.subr.bf16.mxu1 %v3319_v51  ;;  %v3367_v51 = vld [vmem:[%s4255_s1 + $0x3a4] ss:$8 sps:$4 sm:$0xff]  }
  0x62   : > { %2124 = vmatpush1.bf16.msra.mxu0 %v3314_v56  ;;  %v3362_v56 = vld [vmem:[%s4255_s1 + $0x2a0] ss:$8 sps:$4 sm:$0xff]  }
  0x63   : > { %2317 = vmatpush1.bf16.msra.mxu1 %v3317_v57  ;;  %2125 = vmatprep.subr.bf16.mxu0 %v3322_v58  ;;  %v3365_v57 = vld [vmem:[%s4255_s1 + $0x3a0] ss:$8 sps:$4 sm:$0xff]   ;;  %v3370_v58 = vld [vmem:[%s4255_s1 + $0x294] ss:$8 sps:$4 sm:$0xff]  }
  0x64   : > { %2318 = vmatprep.subr.bf16.mxu1 %v3325_v59  ;;  %1790 = vmatmul.mubr.bf16.gmra.mxu0 %v2880_v60  ;;  %v3373_v59 = vld [vmem:[%s4255_s1 + $0x394] ss:$8 sps:$4 sm:$0xff]   ;;  %v2912_v60 = vcombine.low %v235_v36, %v239_v37 }
  0x65   : > { %1983 = vmatmul.mubr.bf16.gmra.mxu1 %v2882_v61  ;;  %1799 = vmatprep.mubr.bf16.mxu0 %v2889_v62  ;;  %v2914_v61 = vcombine.low %v236_v38, %v240_v39  ;;  %v2921_v62 = vcombine.high %v243_v52, %v247_v53  ;;  %v283_v38 = vld [vmem:[%s3556_s4 + $0x340] sm:$0xff] }
  0x66   : > { %1992 = vmatprep.mubr.bf16.mxu1 %v2891_v63  ;;  %2126 = vmatpush1.bf16.msra.mxu0 %v3320_v0  ;;  %v2923_v63 = vcombine.high %v244_v54, %v248_v55  ;;  %v3368_v0 = vld [vmem:[%s4255_s1 + $0x290] ss:$8 sps:$4 sm:$0xff]   ;;  %v287_v39 = vld [vmem:[%s3556_s4 + $0x360] sm:$0xff] }
  0x67   : > { %2319 = vmatpush1.bf16.msra.mxu1 %v3323_v1  ;;  %2127 = vmatprep.subr.bf16.mxu0 %v3328_v2  ;;  %v3371_v1 = vld [vmem:[%s4255_s1 + $0x390] ss:$8 sps:$4 sm:$0xff]   ;;  %v3376_v2 = vld [vmem:[%s4255_s1 + $0x284] ss:$8 sps:$4 sm:$0xff]  }
  0x68   : > { %2320 = vmatprep.subr.bf16.mxu1 %v3331_v3  ;;  %v3379_v3 = vld [vmem:[%s4255_s1 + $0x384] ss:$8 sps:$4 sm:$0xff]  }
  0x6a   : > { %2128 = vmatpush1.bf16.msra.mxu0 %v3326_v8  ;;  %v3374_v8 = vld [vmem:[%s4255_s1 + $0x280] ss:$8 sps:$4 sm:$0xff]  }
  0x6b   : > { %2321 = vmatpush1.bf16.msra.mxu1 %v3329_v9  ;;  %2129 = vmatprep.subr.bf16.mxu0 %v3334_v10  ;;  %v3377_v9 = vld [vmem:[%s4255_s1 + $0x380] ss:$8 sps:$4 sm:$0xff]   ;;  %v2920_v10 = vcombine.low %v243_v52, %v247_v53 }
  0x6c   : > { %2322 = vmatprep.subr.bf16.mxu1 %v3337_v11  ;;  %1800 = vmatmul.mubr.bf16.gmra.mxu0 %v2888_v12  ;;  %v2922_v11 = vcombine.low %v244_v54, %v248_v55  ;;  %v2929_v12 = vcombine.high %v251_v4, %v255_v5  ;;  %v299_v54 = vld [vmem:[%s3556_s4 + $0x3c0] sm:$0xff] }
  0x6d   : > { %1993 = vmatmul.mubr.bf16.gmra.mxu1 %v2890_v13  ;;  %1809 = vmatprep.mubr.bf16.mxu0 %v2897_v14  ;;  %v2931_v13 = vcombine.high %v252_v6, %v256_v7  ;;  %v259_v14 = vld [vmem:[%s3556_s4 + $0x280] sm:$0xff] }
  0x6e   : > { %2002 = vmatprep.mubr.bf16.mxu1 %v2899_v15  ;;  %2130 = vmatpush2.bf16.msra.mxu0 %v3332_v16  ;;  %v263_v15 = vld [vmem:[%s3556_s4 + $0x2a0] sm:$0xff]  ;;  %v260_v16 = vld [vmem:[%s3556_s4 + $0x288] sm:$0xff] }
  0x6f   : > { %2323 = vmatpush2.bf16.msra.mxu1 %v3335_v17  ;;  %2131 = vmatprep.subr.bf16.mxu0 %v3340_v18  ;;  %v264_v17 = vld [vmem:[%s3556_s4 + $0x2a8] sm:$0xff]  ;;  %v2928_v18 = vcombine.low %v251_v4, %v255_v5  ;;  %v2937_v20 = vcombine.high %v259_v14, %v263_v15  ;;  %v303_v55 = vld [vmem:[%s3556_s4 + $0x3e0] sm:$0xff] }
  0x70   : > { %2324 = vmatprep.subr.bf16.mxu1 %v3343_v19  ;;  %v2930_v19 = vcombine.low %v252_v6, %v256_v7  ;;  %v2939_v21 = vcombine.high %v260_v16, %v264_v17  ;;  %v189_v6 = vld [vmem:[%s3556_s4 + $0x50] sm:$0xff] }
  0x71   : > { %v193_v7 = vld [vmem:[%s3556_s4 + $0x70] sm:$0xff] }
  0x72   : > { %2132 = vmatpush2.bf16.msra.mxu0 %v3338_v24  ;;  %v268_v24 = vld [vmem:[%s3556_s4 + $0x2c8] sm:$0xff] }
  0x73   : > { %2325 = vmatpush2.bf16.msra.mxu1 %v3341_v25  ;;  %2133 = vmatprep.subr.bf16.mxu0 %v3346_v26  ;;  %v272_v25 = vld [vmem:[%s3556_s4 + $0x2e8] sm:$0xff]  ;;  %v2936_v26 = vcombine.low %v259_v14, %v263_v15  ;;  %v197_v14 = vld [vmem:[%s3556_s4 + $0x90] sm:$0xff] }
  0x74   : > { %2326 = vmatprep.subr.bf16.mxu1 %v3349_v27  ;;  %1810 = vmatmul.mubr.bf16.gmra.mxu0 %v2896_v28  ;;  %v2938_v27 = vcombine.low %v260_v16, %v264_v17  ;;  %v2945_v28 = vcombine.high %v267_v22, %v271_v23  ;;  %v201_v15 = vld [vmem:[%s3556_s4 + $0xb0] sm:$0xff]  ;;  %v198_v16 = vld [vmem:[%s3556_s4 + $0x98] sm:$0xff] }
  0x75   : > { %2003 = vmatmul.mubr.bf16.gmra.mxu1 %v2898_v29  ;;  %1819 = vmatprep.mubr.bf16.mxu0 %v2905_v30  ;;  %v2947_v29 = vcombine.high %v268_v24, %v272_v25  ;;  %v275_v30 = vld [vmem:[%s3556_s4 + $0x300] sm:$0xff]  ;;  %v202_v17 = vld [vmem:[%s3556_s4 + $0xb8] sm:$0xff] }
  0x76   : > { %2012 = vmatprep.mubr.bf16.mxu1 %v2907_v31  ;;  %2134 = vmatpush2.bf16.msra.mxu0 %v3344_v32  ;;  %v279_v31 = vld [vmem:[%s3556_s4 + $0x320] sm:$0xff]  ;;  %v276_v32 = vld [vmem:[%s3556_s4 + $0x308] sm:$0xff] }
  0x77   : > { %2327 = vmatpush2.bf16.msra.mxu1 %v3347_v33  ;;  %2135 = vmatprep.subr.bf16.mxu0 %v3352_v34  ;;  %v280_v33 = vld [vmem:[%s3556_s4 + $0x328] sm:$0xff]  ;;  %v2944_v34 = vcombine.low %v267_v22, %v271_v23  ;;  %v2953_v36 = vcombine.high %v275_v30, %v279_v31  ;;  %v205_v22 = vld [vmem:[%s3556_s4 + $0xd0] sm:$0xff] }
  0x78   : > { %2328 = vmatprep.subr.bf16.mxu1 %v3355_v35  ;;  %v2946_v35 = vcombine.low %v268_v24, %v272_v25  ;;  %v2955_v37 = vcombine.high %v276_v32, %v280_v33  ;;  %v209_v23 = vld [vmem:[%s3556_s4 + $0xf0] sm:$0xff]  ;;  %v206_v24 = vld [vmem:[%s3556_s4 + $0xd8] sm:$0xff] }
  0x79   : > { %v210_v25 = vld [vmem:[%s3556_s4 + $0xf8] sm:$0xff] }
  0x7a   : > { %2136 = vmatpush2.bf16.msra.mxu0 %v3350_v40  ;;  %v284_v40 = vld [vmem:[%s3556_s4 + $0x348] sm:$0xff] }
  0x7b   : > { %2329 = vmatpush2.bf16.msra.mxu1 %v3353_v41  ;;  %2137 = vmatprep.subr.bf16.mxu0 %v3358_v42  ;;  %v288_v41 = vld [vmem:[%s3556_s4 + $0x368] sm:$0xff]  ;;  %v2952_v42 = vcombine.low %v275_v30, %v279_v31  ;;  %v213_v30 = vld [vmem:[%s3556_s4 + $0x110] sm:$0xff] }
  0x7c   : > { %2330 = vmatprep.subr.bf16.mxu1 %v3361_v43  ;;  %1820 = vmatmul.mubr.bf16.gmra.mxu0 %v2904_v44  ;;  %v2954_v43 = vcombine.low %v276_v32, %v280_v33  ;;  %v2961_v44 = vcombine.high %v283_v38, %v287_v39  ;;  %v217_v31 = vld [vmem:[%s3556_s4 + $0x130] sm:$0xff]  ;;  %v214_v32 = vld [vmem:[%s3556_s4 + $0x118] sm:$0xff] }
  0x7d   : > { %2013 = vmatmul.mubr.bf16.gmra.mxu1 %v2906_v45  ;;  %1829 = vmatprep.mubr.bf16.mxu0 %v2913_v46  ;;  %v2963_v45 = vcombine.high %v284_v40, %v288_v41  ;;  %v291_v46 = vld [vmem:[%s3556_s4 + $0x380] sm:$0xff]  ;;  %v218_v33 = vld [vmem:[%s3556_s4 + $0x138] sm:$0xff] }
  0x7e   : > { %2022 = vmatprep.mubr.bf16.mxu1 %v2915_v47  ;;  %2138 = vmatpush2.bf16.msra.mxu0 %v3356_v48  ;;  %v295_v47 = vld [vmem:[%s3556_s4 + $0x3a0] sm:$0xff]  ;;  %v292_v48 = vld [vmem:[%s3556_s4 + $0x388] sm:$0xff] }
  0x7f   : > { %2331 = vmatpush2.bf16.msra.mxu1 %v3359_v49  ;;  %2139 = vmatprep.subr.bf16.mxu0 %v3364_v50  ;;  %v296_v49 = vld [vmem:[%s3556_s4 + $0x3a8] sm:$0xff]  ;;  %v2960_v50 = vcombine.low %v283_v38, %v287_v39  ;;  %v2969_v52 = vcombine.high %v291_v46, %v295_v47  ;;  %v221_v38 = vld [vmem:[%s3556_s4 + $0x150] sm:$0xff] }
  0x80   : > { %2332 = vmatprep.subr.bf16.mxu1 %v3367_v51  ;;  %v2962_v51 = vcombine.low %v284_v40, %v288_v41  ;;  %v2971_v53 = vcombine.high %v292_v48, %v296_v49  ;;  %v225_v39 = vld [vmem:[%s3556_s4 + $0x170] sm:$0xff]  ;;  %v222_v40 = vld [vmem:[%s3556_s4 + $0x158] sm:$0xff] }
  0x81   : > { %v226_v41 = vld [vmem:[%s3556_s4 + $0x178] sm:$0xff] }
  0x82   : > { %2140 = vmatpush2.bf16.msra.mxu0 %v3362_v56  ;;  %v300_v56 = vld [vmem:[%s3556_s4 + $0x3c8] sm:$0xff] }
  0x83   : > { %2333 = vmatpush2.bf16.msra.mxu1 %v3365_v57  ;;  %2141 = vmatprep.subr.bf16.mxu0 %v3370_v58  ;;  %v304_v57 = vld [vmem:[%s3556_s4 + $0x3e8] sm:$0xff]  ;;  %v2968_v58 = vcombine.low %v291_v46, %v295_v47  ;;  %v229_v46 = vld [vmem:[%s3556_s4 + $0x190] sm:$0xff] }
  0x84   : > { %2334 = vmatprep.subr.bf16.mxu1 %v3373_v59  ;;  %1830 = vmatmul.mubr.bf16.gmra.mxu0 %v2912_v60  ;;  %v2970_v59 = vcombine.low %v292_v48, %v296_v49  ;;  %v2977_v60 = vcombine.high %v299_v54, %v303_v55  ;;  %v233_v47 = vld [vmem:[%s3556_s4 + $0x1b0] sm:$0xff]  ;;  %v230_v48 = vld [vmem:[%s3556_s4 + $0x198] sm:$0xff] }
  0x85   : > { %2023 = vmatmul.mubr.bf16.gmra.mxu1 %v2914_v61  ;;  %1839 = vmatprep.mubr.bf16.mxu0 %v2921_v62  ;;  %v2979_v61 = vcombine.high %v300_v56, %v304_v57  ;;  %v181_v62 = vld [vmem:[%s3556_s4 + $0x10] sm:$0xff]  ;;  %v234_v49 = vld [vmem:[%s3556_s4 + $0x1b8] sm:$0xff] }
  0x86   : > { %2032 = vmatprep.mubr.bf16.mxu1 %v2923_v63  ;;  %2142 = vmatpush2.bf16.msra.mxu0 %v3368_v0  ;;  %v185_v63 = vld [vmem:[%s3556_s4 + $0x30] sm:$0xff]  ;;  %v182_v0 = vld [vmem:[%s3556_s4 + $0x18] sm:$0xff] }
  0x87   : > { %2335 = vmatpush2.bf16.msra.mxu1 %v3371_v1  ;;  %2143 = vmatprep.subr.bf16.mxu0 %v3376_v2  ;;  %v186_v1 = vld [vmem:[%s3556_s4 + $0x38] sm:$0xff]  ;;  %v2976_v2 = vcombine.low %v299_v54, %v303_v55  ;;  %v2861_v4 = vcombine.high %v181_v62, %v185_v63  ;;  %v237_v54 = vld [vmem:[%s3556_s4 + $0x1d0] sm:$0xff] }
  0x88   : > { %2336 = vmatprep.subr.bf16.mxu1 %v3379_v3  ;;  %v2978_v3 = vcombine.low %v300_v56, %v304_v57  ;;  %v2863_v5 = vcombine.high %v182_v0, %v186_v1  ;;  %v241_v55 = vld [vmem:[%s3556_s4 + $0x1f0] sm:$0xff]  ;;  %v238_v56 = vld [vmem:[%s3556_s4 + $0x1d8] sm:$0xff] }
  0x89   : > { %v242_v57 = vld [vmem:[%s3556_s4 + $0x1f8] sm:$0xff] }
  0x8a   : > { %2144 = vmatpush2.bf16.msra.mxu0 %v3374_v8  ;;  %v190_v8 = vld [vmem:[%s3556_s4 + $0x58] sm:$0xff] }
  0x8b   : > { %2337 = vmatpush2.bf16.msra.mxu1 %v3377_v9  ;;  %v194_v9 = vld [vmem:[%s3556_s4 + $0x78] sm:$0xff] }
  0x8c   : > { %1840 = vmatmul.mubr.bf16.gmra.mxu0 %v2920_v10  ;;  %v2860_v10 = vcombine.low %v181_v62, %v185_v63  ;;  %v245_v62 = vld [vmem:[%s3556_s4 + $0x210] sm:$0xff]  ;;  %v437_v63 = vlaneseq }
  0x8d   : > { %2033 = vmatmul.mubr.bf16.gmra.mxu1 %v2922_v11  ;;  %1849 = vmatprep.mubr.bf16.mxu0 %v2929_v12  ;;  %v2862_v11 = vcombine.low %v182_v0, %v186_v1  ;;  %v2869_v12 = vcombine.high %v189_v6, %v193_v7  ;;  %v249_v0 = vld [vmem:[%s3556_s4 + $0x230] sm:$0xff]  ;;  %v246_v1 = vld [vmem:[%s3556_s4 + $0x218] sm:$0xff] }
  0x8e   : > { %2042 = vmatprep.mubr.bf16.mxu1 %v2931_v13  ;;  %v2871_v13 = vcombine.high %v190_v8, %v194_v9 }
  0x94   : > { %1850 = vmatmul.mubr.bf16.gmra.mxu0 %v2928_v18  ;;  %v2868_v18 = vcombine.low %v189_v6, %v193_v7  ;;  %v438_v7 = vshrl.u32 %v437_v63, 7 }
  0x95   : > { %2043 = vmatmul.mubr.bf16.gmra.mxu1 %v2930_v19  ;;  %1859 = vmatprep.mubr.bf16.mxu0 %v2937_v20  ;;  %v2870_v19 = vcombine.low %v190_v8, %v194_v9  ;;  %v2877_v20 = vcombine.high %v197_v14, %v201_v15  ;;  %v435_v8 = vld [vmem:[%s4256_s2] sm:$0x3] }
  0x96   : > { %2052 = vmatprep.mubr.bf16.mxu1 %v2939_v21  ;;  %v2879_v21 = vcombine.high %v198_v16, %v202_v17  ;;  %v439_v9 = vsub.s32 0, %v438_v7 }
  0x9c   : > { %1860 = vmatmul.mubr.bf16.gmra.mxu0 %v2936_v26  ;;  %v2876_v26 = vcombine.low %v197_v14, %v201_v15  ;;  %v443_v14 = vsub.s32 1, %v438_v7  ;;  %v2924_v15 = vcombine.low %v245_v62, %v249_v0 }
  0x9d   : > { %2053 = vmatmul.mubr.bf16.gmra.mxu1 %v2938_v27  ;;  %1869 = vmatprep.mubr.bf16.mxu0 %v2945_v28  ;;  %v2878_v27 = vcombine.low %v198_v16, %v202_v17  ;;  %v2885_v28 = vcombine.high %v205_v22, %v209_v23  ;;  %v3929_v17 = vrot.slane %v435_v8, %v439_v9 }
  0x9e   : > { %2062 = vmatprep.mubr.bf16.mxu1 %v2947_v29  ;;  %v2887_v29 = vcombine.high %v206_v24, %v210_v25 }
  0xa4   : > { %1870 = vmatmul.mubr.bf16.gmra.mxu0 %v2944_v34  ;;  %v2884_v34 = vcombine.low %v205_v22, %v209_v23 }
  0xa5   : > { %2063 = vmatmul.mubr.bf16.gmra.mxu1 %v2946_v35  ;;  %1879 = vmatprep.mubr.bf16.mxu0 %v2953_v36  ;;  %v2886_v35 = vcombine.low %v206_v24, %v210_v25  ;;  %v2893_v36 = vcombine.high %v213_v30, %v217_v31  ;;  %v261_v24 = vld [vmem:[%s3556_s4 + $0x290] sm:$0xff] }
  0xa6   : > { %2072 = vmatprep.mubr.bf16.mxu1 %v2955_v37  ;;  %v2895_v37 = vcombine.high %v214_v32, %v218_v33 }
  0xac   : > { %1880 = vmatmul.mubr.bf16.gmra.mxu0 %v2952_v42  ;;  %v2892_v42 = vcombine.low %v213_v30, %v217_v31 }
  0xad   : > { %2073 = vmatmul.mubr.bf16.gmra.mxu1 %v2954_v43  ;;  %1889 = vmatprep.mubr.bf16.mxu0 %v2961_v44  ;;  %v2894_v43 = vcombine.low %v214_v32, %v218_v33  ;;  %v2901_v44 = vcombine.high %v221_v38, %v225_v39 }
  0xae   : > { %2082 = vmatprep.mubr.bf16.mxu1 %v2963_v45  ;;  %v2903_v45 = vcombine.high %v222_v40, %v226_v41 }
  0xb4   : > { %1890 = vmatmul.mubr.bf16.gmra.mxu0 %v2960_v50  ;;  %v2900_v50 = vcombine.low %v221_v38, %v225_v39 }
  0xb5   : > { %2083 = vmatmul.mubr.bf16.gmra.mxu1 %v2962_v51  ;;  %1899 = vmatprep.mubr.bf16.mxu0 %v2969_v52  ;;  %v2902_v51 = vcombine.low %v222_v40, %v226_v41  ;;  %v2909_v52 = vcombine.high %v229_v46, %v233_v47 }
  0xb6   : > { %2092 = vmatprep.mubr.bf16.mxu1 %v2971_v53  ;;  %v2911_v53 = vcombine.high %v230_v48, %v234_v49 }
  0xbc   : > { %1900 = vmatmul.mubr.bf16.gmra.mxu0 %v2968_v58  ;;  %v2908_v58 = vcombine.low %v229_v46, %v233_v47 }
  0xbd   : > { %2093 = vmatmul.mubr.bf16.gmra.mxu1 %v2970_v59  ;;  %1909 = vmatprep.mubr.bf16.mxu0 %v2977_v60  ;;  %v2910_v59 = vcombine.low %v230_v48, %v234_v49  ;;  %v2917_v60 = vcombine.high %v237_v54, %v241_v55  ;;  %v269_v48 = vld [vmem:[%s3556_s4 + $0x2d0] sm:$0xff] }
  0xbe   : > { %2102 = vmatprep.mubr.bf16.mxu1 %v2979_v61  ;;  %v2919_v61 = vcombine.high %v238_v56, %v242_v57 }
  0xc4   : > { %1910 = vmatmul.mubr.bf16.gmra.mxu0 %v2976_v2  ;;  %v250_v2 = vld [vmem:[%s3556_s4 + $0x238] sm:$0xff] }
  0xc5   : > { %2103 = vmatmul.mubr.bf16.gmra.mxu1 %v2978_v3  ;;  %2145 = vmatprep.mubr.bf16.mxu0 %v2861_v4  ;;  %v2916_v3 = vcombine.low %v237_v54, %v241_v55  ;;  %v2918_v4 = vcombine.low %v238_v56, %v242_v57  ;;  %v2927_v6 = vcombine.high %v246_v1, %v250_v2 }
  0xc6   : > { %2338 = vmatprep.mubr.bf16.mxu1 %v2863_v5  ;;  %v2925_v5 = vcombine.high %v245_v62, %v249_v0  ;;  %v2926_v16 = vcombine.low %v246_v1, %v250_v2 }
  0xcc   : > { %2146 = vmatmul.mubr.bf16.vlgmr.msra.gmra.mxu0 %v2860_v10  ;;  %v253_v10 = vld [vmem:[%s3556_s4 + $0x250] sm:$0xff] }
  0xcd   : > { %2339 = vmatmul.mubr.bf16.vlgmr.msra.gmra.mxu1 %v2862_v11  ;;  %2155 = vmatprep.mubr.bf16.mxu0 %v2869_v12  ;;  %v257_v11 = vld [vmem:[%s3556_s4 + $0x270] sm:$0xff]  ;;  %v254_v12 = vld [vmem:[%s3556_s4 + $0x258] sm:$0xff] }
  0xce   : > { %2348 = vmatprep.mubr.bf16.mxu1 %v2871_v13  ;;  %v258_v13 = vld [vmem:[%s3556_s4 + $0x278] sm:$0xff] }
  0xd4   : > { %2156 = vmatmul.mubr.bf16.gmra.mxu0 %v2868_v18  ;;  %v2933_v18 = vcombine.high %v253_v10, %v257_v11 }
  0xd5   : > { %2349 = vmatmul.mubr.bf16.gmra.mxu1 %v2870_v19  ;;  %2165 = vmatprep.mubr.bf16.mxu0 %v2877_v20  ;;  %v2935_v19 = vcombine.high %v254_v12, %v258_v13  ;;  %v3931_v20 = vrot.slane %v435_v8, %v443_v14  ;;  %v277_v8 = vld [vmem:[%s3556_s4 + $0x310] sm:$0xff] }
  0xd6   : > { %2358 = vmatprep.mubr.bf16.mxu1 %v2879_v21 }
  0xdc   : > { %2166 = vmatmul.mubr.bf16.gmra.mxu0 %v2876_v26 }
  0xdd   : > { %2359 = vmatmul.mubr.bf16.gmra.mxu1 %v2878_v27  ;;  %2175 = vmatprep.mubr.bf16.mxu0 %v2885_v28  ;;  %v265_v27 = vld [vmem:[%s3556_s4 + $0x2b0] sm:$0xff]  ;;  %v262_v28 = vld [vmem:[%s3556_s4 + $0x298] sm:$0xff] }
  0xde   : > { %2368 = vmatprep.mubr.bf16.mxu1 %v2887_v29  ;;  %v266_v29 = vld [vmem:[%s3556_s4 + $0x2b8] sm:$0xff]  ;;  %v2941_v38 = vcombine.high %v261_v24, %v265_v27 }
  0xdf   : > { %v2943_v39 = vcombine.high %v262_v28, %v266_v29 }
  0xe4   : > { %2176 = vmatmul.mubr.bf16.gmra.mxu0 %v2884_v34  ;;  %v2932_v34 = vcombine.low %v253_v10, %v257_v11  ;;  %v281_v11 = vld [vmem:[%s3556_s4 + $0x330] sm:$0xff] }
  0xe5   : > { %2369 = vmatmul.mubr.bf16.gmra.mxu1 %v2886_v35  ;;  %2185 = vmatprep.mubr.bf16.mxu0 %v2893_v36  ;;  %v2934_v35 = vcombine.low %v254_v12, %v258_v13  ;;  %v278_v12 = vld [vmem:[%s3556_s4 + $0x318] sm:$0xff] }
  0xe6   : > { %2378 = vmatprep.mubr.bf16.mxu1 %v2895_v37  ;;  %v282_v13 = vld [vmem:[%s3556_s4 + $0x338] sm:$0xff] }
  0xec   : > { %2186 = vmatmul.mubr.bf16.gmra.mxu0 %v2892_v42 }
  0xed   : > { %2379 = vmatmul.mubr.bf16.gmra.mxu1 %v2894_v43  ;;  %2195 = vmatprep.mubr.bf16.mxu0 %v2901_v44 }
  0xee   : > { %2388 = vmatprep.mubr.bf16.mxu1 %v2903_v45 }
  0xf4   : > { %2196 = vmatmul.mubr.bf16.gmra.mxu0 %v2900_v50 }
  0xf5   : > { %2389 = vmatmul.mubr.bf16.gmra.mxu1 %v2902_v51  ;;  %2205 = vmatprep.mubr.bf16.mxu0 %v2909_v52  ;;  %v273_v51 = vld [vmem:[%s3556_s4 + $0x2f0] sm:$0xff]  ;;  %v270_v52 = vld [vmem:[%s3556_s4 + $0x2d8] sm:$0xff] }
  0xf6   : > { %2398 = vmatprep.mubr.bf16.mxu1 %v2911_v53  ;;  %v274_v53 = vld [vmem:[%s3556_s4 + $0x2f8] sm:$0xff]  ;;  %v2949_v62 = vcombine.high %v269_v48, %v273_v51 }
  0xf7   : > { %v2951_v63 = vcombine.high %v270_v52, %v274_v53 }
  0xfc   : > { %2206 = vmatmul.mubr.bf16.gmra.mxu0 %v2908_v58  ;;  %v2940_v58 = vcombine.low %v261_v24, %v265_v27  ;;  %v2957_v24 = vcombine.high %v277_v8, %v281_v11 }
  0xfd   : > { %2399 = vmatmul.mubr.bf16.gmra.mxu1 %v2910_v59  ;;  %2215 = vmatprep.mubr.bf16.mxu0 %v2917_v60  ;;  %v2942_v59 = vcombine.low %v262_v28, %v266_v29 }
  0xfe   : > { %2408 = vmatprep.mubr.bf16.mxu1 %v2919_v61 }
 0x104   : > { %2216 = vmatmul.mubr.bf16.gmra.mxu0 %v2916_v3 }
 0x105   : > { %2409 = vmatmul.mubr.bf16.gmra.mxu1 %v2918_v4  ;;  %2225 = vmatprep.mubr.bf16.mxu0 %v2925_v5 }
 0x106   : > { %2418 = vmatprep.mubr.bf16.mxu1 %v2927_v6 }
 0x10c   : > { %v1761_v21 = vpop.f32.mrf.mxu0  ;;  %2226 = vmatmul.mubr.bf16.gmra.mxu0 %v2924_v15 }
 0x10d   : > { %v1954_v22 = vpop.f32.mrf.mxu1  ;;  %2419 = vmatmul.mubr.bf16.gmra.mxu1 %v2926_v16  ;;  %v1762_v23 = vadd.f32 %v1761_v21, %v3929_v17  ;;  %2235 = vmatprep.mubr.bf16.mxu0 %v2933_v18  ;;  %v2950_v21 = vcombine.low %v270_v52, %v274_v53 }
 0x10e   : > { %2428 = vmatprep.mubr.bf16.mxu1 %v2935_v19  ;;  %v1763_v25 = vpop.f32.mrf.mxu0  ;;  %v2948_v19 = vcombine.low %v269_v48, %v273_v51  ;;  %v2956_v48 = vcombine.low %v277_v8, %v281_v11 }
 0x10f   : > { %v1956_v26 = vpop.f32.mrf.mxu1  ;;  %v3938_v30 = vadd.f32 %v1954_v22, %v1762_v23  ;;  %v1764_v31 = vadd.f32 %v1763_v25, %v3931_v20  ;;  %v2959_v25 = vcombine.high %v278_v12, %v282_v13 }
 0x110   : > { %v1765_v32 = vpop.f32.mrf.mxu0 }
 0x111   : > { %v1958_v33 = vpop.f32.mrf.mxu1  ;;  %v3941_v36 = vadd.f32 %v1956_v26, %v1764_v31  ;;  %v1766_v37 = vadd.f32 %v1765_v32, %v3929_v17 }
 0x112   : > { %v1767_v40 = vpop.f32.mrf.mxu0 }
 0x113   : > { %v1960_v41 = vpop.f32.mrf.mxu1  ;;  %v3944_v42 = vadd.f32 %v1958_v33, %v1766_v37  ;;  %v1768_v43 = vadd.f32 %v1767_v40, %v3931_v20  ;;  %v286_v40 = vld [vmem:[%s3556_s4 + $0x358] sm:$0xff] }
 0x114   : > { %v1771_v44 = vpop.f32.mrf.mxu0  ;;  %2236 = vmatmul.mubr.bf16.gmra.mxu0 %v2932_v34 }
 0x115   : > { %v1964_v45 = vpop.f32.mrf.mxu1  ;;  %2429 = vmatmul.mubr.bf16.gmra.mxu1 %v2934_v35  ;;  %v3947_v46 = vadd.f32 %v1960_v41, %v1768_v43  ;;  %v1772_v47 = vadd.f32 %v1771_v44, %v3929_v17  ;;  %2245 = vmatprep.mubr.bf16.mxu0 %v2941_v38  ;;  %v285_v35 = vld [vmem:[%s3556_s4 + $0x350] sm:$0xff]  ;;  %v290_v41 = vld [vmem:[%s3556_s4 + $0x378] sm:$0xff] }
 0x116   : > { %2438 = vmatprep.mubr.bf16.mxu1 %v2943_v39  ;;  %v1773_v49 = vpop.f32.mrf.mxu0  ;;  %v289_v39 = vld [vmem:[%s3556_s4 + $0x370] sm:$0xff]  ;;  %v2967_v53 = vcombine.high %v286_v40, %v290_v41 }
 0x117   : > { %v1966_v50 = vpop.f32.mrf.mxu1  ;;  %v3954_v54 = vadd.f32 %v1964_v45, %v1772_v47  ;;  %v1774_v55 = vadd.f32 %v1773_v49, %v3931_v20  ;;  %v2958_v49 = vcombine.low %v278_v12, %v282_v13  ;;  %v2965_v52 = vcombine.high %v285_v35, %v289_v39 }
 0x118   : > { %v1775_v56 = vpop.f32.mrf.mxu0  ;;  %v2964_v12 = vcombine.low %v285_v35, %v289_v39  ;;  %v2966_v13 = vcombine.low %v286_v40, %v290_v41  ;;  %v306_v39 = vld [vmem:[%s3556_s4 + $0x3f8] sm:$0xff] }
 0x119   : > { %v1968_v57 = vpop.f32.mrf.mxu1  ;;  %v3957_v60 = vadd.f32 %v1966_v50, %v1774_v55  ;;  %v1776_v61 = vadd.f32 %v1775_v56, %v3929_v17 }
 0x11a   : > { %v1777_v0 = vpop.f32.mrf.mxu0 }
 0x11b   : > { %v1970_v1 = vpop.f32.mrf.mxu1  ;;  %v3960_v2 = vadd.f32 %v1968_v57, %v1776_v61  ;;  %v1778_v3 = vadd.f32 %v1777_v0, %v3931_v20  ;;  %v293_v0 = vld [vmem:[%s3556_s4 + $0x390] sm:$0xff] }
 0x11c   : > { %v1781_v4 = vpop.f32.mrf.mxu0  ;;  %2246 = vmatmul.mubr.bf16.gmra.mxu0 %v2940_v58 }
 0x11d   : > { %v1974_v5 = vpop.f32.mrf.mxu1  ;;  %2439 = vmatmul.mubr.bf16.gmra.mxu1 %v2942_v59  ;;  %v3963_v6 = vadd.f32 %v1970_v1, %v1778_v3  ;;  %v1782_v7 = vadd.f32 %v1781_v4, %v3929_v17  ;;  %2255 = vmatprep.mubr.bf16.mxu0 %v2949_v62  ;;  %v297_v4 = vld [vmem:[%s3556_s4 + $0x3b0] sm:$0xff] }
 0x11e   : > { %2448 = vmatprep.mubr.bf16.mxu1 %v2951_v63  ;;  %v1783_v9 = vpop.f32.mrf.mxu0 }
 0x11f   : > { %v1976_v10 = vpop.f32.mrf.mxu1  ;;  %v3970_v14 = vadd.f32 %v1974_v5, %v1782_v7  ;;  %v1784_v15 = vadd.f32 %v1783_v9, %v3931_v20  ;;  %v294_v5 = vld [vmem:[%s3556_s4 + $0x398] sm:$0xff] }
 0x120   : > { %v1785_v16 = vpop.f32.mrf.mxu0  ;;  %v298_v7 = vld [vmem:[%s3556_s4 + $0x3b8] sm:$0xff] }
 0x121   : > { %v1978_v18 = vpop.f32.mrf.mxu1  ;;  %v3973_v22 = vadd.f32 %v1976_v10, %v1784_v15  ;;  %v1786_v23 = vadd.f32 %v1785_v16, %v3929_v17 }
 0x122   : > { %v1787_v26 = vpop.f32.mrf.mxu0 }
 0x123   : > { %v1980_v27 = vpop.f32.mrf.mxu1  ;;  %v3976_v28 = vadd.f32 %v1978_v18, %v1786_v23  ;;  %v1788_v29 = vadd.f32 %v1787_v26, %v3931_v20  ;;  %v2973_v18 = vcombine.high %v293_v0, %v297_v4 }
 0x124   : > { %v1791_v31 = vpop.f32.mrf.mxu0  ;;  %2256 = vmatmul.mubr.bf16.gmra.mxu0 %v2948_v19  ;;  %v2975_v19 = vcombine.high %v294_v5, %v298_v7 }
 0x125   : > { %v1984_v32 = vpop.f32.mrf.mxu1  ;;  %2449 = vmatmul.mubr.bf16.gmra.mxu1 %v2950_v21  ;;  %v3979_v33 = vadd.f32 %v1980_v27, %v1788_v29  ;;  %v1792_v34 = vadd.f32 %v1791_v31, %v3929_v17  ;;  %2265 = vmatprep.mubr.bf16.mxu0 %v2957_v24 }
 0x126   : > { %2458 = vmatprep.mubr.bf16.mxu1 %v2959_v25  ;;  %v1793_v37 = vpop.f32.mrf.mxu0 }
 0x127   : > { %v1986_v38 = vpop.f32.mrf.mxu1  ;;  %v3986_v43 = vadd.f32 %v1984_v32, %v1792_v34  ;;  %v1794_v44 = vadd.f32 %v1793_v37, %v3931_v20  ;;  %v301_v32 = vld [vmem:[%s3556_s4 + $0x3d0] sm:$0xff] }
 0x128   : > { %v1795_v45 = vpop.f32.mrf.mxu0  ;;  %v305_v37 = vld [vmem:[%s3556_s4 + $0x3f0] sm:$0xff] }
 0x129   : > { %v1988_v47 = vpop.f32.mrf.mxu1  ;;  %v3989_v50 = vadd.f32 %v1986_v38, %v1794_v44  ;;  %v1796_v51 = vadd.f32 %v1795_v45, %v3929_v17  ;;  %v302_v38 = vld [vmem:[%s3556_s4 + $0x3d8] sm:$0xff]  ;;  %s3147_s4 = sshll.u32 %s4295_s24, 3 }
 0x12a   : > { %v1797_v55 = vpop.f32.mrf.mxu0  ;;  %s4157_s8 = scalar_lea.vmem %s4257_s3, %s3147_s4 }
 0x12b   : > { %v1990_v56 = vpop.f32.mrf.mxu1  ;;  %v3992_v57 = vadd.f32 %v1988_v47, %v1796_v51  ;;  %v1798_v58 = vadd.f32 %v1797_v55, %v3931_v20  ;;  %v2972_v47 = vcombine.low %v293_v0, %v297_v4 }
 0x12c   : > { %v1801_v59 = vpop.f32.mrf.mxu0  ;;  %2266 = vmatmul.mubr.bf16.gmra.mxu0 %v2956_v48  ;;  %v2974_v48 = vcombine.low %v294_v5, %v298_v7 }
 0x12d   : > { %v1994_v61 = vpop.f32.mrf.mxu1  ;;  %2459 = vmatmul.mubr.bf16.gmra.mxu1 %v2958_v49  ;;  %v3995_v62 = vadd.f32 %v1990_v56, %v1798_v58  ;;  %v1802_v63 = vadd.f32 %v1801_v59, %v3929_v17  ;;  %2275 = vmatprep.mubr.bf16.mxu0 %v2965_v52  ;;  %v2981_v52 = vcombine.high %v301_v32, %v305_v37 }
 0x12e   : > { %2468 = vmatprep.mubr.bf16.mxu1 %v2967_v53  ;;  %v1803_v1 = vpop.f32.mrf.mxu0  ;;  %v2983_v53 = vcombine.high %v302_v38, %v306_v39 }
 0x12f   : > { %v1996_v3 = vpop.f32.mrf.mxu1  ;;  %v4002_v8 = vadd.f32 %v1994_v61, %v1802_v63  ;;  %v1804_v9 = vadd.f32 %v1803_v1, %v3931_v20 }
 0x130   : > { %v1805_v10 = vpop.f32.mrf.mxu0 }
 0x131   : > { %v1998_v11 = vpop.f32.mrf.mxu1  ;;  %v4005_v15 = vadd.f32 %v1996_v3, %v1804_v9  ;;  %v1806_v16 = vadd.f32 %v1805_v10, %v3929_v17 }
 0x132   : > { %v1807_v21 = vpop.f32.mrf.mxu0 }
 0x133   : > { %v2000_v23 = vpop.f32.mrf.mxu1  ;;  %v4008_v24 = vadd.f32 %v1998_v11, %v1806_v16  ;;  %v1808_v25 = vadd.f32 %v1807_v21, %v3931_v20  ;;  %v2980_v11 = vcombine.low %v301_v32, %v305_v37 }
 0x134   : > { %v1811_v26 = vpop.f32.mrf.mxu0  ;;  %2276 = vmatmul.mubr.bf16.gmra.mxu0 %v2964_v12  ;;  %v2982_v12 = vcombine.low %v302_v38, %v306_v39 }
 0x135   : > { %v2004_v27 = vpop.f32.mrf.mxu1  ;;  %2469 = vmatmul.mubr.bf16.gmra.mxu1 %v2966_v13  ;;  %v4011_v29 = vadd.f32 %v2000_v23, %v1808_v25  ;;  %v1812_v31 = vadd.f32 %v1811_v26, %v3929_v17  ;;  %2285 = vmatprep.mubr.bf16.mxu0 %v2973_v18 }
 0x136   : > { %2478 = vmatprep.mubr.bf16.mxu1 %v2975_v19  ;;  %v1813_v34 = vpop.f32.mrf.mxu0 }
 0x137   : > { %v2006_v35 = vpop.f32.mrf.mxu1  ;;  %v4018_v40 = vadd.f32 %v2004_v27, %v1812_v31  ;;  %v1814_v41 = vadd.f32 %v1813_v34, %v3931_v20 }
 0x138   : > { %v1815_v44 = vpop.f32.mrf.mxu0 }
 0x139   : > { %v2008_v45 = vpop.f32.mrf.mxu1  ;;  %v4021_v49 = vadd.f32 %v2006_v35, %v1814_v41  ;;  %v1816_v51 = vadd.f32 %v1815_v44, %v3929_v17 }
 0x13a   : > { %v1817_v55 = vpop.f32.mrf.mxu0 }
 0x13b   : > { %v2010_v56 = vpop.f32.mrf.mxu1  ;;  %v4024_v58 = vadd.f32 %v2008_v45, %v1816_v51  ;;  %v1818_v59 = vadd.f32 %v1817_v55, %v3931_v20 }
 0x13c   : > { %v1821_v61 = vpop.f32.mrf.mxu0  ;;  %2286 = vmatmul.mubr.bf16.gmra.mxu0 %v2972_v47 }
 0x13d   : > { %v2014_v63 = vpop.f32.mrf.mxu1  ;;  %2479 = vmatmul.mubr.bf16.gmra.mxu1 %v2974_v48  ;;  %v4027_v1 = vadd.f32 %v2010_v56, %v1818_v59  ;;  %v1822_v0 = vadd.f32 %v1821_v61, %v3929_v17  ;;  %2295 = vmatprep.mubr.bf16.mxu0 %v2981_v52 }
 0x13e   : > { %2488 = vmatprep.mubr.bf16.mxu1 %v2983_v53  ;;  %v1823_v3 = vpop.f32.mrf.mxu0 }
 0x13f   : > { %v2016_v4 = vpop.f32.mrf.mxu1  ;;  %v4030_v5 = vadd.f32 %v2014_v63, %v1822_v0  ;;  %v1824_v7 = vadd.f32 %v1823_v3, %v3931_v20 }
 0x140   : > { %v1825_v9 = vpop.f32.mrf.mxu0 }
 0x141   : > { %v2018_v10 = vpop.f32.mrf.mxu1  ;;  %v4033_v13 = vadd.f32 %v2016_v4, %v1824_v7  ;;  %v1826_v16 = vadd.f32 %v1825_v9, %v3929_v17 }
 0x142   : > { %v1827_v18 = vpop.f32.mrf.mxu0 }
 0x143   : > { %v2020_v19 = vpop.f32.mrf.mxu1  ;;  %v4036_v21 = vadd.f32 %v2018_v10, %v1826_v16  ;;  %v1828_v23 = vadd.f32 %v1827_v18, %v3931_v20 }
 0x144   : > { %v1831_v25 = vpop.f32.mrf.mxu0  ;;  %2296 = vmatmul.mubr.bf16.gmra.mxu0 %v2980_v11 }
 0x145   : > { %v2024_v26 = vpop.f32.mrf.mxu1  ;;  %2489 = vmatmul.mubr.bf16.gmra.mxu1 %v2982_v12  ;;  %v4039_v27 = vadd.f32 %v2020_v19, %v1828_v23  ;;  %v1832_v31 = vadd.f32 %v1831_v25, %v3929_v17 }
 0x146   : > { %v1833_v32 = vpop.f32.mrf.mxu0 }
 0x147   : > { %v2026_v34 = vpop.f32.mrf.mxu1  ;;  %v4042_v35 = vadd.f32 %v2024_v26, %v1832_v31  ;;  %v1834_v37 = vadd.f32 %v1833_v32, %v3931_v20 }
 0x148   : > { %v1835_v38 = vpop.f32.mrf.mxu0 }
 0x149   : > { %v2028_v39 = vpop.f32.mrf.mxu1  ;;  %v4045_v41 = vadd.f32 %v2026_v34, %v1834_v37  ;;  %v1836_v44 = vadd.f32 %v1835_v38, %v3929_v17 }
 0x14a   : > { %v1837_v45 = vpop.f32.mrf.mxu0 }
 0x14b   : > { %v2030_v47 = vpop.f32.mrf.mxu1  ;;  %v4048_v48 = vadd.f32 %v2028_v39, %v1836_v44  ;;  %v1838_v51 = vadd.f32 %v1837_v45, %v3931_v20 }
 0x14c   : > { %v1841_v52 = vpop.f32.mrf.mxu0 }
 0x14d   : > { %v2034_v53 = vpop.f32.mrf.mxu1  ;;  %v4051_v55 = vadd.f32 %v2030_v47, %v1838_v51  ;;  %v1842_v56 = vadd.f32 %v1841_v52, %v3929_v17 }
 0x14e   : > { %v1843_v59 = vpop.f32.mrf.mxu0 }
 0x14f   : > { %v2036_v61 = vpop.f32.mrf.mxu1  ;;  %v4054_v63 = vadd.f32 %v2034_v53, %v1842_v56  ;;  %v1844_v0 = vadd.f32 %v1843_v59, %v3931_v20 }
 0x150   : > { %v1845_v3 = vpop.f32.mrf.mxu0 }
 0x151   : > { %v2038_v4 = vpop.f32.mrf.mxu1  ;;  %v4057_v7 = vadd.f32 %v2036_v61, %v1844_v0  ;;  %v1846_v9 = vadd.f32 %v1845_v3, %v3929_v17 }
 0x152   : > { %v1847_v10 = vpop.f32.mrf.mxu0 }
 0x153   : > { %v2040_v11 = vpop.f32.mrf.mxu1  ;;  %v4060_v12 = vadd.f32 %v2038_v4, %v1846_v9  ;;  %v1848_v16 = vadd.f32 %v1847_v10, %v3931_v20 }
 0x154   : > { %v1851_v18 = vpop.f32.mrf.mxu0 }
 0x155   : > { %v2044_v19 = vpop.f32.mrf.mxu1  ;;  %v4063_v23 = vadd.f32 %v2040_v11, %v1848_v16  ;;  %v1852_v25 = vadd.f32 %v1851_v18, %v3929_v17 }
 0x156   : > { %v1853_v26 = vpop.f32.mrf.mxu0 }
 0x157   : > { %v2046_v31 = vpop.f32.mrf.mxu1  ;;  %v4066_v32 = vadd.f32 %v2044_v19, %v1852_v25  ;;  %v1854_v34 = vadd.f32 %v1853_v26, %v3931_v20 }
 0x158   : > { %v1855_v37 = vpop.f32.mrf.mxu0 }
 0x159   : > { %v2048_v38 = vpop.f32.mrf.mxu1  ;;  %v4069_v39 = vadd.f32 %v2046_v31, %v1854_v34  ;;  %v1856_v44 = vadd.f32 %v1855_v37, %v3929_v17 }
 0x15a   : > { %v1857_v45 = vpop.f32.mrf.mxu0 }
 0x15b   : > { %v2050_v47 = vpop.f32.mrf.mxu1  ;;  %v4072_v51 = vadd.f32 %v2048_v38, %v1856_v44  ;;  %v1858_v52 = vadd.f32 %v1857_v45, %v3931_v20 }
 0x15c   : > { %v1861_v53 = vpop.f32.mrf.mxu0 }
 0x15d   : > { %v2054_v56 = vpop.f32.mrf.mxu1  ;;  %v4075_v59 = vadd.f32 %v2050_v47, %v1858_v52  ;;  %v1862_v61 = vadd.f32 %v1861_v53, %v3929_v17 }
 0x15e   : > { %v1863_v0 = vpop.f32.mrf.mxu0 }
 0x15f   : > { %v2056_v3 = vpop.f32.mrf.mxu1  ;;  %v4078_v4 = vadd.f32 %v2054_v56, %v1862_v61  ;;  %v1864_v9 = vadd.f32 %v1863_v0, %v3931_v20 }
 0x160   : > { %v1865_v10 = vpop.f32.mrf.mxu0 }
 0x161   : > { %v2058_v11 = vpop.f32.mrf.mxu1  ;;  %v4081_v16 = vadd.f32 %v2056_v3, %v1864_v9  ;;  %v1866_v18 = vadd.f32 %v1865_v10, %v3929_v17 }
 0x162   : > { %v1867_v19 = vpop.f32.mrf.mxu0 }
 0x163   : > { %v2060_v25 = vpop.f32.mrf.mxu1  ;;  %v4084_v26 = vadd.f32 %v2058_v11, %v1866_v18  ;;  %v1868_v31 = vadd.f32 %v1867_v19, %v3931_v20 }
 0x164   : > { %v1871_v34 = vpop.f32.mrf.mxu0 }
 0x165   : > { %v2064_v37 = vpop.f32.mrf.mxu1  ;;  %v4087_v38 = vadd.f32 %v2060_v25, %v1868_v31  ;;  %v1872_v44 = vadd.f32 %v1871_v34, %v3929_v17 }
 0x166   : > { %v1873_v45 = vpop.f32.mrf.mxu0 }
 0x167   : > { %v2066_v47 = vpop.f32.mrf.mxu1  ;;  %v4090_v52 = vadd.f32 %v2064_v37, %v1872_v44  ;;  %v1874_v53 = vadd.f32 %v1873_v45, %v3931_v20 }
 0x168   : > { %v1875_v56 = vpop.f32.mrf.mxu0 }
 0x169   : > { %v2068_v61 = vpop.f32.mrf.mxu1  ;;  %v4093_v0 = vadd.f32 %v2066_v47, %v1874_v53  ;;  %v1876_v3 = vadd.f32 %v1875_v56, %v3929_v17 }
 0x16a   : > { %v1877_v9 = vpop.f32.mrf.mxu0 }
 0x16b   : > { %4258 = vst [vmem:[#allocation2_spill] sm:$0xff] %v4093_v0  ;;  %v2070_v10 = vpop.f32.mrf.mxu1  ;;  %v4096_v11 = vadd.f32 %v2068_v61, %v1876_v3  ;;  %v1878_v18 = vadd.f32 %v1877_v9, %v3931_v20 }
 0x16c   : > { %v1881_v19 = vpop.f32.mrf.mxu0 }
 0x16d   : > { %4259 = vst [vmem:[#allocation3_spill] sm:$0xff] %v4096_v11  ;;  %v2074_v25 = vpop.f32.mrf.mxu1  ;;  %v4099_v31 = vadd.f32 %v2070_v10, %v1878_v18  ;;  %v1882_v34 = vadd.f32 %v1881_v19, %v3929_v17 }
 0x16e   : > { %v1883_v37 = vpop.f32.mrf.mxu0 }
 0x16f   : > { %4260 = vst [vmem:[#allocation4_spill] sm:$0xff] %v4099_v31  ;;  %v2076_v44 = vpop.f32.mrf.mxu1  ;;  %v4102_v45 = vadd.f32 %v2074_v25, %v1882_v34  ;;  %v1884_v47 = vadd.f32 %v1883_v37, %v3931_v20 }
 0x170   : > { %v1885_v53 = vpop.f32.mrf.mxu0 }
 0x171   : > { %4261 = vst [vmem:[#allocation5_spill] sm:$0xff] %v4102_v45  ;;  %v2078_v56 = vpop.f32.mrf.mxu1  ;;  %v4105_v0 = vadd.f32 %v2076_v44, %v1884_v47  ;;  %v1886_v61 = vadd.f32 %v1885_v53, %v3929_v17 }
 0x172   : > { %v1887_v3 = vpop.f32.mrf.mxu0 }
 0x173   : > { %4262 = vst [vmem:[#allocation6_spill] sm:$0xff] %v4105_v0  ;;  %v2080_v9 = vpop.f32.mrf.mxu1  ;;  %v4108_v11 = vadd.f32 %v2078_v56, %v1886_v61  ;;  %v1888_v10 = vadd.f32 %v1887_v3, %v3931_v20 }
 0x174   : > { %v1891_v18 = vpop.f32.mrf.mxu0 }
 0x175   : > { %4263 = vst [vmem:[#allocation7_spill] sm:$0xff] %v4108_v11  ;;  %v2084_v19 = vpop.f32.mrf.mxu1  ;;  %v4111_v31 = vadd.f32 %v2080_v9, %v1888_v10  ;;  %v1892_v25 = vadd.f32 %v1891_v18, %v3929_v17 }
 0x176   : > { %v1893_v34 = vpop.f32.mrf.mxu0 }
 0x177   : > { %4264 = vst [vmem:[#allocation8_spill] sm:$0xff] %v4111_v31  ;;  %v2086_v37 = vpop.f32.mrf.mxu1  ;;  %v4114_v45 = vadd.f32 %v2084_v19, %v1892_v25  ;;  %v1894_v44 = vadd.f32 %v1893_v34, %v3931_v20 }
 0x178   : > { %v1895_v47 = vpop.f32.mrf.mxu0 }
 0x179   : > { %4265 = vst [vmem:[#allocation9_spill] sm:$0xff] %v4114_v45  ;;  %v2088_v53 = vpop.f32.mrf.mxu1  ;;  %v4117_v0 = vadd.f32 %v2086_v37, %v1894_v44  ;;  %v1896_v56 = vadd.f32 %v1895_v47, %v3929_v17 }
 0x17a   : > { %v1897_v61 = vpop.f32.mrf.mxu0 }
 0x17b   : > { %4266 = vst [vmem:[#allocation10_spill] sm:$0xff] %v4117_v0  ;;  %v2090_v3 = vpop.f32.mrf.mxu1  ;;  %v4120_v11 = vadd.f32 %v2088_v53, %v1896_v56  ;;  %v1898_v9 = vadd.f32 %v1897_v61, %v3931_v20 }
 0x17c   : > { %v1901_v10 = vpop.f32.mrf.mxu0 }
 0x17d   : > { %4267 = vst [vmem:[#allocation11_spill] sm:$0xff] %v4120_v11  ;;  %v2094_v18 = vpop.f32.mrf.mxu1  ;;  %v4123_v31 = vadd.f32 %v2090_v3, %v1898_v9  ;;  %v1902_v19 = vadd.f32 %v1901_v10, %v3929_v17 }
 0x17e   : > { %v1903_v25 = vpop.f32.mrf.mxu0 }
 0x17f   : > { %4268 = vst [vmem:[#allocation12_spill] sm:$0xff] %v4123_v31  ;;  %v2096_v34 = vpop.f32.mrf.mxu1  ;;  %v4126_v45 = vadd.f32 %v2094_v18, %v1902_v19  ;;  %v1904_v37 = vadd.f32 %v1903_v25, %v3931_v20 }
 0x180   : > { %v1905_v44 = vpop.f32.mrf.mxu0 }
 0x181   : > { %4269 = vst [vmem:[#allocation13_spill] sm:$0xff] %v4126_v45  ;;  %v2098_v47 = vpop.f32.mrf.mxu1  ;;  %v4129_v0 = vadd.f32 %v2096_v34, %v1904_v37  ;;  %v1906_v53 = vadd.f32 %v1905_v44, %v3929_v17 }
 0x182   : > { %v1907_v56 = vpop.f32.mrf.mxu0 }
 0x183   : > { %4270 = vst [vmem:[#allocation14_spill] sm:$0xff] %v4129_v0  ;;  %v2100_v61 = vpop.f32.mrf.mxu1  ;;  %v4132_v11 = vadd.f32 %v2098_v47, %v1906_v53  ;;  %v1908_v3 = vadd.f32 %v1907_v56, %v3931_v20 }
 0x184   : > { %v1911_v9 = vpop.f32.mrf.mxu0 }
 0x185   : > { %4271 = vst [vmem:[#allocation15_spill] sm:$0xff] %v4132_v11  ;;  %v2104_v10 = vpop.f32.mrf.mxu1  ;;  %v4135_v31 = vadd.f32 %v2100_v61, %v1908_v3  ;;  %v1912_v18 = vadd.f32 %v1911_v9, %v3929_v17 }
 0x186   : > { %v1913_v19 = vpop.f32.mrf.mxu0 }
 0x187   : > { %4272 = vst [vmem:[#allocation16_spill] sm:$0xff] %v4135_v31  ;;  %v2106_v25 = vpop.f32.mrf.mxu1  ;;  %v4138_v45 = vadd.f32 %v2104_v10, %v1912_v18  ;;  %v1914_v34 = vadd.f32 %v1913_v19, %v3931_v20 }
 0x188   : > { %v1915_v37 = vpop.f32.mrf.mxu0 }
 0x189   : > { %4273 = vst [vmem:[#allocation17_spill] sm:$0xff] %v4138_v45  ;;  %v2108_v44 = vpop.f32.mrf.mxu1  ;;  %v4141_v0 = vadd.f32 %v2106_v25, %v1914_v34  ;;  %v1916_v47 = vadd.f32 %v1915_v37, %v3929_v17 }
 0x18a   : > { %v1917_v53 = vpop.f32.mrf.mxu0 }
 0x18b   : > { %4274 = vst [vmem:[#allocation18_spill] sm:$0xff] %v4141_v0  ;;  %v2110_v56 = vpop.f32.mrf.mxu1  ;;  %v4144_v11 = vadd.f32 %v2108_v44, %v1916_v47  ;;  %v1918_v61 = vadd.f32 %v1917_v53, %v3931_v20 }
 0x18c   : > { %v2147_v3 = vpop.f32.mrf.mxu0 }
 0x18d   : > { %4275 = vst [vmem:[#allocation19_spill] sm:$0xff] %v4144_v11  ;;  %v2340_v9 = vpop.f32.mrf.mxu1  ;;  %v4147_v31 = vadd.f32 %v2110_v56, %v1918_v61  ;;  %v2148_v10 = vadd.f32 %v2147_v3, %v3938_v30 }
 0x18e   : > { %v2149_v18 = vpop.f32.mrf.mxu0 }
 0x18f   : > { %v2342_v19 = vpop.f32.mrf.mxu1  ;;  %v2341_v45 = vadd.f32 %v2340_v9, %v2148_v10  ;;  %v2150_v25 = vadd.f32 %v2149_v18, %v3941_v36 }
 0x190   : > { %v2151_v34 = vpop.f32.mrf.mxu0 }
 0x191   : > { %v2344_v0 = vpop.f32.mrf.mxu1  ;;  %v2343_v17 = vadd.f32 %v2342_v19, %v2150_v25  ;;  %v2152_v37 = vadd.f32 %v2151_v34, %v3944_v42  ;;  %v2499_v20 = vmax.f32 %v2341_v45, 0.0 }
 0x192   : > { %v2153_v44 = vpop.f32.mrf.mxu0 }
 0x193   : > { %v2346_v47 = vpop.f32.mrf.mxu1  ;;  %v2500_v53 = vmax.f32 %v2343_v17, 0.0  ;;  %v2345_v11 = vadd.f32 %v2344_v0, %v2152_v37  ;;  %v2154_v56 = vadd.f32 %v2153_v44, %v3947_v46 }
 0x194   : > { %v2157_v30 = vpop.f32.mrf.mxu0 }
 0x195   : > { %v2350_v36 = vpop.f32.mrf.mxu1  ;;  %v3148_v61 = vpack.c.bf16 %v2500_v53, %v2499_v20  ;;  %v2347_v3 = vadd.f32 %v2346_v47, %v2154_v56  ;;  %v2158_v42 = vadd.f32 %v2157_v30, %v3954_v54  ;;  %v2501_v45 = vmax.f32 %v2345_v11, 0.0 }
 0x196   : > { %v2159_v9 = vpop.f32.mrf.mxu0 }
 0x197   : > { %v2352_v10 = vpop.f32.mrf.mxu1  ;;  %2755 = vst [vmem:[%s4157_s8] sm:$0xff] %v3148_v61  ;;  %v2502_v0 = vmax.f32 %v2347_v3, 0.0  ;;  %v2351_v18 = vadd.f32 %v2350_v36, %v2158_v42  ;;  %v2160_v46 = vadd.f32 %v2159_v9, %v3957_v60 }
 0x198   : > { %v2161_v19 = vpop.f32.mrf.mxu0 }
 0x199   : > { %v2354_v25 = vpop.f32.mrf.mxu1  ;;  %v3149_v34 = vpack.c.bf16 %v2502_v0, %v2501_v45  ;;  %v2353_v17 = vadd.f32 %v2352_v10, %v2160_v46  ;;  %v2162_v37 = vadd.f32 %v2161_v19, %v3960_v2  ;;  %v2503_v20 = vmax.f32 %v2351_v18, 0.0 }
 0x19a   : > { %v2163_v44 = vpop.f32.mrf.mxu0 }
 0x19b   : > { %v2356_v47 = vpop.f32.mrf.mxu1  ;;  %2756 = vst [vmem:[%s4157_s8 + $0x8] sm:$0xff] %v3149_v34  ;;  %v2504_v54 = vmax.f32 %v2353_v17, 0.0  ;;  %v2355_v53 = vadd.f32 %v2354_v25, %v2162_v37  ;;  %v2164_v56 = vadd.f32 %v2163_v44, %v3963_v6 }
 0x19c   : > { %v2167_v11 = vpop.f32.mrf.mxu0 }
 0x19d   : > { %v2360_v30 = vpop.f32.mrf.mxu1  ;;  %v3150_v36 = vpack.c.bf16 %v2504_v54, %v2503_v20  ;;  %v2357_v61 = vadd.f32 %v2356_v47, %v2164_v56  ;;  %v2168_v60 = vadd.f32 %v2167_v11, %v3970_v14  ;;  %v2505_v9 = vmax.f32 %v2355_v53, 0.0 }
 0x19e   : > { %v2169_v3 = vpop.f32.mrf.mxu0 }
 0x19f   : > { %v2362_v42 = vpop.f32.mrf.mxu1  ;;  %2757 = vst [vmem:[%s4157_s8 + $0x10] sm:$0xff] %v3150_v36  ;;  %v2506_v2 = vmax.f32 %v2357_v61, 0.0  ;;  %v2361_v10 = vadd.f32 %v2360_v30, %v2168_v60  ;;  %v2170_v45 = vadd.f32 %v2169_v3, %v3973_v22 }
 0x1a0   : > { %v2171_v0 = vpop.f32.mrf.mxu0 }
 0x1a1   : > { %v2364_v18 = vpop.f32.mrf.mxu1  ;;  %v3151_v46 = vpack.c.bf16 %v2506_v2, %v2505_v9  ;;  %v2363_v19 = vadd.f32 %v2362_v42, %v2170_v45  ;;  %v2172_v6 = vadd.f32 %v2171_v0, %v3976_v28  ;;  %v2507_v17 = vmax.f32 %v2361_v10, 0.0 }
 0x1a2   : > { %v2173_v25 = vpop.f32.mrf.mxu0 }
 0x1a3   : > { %v2366_v34 = vpop.f32.mrf.mxu1  ;;  %2758 = vst [vmem:[%s4157_s8 + $0x18] sm:$0xff] %v3151_v46  ;;  %v2508_v14 = vmax.f32 %v2363_v19, 0.0  ;;  %v2365_v37 = vadd.f32 %v2364_v18, %v2172_v6  ;;  %v2174_v44 = vadd.f32 %v2173_v25, %v3979_v33 }
 0x1a4   : > { %v2177_v47 = vpop.f32.mrf.mxu0 }
 0x1a5   : > { %v2370_v20 = vpop.f32.mrf.mxu1  ;;  %v3152_v54 = vpack.c.bf16 %v2508_v14, %v2507_v17  ;;  %v2367_v53 = vadd.f32 %v2366_v34, %v2174_v44  ;;  %v2178_v22 = vadd.f32 %v2177_v47, %v3986_v43  ;;  %v2509_v30 = vmax.f32 %v2365_v37, 0.0 }
 0x1a6   : > { %v2179_v56 = vpop.f32.mrf.mxu0 }
 0x1a7   : > { %v2372_v11 = vpop.f32.mrf.mxu1  ;;  %2759 = vst [vmem:[%s4157_s8 + $0x20] sm:$0xff] %v3152_v54  ;;  %v2510_v28 = vmax.f32 %v2367_v53, 0.0  ;;  %v2371_v36 = vadd.f32 %v2370_v20, %v2178_v22  ;;  %v2180_v61 = vadd.f32 %v2179_v56, %v3989_v50 }
 0x1a8   : > { %v2181_v60 = vpop.f32.mrf.mxu0 }
 0x1a9   : > { %v2374_v3 = vpop.f32.mrf.mxu1  ;;  %v3153_v42 = vpack.c.bf16 %v2510_v28, %v2509_v30  ;;  %v2373_v9 = vadd.f32 %v2372_v11, %v2180_v61  ;;  %v2182_v33 = vadd.f32 %v2181_v60, %v3992_v57  ;;  %v2511_v45 = vmax.f32 %v2371_v36, 0.0 }
 0x1aa   : > { %v2183_v2 = vpop.f32.mrf.mxu0 }
 0x1ab   : > { %v2376_v10 = vpop.f32.mrf.mxu1  ;;  %2760 = vst [vmem:[%s4157_s8 + $0x28] sm:$0xff] %v3153_v42  ;;  %v2512_v43 = vmax.f32 %v2373_v9, 0.0  ;;  %v2375_v0 = vadd.f32 %v2374_v3, %v2182_v33  ;;  %v2184_v18 = vadd.f32 %v2183_v2, %v3995_v62 }
 0x1ac   : > { %v2187_v46 = vpop.f32.mrf.mxu0 }
 0x1ad   : > { %v2380_v19 = vpop.f32.mrf.mxu1  ;;  %v3154_v6 = vpack.c.bf16 %v2512_v43, %v2511_v45  ;;  %v2377_v25 = vadd.f32 %v2376_v10, %v2184_v18  ;;  %v2188_v50 = vadd.f32 %v2187_v46, %v4002_v8  ;;  %v2513_v14 = vmax.f32 %v2375_v0, 0.0 }
 0x1ae   : > { %v2189_v34 = vpop.f32.mrf.mxu0 }
 0x1af   : > { %v2382_v17 = vpop.f32.mrf.mxu1  ;;  %2761 = vst [vmem:[%s4157_s8 + $0x30] sm:$0xff] %v3154_v6  ;;  %v2514_v57 = vmax.f32 %v2377_v25, 0.0  ;;  %v2381_v37 = vadd.f32 %v2380_v19, %v2188_v50  ;;  %v2190_v44 = vadd.f32 %v2189_v34, %v4005_v15 }
 0x1b0   : > { %v2191_v47 = vpop.f32.mrf.mxu0 }
 0x1b1   : > { %v2384_v20 = vpop.f32.mrf.mxu1  ;;  %v3155_v54 = vpack.c.bf16 %v2514_v57, %v2513_v14  ;;  %v2383_v53 = vadd.f32 %v2382_v17, %v2190_v44  ;;  %v2192_v62 = vadd.f32 %v2191_v47, %v4008_v24  ;;  %v2515_v11 = vmax.f32 %v2381_v37, 0.0 }
 0x1b2   : > { %v2193_v22 = vpop.f32.mrf.mxu0 }
 0x1b3   : > { %v2386_v56 = vpop.f32.mrf.mxu1  ;;  %2762 = vst [vmem:[%s4157_s8 + $0x38] sm:$0xff] %v3155_v54  ;;  %v2516_v8 = vmax.f32 %v2383_v53, 0.0  ;;  %v2385_v30 = vadd.f32 %v2384_v20, %v2192_v62  ;;  %v2194_v28 = vadd.f32 %v2193_v22, %v4011_v29 }
 0x1b4   : > { %v2197_v36 = vpop.f32.mrf.mxu0 }
 0x1b5   : > { %v2390_v61 = vpop.f32.mrf.mxu1  ;;  %v3156_v60 = vpack.c.bf16 %v2516_v8, %v2515_v11  ;;  %v2387_v3 = vadd.f32 %v2386_v56, %v2194_v28  ;;  %v2198_v15 = vadd.f32 %v2197_v36, %v4018_v40  ;;  %v2517_v33 = vmax.f32 %v2385_v30, 0.0 }
 0x1b6   : > { %v2199_v42 = vpop.f32.mrf.mxu0 }
 0x1b7   : > { %v2392_v9 = vpop.f32.mrf.mxu1  ;;  %2763 = vst [vmem:[%s4157_s8 + $0x40] sm:$0xff] %v3156_v60  ;;  %v2518_v24 = vmax.f32 %v2387_v3, 0.0  ;;  %v2391_v2 = vadd.f32 %v2390_v61, %v2198_v15  ;;  %v2200_v10 = vadd.f32 %v2199_v42, %v4021_v49 }
 0x1b8   : > { %v2201_v45 = vpop.f32.mrf.mxu0 }
 0x1b9   : > { %v2394_v43 = vpop.f32.mrf.mxu1  ;;  %v3157_v0 = vpack.c.bf16 %v2518_v24, %v2517_v33  ;;  %v2393_v18 = vadd.f32 %v2392_v9, %v2200_v10  ;;  %v2202_v29 = vadd.f32 %v2201_v45, %v4024_v58  ;;  %v2519_v6 = vmax.f32 %v2391_v2, 0.0 }
 0x1ba   : > { %v2203_v46 = vpop.f32.mrf.mxu0 }
 0x1bb   : > { %v2396_v19 = vpop.f32.mrf.mxu1  ;;  %2764 = vst [vmem:[%s4157_s8 + $0x48] sm:$0xff] %v3157_v0  ;;  %v2520_v40 = vmax.f32 %v2393_v18, 0.0  ;;  %v2395_v25 = vadd.f32 %v2394_v43, %v2202_v29  ;;  %v2204_v50 = vadd.f32 %v2203_v46, %v4027_v1 }
 0x1bc   : > { %v2207_v34 = vpop.f32.mrf.mxu0 }
 0x1bd   : > { %v2400_v17 = vpop.f32.mrf.mxu1  ;;  %v3158_v14 = vpack.c.bf16 %v2520_v40, %v2519_v6  ;;  %v2397_v57 = vadd.f32 %v2396_v19, %v2204_v50  ;;  %v2208_v49 = vadd.f32 %v2207_v34, %v4030_v5  ;;  %v2521_v47 = vmax.f32 %v2395_v25, 0.0 }
 0x1be   : > { %v2209_v37 = vpop.f32.mrf.mxu0 }
 0x1bf   : > { %v2402_v44 = vpop.f32.mrf.mxu1  ;;  %2765 = vst [vmem:[%s4157_s8 + $0x50] sm:$0xff] %v3158_v14  ;;  %v2522_v58 = vmax.f32 %v2397_v57, 0.0  ;;  %v2401_v20 = vadd.f32 %v2400_v17, %v2208_v49  ;;  %v2210_v54 = vadd.f32 %v2209_v37, %v4033_v13 }
 0x1c0   : > { %v2211_v53 = vpop.f32.mrf.mxu0 }
 0x1c1   : > { %v2404_v62 = vpop.f32.mrf.mxu1  ;;  %v3159_v22 = vpack.c.bf16 %v2522_v58, %v2521_v47  ;;  %v2403_v56 = vadd.f32 %v2402_v44, %v2210_v54  ;;  %v2212_v1 = vadd.f32 %v2211_v53, %v4036_v21  ;;  %v2523_v30 = vmax.f32 %v2401_v20, 0.0 }
 0x1c2   : > { %v2213_v11 = vpop.f32.mrf.mxu0 }
 0x1c3   : > { %v2406_v8 = vpop.f32.mrf.mxu1  ;;  %2766 = vst [vmem:[%s4157_s8 + $0x58] sm:$0xff] %v3159_v22  ;;  %v2524_v5 = vmax.f32 %v2403_v56, 0.0  ;;  %v2405_v28 = vadd.f32 %v2404_v62, %v2212_v1  ;;  %v2214_v36 = vadd.f32 %v2213_v11, %v4039_v27 }
 0x1c4   : > { %v2217_v61 = vpop.f32.mrf.mxu0 }
 0x1c5   : > { %v2410_v60 = vpop.f32.mrf.mxu1  ;;  %v3160_v3 = vpack.c.bf16 %v2524_v5, %v2523_v30  ;;  %v2407_v15 = vadd.f32 %v2406_v8, %v2214_v36  ;;  %v2218_v13 = vadd.f32 %v2217_v61, %v4042_v35  ;;  %v2525_v33 = vmax.f32 %v2405_v28, 0.0 }
 0x1c6   : > { %v2219_v42 = vpop.f32.mrf.mxu0 }
 0x1c7   : > { %v2412_v9 = vpop.f32.mrf.mxu1  ;;  %2767 = vst [vmem:[%s4157_s8 + $0x60] sm:$0xff] %v3160_v3  ;;  %v2526_v21 = vmax.f32 %v2407_v15, 0.0  ;;  %v2411_v24 = vadd.f32 %v2410_v60, %v2218_v13  ;;  %v2220_v2 = vadd.f32 %v2219_v42, %v4045_v41 }
 0x1c8   : > { %v2221_v10 = vpop.f32.mrf.mxu0 }
 0x1c9   : > { %v2414_v45 = vpop.f32.mrf.mxu1  ;;  %v3161_v43 = vpack.c.bf16 %v2526_v21, %v2525_v33  ;;  %v2413_v0 = vadd.f32 %v2412_v9, %v2220_v2  ;;  %v2222_v27 = vadd.f32 %v2221_v10, %v4048_v48  ;;  %v2527_v46 = vmax.f32 %v2411_v24, 0.0 }
 0x1ca   : > { %v2223_v18 = vpop.f32.mrf.mxu0 }
 0x1cb   : > { %v2416_v29 = vpop.f32.mrf.mxu1  ;;  %2768 = vst [vmem:[%s4157_s8 + $0x68] sm:$0xff] %v3161_v43  ;;  %v2528_v35 = vmax.f32 %v2413_v0, 0.0  ;;  %v2415_v19 = vadd.f32 %v2414_v45, %v2222_v27  ;;  %v2224_v6 = vadd.f32 %v2223_v18, %v4051_v55 }
 0x1cc   : > { %v2227_v40 = vpop.f32.mrf.mxu0 }
 0x1cd   : > { %v2420_v25 = vpop.f32.mrf.mxu1  ;;  %v3162_v50 = vpack.c.bf16 %v2528_v35, %v2527_v46  ;;  %v2417_v34 = vadd.f32 %v2416_v29, %v2224_v6  ;;  %v2228_v41 = vadd.f32 %v2227_v40, %v4054_v63  ;;  %v2529_v57 = vmax.f32 %v2415_v19, 0.0 }
 0x1ce   : > { %v2229_v17 = vpop.f32.mrf.mxu0 }
 0x1cf   : > { %v2422_v14 = vpop.f32.mrf.mxu1  ;;  %2769 = vst [vmem:[%s4157_s8 + $0x70] sm:$0xff] %v3162_v50  ;;  %v2530_v48 = vmax.f32 %v2417_v34, 0.0  ;;  %v2421_v49 = vadd.f32 %v2420_v25, %v2228_v41  ;;  %v2230_v37 = vadd.f32 %v2229_v17, %v4057_v7 }
 0x1d0   : > { %v2231_v44 = vpop.f32.mrf.mxu0 }
 0x1d1   : > { %v2424_v47 = vpop.f32.mrf.mxu1  ;;  %v3163_v58 = vpack.c.bf16 %v2530_v48, %v2529_v57  ;;  %v2423_v20 = vadd.f32 %v2422_v14, %v2230_v37  ;;  %v2232_v55 = vadd.f32 %v2231_v44, %v4060_v12  ;;  %v2531_v62 = vmax.f32 %v2421_v49, 0.0 }
 0x1d2   : > { %v2233_v54 = vpop.f32.mrf.mxu0 }
 0x1d3   : > { %v2426_v53 = vpop.f32.mrf.mxu1  ;;  %2770 = vst [vmem:[%s4157_s8 + $0x78] sm:$0xff] %v3163_v58  ;;  %v2532_v63 = vmax.f32 %v2423_v20, 0.0  ;;  %v2425_v22 = vadd.f32 %v2424_v47, %v2232_v55  ;;  %v2234_v56 = vadd.f32 %v2233_v54, %v4063_v23  ;;  %v4276_v55 = vld [vmem:[#allocation2_spill] sm:$0xff] }
 0x1d4   : > { %v2237_v1 = vpop.f32.mrf.mxu0 }
 0x1d5   : > { %v2430_v11 = vpop.f32.mrf.mxu1  ;;  %v3164_v8 = vpack.c.bf16 %v2532_v63, %v2531_v62  ;;  %v2427_v30 = vadd.f32 %v2426_v53, %v2234_v56  ;;  %v2238_v7 = vadd.f32 %v2237_v1, %v4066_v32  ;;  %v2533_v36 = vmax.f32 %v2425_v22, 0.0 }
 0x1d6   : > { %v2239_v5 = vpop.f32.mrf.mxu0 }
 0x1d7   : > { %v2432_v28 = vpop.f32.mrf.mxu1  ;;  %2771 = vst [vmem:[%s4157_s8 + $0x80] sm:$0xff] %v3164_v8  ;;  %v2534_v12 = vmax.f32 %v2427_v30, 0.0  ;;  %v2431_v61 = vadd.f32 %v2430_v11, %v2238_v7  ;;  %v2240_v60 = vadd.f32 %v2239_v5, %v4069_v39  ;;  %v4278_v7 = vld [vmem:[#allocation4_spill] sm:$0xff] }
 0x1d8   : > { %v2241_v3 = vpop.f32.mrf.mxu0 }
 0x1d9   : > { %v2434_v15 = vpop.f32.mrf.mxu1  ;;  %v3165_v13 = vpack.c.bf16 %v2534_v12, %v2533_v36  ;;  %v2433_v42 = vadd.f32 %v2432_v28, %v2240_v60  ;;  %v2242_v23 = vadd.f32 %v2241_v3, %v4072_v51  ;;  %v2535_v21 = vmax.f32 %v2431_v61, 0.0  ;;  %v4279_v60 = vld [vmem:[#allocation5_spill] sm:$0xff] }
 0x1da   : > { %v2243_v9 = vpop.f32.mrf.mxu0 }
 0x1db   : > { %v2436_v33 = vpop.f32.mrf.mxu1  ;;  %2772 = vst [vmem:[%s4157_s8 + $0x88] sm:$0xff] %v3165_v13  ;;  %v2536_v32 = vmax.f32 %v2433_v42, 0.0  ;;  %v2435_v24 = vadd.f32 %v2434_v15, %v2242_v23  ;;  %v2244_v2 = vadd.f32 %v2243_v9, %v4075_v59 }
 0x1dc   : > { %v2247_v10 = vpop.f32.mrf.mxu0 }
 0x1dd   : > { %v2440_v45 = vpop.f32.mrf.mxu1  ;;  %v3166_v43 = vpack.c.bf16 %v2536_v32, %v2535_v21  ;;  %v2437_v0 = vadd.f32 %v2436_v33, %v2244_v2  ;;  %v2248_v39 = vadd.f32 %v2247_v10, %v4078_v4  ;;  %v2537_v29 = vmax.f32 %v2435_v24, 0.0  ;;  %v4280_v33 = vld [vmem:[#allocation6_spill] sm:$0xff] }
 0x1de   : > { %v2249_v27 = vpop.f32.mrf.mxu0 }
 0x1df   : > { %v2442_v18 = vpop.f32.mrf.mxu1  ;;  %2773 = vst [vmem:[%s4157_s8 + $0x90] sm:$0xff] %v3166_v43  ;;  %v2538_v51 = vmax.f32 %v2437_v0, 0.0  ;;  %v2441_v46 = vadd.f32 %v2440_v45, %v2248_v39  ;;  %v2250_v35 = vadd.f32 %v2249_v27, %v4081_v16  ;;  %v4281_v45 = vld [vmem:[#allocation7_spill] sm:$0xff] }
 0x1e0   : > { %v2251_v19 = vpop.f32.mrf.mxu0 }
 0x1e1   : > { %v2444_v6 = vpop.f32.mrf.mxu1  ;;  %v3167_v40 = vpack.c.bf16 %v2538_v51, %v2537_v29  ;;  %v2443_v25 = vadd.f32 %v2442_v18, %v2250_v35  ;;  %v2252_v59 = vadd.f32 %v2251_v19, %v4084_v26  ;;  %v2539_v41 = vmax.f32 %v2441_v46, 0.0  ;;  %v4282_v51 = vld [vmem:[#allocation8_spill] sm:$0xff] }
 0x1e2   : > { %v2253_v50 = vpop.f32.mrf.mxu0 }
 0x1e3   : > { %v2446_v34 = vpop.f32.mrf.mxu1  ;;  %2774 = vst [vmem:[%s4157_s8 + $0x98] sm:$0xff] %v3167_v40  ;;  %v2540_v4 = vmax.f32 %v2443_v25, 0.0  ;;  %v2445_v17 = vadd.f32 %v2444_v6, %v2252_v59  ;;  %v2254_v14 = vadd.f32 %v2253_v50, %v4087_v38  ;;  %v4277_v38 = vld [vmem:[#allocation3_spill] sm:$0xff]  ;;  %v4283_v25 = vld [vmem:[#allocation9_spill] sm:$0xff] }
 0x1e4   : > { %v2257_v57 = vpop.f32.mrf.mxu0 }
 0x1e5   : > { %v2450_v48 = vpop.f32.mrf.mxu1  ;;  %v3168_v49 = vpack.c.bf16 %v2540_v4, %v2539_v41  ;;  %v2447_v37 = vadd.f32 %v2446_v34, %v2254_v14  ;;  %v2258_v16 = vadd.f32 %v2257_v57, %v4090_v52  ;;  %v2541_v58 = vmax.f32 %v2445_v17, 0.0  ;;  %v4284_v14 = vld [vmem:[#allocation10_spill] sm:$0xff] }
 0x1e6   : > { %v2259_v44 = vpop.f32.mrf.mxu0 }
 0x1e7   : > { %v2452_v47 = vpop.f32.mrf.mxu1  ;;  %2775 = vst [vmem:[%s4157_s8 + $0xa0] sm:$0xff] %v3168_v49  ;;  %v2542_v26 = vmax.f32 %v2447_v37, 0.0  ;;  %v2451_v20 = vadd.f32 %v2450_v48, %v2258_v16  ;;  %v2260_v54 = vadd.f32 %v2259_v44, %v4276_v55  ;;  %v4285_v44 = vld [vmem:[#allocation11_spill] sm:$0xff] }
 0x1e8   : > { %v2261_v53 = vpop.f32.mrf.mxu0 }
 0x1e9   : > { %v2454_v62 = vpop.f32.mrf.mxu1  ;;  %v3169_v63 = vpack.c.bf16 %v2542_v26, %v2541_v58  ;;  %v2453_v22 = vadd.f32 %v2452_v47, %v2260_v54  ;;  %v2262_v56 = vadd.f32 %v2261_v53, %v4277_v38  ;;  %v2543_v8 = vmax.f32 %v2451_v20, 0.0  ;;  %v4286_v53 = vld [vmem:[#allocation12_spill] sm:$0xff] }
 0x1ea   : > { %v2263_v1 = vpop.f32.mrf.mxu0 }
 0x1eb   : > { %v2456_v11 = vpop.f32.mrf.mxu1  ;;  %2776 = vst [vmem:[%s4157_s8 + $0xa8] sm:$0xff] %v3169_v63  ;;  %v2544_v52 = vmax.f32 %v2453_v22, 0.0  ;;  %v2455_v30 = vadd.f32 %v2454_v62, %v2262_v56  ;;  %v2264_v5 = vadd.f32 %v2263_v1, %v4278_v7  ;;  %v4287_v1 = vld [vmem:[#allocation13_spill] sm:$0xff] }
 0x1ec   : > { %v2267_v28 = vpop.f32.mrf.mxu0 }
 0x1ed   : > { %v2460_v36 = vpop.f32.mrf.mxu1  ;;  %v3170_v12 = vpack.c.bf16 %v2544_v52, %v2543_v8  ;;  %v2457_v61 = vadd.f32 %v2456_v11, %v2264_v5  ;;  %v2268_v3 = vadd.f32 %v2267_v28, %v4279_v60  ;;  %v2545_v42 = vmax.f32 %v2455_v30, 0.0  ;;  %v4288_v28 = vld [vmem:[#allocation14_spill] sm:$0xff] }
 0x1ee   : > { %v2269_v15 = vpop.f32.mrf.mxu0 }
 0x1ef   : > { %v2462_v13 = vpop.f32.mrf.mxu1  ;;  %2777 = vst [vmem:[%s4157_s8 + $0xb0] sm:$0xff] %v3170_v12  ;;  %v2546_v23 = vmax.f32 %v2457_v61, 0.0  ;;  %v2461_v9 = vadd.f32 %v2460_v36, %v2268_v3  ;;  %v2270_v21 = vadd.f32 %v2269_v15, %v4280_v33  ;;  %v4289_v15 = vld [vmem:[#allocation15_spill] sm:$0xff] }
 0x1f0   : > { %v2271_v32 = vpop.f32.mrf.mxu0 }
 0x1f1   : > { %v2464_v24 = vpop.f32.mrf.mxu1  ;;  %v3171_v2 = vpack.c.bf16 %v2546_v23, %v2545_v42  ;;  %v2463_v10 = vadd.f32 %v2462_v13, %v2270_v21  ;;  %v2272_v43 = vadd.f32 %v2271_v32, %v4281_v45  ;;  %v2547_v27 = vmax.f32 %v2461_v9, 0.0  ;;  %v4290_v32 = vld [vmem:[#allocation16_spill] sm:$0xff] }
 0x1f2   : > { %v2273_v0 = vpop.f32.mrf.mxu0 }
 0x1f3   : > { %v2466_v39 = vpop.f32.mrf.mxu1  ;;  %2778 = vst [vmem:[%s4157_s8 + $0xb8] sm:$0xff] %v3171_v2  ;;  %v2548_v18 = vmax.f32 %v2463_v10, 0.0  ;;  %v2465_v29 = vadd.f32 %v2464_v24, %v2272_v43  ;;  %v2274_v46 = vadd.f32 %v2273_v0, %v4282_v51  ;;  %v4291_v0 = vld [vmem:[#allocation17_spill] sm:$0xff] }
 0x1f4   : > { %v2277_v35 = vpop.f32.mrf.mxu0 }
 0x1f5   : > { %v2470_v19 = vpop.f32.mrf.mxu1  ;;  %v3172_v6 = vpack.c.bf16 %v2548_v18, %v2547_v27  ;;  %v2467_v40 = vadd.f32 %v2466_v39, %v2274_v46  ;;  %v2278_v59 = vadd.f32 %v2277_v35, %v4283_v25  ;;  %v2549_v41 = vmax.f32 %v2465_v29, 0.0  ;;  %v4292_v35 = vld [vmem:[#allocation18_spill] sm:$0xff] }
 0x1f6   : > { %v2279_v50 = vpop.f32.mrf.mxu0 }
 0x1f7   : > { %v2472_v34 = vpop.f32.mrf.mxu1  ;;  %2779 = vst [vmem:[%s4157_s8 + $0xc0] sm:$0xff] %v3172_v6  ;;  %v2550_v4 = vmax.f32 %v2467_v40, 0.0  ;;  %v2471_v17 = vadd.f32 %v2470_v19, %v2278_v59  ;;  %v2280_v57 = vadd.f32 %v2279_v50, %v4284_v14  ;;  %v4293_v50 = vld [vmem:[#allocation19_spill] sm:$0xff] }
 0x1f8   : > { %v2281_v48 = vpop.f32.mrf.mxu0 }
 0x1f9   : > { %v2474_v49 = vpop.f32.mrf.mxu1  ;;  %v3173_v37 = vpack.c.bf16 %v2550_v4, %v2549_v41  ;;  %v2473_v16 = vadd.f32 %v2472_v34, %v2280_v57  ;;  %v2282_v47 = vadd.f32 %v2281_v48, %v4285_v44  ;;  %v2551_v20 = vmax.f32 %v2471_v17, 0.0 }
 0x1fa   : > { %v2283_v58 = vpop.f32.mrf.mxu0 }
 0x1fb   : > { %v2476_v26 = vpop.f32.mrf.mxu1  ;;  %2780 = vst [vmem:[%s4157_s8 + $0xc8] sm:$0xff] %v3173_v37  ;;  %v2552_v55 = vmax.f32 %v2473_v16, 0.0  ;;  %v2475_v54 = vadd.f32 %v2474_v49, %v2282_v47  ;;  %v2284_v62 = vadd.f32 %v2283_v58, %v4286_v53 }
 0x1fc   : > { %v2287_v63 = vpop.f32.mrf.mxu0 }
 0x1fd   : > { %v2480_v22 = vpop.f32.mrf.mxu1  ;;  %v3174_v38 = vpack.c.bf16 %v2552_v55, %v2551_v20  ;;  %v2477_v56 = vadd.f32 %v2476_v26, %v2284_v62  ;;  %v2288_v11 = vadd.f32 %v2287_v63, %v4287_v1  ;;  %v2553_v30 = vmax.f32 %v2475_v54, 0.0 }
 0x1fe   : > { %v2289_v8 = vpop.f32.mrf.mxu0 }
 0x1ff   : > { %v2482_v52 = vpop.f32.mrf.mxu1  ;;  %2781 = vst [vmem:[%s4157_s8 + $0xd0] sm:$0xff] %v3174_v38  ;;  %v2554_v7 = vmax.f32 %v2477_v56, 0.0  ;;  %v2481_v5 = vadd.f32 %v2480_v22, %v2288_v11  ;;  %v2290_v36 = vadd.f32 %v2289_v8, %v4288_v28 }
 0x200   : > { %v2291_v12 = vpop.f32.mrf.mxu0 }
 0x201   : > { %v2484_v61 = vpop.f32.mrf.mxu1  ;;  %v3175_v60 = vpack.c.bf16 %v2554_v7, %v2553_v30  ;;  %v2483_v3 = vadd.f32 %v2482_v52, %v2290_v36  ;;  %v2292_v13 = vadd.f32 %v2291_v12, %v4289_v15  ;;  %v2555_v9 = vmax.f32 %v2481_v5, 0.0 }
 0x202   : > { %v2293_v42 = vpop.f32.mrf.mxu0 }
 0x203   : > { %v2486_v23 = vpop.f32.mrf.mxu1  ;;  %2782 = vst [vmem:[%s4157_s8 + $0xd8] sm:$0xff] %v3175_v60  ;;  %v2556_v33 = vmax.f32 %v2483_v3, 0.0  ;;  %v2485_v21 = vadd.f32 %v2484_v61, %v2292_v13  ;;  %v2294_v24 = vadd.f32 %v2293_v42, %v4290_v32 }
 0x204   : > { %v2297_v2 = vpop.f32.mrf.mxu0 }
 0x205   : > { %v2490_v10 = vpop.f32.mrf.mxu1  ;;  %v3176_v45 = vpack.c.bf16 %v2556_v33, %v2555_v9  ;;  %v2487_v43 = vadd.f32 %v2486_v23, %v2294_v24  ;;  %v2298_v39 = vadd.f32 %v2297_v2, %v4291_v0  ;;  %v2557_v29 = vmax.f32 %v2485_v21, 0.0 }
 0x206   : > { %v2299_v27 = vpop.f32.mrf.mxu0 }
 0x207   : > { %v2492_v18 = vpop.f32.mrf.mxu1  ;;  %2783 = vst [vmem:[%s4157_s8 + $0xe0] sm:$0xff] %v3176_v45  ;;  %v2558_v51 = vmax.f32 %v2487_v43, 0.0  ;;  %v2491_v46 = vadd.f32 %v2490_v10, %v2298_v39  ;;  %v2300_v19 = vadd.f32 %v2299_v27, %v4292_v35 }
 0x208   : > { %v2301_v6 = vpop.f32.mrf.mxu0 }
 0x209   : > { %v2494_v40 = vpop.f32.mrf.mxu1  ;;  %v3177_v25 = vpack.c.bf16 %v2558_v51, %v2557_v29  ;;  %v2493_v59 = vadd.f32 %v2492_v18, %v2300_v19  ;;  %v2302_v34 = vadd.f32 %v2301_v6, %v4293_v50  ;;  %v2559_v4 = vmax.f32 %v2491_v46, 0.0 }
 0x20a   : > { %v2303_v41 = vpop.f32.mrf.mxu0 }
 0x20b   : > { %2784 = vst [vmem:[%s4157_s8 + $0xe8] sm:$0xff] %v3177_v25  ;;  %v2560_v17 = vmax.f32 %v2493_v59, 0.0  ;;  %v2495_v14 = vadd.f32 %v2494_v40, %v2302_v34  ;;  %v2304_v57 = vadd.f32 %v2303_v41, %v4147_v31  ;;  %v2496_v48 = vpop.f32.mrf.mxu1 }
 0x20d   : > { %v3178_v49 = vpack.c.bf16 %v2560_v17, %v2559_v4  ;;  %v2497_v37 = vadd.f32 %v2496_v48, %v2304_v57  ;;  %v2561_v16 = vmax.f32 %v2495_v14, 0.0 }
 0x20f   : > { %2785 = vst [vmem:[%s4157_s8 + $0xf0] sm:$0xff] %v3178_v49  ;;  %v2562_v44 = vmax.f32 %v2497_v37, 0.0 }
 0x211   : > { %v3179_v47 = vpack.c.bf16 %v2562_v44, %v2561_v16 }
 0x213   : > { %2786 = vst [vmem:[%s4157_s8 + $0xf8] sm:$0xff] %v3179_v47 }
 0x214 PF: > { %s13_s12 = sadd.s32 1, %s3386_s12  }
 0x215   : > { %p10_p4 = scmp.ge.s32.totalorder %s13_s12, 4  }
 0x217   :  { %12 = sbr.rel (!%p10_p4) target bundleno = 1 (0x1), region = 62 }

// kernel: segformer_forward.4
= control target key start
LH: loop header
LB: loop body
LE: loop exit
PB: predicated region body
PF: predicated region fallthrough
CT: control target
= control target key end

     0   :  { %s10919_s21 = smov 0   ;;  %s14537_s0 = inlined_call_operand.vmem [shape: bf16[512,2304], index: 0, kind: input, shape index: {}]   ;;  %s14538_s1 = inlined_call_operand.vmem [shape: bf16[2304,256], index: 1, kind: input, shape index: {}]   ;;  %s14539_s2 = inlined_call_operand.vmem [shape: f32[1,256], index: 2, kind: input, shape index: {}]   ;;  %s14540_s3 = inlined_call_operand.vmem [shape: bf16[256,128], index: 3, kind: input, shape index: {}]   ;;  %s14541_s4 = inlined_call_operand.vmem [shape: f32[1,128], index: 4, kind: input, shape index: {}]   ;;  %s14542_s5 = inlined_call_operand.vmem [shape: bf16[512,128], index: 5, kind: output, shape index: {0}]   ;;  %s14543_s6 = inlined_call_operand.vmem [shape: f32[512,128], index: 6, kind: output, shape index: {1}]  }
   0x1 LB: > { %s8341_s22 = sadd.s32 4294967295, %s10882_s21   ;;  %p8345_p0 = scmp.ge.s32.totalorder %s10882_s21, 1  ;;  %s10882_s21 = sphi %s10919_s21, %s17_s21  }
   0x2   : > { %p217_p1 = scmp.lt.s32.totalorder %s10882_s21, 3 }
   0x4   : > { %p218_p2 = pnand %p8345_p0, %p217_p1 }
   0x6   : > { %221 = sbr.rel (%p218_p2) target bundleno = 1262 (0x4ee), region = 40 }
   0xb   : > { %v9548_v0 = vld [vmem:[%s14538_s1 + $0x74] ss:$8 sps:$4 sm:$0xff]   ;;  %v9550_v1 = vld [vmem:[%s14538_s1 + $0x70] ss:$8 sps:$4 sm:$0xff]   ;;  %v9554_v4 = vld [vmem:[%s14538_s1 + $0x64] ss:$8 sps:$4 sm:$0xff]  }
   0xc   : > { %2877 = vmatprep.subr.bf16.mxu0 %v9548_v0  ;;  %v9551_v2 = vld [vmem:[%s14538_s1 + $0x174] ss:$8 sps:$4 sm:$0xff]   ;;  %v9553_v3 = vld [vmem:[%s14538_s1 + $0x170] ss:$8 sps:$4 sm:$0xff]   ;;  %v9556_v5 = vld [vmem:[%s14538_s1 + $0x60] ss:$8 sps:$4 sm:$0xff]  }
   0xd   : > { %2878 = vmatpush1.bf16.msra.mxu0 %v9550_v1  ;;  %2990 = vmatprep.subr.bf16.mxu1 %v9551_v2  ;;  %v9557_v6 = vld [vmem:[%s14538_s1 + $0x164] ss:$8 sps:$4 sm:$0xff]   ;;  %v9559_v7 = vld [vmem:[%s14538_s1 + $0x160] ss:$8 sps:$4 sm:$0xff]   ;;  %v9560_v8 = vld [vmem:[%s14538_s1 + $0x54] ss:$8 sps:$4 sm:$0xff]  }
   0xe   : > { %2991 = vmatpush1.bf16.msra.mxu1 %v9553_v3  ;;  %2879 = vmatprep.subr.bf16.mxu0 %v9554_v4  ;;  %v9562_v9 = vld [vmem:[%s14538_s1 + $0x50] ss:$8 sps:$4 sm:$0xff]   ;;  %v9563_v10 = vld [vmem:[%s14538_s1 + $0x154] ss:$8 sps:$4 sm:$0xff]   ;;  %v9566_v11 = vld [vmem:[%s14538_s1 + $0x44] ss:$8 sps:$4 sm:$0xff]  }
   0xf   : > { %2992 = vmatprep.subr.bf16.mxu1 %v9557_v6  ;;  %v9565_v12 = vld [vmem:[%s14538_s1 + $0x150] ss:$8 sps:$4 sm:$0xff]   ;;  %v9569_v13 = vld [vmem:[%s14538_s1 + $0x144] ss:$8 sps:$4 sm:$0xff]   ;;  %v9568_v14 = vld [vmem:[%s14538_s1 + $0x40] ss:$8 sps:$4 sm:$0xff]  }
  0x10   : > { %v9572_v15 = vld [vmem:[%s14538_s1 + $0x34] ss:$8 sps:$4 sm:$0xff]   ;;  %v9571_v16 = vld [vmem:[%s14538_s1 + $0x140] ss:$8 sps:$4 sm:$0xff]   ;;  %v9574_v18 = vld [vmem:[%s14538_s1 + $0x30] ss:$8 sps:$4 sm:$0xff]  }
  0x11   : > { %2880 = vmatpush1.bf16.msra.mxu0 %v9556_v5  ;;  %v9575_v17 = vld [vmem:[%s14538_s1 + $0x134] ss:$8 sps:$4 sm:$0xff]   ;;  %v9578_v19 = vld [vmem:[%s14538_s1 + $0x24] ss:$8 sps:$4 sm:$0xff]   ;;  %v9577_v20 = vld [vmem:[%s14538_s1 + $0x130] ss:$8 sps:$4 sm:$0xff]  }
  0x12   : > { %2881 = vmatprep.subr.bf16.mxu0 %v9560_v8  ;;  %2993 = vmatpush1.bf16.msra.mxu1 %v9559_v7  ;;  %v9581_v21 = vld [vmem:[%s14538_s1 + $0x124] ss:$8 sps:$4 sm:$0xff]   ;;  %v9580_v22 = vld [vmem:[%s14538_s1 + $0x20] ss:$8 sps:$4 sm:$0xff]   ;;  %v9584_v23 = vld [vmem:[%s14538_s1 + $0x14] ss:$8 sps:$4 sm:$0xff]  }
  0x13   : > { %2994 = vmatprep.subr.bf16.mxu1 %v9563_v10  ;;  %v9583_v24 = vld [vmem:[%s14538_s1 + $0x120] ss:$8 sps:$4 sm:$0xff]   ;;  %v9587_v25 = vld [vmem:[%s14538_s1 + $0x114] ss:$8 sps:$4 sm:$0xff]   ;;  %v9586_v26 = vld [vmem:[%s14538_s1 + $0x10] ss:$8 sps:$4 sm:$0xff]  }
  0x14   : > { %v9590_v27 = vld [vmem:[%s14538_s1 + $0x4] ss:$8 sps:$4 sm:$0xff]   ;;  %v9589_v28 = vld [vmem:[%s14538_s1 + $0x110] ss:$8 sps:$4 sm:$0xff]   ;;  %s8346_s13 = sshll.u32 %s8341_s22, 5 }
  0x15   : > { %2882 = vmatpush1.bf16.msra.mxu0 %v9562_v9  ;;  %v9593_v29 = vld [vmem:[%s14538_s1 + $0x104] ss:$8 sps:$4 sm:$0xff]   ;;  %v9592_v30 = vld [vmem:[%s14538_s1] ss:$8 sps:$4 sm:$0xff]   ;;  %v9596_v31 = vld [vmem:[%s14538_s1 + $0xf4] ss:$8 sps:$4 sm:$0xff]  }
  0x16   : > { %2883 = vmatprep.subr.bf16.mxu0 %v9566_v11  ;;  %2995 = vmatpush1.bf16.msra.mxu1 %v9565_v12  ;;  %p254_p3 = scmp.lt.s32.totalorder %s8346_s13, 63  ;;  %v9595_v32 = vld [vmem:[%s14538_s1 + $0x100] ss:$8 sps:$4 sm:$0xff]   ;;  %v9599_v33 = vld [vmem:[%s14538_s1 + $0x1f4] ss:$8 sps:$4 sm:$0xff]  }
  0x17   : > { %2996 = vmatprep.subr.bf16.mxu1 %v9569_v13  ;;  %v9598_v34 = vld [vmem:[%s14538_s1 + $0xf0] ss:$8 sps:$4 sm:$0xff]   ;;  %v9602_v35 = vld [vmem:[%s14538_s1 + $0xe4] ss:$8 sps:$4 sm:$0xff]   ;;  %v9604_v38 = vld [vmem:[%s14538_s1 + $0xe0] ss:$8 sps:$4 sm:$0xff]  }
  0x18   : > { %s14785_s13 = smov (!%p254_p3, %s8346_s13), 63  ;;  %v9601_v36 = vld [vmem:[%s14538_s1 + $0x1f0] ss:$8 sps:$4 sm:$0xff]   ;;  %v9605_v37 = vld [vmem:[%s14538_s1 + $0x1e4] ss:$8 sps:$4 sm:$0xff]  }
  0x19   : > { %2884 = vmatpush1.bf16.msra.mxu0 %v9568_v14  ;;  %v9608_v39 = vld [vmem:[%s14538_s1 + $0xd4] ss:$8 sps:$4 sm:$0xff]   ;;  %s9539_s14 = smul.u32 72, %s14785_s13  ;;  %v9607_v40 = vld [vmem:[%s14538_s1 + $0x1e0] ss:$8 sps:$4 sm:$0xff]   ;;  %s8349_s27 = sshll.u32 %s14785_s13, 2 }
  0x1a   : > { %2885 = vmatprep.subr.bf16.mxu0 %v9572_v15  ;;  %2997 = vmatpush1.bf16.msra.mxu1 %v9571_v16  ;;  %v9611_v41 = vld [vmem:[%s14538_s1 + $0x1d4] ss:$8 sps:$4 sm:$0xff]   ;;  %v9610_v42 = vld [vmem:[%s14538_s1 + $0xd0] ss:$8 sps:$4 sm:$0xff]   ;;  %v9614_v43 = vld [vmem:[%s14538_s1 + $0xc4] ss:$8 sps:$4 sm:$0xff]   ;;  %s12828_s8 = scalar_lea.vmem %s14542_s5, %s8349_s27 }
  0x1b   : > { %2998 = vmatprep.subr.bf16.mxu1 %v9575_v17  ;;  %s11067_s26 = scalar_lea.vmem %s14537_s0, %s9539_s14  ;;  %v9613_v44 = vld [vmem:[%s14538_s1 + $0x1d0] ss:$8 sps:$4 sm:$0xff]   ;;  %v9617_v45 = vld [vmem:[%s14538_s1 + $0x1c4] ss:$8 sps:$4 sm:$0xff]   ;;  %v9616_v46 = vld [vmem:[%s14538_s1 + $0xc0] ss:$8 sps:$4 sm:$0xff]  }
  0x1c   : > { %v9645_v47 = vld [vmem:[%s11067_s26 + $0x4] ss:$72 sps:$4 sm:$0xff]   ;;  %v9620_v48 = vld [vmem:[%s14538_s1 + $0xb4] ss:$8 sps:$4 sm:$0xff]   ;;  %v9619_v49 = vld [vmem:[%s14538_s1 + $0x1c0] ss:$8 sps:$4 sm:$0xff]  }
  0x1d   : > { %2886 = vmatpush1.bf16.msra.mxu0 %v9574_v18  ;;  %2909 = vmatprep.mubr.bf16.mxu0 %v9645_v47  ;;  %v9623_v50 = vld [vmem:[%s14538_s1 + $0x1b4] ss:$8 sps:$4 sm:$0xff]   ;;  %v9622_v52 = vld [vmem:[%s14538_s1 + $0xb0] ss:$8 sps:$4 sm:$0xff]   ;;  %v9626_v53 = vld [vmem:[%s14538_s1 + $0xa4] ss:$8 sps:$4 sm:$0xff]  }
  0x1e   : > { %2887 = vmatprep.subr.bf16.mxu0 %v9578_v19  ;;  %2999 = vmatpush1.bf16.msra.mxu1 %v9577_v20  ;;  %v9652_v51 = vld [vmem:[%s11067_s26 + $0xc] ss:$72 sps:$4 sm:$0xff]   ;;  %v9625_v54 = vld [vmem:[%s14538_s1 + $0x1b0] ss:$8 sps:$4 sm:$0xff]   ;;  %v9628_v56 = vld [vmem:[%s14538_s1 + $0xa0] ss:$8 sps:$4 sm:$0xff]  }
  0x1f   : > { %3000 = vmatprep.subr.bf16.mxu1 %v9581_v21  ;;  %3022 = vmatprep.mubr.bf16.mxu1 %v9652_v51  ;;  %v9629_v55 = vld [vmem:[%s14538_s1 + $0x1a4] ss:$8 sps:$4 sm:$0xff]   ;;  %v9632_v57 = vld [vmem:[%s14538_s1 + $0x94] ss:$8 sps:$4 sm:$0xff]   ;;  %v9631_v58 = vld [vmem:[%s14538_s1 + $0x1a0] ss:$8 sps:$4 sm:$0xff]  }
  0x20   : > { %v9635_v59 = vld [vmem:[%s14538_s1 + $0x194] ss:$8 sps:$4 sm:$0xff]   ;;  %v9634_v60 = vld [vmem:[%s14538_s1 + $0x90] ss:$8 sps:$4 sm:$0xff]   ;;  %v9638_v61 = vld [vmem:[%s14538_s1 + $0x84] ss:$8 sps:$4 sm:$0xff]  }
  0x21   : > { %2888 = vmatpush1.bf16.msra.mxu0 %v9580_v22  ;;  %v9637_v62 = vld [vmem:[%s14538_s1 + $0x190] ss:$8 sps:$4 sm:$0xff]   ;;  %v9641_v63 = vld [vmem:[%s14538_s1 + $0x184] ss:$8 sps:$4 sm:$0xff]   ;;  %v9640_v0 = vld [vmem:[%s14538_s1 + $0x80] ss:$8 sps:$4 sm:$0xff]  }
  0x22   : > { %2889 = vmatprep.subr.bf16.mxu0 %v9584_v23  ;;  %3001 = vmatpush1.bf16.msra.mxu1 %v9583_v24  ;;  %v9646_v1 = vld [vmem:[%s14538_s1 + $0x180] ss:$8 sps:$4 sm:$0xff]   ;;  %v9649_v3 = vld [vmem:[%s14538_s1 + $0x274] ss:$8 sps:$4 sm:$0xff]   ;;  %v9647_v4 = vld [vmem:[%s14538_s1 + $0x270] ss:$8 sps:$4 sm:$0xff]  }
  0x23   : > { %3002 = vmatprep.subr.bf16.mxu1 %v9587_v25  ;;  %v9643_v2 = vld [vmem:[%s11067_s26] ss:$72 sps:$4 sm:$0xff]   ;;  %v9655_v6 = vld [vmem:[%s14538_s1 + $0x374] ss:$8 sps:$4 sm:$0xff]   ;;  %v9653_v7 = vld [vmem:[%s14538_s1 + $0x370] ss:$8 sps:$4 sm:$0xff]  }
  0x24   : > { %v9650_v5 = vld [vmem:[%s11067_s26 + $0x8] ss:$72 sps:$4 sm:$0xff]   ;;  %v9662_v8 = vld [vmem:[%s11067_s26 + $0x94] ss:$72 sps:$4 sm:$0xff]   ;;  %v9658_v9 = vld [vmem:[%s14538_s1 + $0x264] ss:$8 sps:$4 sm:$0xff]  }
  0x25   : > { %2890 = vmatpush1.bf16.msra.mxu0 %v9586_v26  ;;  %v9668_v10 = vld [vmem:[%s11067_s26 + $0x9c] ss:$72 sps:$4 sm:$0xff]   ;;  %v9656_v12 = vld [vmem:[%s14538_s1 + $0x260] ss:$8 sps:$4 sm:$0xff]   ;;  %v9664_v14 = vld [vmem:[%s11067_s26 + $0x90] ss:$72 sps:$4 sm:$0xff]  }
  0x26   : > { %2891 = vmatprep.subr.bf16.mxu0 %v9590_v27  ;;  %3003 = vmatpush1.bf16.msra.mxu1 %v9589_v28  ;;  %v9661_v11 = vld [vmem:[%s14538_s1 + $0x364] ss:$8 sps:$4 sm:$0xff]   ;;  %v9659_v13 = vld [vmem:[%s14538_s1 + $0x360] ss:$8 sps:$4 sm:$0xff]   ;;  %v9667_v15 = vld [vmem:[%s14538_s1 + $0x254] ss:$8 sps:$4 sm:$0xff]  }
  0x27   : > { %3004 = vmatprep.subr.bf16.mxu1 %v9593_v29  ;;  %v9665_v16 = vld [vmem:[%s14538_s1 + $0x250] ss:$8 sps:$4 sm:$0xff]   ;;  %v9673_v18 = vld [vmem:[%s14538_s1 + $0x354] ss:$8 sps:$4 sm:$0xff]   ;;  %v9680_v20 = vld [vmem:[%s11067_s26 + $0x124] ss:$72 sps:$4 sm:$0xff]  }
  0x28   : > { %v9670_v17 = vld [vmem:[%s11067_s26 + $0x98] ss:$72 sps:$4 sm:$0xff]   ;;  %v9676_v21 = vld [vmem:[%s14538_s1 + $0x244] ss:$8 sps:$4 sm:$0xff]   ;;  %v9685_v27 = vld [vmem:[%s14538_s1 + $0x234] ss:$8 sps:$4 sm:$0xff]  }
  0x29   : > { %2892 = vmatpush1.bf16.msra.mxu0 %v9592_v30  ;;  %v9671_v19 = vld [vmem:[%s14538_s1 + $0x350] ss:$8 sps:$4 sm:$0xff]   ;;  %v9686_v22 = vld [vmem:[%s11067_s26 + $0x12c] ss:$72 sps:$4 sm:$0xff]   ;;  %v9674_v24 = vld [vmem:[%s14538_s1 + $0x240] ss:$8 sps:$4 sm:$0xff]  }
  0x2a   : > { %2893 = vmatprep.subr.bf16.mxu0 %v9596_v31  ;;  %3005 = vmatpush1.bf16.msra.mxu1 %v9595_v32  ;;  %v9679_v23 = vld [vmem:[%s14538_s1 + $0x344] ss:$8 sps:$4 sm:$0xff]   ;;  %v9677_v25 = vld [vmem:[%s14538_s1 + $0x340] ss:$8 sps:$4 sm:$0xff]   ;;  %v9683_v28 = vld [vmem:[%s14538_s1 + $0x230] ss:$8 sps:$4 sm:$0xff]  }
  0x2b   : > { %3006 = vmatprep.subr.bf16.mxu1 %v9599_v33  ;;  %v9682_v26 = vld [vmem:[%s11067_s26 + $0x120] ss:$72 sps:$4 sm:$0xff]   ;;  %v9691_v30 = vld [vmem:[%s14538_s1 + $0x334] ss:$8 sps:$4 sm:$0xff]   ;;  %v9689_v31 = vld [vmem:[%s14538_s1 + $0x330] ss:$8 sps:$4 sm:$0xff]  }
  0x2c   : > { %v9688_v29 = vld [vmem:[%s11067_s26 + $0x128] ss:$72 sps:$4 sm:$0xff]   ;;  %v9698_v32 = vld [vmem:[%s11067_s26 + $0x1b4] ss:$72 sps:$4 sm:$0xff]   ;;  %v9694_v33 = vld [vmem:[%s14538_s1 + $0x224] ss:$8 sps:$4 sm:$0xff]  }
  0x2d   : > { %2894 = vmatpush2.bf16.msra.mxu0 %v9598_v34  ;;  %v9704_v34 = vld [vmem:[%s11067_s26 + $0x1bc] ss:$72 sps:$4 sm:$0xff]   ;;  %s8351_s14 = sshll.u32 %s14785_s13, 3 }
  0x2e   : > { %2895 = vmatprep.subr.bf16.mxu0 %v9602_v35  ;;  %3007 = vmatpush2.bf16.msra.mxu1 %v9601_v36  ;;  %v9697_v35 = vld [vmem:[%s14538_s1 + $0x324] ss:$8 sps:$4 sm:$0xff]   ;;  %v9692_v36 = vld [vmem:[%s14538_s1 + $0x220] ss:$8 sps:$4 sm:$0xff]   ;;  %v9721_v51 = vld [vmem:[%s14538_s1 + $0x2f4] ss:$8 sps:$4 sm:$0xff]   ;;  %s13649_s22 = scalar_lea.vmem %s14543_s6, %s8351_s14 }
  0x2f   : > { %3008 = vmatprep.subr.bf16.mxu1 %v9605_v37  ;;  %v9695_v37 = vld [vmem:[%s14538_s1 + $0x320] ss:$8 sps:$4 sm:$0xff]   ;;  %v9715_v47 = vld [vmem:[%s14538_s1 + $0x304] ss:$8 sps:$4 sm:$0xff]  }
  0x31   : > { %2896 = vmatpush2.bf16.msra.mxu0 %v9604_v38  ;;  %v9700_v38 = vld [vmem:[%s11067_s26 + $0x1b0] ss:$72 sps:$4 sm:$0xff]  }
  0x32   : > { %2897 = vmatprep.subr.bf16.mxu0 %v9608_v39  ;;  %3009 = vmatpush2.bf16.msra.mxu1 %v9607_v40  ;;  %v9703_v39 = vld [vmem:[%s14538_s1 + $0x214] ss:$8 sps:$4 sm:$0xff]   ;;  %v9701_v40 = vld [vmem:[%s14538_s1 + $0x210] ss:$8 sps:$4 sm:$0xff]  }
  0x33   : > { %3010 = vmatprep.subr.bf16.mxu1 %v9611_v41  ;;  %v9706_v41 = vld [vmem:[%s11067_s26 + $0x1b8] ss:$72 sps:$4 sm:$0xff]  }
  0x35   : > { %2898 = vmatpush2.bf16.msra.mxu0 %v9610_v42  ;;  %v9709_v42 = vld [vmem:[%s14538_s1 + $0x314] ss:$8 sps:$4 sm:$0xff]  }
  0x36   : > { %2899 = vmatprep.subr.bf16.mxu0 %v9614_v43  ;;  %3011 = vmatpush2.bf16.msra.mxu1 %v9613_v44  ;;  %v9707_v43 = vld [vmem:[%s14538_s1 + $0x310] ss:$8 sps:$4 sm:$0xff]   ;;  %v9716_v44 = vld [vmem:[%s11067_s26 + $0x244] ss:$72 sps:$4 sm:$0xff]  }
  0x37   : > { %3012 = vmatprep.subr.bf16.mxu1 %v9617_v45  ;;  %v9712_v45 = vld [vmem:[%s14538_s1 + $0x204] ss:$8 sps:$4 sm:$0xff]  }
  0x39   : > { %2900 = vmatpush2.bf16.msra.mxu0 %v9616_v46  ;;  %v9722_v46 = vld [vmem:[%s11067_s26 + $0x24c] ss:$72 sps:$4 sm:$0xff]  }
  0x3a   : > { %2901 = vmatprep.subr.bf16.mxu0 %v9620_v48  ;;  %3013 = vmatpush2.bf16.msra.mxu1 %v9619_v49  ;;  %v9710_v48 = vld [vmem:[%s14538_s1 + $0x200] ss:$8 sps:$4 sm:$0xff]  }
  0x3b   : > { %3014 = vmatprep.subr.bf16.mxu1 %v9623_v50  ;;  %v9713_v49 = vld [vmem:[%s14538_s1 + $0x300] ss:$8 sps:$4 sm:$0xff]  }
  0x3c   : > { %v9718_v50 = vld [vmem:[%s11067_s26 + $0x240] ss:$72 sps:$4 sm:$0xff]  }
  0x3d   : > { %2902 = vmatpush2.bf16.msra.mxu0 %v9622_v52  ;;  %v9719_v52 = vld [vmem:[%s14538_s1 + $0x2f0] ss:$8 sps:$4 sm:$0xff]  }
  0x3e   : > { %2903 = vmatprep.subr.bf16.mxu0 %v9626_v53  ;;  %3015 = vmatpush2.bf16.msra.mxu1 %v9625_v54  ;;  %v9724_v53 = vld [vmem:[%s11067_s26 + $0x248] ss:$72 sps:$4 sm:$0xff]   ;;  %v9727_v54 = vld [vmem:[%s14538_s1 + $0x3f4] ss:$8 sps:$4 sm:$0xff]  }
  0x3f   : > { %3016 = vmatprep.subr.bf16.mxu1 %v9629_v55  ;;  %v9725_v55 = vld [vmem:[%s14538_s1 + $0x3f0] ss:$8 sps:$4 sm:$0xff]  }
  0x41   : > { %2904 = vmatpush2.bf16.msra.mxu0 %v9628_v56  ;;  %v9734_v56 = vld [vmem:[%s11067_s26 + $0x2d4] ss:$72 sps:$4 sm:$0xff]  }
  0x42   : > { %2905 = vmatprep.subr.bf16.mxu0 %v9632_v57  ;;  %3017 = vmatpush2.bf16.msra.mxu1 %v9631_v58  ;;  %v9730_v57 = vld [vmem:[%s14538_s1 + $0x2e4] ss:$8 sps:$4 sm:$0xff]  }
  0x43   : > { %3018 = vmatprep.subr.bf16.mxu1 %v9635_v59  ;;  %v9740_v58 = vld [vmem:[%s11067_s26 + $0x2dc] ss:$72 sps:$4 sm:$0xff]  }
  0x44   : > { %v9733_v59 = vld [vmem:[%s14538_s1 + $0x3e4] ss:$8 sps:$4 sm:$0xff]  }
  0x45   : > { %2906 = vmatpush2.bf16.msra.mxu0 %v9634_v60  ;;  %v9728_v60 = vld [vmem:[%s14538_s1 + $0x2e0] ss:$8 sps:$4 sm:$0xff]  }
  0x46   : > { %2907 = vmatprep.subr.bf16.mxu0 %v9638_v61  ;;  %3019 = vmatpush2.bf16.msra.mxu1 %v9637_v62  ;;  %v9731_v61 = vld [vmem:[%s14538_s1 + $0x3e0] ss:$8 sps:$4 sm:$0xff]   ;;  %v9736_v62 = vld [vmem:[%s11067_s26 + $0x2d0] ss:$72 sps:$4 sm:$0xff]  }
  0x47   : > { %3020 = vmatprep.subr.bf16.mxu1 %v9641_v63  ;;  %v9739_v63 = vld [vmem:[%s14538_s1 + $0x2d4] ss:$8 sps:$4 sm:$0xff]  }
  0x49   : > { %2908 = vmatpush2.bf16.msra.mxu0 %v9640_v0  ;;  %v9737_v0 = vld [vmem:[%s14538_s1 + $0x2d0] ss:$8 sps:$4 sm:$0xff]  }
  0x4a   : > { %3103 = vmatprep.subr.bf16.mxu0 %v9649_v3  ;;  %3021 = vmatpush2.bf16.msra.mxu1 %v9646_v1  ;;  %v9742_v1 = vld [vmem:[%s11067_s26 + $0x2d8] ss:$72 sps:$4 sm:$0xff]  }
  0x4b   : > { %3216 = vmatprep.subr.bf16.mxu1 %v9655_v6  ;;  %v9743_v3 = vld [vmem:[%s14538_s1 + $0x3d0] ss:$8 sps:$4 sm:$0xff]   ;;  %v9758_v6 = vld [vmem:[%s11067_s26 + $0x36c] ss:$72 sps:$4 sm:$0xff]  }
  0x4c   : > { %2910 = vmatmul.mubr.bf16.vlgmr.msra.gmra.mxu0 %v9643_v2  ;;  %v9745_v2 = vld [vmem:[%s14538_s1 + $0x3d4] ss:$8 sps:$4 sm:$0xff]  }
  0x4d   : > { %3104 = vmatpush1.bf16.msra.mxu0 %v9647_v4  ;;  %2919 = vmatprep.mubr.bf16.mxu0 %v9662_v8  ;;  %v9752_v4 = vld [vmem:[%s11067_s26 + $0x364] ss:$72 sps:$4 sm:$0xff]   ;;  %v9746_v8 = vld [vmem:[%s14538_s1 + $0x2c0] ss:$8 sps:$4 sm:$0xff]  }
  0x4e   : > { %3023 = vmatmul.mubr.bf16.vlgmr.msra.gmra.mxu1 %v9650_v5  ;;  %3105 = vmatprep.subr.bf16.mxu0 %v9658_v9  ;;  %v9748_v5 = vld [vmem:[%s14538_s1 + $0x2c4] ss:$8 sps:$4 sm:$0xff]   ;;  %v9749_v9 = vld [vmem:[%s14538_s1 + $0x3c0] ss:$8 sps:$4 sm:$0xff]  }
  0x4f   : > { %3217 = vmatpush1.bf16.msra.mxu1 %v9653_v7  ;;  %3032 = vmatprep.mubr.bf16.mxu1 %v9668_v10  ;;  %v9751_v7 = vld [vmem:[%s14538_s1 + $0x3c4] ss:$8 sps:$4 sm:$0xff]   ;;  %v9754_v10 = vld [vmem:[%s11067_s26 + $0x360] ss:$72 sps:$4 sm:$0xff]  }
  0x50   : > { %3218 = vmatprep.subr.bf16.mxu1 %v9661_v11  ;;  %v9757_v11 = vld [vmem:[%s14538_s1 + $0x2b4] ss:$8 sps:$4 sm:$0xff]  }
  0x51   : > { %3106 = vmatpush1.bf16.msra.mxu0 %v9656_v12  ;;  %v9755_v12 = vld [vmem:[%s14538_s1 + $0x2b0] ss:$8 sps:$4 sm:$0xff]  }
  0x52   : > { %3107 = vmatprep.subr.bf16.mxu0 %v9667_v15  ;;  %v9761_v15 = vld [vmem:[%s14538_s1 + $0x3b0] ss:$8 sps:$4 sm:$0xff]  }
  0x53   : > { %3219 = vmatpush1.bf16.msra.mxu1 %v9659_v13  ;;  %v9760_v13 = vld [vmem:[%s11067_s26 + $0x368] ss:$72 sps:$4 sm:$0xff]  }
  0x54   : > { %2920 = vmatmul.mubr.bf16.gmra.mxu0 %v9664_v14  ;;  %3220 = vmatprep.subr.bf16.mxu1 %v9673_v18  ;;  %v9763_v14 = vld [vmem:[%s14538_s1 + $0x3b4] ss:$8 sps:$4 sm:$0xff]  }
  0x55   : > { %3108 = vmatpush1.bf16.msra.mxu0 %v9665_v16  ;;  %2929 = vmatprep.mubr.bf16.mxu0 %v9680_v20  ;;  %v9770_v16 = vld [vmem:[%s11067_s26 + $0x3f4] ss:$72 sps:$4 sm:$0xff]   ;;  %v9764_v20 = vld [vmem:[%s14538_s1 + $0x2a0] ss:$8 sps:$4 sm:$0xff]  }
  0x56   : > { %3033 = vmatmul.mubr.bf16.gmra.mxu1 %v9670_v17  ;;  %3109 = vmatprep.subr.bf16.mxu0 %v9676_v21  ;;  %v9766_v17 = vld [vmem:[%s14538_s1 + $0x2a4] ss:$8 sps:$4 sm:$0xff]   ;;  %v9767_v21 = vld [vmem:[%s14538_s1 + $0x3a0] ss:$8 sps:$4 sm:$0xff]  }
  0x57   : > { %3221 = vmatpush1.bf16.msra.mxu1 %v9671_v19  ;;  %3042 = vmatprep.mubr.bf16.mxu1 %v9686_v22  ;;  %v9776_v18 = vld [vmem:[%s11067_s26 + $0x3fc] ss:$72 sps:$4 sm:$0xff]   ;;  %v9772_v22 = vld [vmem:[%s11067_s26 + $0x3f0] ss:$72 sps:$4 sm:$0xff]  }
  0x58   : > { %3222 = vmatprep.subr.bf16.mxu1 %v9679_v23  ;;  %v9769_v19 = vld [vmem:[%s14538_s1 + $0x3a4] ss:$8 sps:$4 sm:$0xff]   ;;  %v9775_v23 = vld [vmem:[%s14538_s1 + $0x294] ss:$8 sps:$4 sm:$0xff]  }
  0x59   : > { %3110 = vmatpush1.bf16.msra.mxu0 %v9674_v24  ;;  %v9773_v24 = vld [vmem:[%s14538_s1 + $0x290] ss:$8 sps:$4 sm:$0xff]  }
  0x5a   : > { %3111 = vmatprep.subr.bf16.mxu0 %v9685_v27  ;;  %v9779_v27 = vld [vmem:[%s14538_s1 + $0x390] ss:$8 sps:$4 sm:$0xff]  }
  0x5b   : > { %3223 = vmatpush1.bf16.msra.mxu1 %v9677_v25  ;;  %v9778_v25 = vld [vmem:[%s11067_s26 + $0x3f8] ss:$72 sps:$4 sm:$0xff]  }
  0x5c   : > { %2930 = vmatmul.mubr.bf16.gmra.mxu0 %v9682_v26  ;;  %3224 = vmatprep.subr.bf16.mxu1 %v9691_v30  ;;  %v9781_v26 = vld [vmem:[%s14538_s1 + $0x394] ss:$8 sps:$4 sm:$0xff]  }
  0x5d   : > { %3112 = vmatpush1.bf16.msra.mxu0 %v9683_v28  ;;  %2939 = vmatprep.mubr.bf16.mxu0 %v9698_v32  ;;  %v9790_v28 = vld [vmem:[%s11067_s26 + $0x14] ss:$72 sps:$4 sm:$0xff]   ;;  %v9782_v32 = vld [vmem:[%s14538_s1 + $0x280] ss:$8 sps:$4 sm:$0xff]  }
  0x5e   : > { %3043 = vmatmul.mubr.bf16.gmra.mxu1 %v9688_v29  ;;  %3113 = vmatprep.subr.bf16.mxu0 %v9694_v33  ;;  %v9784_v29 = vld [vmem:[%s14538_s1 + $0x284] ss:$8 sps:$4 sm:$0xff]   ;;  %v9785_v33 = vld [vmem:[%s14538_s1 + $0x380] ss:$8 sps:$4 sm:$0xff]  }
  0x5f   : > { %3225 = vmatpush1.bf16.msra.mxu1 %v9689_v31  ;;  %3052 = vmatprep.mubr.bf16.mxu1 %v9704_v34  ;;  %v9796_v30 = vld [vmem:[%s11067_s26 + $0x1c] ss:$72 sps:$4 sm:$0xff]   ;;  %v9788_v34 = vld [vmem:[%s11067_s26 + $0x10] ss:$72 sps:$4 sm:$0xff]  }
  0x60   : > { %3226 = vmatprep.subr.bf16.mxu1 %v9697_v35  ;;  %v9787_v31 = vld [vmem:[%s14538_s1 + $0x384] ss:$8 sps:$4 sm:$0xff]   ;;  %v9793_v35 = vld [vmem:[%s14538_s1 + $0x474] ss:$8 sps:$4 sm:$0xff]  }
  0x61   : > { %3114 = vmatpush1.bf16.msra.mxu0 %v9692_v36  ;;  %v9791_v36 = vld [vmem:[%s14538_s1 + $0x470] ss:$8 sps:$4 sm:$0xff]  }
  0x62   : > { %3115 = vmatprep.subr.bf16.mxu0 %v9703_v39  ;;  %v9797_v39 = vld [vmem:[%s14538_s1 + $0x570] ss:$8 sps:$4 sm:$0xff]  }
  0x63   : > { %3227 = vmatpush1.bf16.msra.mxu1 %v9695_v37  ;;  %v9794_v37 = vld [vmem:[%s11067_s26 + $0x18] ss:$72 sps:$4 sm:$0xff]  }
  0x64   : > { %2940 = vmatmul.mubr.bf16.gmra.mxu0 %v9700_v38  ;;  %3228 = vmatprep.subr.bf16.mxu1 %v9709_v42  ;;  %v9799_v38 = vld [vmem:[%s14538_s1 + $0x574] ss:$8 sps:$4 sm:$0xff]  }
  0x65   : > { %3116 = vmatpush1.bf16.msra.mxu0 %v9701_v40  ;;  %2949 = vmatprep.mubr.bf16.mxu0 %v9716_v44  ;;  %v9806_v40 = vld [vmem:[%s11067_s26 + $0xa4] ss:$72 sps:$4 sm:$0xff]   ;;  %v9800_v44 = vld [vmem:[%s14538_s1 + $0x460] ss:$8 sps:$4 sm:$0xff]  }
  0x66   : > { %3053 = vmatmul.mubr.bf16.gmra.mxu1 %v9706_v41  ;;  %3117 = vmatprep.subr.bf16.mxu0 %v9712_v45  ;;  %v9802_v41 = vld [vmem:[%s14538_s1 + $0x464] ss:$8 sps:$4 sm:$0xff]   ;;  %v9803_v45 = vld [vmem:[%s14538_s1 + $0x560] ss:$8 sps:$4 sm:$0xff]  }
  0x67   : > { %3229 = vmatpush1.bf16.msra.mxu1 %v9707_v43  ;;  %3062 = vmatprep.mubr.bf16.mxu1 %v9722_v46  ;;  %v9812_v42 = vld [vmem:[%s11067_s26 + $0xac] ss:$72 sps:$4 sm:$0xff]   ;;  %v9808_v46 = vld [vmem:[%s11067_s26 + $0xa0] ss:$72 sps:$4 sm:$0xff]  }
  0x68   : > { %3230 = vmatprep.subr.bf16.mxu1 %v9715_v47  ;;  %v9805_v43 = vld [vmem:[%s14538_s1 + $0x564] ss:$8 sps:$4 sm:$0xff]   ;;  %v9811_v47 = vld [vmem:[%s14538_s1 + $0x454] ss:$8 sps:$4 sm:$0xff]  }
  0x69   : > { %3118 = vmatpush1.bf16.msra.mxu0 %v9710_v48  ;;  %v9809_v48 = vld [vmem:[%s14538_s1 + $0x450] ss:$8 sps:$4 sm:$0xff]  }
  0x6a   : > { %3119 = vmatprep.subr.bf16.mxu0 %v9721_v51  ;;  %v9815_v51 = vld [vmem:[%s14538_s1 + $0x550] ss:$8 sps:$4 sm:$0xff]  }
  0x6b   : > { %3231 = vmatpush1.bf16.msra.mxu1 %v9713_v49  ;;  %v9814_v49 = vld [vmem:[%s11067_s26 + $0xa8] ss:$72 sps:$4 sm:$0xff]  }
  0x6c   : > { %2950 = vmatmul.mubr.bf16.gmra.mxu0 %v9718_v50  ;;  %3232 = vmatprep.subr.bf16.mxu1 %v9727_v54  ;;  %v9817_v50 = vld [vmem:[%s14538_s1 + $0x554] ss:$8 sps:$4 sm:$0xff]  }
  0x6d   : > { %3120 = vmatpush2.bf16.msra.mxu0 %v9719_v52  ;;  %2959 = vmatprep.mubr.bf16.mxu0 %v9734_v56  ;;  %v9824_v52 = vld [vmem:[%s11067_s26 + $0x134] ss:$72 sps:$4 sm:$0xff]   ;;  %v9818_v56 = vld [vmem:[%s14538_s1 + $0x440] ss:$8 sps:$4 sm:$0xff]  }
  0x6e   : > { %3063 = vmatmul.mubr.bf16.gmra.mxu1 %v9724_v53  ;;  %3121 = vmatprep.subr.bf16.mxu0 %v9730_v57  ;;  %v9820_v53 = vld [vmem:[%s14538_s1 + $0x444] ss:$8 sps:$4 sm:$0xff]   ;;  %v9821_v57 = vld [vmem:[%s14538_s1 + $0x540] ss:$8 sps:$4 sm:$0xff]  }
  0x6f   : > { %3233 = vmatpush2.bf16.msra.mxu1 %v9725_v55  ;;  %3072 = vmatprep.mubr.bf16.mxu1 %v9740_v58  ;;  %v9830_v54 = vld [vmem:[%s11067_s26 + $0x13c] ss:$72 sps:$4 sm:$0xff]   ;;  %v9826_v58 = vld [vmem:[%s11067_s26 + $0x130] ss:$72 sps:$4 sm:$0xff]  }
  0x70   : > { %3234 = vmatprep.subr.bf16.mxu1 %v9733_v59  ;;  %v9823_v55 = vld [vmem:[%s14538_s1 + $0x544] ss:$8 sps:$4 sm:$0xff]   ;;  %v9829_v59 = vld [vmem:[%s14538_s1 + $0x434] ss:$8 sps:$4 sm:$0xff]  }
  0x71   : > { %3122 = vmatpush2.bf16.msra.mxu0 %v9728_v60  ;;  %v9827_v60 = vld [vmem:[%s14538_s1 + $0x430] ss:$8 sps:$4 sm:$0xff]  }
  0x72   : > { %3123 = vmatprep.subr.bf16.mxu0 %v9739_v63  ;;  %v9833_v63 = vld [vmem:[%s14538_s1 + $0x530] ss:$8 sps:$4 sm:$0xff]  }
  0x73   : > { %3235 = vmatpush2.bf16.msra.mxu1 %v9731_v61  ;;  %v9832_v61 = vld [vmem:[%s11067_s26 + $0x138] ss:$72 sps:$4 sm:$0xff]  }
  0x74   : > { %2960 = vmatmul.mubr.bf16.gmra.mxu0 %v9736_v62  ;;  %3236 = vmatprep.subr.bf16.mxu1 %v9745_v2  ;;  %v9835_v62 = vld [vmem:[%s14538_s1 + $0x534] ss:$8 sps:$4 sm:$0xff]  }
  0x75   : > { %3124 = vmatpush2.bf16.msra.mxu0 %v9737_v0  ;;  %2969 = vmatprep.mubr.bf16.mxu0 %v9752_v4  ;;  %v9842_v0 = vld [vmem:[%s11067_s26 + $0x1c4] ss:$72 sps:$4 sm:$0xff]   ;;  %v9836_v4 = vld [vmem:[%s14538_s1 + $0x420] ss:$8 sps:$4 sm:$0xff]  }
  0x76   : > { %3073 = vmatmul.mubr.bf16.gmra.mxu1 %v9742_v1  ;;  %3125 = vmatprep.subr.bf16.mxu0 %v9748_v5  ;;  %v9838_v1 = vld [vmem:[%s14538_s1 + $0x424] ss:$8 sps:$4 sm:$0xff]   ;;  %v9839_v5 = vld [vmem:[%s14538_s1 + $0x520] ss:$8 sps:$4 sm:$0xff]  }
  0x77   : > { %3237 = vmatpush2.bf16.msra.mxu1 %v9743_v3  ;;  %3082 = vmatprep.mubr.bf16.mxu1 %v9758_v6  ;;  %v9848_v2 = vld [vmem:[%s11067_s26 + $0x1cc] ss:$72 sps:$4 sm:$0xff]   ;;  %v9844_v6 = vld [vmem:[%s11067_s26 + $0x1c0] ss:$72 sps:$4 sm:$0xff]  }
  0x78   : > { %3238 = vmatprep.subr.bf16.mxu1 %v9751_v7  ;;  %v9841_v3 = vld [vmem:[%s14538_s1 + $0x524] ss:$8 sps:$4 sm:$0xff]   ;;  %v9847_v7 = vld [vmem:[%s14538_s1 + $0x414] ss:$8 sps:$4 sm:$0xff]  }
  0x79   : > { %3126 = vmatpush2.bf16.msra.mxu0 %v9746_v8  ;;  %v9845_v8 = vld [vmem:[%s14538_s1 + $0x410] ss:$8 sps:$4 sm:$0xff]  }
  0x7a   : > { %3127 = vmatprep.subr.bf16.mxu0 %v9757_v11  ;;  %v9851_v11 = vld [vmem:[%s14538_s1 + $0x510] ss:$8 sps:$4 sm:$0xff]  }
  0x7b   : > { %3239 = vmatpush2.bf16.msra.mxu1 %v9749_v9  ;;  %v9850_v9 = vld [vmem:[%s11067_s26 + $0x1c8] ss:$72 sps:$4 sm:$0xff]  }
  0x7c   : > { %2970 = vmatmul.mubr.bf16.gmra.mxu0 %v9754_v10  ;;  %3240 = vmatprep.subr.bf16.mxu1 %v9763_v14  ;;  %v9853_v10 = vld [vmem:[%s14538_s1 + $0x514] ss:$8 sps:$4 sm:$0xff]  }
  0x7d   : > { %3128 = vmatpush2.bf16.msra.mxu0 %v9755_v12  ;;  %2979 = vmatprep.mubr.bf16.mxu0 %v9770_v16  ;;  %v9860_v12 = vld [vmem:[%s11067_s26 + $0x254] ss:$72 sps:$4 sm:$0xff]   ;;  %v9854_v16 = vld [vmem:[%s14538_s1 + $0x400] ss:$8 sps:$4 sm:$0xff]  }
  0x7e   : > { %3083 = vmatmul.mubr.bf16.gmra.mxu1 %v9760_v13  ;;  %3129 = vmatprep.subr.bf16.mxu0 %v9766_v17  ;;  %v9856_v13 = vld [vmem:[%s14538_s1 + $0x404] ss:$8 sps:$4 sm:$0xff]   ;;  %v9857_v17 = vld [vmem:[%s14538_s1 + $0x500] ss:$8 sps:$4 sm:$0xff]  }
  0x7f   : > { %3241 = vmatpush2.bf16.msra.mxu1 %v9761_v15  ;;  %3092 = vmatprep.mubr.bf16.mxu1 %v9776_v18  ;;  %v9866_v14 = vld [vmem:[%s11067_s26 + $0x25c] ss:$72 sps:$4 sm:$0xff]   ;;  %v9862_v18 = vld [vmem:[%s11067_s26 + $0x250] ss:$72 sps:$4 sm:$0xff]  }
  0x80   : > { %3242 = vmatprep.subr.bf16.mxu1 %v9769_v19  ;;  %v9859_v15 = vld [vmem:[%s14538_s1 + $0x504] ss:$8 sps:$4 sm:$0xff]   ;;  %v9865_v19 = vld [vmem:[%s14538_s1 + $0x4f4] ss:$8 sps:$4 sm:$0xff]  }
  0x81   : > { %3130 = vmatpush2.bf16.msra.mxu0 %v9764_v20  ;;  %v9863_v20 = vld [vmem:[%s14538_s1 + $0x4f0] ss:$8 sps:$4 sm:$0xff]  }
  0x82   : > { %3131 = vmatprep.subr.bf16.mxu0 %v9775_v23  ;;  %v9869_v23 = vld [vmem:[%s14538_s1 + $0x5f0] ss:$8 sps:$4 sm:$0xff]  }
  0x83   : > { %3243 = vmatpush2.bf16.msra.mxu1 %v9767_v21  ;;  %v9868_v21 = vld [vmem:[%s11067_s26 + $0x258] ss:$72 sps:$4 sm:$0xff]  }
  0x84   : > { %2980 = vmatmul.mubr.bf16.gmra.mxu0 %v9772_v22  ;;  %3244 = vmatprep.subr.bf16.mxu1 %v9781_v26  ;;  %v9871_v22 = vld [vmem:[%s14538_s1 + $0x5f4] ss:$8 sps:$4 sm:$0xff]  }
  0x85   : > { %3132 = vmatpush2.bf16.msra.mxu0 %v9773_v24  ;;  %3135 = vmatprep.mubr.bf16.mxu0 %v9790_v28  ;;  %v9878_v24 = vld [vmem:[%s11067_s26 + $0x2e4] ss:$72 sps:$4 sm:$0xff]   ;;  %v9872_v28 = vld [vmem:[%s14538_s1 + $0x4e0] ss:$8 sps:$4 sm:$0xff]  }
  0x86   : > { %3093 = vmatmul.mubr.bf16.gmra.mxu1 %v9778_v25  ;;  %3133 = vmatprep.subr.bf16.mxu0 %v9784_v29  ;;  %v9874_v25 = vld [vmem:[%s14538_s1 + $0x4e4] ss:$8 sps:$4 sm:$0xff]   ;;  %v9875_v29 = vld [vmem:[%s14538_s1 + $0x5e0] ss:$8 sps:$4 sm:$0xff]  }
  0x87   : > { %3245 = vmatpush2.bf16.msra.mxu1 %v9779_v27  ;;  %3248 = vmatprep.mubr.bf16.mxu1 %v9796_v30  ;;  %v9884_v26 = vld [vmem:[%s11067_s26 + $0x2ec] ss:$72 sps:$4 sm:$0xff]   ;;  %v9880_v30 = vld [vmem:[%s11067_s26 + $0x2e0] ss:$72 sps:$4 sm:$0xff]  }
  0x88   : > { %3246 = vmatprep.subr.bf16.mxu1 %v9787_v31  ;;  %v9877_v27 = vld [vmem:[%s14538_s1 + $0x5e4] ss:$8 sps:$4 sm:$0xff]   ;;  %v9883_v31 = vld [vmem:[%s14538_s1 + $0x4d4] ss:$8 sps:$4 sm:$0xff]  }
  0x89   : > { %3134 = vmatpush2.bf16.msra.mxu0 %v9782_v32  ;;  %v9881_v32 = vld [vmem:[%s14538_s1 + $0x4d0] ss:$8 sps:$4 sm:$0xff]  }
  0x8a   : > { %3329 = vmatprep.subr.bf16.mxu0 %v9793_v35  ;;  %v9887_v35 = vld [vmem:[%s14538_s1 + $0x5d0] ss:$8 sps:$4 sm:$0xff]  }
  0x8b   : > { %3247 = vmatpush2.bf16.msra.mxu1 %v9785_v33  ;;  %v9886_v33 = vld [vmem:[%s11067_s26 + $0x2e8] ss:$72 sps:$4 sm:$0xff]  }
  0x8c   : > { %3136 = vmatmul.mubr.bf16.vlgmr.msra.gmra.mxu0 %v9788_v34  ;;  %3442 = vmatprep.subr.bf16.mxu1 %v9799_v38  ;;  %v9889_v34 = vld [vmem:[%s14538_s1 + $0x5d4] ss:$8 sps:$4 sm:$0xff]  }
  0x8d   : > { %3330 = vmatpush1.bf16.msra.mxu0 %v9791_v36  ;;  %3145 = vmatprep.mubr.bf16.mxu0 %v9806_v40  ;;  %v9896_v36 = vld [vmem:[%s11067_s26 + $0x374] ss:$72 sps:$4 sm:$0xff]   ;;  %v9890_v40 = vld [vmem:[%s14538_s1 + $0x4c0] ss:$8 sps:$4 sm:$0xff]  }
  0x8e   : > { %3249 = vmatmul.mubr.bf16.vlgmr.msra.gmra.mxu1 %v9794_v37  ;;  %3331 = vmatprep.subr.bf16.mxu0 %v9802_v41  ;;  %v9892_v37 = vld [vmem:[%s14538_s1 + $0x4c4] ss:$8 sps:$4 sm:$0xff]   ;;  %v9893_v41 = vld [vmem:[%s14538_s1 + $0x5c0] ss:$8 sps:$4 sm:$0xff]  }
  0x8f   : > { %3443 = vmatpush1.bf16.msra.mxu1 %v9797_v39  ;;  %3258 = vmatprep.mubr.bf16.mxu1 %v9812_v42  ;;  %v9902_v38 = vld [vmem:[%s11067_s26 + $0x37c] ss:$72 sps:$4 sm:$0xff]   ;;  %v9898_v42 = vld [vmem:[%s11067_s26 + $0x370] ss:$72 sps:$4 sm:$0xff]  }
  0x90   : > { %3444 = vmatprep.subr.bf16.mxu1 %v9805_v43  ;;  %v9895_v39 = vld [vmem:[%s14538_s1 + $0x5c4] ss:$8 sps:$4 sm:$0xff]   ;;  %v9901_v43 = vld [vmem:[%s14538_s1 + $0x4b4] ss:$8 sps:$4 sm:$0xff]  }
  0x91   : > { %3332 = vmatpush1.bf16.msra.mxu0 %v9800_v44  ;;  %v9899_v44 = vld [vmem:[%s14538_s1 + $0x4b0] ss:$8 sps:$4 sm:$0xff]  }
  0x92   : > { %3333 = vmatprep.subr.bf16.mxu0 %v9811_v47  ;;  %v9905_v47 = vld [vmem:[%s14538_s1 + $0x5b0] ss:$8 sps:$4 sm:$0xff]  }
  0x93   : > { %3445 = vmatpush1.bf16.msra.mxu1 %v9803_v45  ;;  %v9904_v45 = vld [vmem:[%s11067_s26 + $0x378] ss:$72 sps:$4 sm:$0xff]  }
  0x94   : > { %3146 = vmatmul.mubr.bf16.gmra.mxu0 %v9808_v46  ;;  %3446 = vmatprep.subr.bf16.mxu1 %v9817_v50  ;;  %v9907_v46 = vld [vmem:[%s14538_s1 + $0x5b4] ss:$8 sps:$4 sm:$0xff]  }
  0x95   : > { %3334 = vmatpush1.bf16.msra.mxu0 %v9809_v48  ;;  %3155 = vmatprep.mubr.bf16.mxu0 %v9824_v52  ;;  %v9914_v48 = vld [vmem:[%s11067_s26 + $0x404] ss:$72 sps:$4 sm:$0xff]   ;;  %v9908_v52 = vld [vmem:[%s14538_s1 + $0x4a0] ss:$8 sps:$4 sm:$0xff]  }
  0x96   : > { %3259 = vmatmul.mubr.bf16.gmra.mxu1 %v9814_v49  ;;  %3335 = vmatprep.subr.bf16.mxu0 %v9820_v53  ;;  %v9910_v49 = vld [vmem:[%s14538_s1 + $0x4a4] ss:$8 sps:$4 sm:$0xff]   ;;  %v9911_v53 = vld [vmem:[%s14538_s1 + $0x5a0] ss:$8 sps:$4 sm:$0xff]  }
  0x97   : > { %3447 = vmatpush1.bf16.msra.mxu1 %v9815_v51  ;;  %3268 = vmatprep.mubr.bf16.mxu1 %v9830_v54  ;;  %v9920_v50 = vld [vmem:[%s11067_s26 + $0x40c] ss:$72 sps:$4 sm:$0xff]   ;;  %v9916_v54 = vld [vmem:[%s11067_s26 + $0x400] ss:$72 sps:$4 sm:$0xff]  }
  0x98   : > { %3448 = vmatprep.subr.bf16.mxu1 %v9823_v55  ;;  %v9913_v51 = vld [vmem:[%s14538_s1 + $0x5a4] ss:$8 sps:$4 sm:$0xff]   ;;  %v9919_v55 = vld [vmem:[%s14538_s1 + $0x494] ss:$8 sps:$4 sm:$0xff]  }
  0x99   : > { %3336 = vmatpush1.bf16.msra.mxu0 %v9818_v56  ;;  %v9917_v56 = vld [vmem:[%s14538_s1 + $0x490] ss:$8 sps:$4 sm:$0xff]  }
  0x9a   : > { %3337 = vmatprep.subr.bf16.mxu0 %v9829_v59  ;;  %v9923_v59 = vld [vmem:[%s14538_s1 + $0x590] ss:$8 sps:$4 sm:$0xff]  }
  0x9b   : > { %3449 = vmatpush1.bf16.msra.mxu1 %v9821_v57  ;;  %v9922_v57 = vld [vmem:[%s11067_s26 + $0x408] ss:$72 sps:$4 sm:$0xff]  }
  0x9c   : > { %3156 = vmatmul.mubr.bf16.gmra.mxu0 %v9826_v58  ;;  %3450 = vmatprep.subr.bf16.mxu1 %v9835_v62  ;;  %v9925_v58 = vld [vmem:[%s14538_s1 + $0x594] ss:$8 sps:$4 sm:$0xff]  }
  0x9d   : > { %3338 = vmatpush1.bf16.msra.mxu0 %v9827_v60  ;;  %3165 = vmatprep.mubr.bf16.mxu0 %v9842_v0  ;;  %v9934_v60 = vld [vmem:[%s11067_s26 + $0x24] ss:$72 sps:$4 sm:$0xff]   ;;  %v9926_v0 = vld [vmem:[%s14538_s1 + $0x480] ss:$8 sps:$4 sm:$0xff]  }
  0x9e   : > { %3269 = vmatmul.mubr.bf16.gmra.mxu1 %v9832_v61  ;;  %3339 = vmatprep.subr.bf16.mxu0 %v9838_v1  ;;  %v9928_v61 = vld [vmem:[%s14538_s1 + $0x484] ss:$8 sps:$4 sm:$0xff]   ;;  %v9929_v1 = vld [vmem:[%s14538_s1 + $0x580] ss:$8 sps:$4 sm:$0xff]  }
  0x9f   : > { %3451 = vmatpush1.bf16.msra.mxu1 %v9833_v63  ;;  %3278 = vmatprep.mubr.bf16.mxu1 %v9848_v2  ;;  %v9940_v62 = vld [vmem:[%s11067_s26 + $0x2c] ss:$72 sps:$4 sm:$0xff]   ;;  %v9932_v2 = vld [vmem:[%s11067_s26 + $0x20] ss:$72 sps:$4 sm:$0xff]  }
  0xa0   : > { %3452 = vmatprep.subr.bf16.mxu1 %v9841_v3  ;;  %v9931_v63 = vld [vmem:[%s14538_s1 + $0x584] ss:$8 sps:$4 sm:$0xff]   ;;  %v9937_v3 = vld [vmem:[%s14538_s1 + $0x674] ss:$8 sps:$4 sm:$0xff]  }
  0xa1   : > { %3340 = vmatpush1.bf16.msra.mxu0 %v9836_v4  ;;  %v9935_v4 = vld [vmem:[%s14538_s1 + $0x670] ss:$8 sps:$4 sm:$0xff]  }
  0xa2   : > { %3341 = vmatprep.subr.bf16.mxu0 %v9847_v7  ;;  %v9941_v7 = vld [vmem:[%s14538_s1 + $0x770] ss:$8 sps:$4 sm:$0xff]  }
  0xa3   : > { %3453 = vmatpush1.bf16.msra.mxu1 %v9839_v5  ;;  %v9938_v5 = vld [vmem:[%s11067_s26 + $0x28] ss:$72 sps:$4 sm:$0xff]  }
  0xa4   : > { %3166 = vmatmul.mubr.bf16.gmra.mxu0 %v9844_v6  ;;  %3454 = vmatprep.subr.bf16.mxu1 %v9853_v10  ;;  %v9943_v6 = vld [vmem:[%s14538_s1 + $0x774] ss:$8 sps:$4 sm:$0xff]  }
  0xa5   : > { %3342 = vmatpush1.bf16.msra.mxu0 %v9845_v8  ;;  %3175 = vmatprep.mubr.bf16.mxu0 %v9860_v12  ;;  %v9950_v8 = vld [vmem:[%s11067_s26 + $0xb4] ss:$72 sps:$4 sm:$0xff]   ;;  %v9944_v12 = vld [vmem:[%s14538_s1 + $0x660] ss:$8 sps:$4 sm:$0xff]  }
  0xa6   : > { %3279 = vmatmul.mubr.bf16.gmra.mxu1 %v9850_v9  ;;  %3343 = vmatprep.subr.bf16.mxu0 %v9856_v13  ;;  %v9946_v9 = vld [vmem:[%s14538_s1 + $0x664] ss:$8 sps:$4 sm:$0xff]   ;;  %v9947_v13 = vld [vmem:[%s14538_s1 + $0x760] ss:$8 sps:$4 sm:$0xff]  }
  0xa7   : > { %3455 = vmatpush1.bf16.msra.mxu1 %v9851_v11  ;;  %3288 = vmatprep.mubr.bf16.mxu1 %v9866_v14  ;;  %v9956_v10 = vld [vmem:[%s11067_s26 + $0xbc] ss:$72 sps:$4 sm:$0xff]   ;;  %v9952_v14 = vld [vmem:[%s11067_s26 + $0xb0] ss:$72 sps:$4 sm:$0xff]  }
  0xa8   : > { %3456 = vmatprep.subr.bf16.mxu1 %v9859_v15  ;;  %v9949_v11 = vld [vmem:[%s14538_s1 + $0x764] ss:$8 sps:$4 sm:$0xff]   ;;  %v9955_v15 = vld [vmem:[%s14538_s1 + $0x654] ss:$8 sps:$4 sm:$0xff]  }
  0xa9   : > { %3344 = vmatpush1.bf16.msra.mxu0 %v9854_v16  ;;  %v9953_v16 = vld [vmem:[%s14538_s1 + $0x650] ss:$8 sps:$4 sm:$0xff]  }
  0xaa   : > { %3345 = vmatprep.subr.bf16.mxu0 %v9865_v19  ;;  %v9959_v19 = vld [vmem:[%s14538_s1 + $0x750] ss:$8 sps:$4 sm:$0xff]  }
  0xab   : > { %3457 = vmatpush1.bf16.msra.mxu1 %v9857_v17  ;;  %v9958_v17 = vld [vmem:[%s11067_s26 + $0xb8] ss:$72 sps:$4 sm:$0xff]  }
  0xac   : > { %3176 = vmatmul.mubr.bf16.gmra.mxu0 %v9862_v18  ;;  %3458 = vmatprep.subr.bf16.mxu1 %v9871_v22  ;;  %v9961_v18 = vld [vmem:[%s14538_s1 + $0x754] ss:$8 sps:$4 sm:$0xff]  }
  0xad   : > { %3346 = vmatpush2.bf16.msra.mxu0 %v9863_v20  ;;  %3185 = vmatprep.mubr.bf16.mxu0 %v9878_v24  ;;  %v9968_v20 = vld [vmem:[%s11067_s26 + $0x144] ss:$72 sps:$4 sm:$0xff]   ;;  %v9962_v24 = vld [vmem:[%s14538_s1 + $0x640] ss:$8 sps:$4 sm:$0xff]  }
  0xae   : > { %3289 = vmatmul.mubr.bf16.gmra.mxu1 %v9868_v21  ;;  %3347 = vmatprep.subr.bf16.mxu0 %v9874_v25  ;;  %v9964_v21 = vld [vmem:[%s14538_s1 + $0x644] ss:$8 sps:$4 sm:$0xff]   ;;  %v9965_v25 = vld [vmem:[%s14538_s1 + $0x740] ss:$8 sps:$4 sm:$0xff]  }
  0xaf   : > { %3459 = vmatpush2.bf16.msra.mxu1 %v9869_v23  ;;  %3298 = vmatprep.mubr.bf16.mxu1 %v9884_v26  ;;  %v9974_v22 = vld [vmem:[%s11067_s26 + $0x14c] ss:$72 sps:$4 sm:$0xff]   ;;  %v9970_v26 = vld [vmem:[%s11067_s26 + $0x140] ss:$72 sps:$4 sm:$0xff]  }
  0xb0   : > { %3460 = vmatprep.subr.bf16.mxu1 %v9877_v27  ;;  %v9967_v23 = vld [vmem:[%s14538_s1 + $0x744] ss:$8 sps:$4 sm:$0xff]   ;;  %v9973_v27 = vld [vmem:[%s14538_s1 + $0x634] ss:$8 sps:$4 sm:$0xff]  }
  0xb1   : > { %3348 = vmatpush2.bf16.msra.mxu0 %v9872_v28  ;;  %v9971_v28 = vld [vmem:[%s14538_s1 + $0x630] ss:$8 sps:$4 sm:$0xff]  }
  0xb2   : > { %3349 = vmatprep.subr.bf16.mxu0 %v9883_v31  ;;  %v9977_v31 = vld [vmem:[%s14538_s1 + $0x730] ss:$8 sps:$4 sm:$0xff]  }
  0xb3   : > { %3461 = vmatpush2.bf16.msra.mxu1 %v9875_v29  ;;  %v9976_v29 = vld [vmem:[%s11067_s26 + $0x148] ss:$72 sps:$4 sm:$0xff]  }
  0xb4   : > { %3186 = vmatmul.mubr.bf16.gmra.mxu0 %v9880_v30  ;;  %3462 = vmatprep.subr.bf16.mxu1 %v9889_v34  ;;  %v9979_v30 = vld [vmem:[%s14538_s1 + $0x734] ss:$8 sps:$4 sm:$0xff]  }
  0xb5   : > { %3350 = vmatpush2.bf16.msra.mxu0 %v9881_v32  ;;  %3195 = vmatprep.mubr.bf16.mxu0 %v9896_v36  ;;  %v9986_v32 = vld [vmem:[%s11067_s26 + $0x1d4] ss:$72 sps:$4 sm:$0xff]   ;;  %v9980_v36 = vld [vmem:[%s14538_s1 + $0x620] ss:$8 sps:$4 sm:$0xff]  }
  0xb6   : > { %3299 = vmatmul.mubr.bf16.gmra.mxu1 %v9886_v33  ;;  %3351 = vmatprep.subr.bf16.mxu0 %v9892_v37  ;;  %v9982_v33 = vld [vmem:[%s14538_s1 + $0x624] ss:$8 sps:$4 sm:$0xff]   ;;  %v9983_v37 = vld [vmem:[%s14538_s1 + $0x720] ss:$8 sps:$4 sm:$0xff]  }
  0xb7   : > { %3463 = vmatpush2.bf16.msra.mxu1 %v9887_v35  ;;  %3308 = vmatprep.mubr.bf16.mxu1 %v9902_v38  ;;  %v9992_v34 = vld [vmem:[%s11067_s26 + $0x1dc] ss:$72 sps:$4 sm:$0xff]   ;;  %v9988_v38 = vld [vmem:[%s11067_s26 + $0x1d0] ss:$72 sps:$4 sm:$0xff]  }
  0xb8   : > { %3464 = vmatprep.subr.bf16.mxu1 %v9895_v39  ;;  %v9985_v35 = vld [vmem:[%s14538_s1 + $0x724] ss:$8 sps:$4 sm:$0xff]   ;;  %v9991_v39 = vld [vmem:[%s14538_s1 + $0x614] ss:$8 sps:$4 sm:$0xff]  }
  0xb9   : > { %3352 = vmatpush2.bf16.msra.mxu0 %v9890_v40  ;;  %v9989_v40 = vld [vmem:[%s14538_s1 + $0x610] ss:$8 sps:$4 sm:$0xff]  }
  0xba   : > { %3353 = vmatprep.subr.bf16.mxu0 %v9901_v43  ;;  %v9995_v43 = vld [vmem:[%s14538_s1 + $0x710] ss:$8 sps:$4 sm:$0xff]  }
  0xbb   : > { %3465 = vmatpush2.bf16.msra.mxu1 %v9893_v41  ;;  %v9994_v41 = vld [vmem:[%s11067_s26 + $0x1d8] ss:$72 sps:$4 sm:$0xff]  }
  0xbc   : > { %3196 = vmatmul.mubr.bf16.gmra.mxu0 %v9898_v42  ;;  %3466 = vmatprep.subr.bf16.mxu1 %v9907_v46  ;;  %v9997_v42 = vld [vmem:[%s14538_s1 + $0x714] ss:$8 sps:$4 sm:$0xff]  }
  0xbd   : > { %3354 = vmatpush2.bf16.msra.mxu0 %v9899_v44  ;;  %3205 = vmatprep.mubr.bf16.mxu0 %v9914_v48  ;;  %v10004_v44 = vld [vmem:[%s11067_s26 + $0x264] ss:$72 sps:$4 sm:$0xff]   ;;  %v9998_v48 = vld [vmem:[%s14538_s1 + $0x600] ss:$8 sps:$4 sm:$0xff]  }
  0xbe   : > { %3309 = vmatmul.mubr.bf16.gmra.mxu1 %v9904_v45  ;;  %3355 = vmatprep.subr.bf16.mxu0 %v9910_v49  ;;  %v10000_v45 = vld [vmem:[%s14538_s1 + $0x604] ss:$8 sps:$4 sm:$0xff]   ;;  %v10001_v49 = vld [vmem:[%s14538_s1 + $0x700] ss:$8 sps:$4 sm:$0xff]  }
  0xbf   : > { %3467 = vmatpush2.bf16.msra.mxu1 %v9905_v47  ;;  %3318 = vmatprep.mubr.bf16.mxu1 %v9920_v50  ;;  %v10010_v46 = vld [vmem:[%s11067_s26 + $0x26c] ss:$72 sps:$4 sm:$0xff]   ;;  %v10006_v50 = vld [vmem:[%s11067_s26 + $0x260] ss:$72 sps:$4 sm:$0xff]  }
  0xc0   : > { %3468 = vmatprep.subr.bf16.mxu1 %v9913_v51  ;;  %v10003_v47 = vld [vmem:[%s14538_s1 + $0x704] ss:$8 sps:$4 sm:$0xff]   ;;  %v10009_v51 = vld [vmem:[%s14538_s1 + $0x6f4] ss:$8 sps:$4 sm:$0xff]  }
  0xc1   : > { %3356 = vmatpush2.bf16.msra.mxu0 %v9908_v52  ;;  %v10007_v52 = vld [vmem:[%s14538_s1 + $0x6f0] ss:$8 sps:$4 sm:$0xff]  }
  0xc2   : > { %3357 = vmatprep.subr.bf16.mxu0 %v9919_v55  ;;  %v10013_v55 = vld [vmem:[%s14538_s1 + $0x7f0] ss:$8 sps:$4 sm:$0xff]  }
  0xc3   : > { %3469 = vmatpush2.bf16.msra.mxu1 %v9911_v53  ;;  %v10012_v53 = vld [vmem:[%s11067_s26 + $0x268] ss:$72 sps:$4 sm:$0xff]  }
  0xc4   : > { %3206 = vmatmul.mubr.bf16.gmra.mxu0 %v9916_v54  ;;  %3470 = vmatprep.subr.bf16.mxu1 %v9925_v58  ;;  %v10015_v54 = vld [vmem:[%s14538_s1 + $0x7f4] ss:$8 sps:$4 sm:$0xff]  }
  0xc5   : > { %3358 = vmatpush2.bf16.msra.mxu0 %v9917_v56  ;;  %3361 = vmatprep.mubr.bf16.mxu0 %v9934_v60  ;;  %v10022_v56 = vld [vmem:[%s11067_s26 + $0x2f4] ss:$72 sps:$4 sm:$0xff]   ;;  %v10016_v60 = vld [vmem:[%s14538_s1 + $0x6e0] ss:$8 sps:$4 sm:$0xff]  }
  0xc6   : > { %3319 = vmatmul.mubr.bf16.gmra.mxu1 %v9922_v57  ;;  %3359 = vmatprep.subr.bf16.mxu0 %v9928_v61  ;;  %v10018_v57 = vld [vmem:[%s14538_s1 + $0x6e4] ss:$8 sps:$4 sm:$0xff]   ;;  %v10019_v61 = vld [vmem:[%s14538_s1 + $0x7e0] ss:$8 sps:$4 sm:$0xff]  }
  0xc7   : > { %3471 = vmatpush2.bf16.msra.mxu1 %v9923_v59  ;;  %3474 = vmatprep.mubr.bf16.mxu1 %v9940_v62  ;;  %v10028_v58 = vld [vmem:[%s11067_s26 + $0x2fc] ss:$72 sps:$4 sm:$0xff]   ;;  %v10024_v62 = vld [vmem:[%s11067_s26 + $0x2f0] ss:$72 sps:$4 sm:$0xff]  }
  0xc8   : > { %3472 = vmatprep.subr.bf16.mxu1 %v9931_v63  ;;  %v10021_v59 = vld [vmem:[%s14538_s1 + $0x7e4] ss:$8 sps:$4 sm:$0xff]   ;;  %v10027_v63 = vld [vmem:[%s14538_s1 + $0x6d4] ss:$8 sps:$4 sm:$0xff]  }
  0xc9   : > { %3360 = vmatpush2.bf16.msra.mxu0 %v9926_v0  ;;  %v10025_v0 = vld [vmem:[%s14538_s1 + $0x6d0] ss:$8 sps:$4 sm:$0xff]  }
  0xca   : > { %3555 = vmatprep.subr.bf16.mxu0 %v9937_v3  ;;  %v10031_v3 = vld [vmem:[%s14538_s1 + $0x7d0] ss:$8 sps:$4 sm:$0xff]  }
  0xcb   : > { %3473 = vmatpush2.bf16.msra.mxu1 %v9929_v1  ;;  %v10030_v1 = vld [vmem:[%s11067_s26 + $0x2f8] ss:$72 sps:$4 sm:$0xff]  }
  0xcc   : > { %3362 = vmatmul.mubr.bf16.vlgmr.msra.gmra.mxu0 %v9932_v2  ;;  %3668 = vmatprep.subr.bf16.mxu1 %v9943_v6  ;;  %v10033_v2 = vld [vmem:[%s14538_s1 + $0x7d4] ss:$8 sps:$4 sm:$0xff]  }
  0xcd   : > { %3556 = vmatpush1.bf16.msra.mxu0 %v9935_v4  ;;  %3371 = vmatprep.mubr.bf16.mxu0 %v9950_v8  ;;  %v10040_v4 = vld [vmem:[%s11067_s26 + $0x384] ss:$72 sps:$4 sm:$0xff]   ;;  %v10034_v8 = vld [vmem:[%s14538_s1 + $0x6c0] ss:$8 sps:$4 sm:$0xff]  }
  0xce   : > { %3475 = vmatmul.mubr.bf16.vlgmr.msra.gmra.mxu1 %v9938_v5  ;;  %3557 = vmatprep.subr.bf16.mxu0 %v9946_v9  ;;  %v10036_v5 = vld [vmem:[%s14538_s1 + $0x6c4] ss:$8 sps:$4 sm:$0xff]   ;;  %v10037_v9 = vld [vmem:[%s14538_s1 + $0x7c0] ss:$8 sps:$4 sm:$0xff]  }
  0xcf   : > { %3669 = vmatpush1.bf16.msra.mxu1 %v9941_v7  ;;  %3484 = vmatprep.mubr.bf16.mxu1 %v9956_v10  ;;  %v10046_v6 = vld [vmem:[%s11067_s26 + $0x38c] ss:$72 sps:$4 sm:$0xff]  }
  0xd0   : > { %3670 = vmatprep.subr.bf16.mxu1 %v9949_v11  ;;  %v10039_v7 = vld [vmem:[%s14538_s1 + $0x7c4] ss:$8 sps:$4 sm:$0xff]   ;;  %v10045_v10 = vld [vmem:[%s14538_s1 + $0x6b4] ss:$8 sps:$4 sm:$0xff]   ;;  %v10042_v11 = vld [vmem:[%s11067_s26 + $0x380] ss:$72 sps:$4 sm:$0xff]  }
  0xd1   : > { %3558 = vmatpush1.bf16.msra.mxu0 %v9944_v12  ;;  %v10043_v12 = vld [vmem:[%s14538_s1 + $0x6b0] ss:$8 sps:$4 sm:$0xff]  }
  0xd2   : > { %3559 = vmatprep.subr.bf16.mxu0 %v9955_v15  ;;  %v10058_v15 = vld [vmem:[%s11067_s26 + $0x414] ss:$72 sps:$4 sm:$0xff]  }
  0xd3   : > { %3671 = vmatpush1.bf16.msra.mxu1 %v9947_v13  ;;  %v10048_v13 = vld [vmem:[%s11067_s26 + $0x388] ss:$72 sps:$4 sm:$0xff]  }
  0xd4   : > { %3372 = vmatmul.mubr.bf16.gmra.mxu0 %v9952_v14  ;;  %3672 = vmatprep.subr.bf16.mxu1 %v9961_v18  ;;  %v10051_v14 = vld [vmem:[%s14538_s1 + $0x7b4] ss:$8 sps:$4 sm:$0xff]  }
  0xd5   : > { %3560 = vmatpush1.bf16.msra.mxu0 %v9953_v16  ;;  %3381 = vmatprep.mubr.bf16.mxu0 %v9968_v20  ;;  %v10054_v16 = vld [vmem:[%s14538_s1 + $0x6a4] ss:$8 sps:$4 sm:$0xff]  }
  0xd6   : > { %3485 = vmatmul.mubr.bf16.gmra.mxu1 %v9958_v17  ;;  %3561 = vmatprep.subr.bf16.mxu0 %v9964_v21  ;;  %v10049_v17 = vld [vmem:[%s14538_s1 + $0x7b0] ss:$8 sps:$4 sm:$0xff]   ;;  %v10064_v18 = vld [vmem:[%s11067_s26 + $0x41c] ss:$72 sps:$4 sm:$0xff]   ;;  %v10055_v21 = vld [vmem:[%s14538_s1 + $0x7a0] ss:$8 sps:$4 sm:$0xff]  }
  0xd7   : > { %3673 = vmatpush1.bf16.msra.mxu1 %v9959_v19  ;;  %3494 = vmatprep.mubr.bf16.mxu1 %v9974_v22  ;;  %v10052_v19 = vld [vmem:[%s14538_s1 + $0x6a0] ss:$8 sps:$4 sm:$0xff]   ;;  %v10057_v20 = vld [vmem:[%s14538_s1 + $0x7a4] ss:$8 sps:$4 sm:$0xff]   ;;  %v707_v22 = vlaneseq }
  0xd8   : > { %3674 = vmatprep.subr.bf16.mxu1 %v9967_v23  ;;  %v10063_v23 = vld [vmem:[%s14538_s1 + $0x694] ss:$8 sps:$4 sm:$0xff]  }
  0xd9   : > { %3562 = vmatpush1.bf16.msra.mxu0 %v9962_v24  ;;  %v10060_v24 = vld [vmem:[%s11067_s26 + $0x410] ss:$72 sps:$4 sm:$0xff]  }
  0xda   : > { %3563 = vmatprep.subr.bf16.mxu0 %v9973_v27  ;;  %v10069_v27 = vld [vmem:[%s14538_s1 + $0x794] ss:$8 sps:$4 sm:$0xff]  }
  0xdb   : > { %3675 = vmatpush1.bf16.msra.mxu1 %v9965_v25  ;;  %v10061_v25 = vld [vmem:[%s14538_s1 + $0x690] ss:$8 sps:$4 sm:$0xff]  }
  0xdc   : > { %3382 = vmatmul.mubr.bf16.gmra.mxu0 %v9970_v26  ;;  %3676 = vmatprep.subr.bf16.mxu1 %v9979_v30  ;;  %v10066_v26 = vld [vmem:[%s11067_s26 + $0x418] ss:$72 sps:$4 sm:$0xff]   ;;  %v10072_v30 = vld [vmem:[%s14538_s1 + $0x684] ss:$8 sps:$4 sm:$0xff]  }
  0xdd   : > { %3564 = vmatpush1.bf16.msra.mxu0 %v9971_v28  ;;  %3391 = vmatprep.mubr.bf16.mxu0 %v9986_v32  ;;  %v10078_v28 = vld [vmem:[%s11067_s26 + $0x34] ss:$72 sps:$4 sm:$0xff]  }
  0xde   : > { %3495 = vmatmul.mubr.bf16.gmra.mxu1 %v9976_v29  ;;  %3565 = vmatprep.subr.bf16.mxu0 %v9982_v33  ;;  %v11787_v29 = vshrl.u32 %v707_v22, 7  ;;  %v10084_v32 = vld [vmem:[%s11067_s26 + $0x3c] ss:$72 sps:$4 sm:$0xff]   ;;  %v10070_v33 = vld [vmem:[%s14538_s1 + $0x680] ss:$8 sps:$4 sm:$0xff]  }
  0xdf   : > { %3677 = vmatpush1.bf16.msra.mxu1 %v9977_v31  ;;  %3504 = vmatprep.mubr.bf16.mxu1 %v9992_v34  ;;  %v10067_v31 = vld [vmem:[%s14538_s1 + $0x790] ss:$8 sps:$4 sm:$0xff]   ;;  %v10075_v34 = vld [vmem:[%s14538_s1 + $0x784] ss:$8 sps:$4 sm:$0xff]  }
  0xe0   : > { %3678 = vmatprep.subr.bf16.mxu1 %v9985_v35  ;;  %14548 = vst [vmem:[#allocation2_spill] sm:$0xff] %v11787_v29  ;;  %v705_v35 = vld [vmem:[%s14539_s2] sm:$0x3] }
  0xe1   : > { %3566 = vmatpush1.bf16.msra.mxu0 %v9980_v36  ;;  %v14545_v36 = vsub.s32 0, %v11787_v29 }
  0xe2   : > { %3567 = vmatprep.subr.bf16.mxu0 %v9991_v39  ;;  %v10076_v39 = vld [vmem:[%s11067_s26 + $0x30] ss:$72 sps:$4 sm:$0xff]  }
  0xe3   : > { %3679 = vmatpush1.bf16.msra.mxu1 %v9983_v37  ;;  %v10081_v37 = vld [vmem:[%s14538_s1 + $0x874] ss:$8 sps:$4 sm:$0xff]  }
  0xe4   : > { %3392 = vmatmul.mubr.bf16.gmra.mxu0 %v9988_v38  ;;  %3680 = vmatprep.subr.bf16.mxu1 %v9997_v42  ;;  %v10073_v38 = vld [vmem:[%s14538_s1 + $0x780] ss:$8 sps:$4 sm:$0xff]  }
  0xe5   : > { %3568 = vmatpush1.bf16.msra.mxu0 %v9989_v40  ;;  %3401 = vmatprep.mubr.bf16.mxu0 %v10004_v44  ;;  %v14544_v40 = vsub.s32 1, %v11787_v29  ;;  %v10082_v42 = vld [vmem:[%s11067_s26 + $0x38] ss:$72 sps:$4 sm:$0xff]   ;;  %v10088_v44 = vld [vmem:[%s11067_s26 + $0xc4] ss:$72 sps:$4 sm:$0xff]  }
  0xe6   : > { %3505 = vmatmul.mubr.bf16.gmra.mxu1 %v9994_v41  ;;  %3569 = vmatprep.subr.bf16.mxu0 %v10000_v45  ;;  %v10079_v41 = vld [vmem:[%s14538_s1 + $0x870] ss:$8 sps:$4 sm:$0xff]   ;;  %v10087_v45 = vld [vmem:[%s14538_s1 + $0x864] ss:$8 sps:$4 sm:$0xff]  }
  0xe7   : > { %3681 = vmatpush1.bf16.msra.mxu1 %v9995_v43  ;;  %3514 = vmatprep.mubr.bf16.mxu1 %v10010_v46  ;;  %v11820_v43 = vrot.slane %v705_v35, %v14545_v36  ;;  %v11828_v46 = vrot.slane %v705_v35, %v14544_v40  ;;  %v10109_v35 = vld [vmem:[%s14538_s1 + $0x820] ss:$8 sps:$4 sm:$0xff]  }
  0xe8   : > { %3682 = vmatprep.subr.bf16.mxu1 %v10003_v47  ;;  %v10094_v47 = vld [vmem:[%s11067_s26 + $0xcc] ss:$72 sps:$4 sm:$0xff]  }
  0xe9   : > { %3570 = vmatpush1.bf16.msra.mxu0 %v9998_v48 }
  0xea   : > { %3571 = vmatprep.subr.bf16.mxu0 %v10009_v51 }
  0xeb   : > { %3683 = vmatpush1.bf16.msra.mxu1 %v10001_v49 }
  0xec   : > { %3402 = vmatmul.mubr.bf16.gmra.mxu0 %v10006_v50  ;;  %3684 = vmatprep.subr.bf16.mxu1 %v10015_v54  ;;  %v10085_v50 = vld [vmem:[%s14538_s1 + $0x860] ss:$8 sps:$4 sm:$0xff]  }
  0xed   : > { %3572 = vmatpush2.bf16.msra.mxu0 %v10007_v52  ;;  %3411 = vmatprep.mubr.bf16.mxu0 %v10022_v56  ;;  %v10090_v56 = vld [vmem:[%s11067_s26 + $0xc0] ss:$72 sps:$4 sm:$0xff]  }
  0xee   : > { %3515 = vmatmul.mubr.bf16.gmra.mxu1 %v10012_v53  ;;  %3573 = vmatprep.subr.bf16.mxu0 %v10018_v57  ;;  %v10093_v53 = vld [vmem:[%s14538_s1 + $0x854] ss:$8 sps:$4 sm:$0xff]  }
  0xef   : > { %3685 = vmatpush2.bf16.msra.mxu1 %v10013_v55  ;;  %3524 = vmatprep.mubr.bf16.mxu1 %v10028_v58 }
  0xf0   : > { %3686 = vmatprep.subr.bf16.mxu1 %v10021_v59  ;;  %v10091_v59 = vld [vmem:[%s14538_s1 + $0x850] ss:$8 sps:$4 sm:$0xff]  }
  0xf1   : > { %3574 = vmatpush2.bf16.msra.mxu0 %v10016_v60  ;;  %v10096_v60 = vld [vmem:[%s11067_s26 + $0xc8] ss:$72 sps:$4 sm:$0xff]  }
  0xf2   : > { %3575 = vmatprep.subr.bf16.mxu0 %v10027_v63  ;;  %v10100_v63 = vld [vmem:[%s11067_s26 + $0x154] ss:$72 sps:$4 sm:$0xff]  }
  0xf3   : > { %3687 = vmatpush2.bf16.msra.mxu1 %v10019_v61 }
  0xf4   : > { %3412 = vmatmul.mubr.bf16.gmra.mxu0 %v10024_v62  ;;  %3688 = vmatprep.subr.bf16.mxu1 %v10033_v2  ;;  %v10099_v2 = vld [vmem:[%s14538_s1 + $0x844] ss:$8 sps:$4 sm:$0xff]  }
  0xf5   : > { %3576 = vmatpush2.bf16.msra.mxu0 %v10025_v0  ;;  %3421 = vmatprep.mubr.bf16.mxu0 %v10040_v4 }
  0xf6   : > { %3525 = vmatmul.mubr.bf16.gmra.mxu1 %v10030_v1  ;;  %3577 = vmatprep.subr.bf16.mxu0 %v10036_v5  ;;  %v10106_v5 = vld [vmem:[%s11067_s26 + $0x15c] ss:$72 sps:$4 sm:$0xff]  }
  0xf7   : > { %3689 = vmatpush2.bf16.msra.mxu1 %v10031_v3  ;;  %3534 = vmatprep.mubr.bf16.mxu1 %v10046_v6 }
  0xf8   : > { %3690 = vmatprep.subr.bf16.mxu1 %v10039_v7 }
  0xf9   : > { %3578 = vmatpush2.bf16.msra.mxu0 %v10034_v8 }
  0xfa   : > { %3579 = vmatprep.subr.bf16.mxu0 %v10045_v10  ;;  %v10097_v10 = vld [vmem:[%s14538_s1 + $0x840] ss:$8 sps:$4 sm:$0xff]  }
  0xfb   : > { %3691 = vmatpush2.bf16.msra.mxu1 %v10037_v9 }
  0xfc   : > { %3422 = vmatmul.mubr.bf16.gmra.mxu0 %v10042_v11  ;;  %3692 = vmatprep.subr.bf16.mxu1 %v10051_v14 }
  0xfd   : > { %3580 = vmatpush2.bf16.msra.mxu0 %v10043_v12  ;;  %3431 = vmatprep.mubr.bf16.mxu0 %v10058_v15 }
  0xfe   : > { %3535 = vmatmul.mubr.bf16.gmra.mxu1 %v10048_v13  ;;  %3581 = vmatprep.subr.bf16.mxu0 %v10054_v16  ;;  %v10105_v13 = vld [vmem:[%s14538_s1 + $0x834] ss:$8 sps:$4 sm:$0xff]   ;;  %v10102_v16 = vld [vmem:[%s11067_s26 + $0x150] ss:$72 sps:$4 sm:$0xff]  }
  0xff   : > { %3693 = vmatpush2.bf16.msra.mxu1 %v10049_v17  ;;  %3544 = vmatprep.mubr.bf16.mxu1 %v10064_v18 }
 0x100   : > { %3694 = vmatprep.subr.bf16.mxu1 %v10057_v20  ;;  %v10108_v20 = vld [vmem:[%s11067_s26 + $0x158] ss:$72 sps:$4 sm:$0xff]  }
 0x101   : > { %3582 = vmatpush2.bf16.msra.mxu0 %v10052_v19  ;;  %v10103_v19 = vld [vmem:[%s14538_s1 + $0x830] ss:$8 sps:$4 sm:$0xff]  }
 0x102   : > { %3583 = vmatprep.subr.bf16.mxu0 %v10063_v23  ;;  %v10112_v23 = vld [vmem:[%s11067_s26 + $0x1e4] ss:$72 sps:$4 sm:$0xff]  }
 0x103   : > { %3695 = vmatpush2.bf16.msra.mxu1 %v10055_v21 }
 0x104   : > { %3432 = vmatmul.mubr.bf16.gmra.mxu0 %v10060_v24  ;;  %3696 = vmatprep.subr.bf16.mxu1 %v10069_v27 }
 0x105   : > { %3584 = vmatpush2.bf16.msra.mxu0 %v10061_v25  ;;  %3587 = vmatprep.mubr.bf16.mxu0 %v10078_v28 }
 0x106   : > { %3545 = vmatmul.mubr.bf16.gmra.mxu1 %v10066_v26  ;;  %3585 = vmatprep.subr.bf16.mxu0 %v10072_v30  ;;  %v10111_v26 = vld [vmem:[%s14538_s1 + $0x824] ss:$8 sps:$4 sm:$0xff]  }
 0x107   : > { %3697 = vmatpush2.bf16.msra.mxu1 %v10067_v31  ;;  %3700 = vmatprep.mubr.bf16.mxu1 %v10084_v32  ;;  %v10118_v30 = vld [vmem:[%s11067_s26 + $0x1ec] ss:$72 sps:$4 sm:$0xff]  }
 0x108   : > { %3698 = vmatprep.subr.bf16.mxu1 %v10075_v34 }
 0x109   : > { %3586 = vmatpush2.bf16.msra.mxu0 %v10070_v33 }
 0x10a   : > { %3781 = vmatprep.subr.bf16.mxu0 %v10081_v37 }
 0x10b   : > { %3699 = vmatpush2.bf16.msra.mxu1 %v10073_v38 }
 0x10c   : > { %v2911_v48 = vpop.f32.mrf.mxu0  ;;  %3588 = vmatmul.mubr.bf16.vlgmr.msra.gmra.mxu0 %v10076_v39  ;;  %v10117_v39 = vld [vmem:[%s14538_s1 + $0x814] ss:$8 sps:$4 sm:$0xff]  }
 0x10d   : > { %v2912_v49 = vadd.f32 %v2911_v48, %v11820_v43  ;;  %3782 = vmatpush1.bf16.msra.mxu0 %v10079_v41  ;;  %3597 = vmatprep.mubr.bf16.mxu0 %v10088_v44  ;;  %v10114_v44 = vld [vmem:[%s11067_s26 + $0x1e0] ss:$72 sps:$4 sm:$0xff]   ;;  %v10115_v48 = vld [vmem:[%s14538_s1 + $0x810] ss:$8 sps:$4 sm:$0xff]  }
 0x10e   : > { %v2913_v51 = vpop.f32.mrf.mxu0  ;;  %v3024_v52 = vpop.f32.mrf.mxu1  ;;  %3701 = vmatmul.mubr.bf16.vlgmr.msra.gmra.mxu1 %v10082_v42  ;;  %3783 = vmatprep.subr.bf16.mxu0 %v10087_v45 }
 0x10f   : > { %v2914_v54 = vadd.f32 %v2913_v51, %v11828_v46  ;;  %v11839_v55 = vadd.f32 %v3024_v52, %v2912_v49  ;;  %3710 = vmatprep.mubr.bf16.mxu1 %v10094_v47  ;;  %v10120_v49 = vld [vmem:[%s11067_s26 + $0x1e8] ss:$72 sps:$4 sm:$0xff]   ;;  %v10126_v52 = vld [vmem:[%s11067_s26 + $0x274] ss:$72 sps:$4 sm:$0xff]  }
 0x110   : > { %v2915_v57 = vpop.f32.mrf.mxu0  ;;  %v3026_v58 = vpop.f32.mrf.mxu1 }
 0x111   : > { %v2916_v61 = vadd.f32 %v2915_v57, %v11820_v43  ;;  %v11847_v62 = vadd.f32 %v3026_v58, %v2914_v54  ;;  %3784 = vmatpush1.bf16.msra.mxu0 %v10085_v50 }
 0x112   : > { %v2917_v0 = vpop.f32.mrf.mxu0  ;;  %v3028_v1 = vpop.f32.mrf.mxu1  ;;  %3785 = vmatprep.subr.bf16.mxu0 %v10093_v53 }
 0x113   : > { %v2918_v3 = vadd.f32 %v2917_v0, %v11828_v46  ;;  %v11854_v4 = vadd.f32 %v3028_v1, %v2916_v61  ;;  %v10121_v1 = vld [vmem:[%s14538_s1 + $0x800] ss:$8 sps:$4 sm:$0xff]  }
 0x114   : > { %v2921_v6 = vpop.f32.mrf.mxu0  ;;  %v3030_v7 = vpop.f32.mrf.mxu1  ;;  %3598 = vmatmul.mubr.bf16.gmra.mxu0 %v10090_v56  ;;  %v10123_v56 = vld [vmem:[%s14538_s1 + $0x804] ss:$8 sps:$4 sm:$0xff]  }
 0x115   : > { %v2922_v8 = vadd.f32 %v2921_v6, %v11820_v43  ;;  %v11858_v9 = vadd.f32 %v3030_v7, %v2918_v3  ;;  %3786 = vmatpush1.bf16.msra.mxu0 %v10091_v59  ;;  %3607 = vmatprep.mubr.bf16.mxu0 %v10100_v63  ;;  %v10132_v59 = vld [vmem:[%s11067_s26 + $0x27c] ss:$72 sps:$4 sm:$0xff]  }
 0x116   : > { %v2923_v11 = vpop.f32.mrf.mxu0  ;;  %v3034_v12 = vpop.f32.mrf.mxu1  ;;  %3711 = vmatmul.mubr.bf16.gmra.mxu1 %v10096_v60  ;;  %3787 = vmatprep.subr.bf16.mxu0 %v10099_v2 }
 0x117   : > { %v2924_v14 = vadd.f32 %v2923_v11, %v11828_v46  ;;  %v11867_v15 = vadd.f32 %v3034_v12, %v2922_v8  ;;  %3720 = vmatprep.mubr.bf16.mxu1 %v10106_v5  ;;  %v10129_v5 = vld [vmem:[%s14538_s1 + $0x8f4] ss:$8 sps:$4 sm:$0xff]   ;;  %v10124_v8 = vld [vmem:[%s11067_s26 + $0x270] ss:$72 sps:$4 sm:$0xff]  }
 0x118   : > { %v2925_v17 = vpop.f32.mrf.mxu0  ;;  %v3036_v18 = vpop.f32.mrf.mxu1 }
 0x119   : > { %v2926_v21 = vadd.f32 %v2925_v17, %v11820_v43  ;;  %v11875_v22 = vadd.f32 %v3036_v18, %v2924_v14  ;;  %3788 = vmatpush1.bf16.msra.mxu0 %v10097_v10  ;;  %v10127_v10 = vld [vmem:[%s14538_s1 + $0x8f0] ss:$8 sps:$4 sm:$0xff]   ;;  %v10135_v14 = vld [vmem:[%s14538_s1 + $0x8e4] ss:$8 sps:$4 sm:$0xff]  }
 0x11a   : > { %v2927_v24 = vpop.f32.mrf.mxu0  ;;  %v3038_v25 = vpop.f32.mrf.mxu1  ;;  %3789 = vmatprep.subr.bf16.mxu0 %v10105_v13  ;;  %v10130_v13 = vld [vmem:[%s11067_s26 + $0x278] ss:$72 sps:$4 sm:$0xff]   ;;  %v10138_v18 = vld [vmem:[%s11067_s26 + $0x304] ss:$72 sps:$4 sm:$0xff]  }
 0x11b   : > { %v2928_v27 = vadd.f32 %v2927_v24, %v11828_v46  ;;  %v11882_v28 = vadd.f32 %v3038_v25, %v2926_v21  ;;  %v10144_v21 = vld [vmem:[%s11067_s26 + $0x30c] ss:$72 sps:$4 sm:$0xff]   ;;  %v10133_v25 = vld [vmem:[%s14538_s1 + $0x8e0] ss:$8 sps:$4 sm:$0xff]  }
 0x11c   : > { %v2931_v31 = vpop.f32.mrf.mxu0  ;;  %v3040_v32 = vpop.f32.mrf.mxu1  ;;  %3608 = vmatmul.mubr.bf16.gmra.mxu0 %v10102_v16 }
 0x11d   : > { %v2932_v33 = vadd.f32 %v2931_v31, %v11820_v43  ;;  %v11886_v34 = vadd.f32 %v3040_v32, %v2928_v27  ;;  %3790 = vmatpush1.bf16.msra.mxu0 %v10103_v19  ;;  %3617 = vmatprep.mubr.bf16.mxu0 %v10112_v23 }
 0x11e   : > { %v2933_v37 = vpop.f32.mrf.mxu0  ;;  %v3044_v38 = vpop.f32.mrf.mxu1  ;;  %3721 = vmatmul.mubr.bf16.gmra.mxu1 %v10108_v20  ;;  %3791 = vmatprep.subr.bf16.mxu0 %v10111_v26 }
 0x11f   : > { %v2934_v41 = vadd.f32 %v2933_v37, %v11828_v46  ;;  %v11895_v42 = vadd.f32 %v3044_v38, %v2932_v33  ;;  %3730 = vmatprep.mubr.bf16.mxu1 %v10118_v30  ;;  %v10141_v30 = vld [vmem:[%s14538_s1 + $0x8d4] ss:$8 sps:$4 sm:$0xff]   ;;  %v10136_v37 = vld [vmem:[%s11067_s26 + $0x300] ss:$72 sps:$4 sm:$0xff]  }
 0x120   : > { %v2935_v45 = vpop.f32.mrf.mxu0  ;;  %v3046_v47 = vpop.f32.mrf.mxu1 }
 0x121   : > { %v2936_v50 = vadd.f32 %v2935_v45, %v11820_v43  ;;  %v11903_v51 = vadd.f32 %v3046_v47, %v2934_v41  ;;  %3792 = vmatpush1.bf16.msra.mxu0 %v10109_v35  ;;  %v10139_v41 = vld [vmem:[%s14538_s1 + $0x8d0] ss:$8 sps:$4 sm:$0xff]  }
 0x122   : > { %v2937_v53 = vpop.f32.mrf.mxu0  ;;  %v3048_v54 = vpop.f32.mrf.mxu1  ;;  %3793 = vmatprep.subr.bf16.mxu0 %v10117_v39 }
 0x123   : > { %v2938_v57 = vadd.f32 %v2937_v53, %v11828_v46  ;;  %v11910_v58 = vadd.f32 %v3048_v54, %v2936_v50  ;;  %v10156_v53 = vld [vmem:[%s11067_s26 + $0x39c] ss:$72 sps:$4 sm:$0xff]  }
 0x124   : > { %v2941_v60 = vpop.f32.mrf.mxu0  ;;  %v3050_v61 = vpop.f32.mrf.mxu1  ;;  %3618 = vmatmul.mubr.bf16.gmra.mxu0 %v10114_v44  ;;  %v10150_v44 = vld [vmem:[%s11067_s26 + $0x394] ss:$72 sps:$4 sm:$0xff]  }
 0x125   : > { %v2942_v63 = vadd.f32 %v2941_v60, %v11820_v43  ;;  %v11914_v0 = vadd.f32 %v3050_v61, %v2938_v57  ;;  %3794 = vmatpush1.bf16.msra.mxu0 %v10115_v48  ;;  %3627 = vmatprep.mubr.bf16.mxu0 %v10126_v52  ;;  %v10142_v48 = vld [vmem:[%s11067_s26 + $0x308] ss:$72 sps:$4 sm:$0xff]  }
 0x126   : > { %v2943_v2 = vpop.f32.mrf.mxu0  ;;  %v3054_v3 = vpop.f32.mrf.mxu1  ;;  %3731 = vmatmul.mubr.bf16.gmra.mxu1 %v10120_v49  ;;  %3795 = vmatprep.subr.bf16.mxu0 %v10123_v56  ;;  %v10147_v49 = vld [vmem:[%s14538_s1 + $0x8c4] ss:$8 sps:$4 sm:$0xff]  }
 0x127   : > { %v2944_v6 = vadd.f32 %v2943_v2, %v11828_v46  ;;  %v11923_v7 = vadd.f32 %v3054_v3, %v2942_v63  ;;  %3740 = vmatprep.mubr.bf16.mxu1 %v10132_v59  ;;  %v10145_v59 = vld [vmem:[%s14538_s1 + $0x8c0] ss:$8 sps:$4 sm:$0xff]   ;;  %v10153_v63 = vld [vmem:[%s14538_s1 + $0x8b4] ss:$8 sps:$4 sm:$0xff]  }
 0x128   : > { %v2945_v11 = vpop.f32.mrf.mxu0  ;;  %v3056_v12 = vpop.f32.mrf.mxu1 }
 0x129   : > { %v2946_v16 = vadd.f32 %v2945_v11, %v11820_v43  ;;  %v11934_v17 = vadd.f32 %v3056_v12, %v2944_v6  ;;  %3796 = vmatpush1.bf16.msra.mxu0 %v10121_v1  ;;  %v10162_v11 = vld [vmem:[%s11067_s26 + $0x424] ss:$72 sps:$4 sm:$0xff]  }
 0x12a   : > { %v2947_v19 = vpop.f32.mrf.mxu0  ;;  %v3058_v20 = vpop.f32.mrf.mxu1  ;;  %3797 = vmatprep.subr.bf16.mxu0 %v10129_v5  ;;  %v10148_v5 = vld [vmem:[%s11067_s26 + $0x390] ss:$72 sps:$4 sm:$0xff]  }
 0x12b   : > { %v2948_v23 = vadd.f32 %v2947_v19, %v11828_v46  ;;  %v11939_v24 = vadd.f32 %v3058_v20, %v2946_v16  ;;  %v10159_v16 = vld [vmem:[%s14538_s1 + $0x8a4] ss:$8 sps:$4 sm:$0xff]  }
 0x12c   : > { %v2951_v26 = vpop.f32.mrf.mxu0  ;;  %v3060_v27 = vpop.f32.mrf.mxu1  ;;  %3628 = vmatmul.mubr.bf16.gmra.mxu0 %v10124_v8  ;;  %v10168_v20 = vld [vmem:[%s11067_s26 + $0x42c] ss:$72 sps:$4 sm:$0xff]  }
 0x12d   : > { %v2952_v31 = vadd.f32 %v2951_v26, %v11820_v43  ;;  %v11948_v32 = vadd.f32 %v3060_v27, %v2948_v23  ;;  %3798 = vmatpush2.bf16.msra.mxu0 %v10127_v10  ;;  %3637 = vmatprep.mubr.bf16.mxu0 %v10138_v18  ;;  %v10151_v10 = vld [vmem:[%s14538_s1 + $0x8b0] ss:$8 sps:$4 sm:$0xff]   ;;  %v10157_v26 = vld [vmem:[%s14538_s1 + $0x8a0] ss:$8 sps:$4 sm:$0xff]  }
 0x12e   : > { %v2953_v33 = vpop.f32.mrf.mxu0  ;;  %v3064_v35 = vpop.f32.mrf.mxu1  ;;  %3741 = vmatmul.mubr.bf16.gmra.mxu1 %v10130_v13  ;;  %3799 = vmatprep.subr.bf16.mxu0 %v10135_v14  ;;  %v10154_v14 = vld [vmem:[%s11067_s26 + $0x398] ss:$72 sps:$4 sm:$0xff]  }
 0x12f   : > { %v2954_v38 = vadd.f32 %v2953_v33, %v11828_v46  ;;  %v11952_v39 = vadd.f32 %v3064_v35, %v2952_v31  ;;  %3750 = vmatprep.mubr.bf16.mxu1 %v10144_v21  ;;  %v10165_v31 = vld [vmem:[%s14538_s1 + $0x894] ss:$8 sps:$4 sm:$0xff]  }
 0x130   : > { %v2955_v45 = vpop.f32.mrf.mxu0  ;;  %v3066_v47 = vpop.f32.mrf.mxu1 }
 0x131   : > { %v2956_v50 = vadd.f32 %v2955_v45, %v11820_v43  ;;  %v11963_v52 = vadd.f32 %v3066_v47, %v2954_v38  ;;  %3800 = vmatpush2.bf16.msra.mxu0 %v10133_v25  ;;  %v10160_v38 = vld [vmem:[%s11067_s26 + $0x420] ss:$72 sps:$4 sm:$0xff]   ;;  %v10163_v45 = vld [vmem:[%s14538_s1 + $0x890] ss:$8 sps:$4 sm:$0xff]   ;;  %v10174_v47 = vld [vmem:[%s11067_s26 + $0x44] ss:$72 sps:$4 sm:$0xff]  }
 0x132   : > { %v11966_v54 = vpop.f32.mrf.mxu0  ;;  %v3068_v56 = vpop.f32.mrf.mxu1  ;;  %3801 = vmatprep.subr.bf16.mxu0 %v10141_v30 }
 0x133   : > { %v11968_v57 = vadd.f32 %v3068_v56, %v2956_v50  ;;  %v10166_v50 = vld [vmem:[%s11067_s26 + $0x428] ss:$72 sps:$4 sm:$0xff]  }
 0x134   : > { %v2961_v60 = vpop.f32.mrf.mxu0  ;;  %v11973_v61 = vpop.f32.mrf.mxu1  ;;  %3638 = vmatmul.mubr.bf16.gmra.mxu0 %v10136_v37 }
 0x135   : > { %v2962_v1 = vadd.f32 %v2961_v60, %v11820_v43  ;;  %3802 = vmatpush2.bf16.msra.mxu0 %v10139_v41  ;;  %3647 = vmatprep.mubr.bf16.mxu0 %v10150_v44 }
 0x136   : > { %v2963_v2 = vpop.f32.mrf.mxu0  ;;  %v3074_v3 = vpop.f32.mrf.mxu1  ;;  %3751 = vmatmul.mubr.bf16.gmra.mxu1 %v10142_v48  ;;  %3803 = vmatprep.subr.bf16.mxu0 %v10147_v49 }
 0x137   : > { %v2964_v6 = vadd.f32 %v2963_v2, %v11828_v46  ;;  %v11981_v8 = vadd.f32 %v3074_v3, %v2962_v1  ;;  %3760 = vmatprep.mubr.bf16.mxu1 %v10156_v53  ;;  %v10171_v53 = vld [vmem:[%s14538_s1 + $0x884] ss:$8 sps:$4 sm:$0xff]   ;;  %v10169_v2 = vld [vmem:[%s14538_s1 + $0x880] ss:$8 sps:$4 sm:$0xff]  }
 0x138   : > { %v2965_v12 = vpop.f32.mrf.mxu0  ;;  %v3076_v13 = vpop.f32.mrf.mxu1 }
 0x139   : > { %v2966_v18 = vadd.f32 %v2965_v12, %v11820_v43  ;;  %v11992_v19 = vadd.f32 %v3076_v13, %v2964_v6  ;;  %3804 = vmatpush2.bf16.msra.mxu0 %v10145_v59  ;;  %v10172_v12 = vld [vmem:[%s11067_s26 + $0x40] ss:$72 sps:$4 sm:$0xff]  }
 0x13a   : > { %v11995_v21 = vpop.f32.mrf.mxu0  ;;  %v3078_v23 = vpop.f32.mrf.mxu1  ;;  %3805 = vmatprep.subr.bf16.mxu0 %v10153_v63 }
 0x13b   : > { %v11997_v25 = vadd.f32 %v3078_v23, %v2966_v18 }
 0x13c   : > { %v2971_v27 = vpop.f32.mrf.mxu0  ;;  %v12002_v30 = vpop.f32.mrf.mxu1  ;;  %3648 = vmatmul.mubr.bf16.gmra.mxu0 %v10148_v5 }
 0x13d   : > { %v2972_v33 = vadd.f32 %v2971_v27, %v11820_v43  ;;  %3806 = vmatpush2.bf16.msra.mxu0 %v10151_v10  ;;  %3657 = vmatprep.mubr.bf16.mxu0 %v10162_v11 }
 0x13e   : > { %v2973_v35 = vpop.f32.mrf.mxu0  ;;  %v3084_v37 = vpop.f32.mrf.mxu1  ;;  %3761 = vmatmul.mubr.bf16.gmra.mxu1 %v10154_v14  ;;  %3807 = vmatprep.subr.bf16.mxu0 %v10159_v16  ;;  %v10177_v16 = vld [vmem:[%s11067_s26 + $0xd4] ss:$72 sps:$4 sm:$0xff]  }
 0x13f   : > { %v2974_v41 = vadd.f32 %v2973_v35, %v11828_v46  ;;  %v12010_v44 = vadd.f32 %v3084_v37, %v2972_v33  ;;  %3770 = vmatprep.mubr.bf16.mxu1 %v10168_v20 }
 0x140   : > { %v2975_v48 = vpop.f32.mrf.mxu0  ;;  %v3086_v49 = vpop.f32.mrf.mxu1 }
 0x141   : > { %v2976_v56 = vadd.f32 %v2975_v48, %v11820_v43  ;;  %v12021_v59 = vadd.f32 %v3086_v49, %v2974_v41  ;;  %3808 = vmatpush2.bf16.msra.mxu0 %v10157_v26  ;;  %v10180_v49 = vld [vmem:[%s11067_s26 + $0x164] ss:$72 sps:$4 sm:$0xff]  }
 0x142   : > { %v12023_v60 = vpop.f32.mrf.mxu0  ;;  %v3088_v63 = vpop.f32.mrf.mxu1  ;;  %3809 = vmatprep.subr.bf16.mxu0 %v10165_v31 }
 0x143   : > { %v12025_v1 = vadd.f32 %v3088_v63, %v2976_v56 }
 0x144   : > { %v2981_v3 = vpop.f32.mrf.mxu0  ;;  %v12030_v5 = vpop.f32.mrf.mxu1  ;;  %3658 = vmatmul.mubr.bf16.gmra.mxu0 %v10160_v38 }
 0x145   : > { %v2982_v6 = vadd.f32 %v2981_v3, %v11820_v43  ;;  %3810 = vmatpush2.bf16.msra.mxu0 %v10163_v45  ;;  %3813 = vmatprep.mubr.bf16.mxu0 %v10174_v47  ;;  %v10175_v47 = vld [vmem:[%s11067_s26 + $0xd0] ss:$72 sps:$4 sm:$0xff]  }
 0x146   : > { %v2983_v10 = vpop.f32.mrf.mxu0  ;;  %v3094_v11 = vpop.f32.mrf.mxu1  ;;  %3771 = vmatmul.mubr.bf16.gmra.mxu1 %v10166_v50  ;;  %3811 = vmatprep.subr.bf16.mxu0 %v10171_v53 }
 0x147   : > { %v2984_v13 = vadd.f32 %v2983_v10, %v11828_v46  ;;  %v12035_v14 = vadd.f32 %v3094_v11, %v2982_v6  ;;  %v10198_v11 = vld [vmem:[%s14538_s1 + $0x74] ss:$8 sps:$4 sm:$0xff]  }
 0x148   : > { %v2985_v18 = vpop.f32.mrf.mxu0  ;;  %v3096_v20 = vpop.f32.mrf.mxu1 }
 0x149   : > { %v2986_v23 = vadd.f32 %v2985_v18, %v11820_v43  ;;  %v12039_v26 = vadd.f32 %v3096_v20, %v2984_v13  ;;  %3812 = vmatpush2.bf16.msra.mxu0 %v10169_v2 }
 0x14a   : > { %v12041_v27 = vpop.f32.mrf.mxu0  ;;  %v3098_v31 = vpop.f32.mrf.mxu1  ;;  %6866 = vmatprep.subr.bf16.mxu0 %v10198_v11 }
 0x14b   : > { %v12043_v33 = vadd.f32 %v3098_v31, %v2986_v23  ;;  %v10183_v23 = vld [vmem:[%s11067_s26 + $0x1f4] ss:$72 sps:$4 sm:$0xff]  }
 0x14c   : > { %v12045_v35 = vpop.f32.mrf.mxu1  ;;  %v3137_v37 = vpop.f32.mrf.mxu0  ;;  %3814 = vmatmul.mubr.bf16.vlgmr.msra.gmra.mxu0 %v10172_v12  ;;  %v10196_v12 = vld [vmem:[%s14538_s1 + $0x70] ss:$8 sps:$4 sm:$0xff]  }
 0x14d   : > { %v3138_v38 = vadd.f32 %v3137_v37, %v11839_v55  ;;  %3823 = vmatprep.mubr.bf16.mxu0 %v10177_v16  ;;  %v10178_v16 = vld [vmem:[%s11067_s26 + $0x160] ss:$72 sps:$4 sm:$0xff]   ;;  %6867 = vmatpush1.bf16.msra.mxu0 %v10196_v12 }
 0x14e   : > { %v3139_v41 = vpop.f32.mrf.mxu0  ;;  %v3250_v45 = vpop.f32.mrf.mxu1 }
 0x14f   : > { %v3140_v43 = vadd.f32 %v3139_v41, %v11847_v62  ;;  %v12050_v48 = vadd.f32 %v3250_v45, %v3138_v38  ;;  %v10201_v45 = vld [vmem:[%s14538_s1 + $0x60] ss:$8 sps:$4 sm:$0xff]  }
 0x150   : > { %v3141_v50 = vpop.f32.mrf.mxu0  ;;  %v3252_v53 = vpop.f32.mrf.mxu1 }
 0x151   : > { %v3142_v56 = vadd.f32 %v3141_v50, %v11854_v4  ;;  %v12054_v63 = vadd.f32 %v3252_v53, %v3140_v43  ;;  %v10199_v50 = vld [vmem:[%s14540_s3 + $0x78] sm:$0xff]  }
 0x152   : > { %v3143_v2 = vpop.f32.mrf.mxu0  ;;  %v3254_v3 = vpop.f32.mrf.mxu1  ;;  %9411 = vmatprep.subr.bf16.mxu1 %v10199_v50 }
 0x153   : > { %v12057_v55 = vadd.f32 %v3143_v2, %v11858_v9  ;;  %v12059_v6 = vadd.f32 %v3254_v3, %v3142_v56  ;;  %v10204_v3 = vld [vmem:[%s14538_s1 + $0x50] ss:$8 sps:$4 sm:$0xff]  }
 0x154   : > { %v3147_v10 = vpop.f32.mrf.mxu0  ;;  %v12061_v62 = vpop.f32.mrf.mxu1  ;;  %3824 = vmatmul.mubr.bf16.gmra.mxu0 %v10175_v47 }
 0x155   : > { %v3148_v4 = vadd.f32 %v3147_v10, %v11867_v15  ;;  %3833 = vmatprep.mubr.bf16.mxu0 %v10180_v49  ;;  %v10203_v15 = vld [vmem:[%s14538_s1 + $0x64] ss:$8 sps:$4 sm:$0xff]  }
 0x156   : > { %v3149_v13 = vpop.f32.mrf.mxu0  ;;  %v3260_v9 = vpop.f32.mrf.mxu1  ;;  %6868 = vmatprep.subr.bf16.mxu0 %v10203_v15 }
 0x157   : > { %v3150_v18 = vadd.f32 %v3149_v13, %v11875_v22  ;;  %v12072_v20 = vadd.f32 %v3260_v9, %v3148_v4  ;;  %6869 = vmatpush1.bf16.msra.mxu0 %v10201_v45  ;;  %v10181_v4 = vld [vmem:[%s11067_s26 + $0x1f0] ss:$72 sps:$4 sm:$0xff]   ;;  %v10186_v9 = vld [vmem:[%s11067_s26 + $0x284] ss:$72 sps:$4 sm:$0xff]  }
 0x158   : > { %v3151_v31 = vpop.f32.mrf.mxu0  ;;  %v3262_v37 = vpop.f32.mrf.mxu1 }
 0x159   : > { %v3152_v38 = vadd.f32 %v3151_v31, %v11882_v28  ;;  %v12079_v41 = vadd.f32 %v3262_v37, %v3150_v18  ;;  %v10200_v28 = vld [vmem:[%s14540_s3 + $0x38] sm:$0xff]   ;;  %v10209_v37 = vld [vmem:[%s14538_s1 + $0x40] ss:$8 sps:$4 sm:$0xff]  }
 0x15a   : > { %v3153_v47 = vpop.f32.mrf.mxu0  ;;  %v3264_v22 = vpop.f32.mrf.mxu1  ;;  %9412 = vmatpush3.bf16.msra.mxu1 %v10200_v28 }
 0x15b   : > { %v12085_v43 = vadd.f32 %v3153_v47, %v11886_v34  ;;  %v12087_v49 = vadd.f32 %v3264_v22, %v3152_v38  ;;  %v10206_v34 = vld [vmem:[%s14538_s1 + $0x54] ss:$8 sps:$4 sm:$0xff]  }
 0x15c   : > { %v3157_v53 = vpop.f32.mrf.mxu0  ;;  %v12095_v56 = vpop.f32.mrf.mxu1  ;;  %3834 = vmatmul.mubr.bf16.gmra.mxu0 %v10178_v16  ;;  %6870 = vmatprep.subr.bf16.mxu0 %v10206_v34  ;;  %v10207_v47 = vld [vmem:[%s14540_s3 + $0x70] sm:$0xff]  }
 0x15d   : > { %v3158_v2 = vadd.f32 %v3157_v53, %v11895_v42  ;;  %3843 = vmatprep.mubr.bf16.mxu0 %v10183_v23  ;;  %6871 = vmatpush1.bf16.msra.mxu0 %v10204_v3  ;;  %v10211_v42 = vld [vmem:[%s14538_s1 + $0x44] ss:$8 sps:$4 sm:$0xff]   ;;  %v10212_v53 = vld [vmem:[%s14538_s1 + $0x30] ss:$8 sps:$4 sm:$0xff]   ;;  %v10184_v3 = vld [vmem:[%s11067_s26 + $0x280] ss:$72 sps:$4 sm:$0xff]  }
 0x15e   : > { %v3159_v10 = vpop.f32.mrf.mxu0  ;;  %v3270_v11 = vpop.f32.mrf.mxu1  ;;  %6872 = vmatprep.subr.bf16.mxu0 %v10211_v42  ;;  %9413 = vmatprep.subr.bf16.mxu1 %v10207_v47  ;;  %v10217_v42 = vld [vmem:[%s14538_s1 + $0x20] ss:$8 sps:$4 sm:$0xff]  }
 0x15f   : > { %v3160_v12 = vadd.f32 %v3159_v10, %v11903_v51  ;;  %v12106_v13 = vadd.f32 %v3270_v11, %v3158_v2 }
 0x160   : > { %v3161_v16 = vpop.f32.mrf.mxu0  ;;  %v3272_v18 = vpop.f32.mrf.mxu1 }
 0x161   : > { %v3162_v23 = vadd.f32 %v3161_v16, %v11910_v58  ;;  %v12113_v31 = vadd.f32 %v3272_v18, %v3160_v12  ;;  %v10208_v58 = vld [vmem:[%s14540_s3 + $0x30] sm:$0xff]   ;;  %6873 = vmatpush1.bf16.msra.mxu0 %v10209_v37 }
 0x162   : > { %v3163_v15 = vpop.f32.mrf.mxu0  ;;  %v3274_v51 = vpop.f32.mrf.mxu1  ;;  %9414 = vmatpush3.bf16.msra.mxu1 %v10208_v58 }
 0x163   : > { %v12119_v38 = vadd.f32 %v3163_v15, %v11914_v0  ;;  %v12121_v45 = vadd.f32 %v3274_v51, %v3162_v23  ;;  %v10214_v0 = vld [vmem:[%s14538_s1 + $0x34] ss:$8 sps:$4 sm:$0xff]   ;;  %v10215_v51 = vld [vmem:[%s14540_s3 + $0x68] sm:$0xff]  }
 0x164   : > { %v3167_v22 = vpop.f32.mrf.mxu0  ;;  %v12129_v50 = vpop.f32.mrf.mxu1  ;;  %3844 = vmatmul.mubr.bf16.gmra.mxu0 %v10181_v4  ;;  %6874 = vmatprep.subr.bf16.mxu0 %v10214_v0  ;;  %v10189_v4 = vld [vmem:[%s11067_s26 + $0x314] ss:$72 sps:$4 sm:$0xff]  }
 0x165   : > { %v3168_v28 = vadd.f32 %v3167_v22, %v11923_v7  ;;  %3853 = vmatprep.mubr.bf16.mxu0 %v10186_v9  ;;  %6875 = vmatpush1.bf16.msra.mxu0 %v10212_v53  ;;  %v10219_v7 = vld [vmem:[%s14538_s1 + $0x24] ss:$8 sps:$4 sm:$0xff]   ;;  %v2958_v22 = vadd.f32 %v11966_v54, %v11828_v46 }
 0x166   : > { %v3169_v34 = vpop.f32.mrf.mxu0  ;;  %v3280_v2 = vpop.f32.mrf.mxu1  ;;  %6876 = vmatprep.subr.bf16.mxu0 %v10219_v7  ;;  %9415 = vmatprep.subr.bf16.mxu1 %v10215_v51 }
 0x167   : > { %v3170_v10 = vadd.f32 %v3169_v34, %v11934_v17  ;;  %v12140_v11 = vadd.f32 %v3280_v2, %v3168_v28  ;;  %v10220_v28 = vld [vmem:[%s14538_s1 + $0x10] ss:$8 sps:$4 sm:$0xff]  }
 0x168   : > { %v3171_v12 = vpop.f32.mrf.mxu0  ;;  %v3282_v16 = vpop.f32.mrf.mxu1  ;;  %v10187_v2 = vld [vmem:[%s11067_s26 + $0x310] ss:$72 sps:$4 sm:$0xff]  }
 0x169   : > { %v3172_v9 = vadd.f32 %v3171_v12, %v11939_v24  ;;  %v12147_v18 = vadd.f32 %v3282_v16, %v3170_v10  ;;  %v10216_v24 = vld [vmem:[%s14540_s3 + $0x28] sm:$0xff]   ;;  %6877 = vmatpush1.bf16.msra.mxu0 %v10217_v42 }
 0x16a   : > { %v3173_v23 = vpop.f32.mrf.mxu0  ;;  %v3284_v17 = vpop.f32.mrf.mxu1  ;;  %9416 = vmatpush3.bf16.msra.mxu1 %v10216_v24  ;;  %v10192_v12 = vld [vmem:[%s11067_s26 + $0x3a4] ss:$72 sps:$4 sm:$0xff]  }
 0x16b   : > { %v12153_v37 = vadd.f32 %v3173_v23, %v11948_v32  ;;  %v12155_v15 = vadd.f32 %v3284_v17, %v3172_v9  ;;  %v10222_v32 = vld [vmem:[%s14538_s1 + $0x14] ss:$8 sps:$4 sm:$0xff]  }
 0x16c   : > { %v3177_v47 = vpop.f32.mrf.mxu0  ;;  %v12163_v58 = vpop.f32.mrf.mxu1  ;;  %3854 = vmatmul.mubr.bf16.gmra.mxu0 %v10184_v3  ;;  %6878 = vmatprep.subr.bf16.mxu0 %v10222_v32  ;;  %v10230_v32 = vld [vmem:[%s14538_s1 + $0xf4] ss:$8 sps:$4 sm:$0xff]  }
 0x16d   : > { %v3178_v0 = vadd.f32 %v3177_v47, %v11952_v39  ;;  %3863 = vmatprep.mubr.bf16.mxu0 %v10189_v4  ;;  %6879 = vmatpush1.bf16.msra.mxu0 %v10220_v28  ;;  %v10227_v39 = vld [vmem:[%s14538_s1 + $0x4] ss:$8 sps:$4 sm:$0xff]   ;;  %v3071_v4 = vadd.f32 %v11973_v61, %v2958_v22  ;;  %v2968_v22 = vadd.f32 %v11995_v21, %v11828_v46  ;;  %v10228_v28 = vld [vmem:[%s14538_s1 + $0xf0] ss:$8 sps:$4 sm:$0xff]  }
 0x16e   : > { %v3179_v53 = vpop.f32.mrf.mxu0  ;;  %v3290_v34 = vpop.f32.mrf.mxu1  ;;  %6880 = vmatprep.subr.bf16.mxu0 %v10227_v39  ;;  %v10223_v61 = vld [vmem:[%s14540_s3 + $0x60] sm:$0xff]  }
 0x16f   : > { %v3180_v3 = vadd.f32 %v3179_v53, %v11963_v52  ;;  %v12176_v10 = vadd.f32 %v3290_v34, %v3178_v0  ;;  %v10225_v52 = vld [vmem:[%s14538_s1] ss:$8 sps:$4 sm:$0xff]   ;;  %9417 = vmatprep.subr.bf16.mxu1 %v10223_v61 }
 0x170   : > { %v3181_v54 = vpop.f32.mrf.mxu0  ;;  %v3292_v16 = vpop.f32.mrf.mxu1 }
 0x171   : > { %v3182_v7 = vadd.f32 %v3181_v54, %v11968_v57  ;;  %v12184_v9 = vadd.f32 %v3292_v16, %v3180_v3  ;;  %v10224_v57 = vld [vmem:[%s14540_s3 + $0x20] sm:$0xff]   ;;  %6881 = vmatpush1.bf16.msra.mxu0 %v10225_v52  ;;  %v10195_v16 = vld [vmem:[%s11067_s26 + $0x434] ss:$72 sps:$4 sm:$0xff]  }
 0x172   : > { %v3183_v42 = vpop.f32.mrf.mxu0  ;;  %v3294_v23 = vpop.f32.mrf.mxu1  ;;  %v10190_v3 = vld [vmem:[%s11067_s26 + $0x3a0] ss:$72 sps:$4 sm:$0xff]   ;;  %9418 = vmatpush3.bf16.msra.mxu1 %v10224_v57  ;;  %6882 = vmatprep.subr.bf16.mxu0 %v10230_v32  ;;  %v10238_v32 = vld [vmem:[%s14538_s1 + $0xd4] ss:$8 sps:$4 sm:$0xff]  }
 0x173   : > { %v12189_v17 = vadd.f32 %v3183_v42, %v3071_v4  ;;  %v12191_v51 = vadd.f32 %v3294_v23, %v3182_v7 }
 0x174   : > { %v3187_v24 = vpop.f32.mrf.mxu0  ;;  %v12199_v47 = vpop.f32.mrf.mxu1  ;;  %3864 = vmatmul.mubr.bf16.gmra.mxu0 %v10187_v2 }
 0x175   : > { %v3188_v0 = vadd.f32 %v3187_v24, %v11981_v8  ;;  %3873 = vmatprep.mubr.bf16.mxu0 %v10192_v12  ;;  %6883 = vmatpush2.bf16.msra.mxu0 %v10228_v28  ;;  %v10235_v8 = vld [vmem:[%s14538_s1 + $0xe4] ss:$8 sps:$4 sm:$0xff]   ;;  %v3081_v12 = vadd.f32 %v12002_v30, %v2968_v22  ;;  %v10231_v30 = vld [vmem:[%s14540_s3 + $0x58] sm:$0xff]   ;;  %v2978_v22 = vadd.f32 %v12023_v60, %v11828_v46 }
 0x176   : > { %v3189_v53 = vpop.f32.mrf.mxu0  ;;  %v3300_v34 = vpop.f32.mrf.mxu1  ;;  %6884 = vmatprep.subr.bf16.mxu0 %v10235_v8  ;;  %9419 = vmatprep.subr.bf16.mxu1 %v10231_v30  ;;  %v10236_v28 = vld [vmem:[%s14538_s1 + $0xd0] ss:$8 sps:$4 sm:$0xff]  }
 0x177   : > { %v3190_v2 = vadd.f32 %v3189_v53, %v11992_v19  ;;  %v12212_v54 = vadd.f32 %v3300_v34, %v3188_v0  ;;  %v10233_v19 = vld [vmem:[%s14538_s1 + $0xe0] ss:$8 sps:$4 sm:$0xff]   ;;  %v10239_v30 = vld [vmem:[%s14540_s3 + $0x50] sm:$0xff]  }
 0x178   : > { %v3191_v21 = vpop.f32.mrf.mxu0  ;;  %v3302_v39 = vpop.f32.mrf.mxu1 }
 0x179   : > { %v3192_v4 = vadd.f32 %v3191_v21, %v11997_v25  ;;  %v12220_v7 = vadd.f32 %v3302_v39, %v3190_v2  ;;  %v10232_v25 = vld [vmem:[%s14540_s3 + $0x18] sm:$0xff]   ;;  %6885 = vmatpush2.bf16.msra.mxu0 %v10233_v19 }
 0x17a   : > { %v3193_v52 = vpop.f32.mrf.mxu0  ;;  %v3304_v42 = vpop.f32.mrf.mxu1  ;;  %v10193_v2 = vld [vmem:[%s11067_s26 + $0x430] ss:$72 sps:$4 sm:$0xff]   ;;  %9420 = vmatpush3.bf16.msra.mxu1 %v10232_v25  ;;  %6886 = vmatprep.subr.bf16.mxu0 %v10238_v32  ;;  %v2988_v32 = vadd.f32 %v12041_v27, %v11828_v46  ;;  %v10251_v46 = vld [vmem:[%s14538_s1 + $0xa4] ss:$8 sps:$4 sm:$0xff]  }
 0x17b   : > { %v12225_v23 = vadd.f32 %v3193_v52, %v3081_v12  ;;  %v12227_v61 = vadd.f32 %v3304_v42, %v3192_v4  ;;  %v10241_v4 = vld [vmem:[%s14538_s1 + $0xc0] ss:$8 sps:$4 sm:$0xff]   ;;  %9421 = vmatprep.subr.bf16.mxu1 %v10239_v30  ;;  %v10254_v30 = vld [vmem:[%s14538_s1 + $0x94] ss:$8 sps:$4 sm:$0xff]  }
 0x17c   : > { %v3197_v57 = vpop.f32.mrf.mxu0  ;;  %v12235_v24 = vpop.f32.mrf.mxu1  ;;  %3874 = vmatmul.mubr.bf16.gmra.mxu0 %v10190_v3 }
 0x17d   : > { %v3198_v0 = vadd.f32 %v3197_v57, %v12010_v44  ;;  %3883 = vmatprep.mubr.bf16.mxu0 %v10195_v16  ;;  %6887 = vmatpush2.bf16.msra.mxu0 %v10236_v28  ;;  %v10243_v44 = vld [vmem:[%s14538_s1 + $0xc4] ss:$8 sps:$4 sm:$0xff]   ;;  %v3091_v16 = vadd.f32 %v12030_v5, %v2978_v22  ;;  %v10246_v57 = vld [vmem:[%s14538_s1 + $0xb4] ss:$8 sps:$4 sm:$0xff]  }
 0x17e   : > { %v3199_v53 = vpop.f32.mrf.mxu0  ;;  %v3310_v34 = vpop.f32.mrf.mxu1  ;;  %6888 = vmatprep.subr.bf16.mxu0 %v10243_v44  ;;  %v10249_v44 = vld [vmem:[%s14538_s1 + $0xa0] ss:$8 sps:$4 sm:$0xff]  }
 0x17f   : > { %v3200_v3 = vadd.f32 %v3199_v53, %v12021_v59  ;;  %v12248_v21 = vadd.f32 %v3310_v34, %v3198_v0  ;;  %v10244_v0 = vld [vmem:[%s14538_s1 + $0xb0] ss:$8 sps:$4 sm:$0xff]  }
 0x180   : > { %v3201_v39 = vpop.f32.mrf.mxu0  ;;  %v3312_v60 = vpop.f32.mrf.mxu1 }
 0x181   : > { %v3202_v8 = vadd.f32 %v3201_v39, %v12025_v1  ;;  %v12255_v12 = vadd.f32 %v3312_v60, %v3200_v3  ;;  %v10240_v1 = vld [vmem:[%s14540_s3 + $0x10] sm:$0xff]   ;;  %6889 = vmatpush2.bf16.msra.mxu0 %v10241_v4 }
 0x182   : > { %v3203_v59 = vpop.f32.mrf.mxu0  ;;  %v3314_v19 = vpop.f32.mrf.mxu1  ;;  %9422 = vmatpush3.bf16.msra.mxu1 %v10240_v1  ;;  %6890 = vmatprep.subr.bf16.mxu0 %v10246_v57 }
 0x183   : > { %v12260_v52 = vadd.f32 %v3203_v59, %v3091_v16  ;;  %v12262_v42 = vadd.f32 %v3314_v19, %v3202_v8  ;;  %v10247_v59 = vld [vmem:[%s14540_s3 + $0x48] sm:$0xff]  }
 0x184   : > { %v3207_v5 = vpop.f32.mrf.mxu0  ;;  %v12270_v25 = vpop.f32.mrf.mxu1  ;;  %3884 = vmatmul.mubr.bf16.gmra.mxu0 %v10193_v2  ;;  %9423 = vmatprep.subr.bf16.mxu1 %v10247_v59 }
 0x185   : > { %v3208_v22 = vadd.f32 %v3207_v5, %v12035_v14  ;;  %6891 = vmatpush2.bf16.msra.mxu0 %v10244_v0  ;;  %v3101_v14 = vadd.f32 %v12045_v35, %v2988_v32  ;;  %v10252_v5 = vld [vmem:[%s14538_s1 + $0x90] ss:$8 sps:$4 sm:$0xff]  }
 0x186   : > { %v3209_v28 = vpop.f32.mrf.mxu0  ;;  %v3320_v53 = vpop.f32.mrf.mxu1  ;;  %6892 = vmatprep.subr.bf16.mxu0 %v10251_v46 }
 0x187   : > { %v3210_v34 = vadd.f32 %v3209_v28, %v12039_v26  ;;  %v12282_v2 = vadd.f32 %v3320_v53, %v3208_v22 }
 0x188   : > { %v3211_v3 = vpop.f32.mrf.mxu0  ;;  %v3322_v39 = vpop.f32.mrf.mxu1 }
 0x189   : > { %v3212_v27 = vadd.f32 %v3211_v3, %v12043_v33  ;;  %v12289_v60 = vadd.f32 %v3322_v39, %v3210_v34  ;;  %v10248_v33 = vld [vmem:[%s14540_s3 + $0x8] sm:$0xff]   ;;  %6893 = vmatpush2.bf16.msra.mxu0 %v10249_v44  ;;  %v3257_v34 = vadd.f32 %v12061_v62, %v12057_v55  ;;  %v10255_v55 = vld [vmem:[%s14540_s3 + $0x40] sm:$0xff]   ;;  %v10265_v62 = vld [vmem:[%s14538_s1 + $0x274] ss:$8 sps:$4 sm:$0xff]  }
 0x18a   : > { %v3213_v26 = vpop.f32.mrf.mxu0  ;;  %v3324_v16 = vpop.f32.mrf.mxu1  ;;  %9424 = vmatpush3.bf16.msra.mxu1 %v10248_v33  ;;  %6894 = vmatprep.subr.bf16.mxu0 %v10254_v30  ;;  %v10262_v44 = vld [vmem:[%s11067_s26 + $0x484] ss:$72 sps:$4 sm:$0xff]  }
 0x18b   : > { %v12294_v8 = vadd.f32 %v3213_v26, %v3101_v14  ;;  %v12296_v4 = vadd.f32 %v3324_v16, %v3212_v27  ;;  %v10256_v33 = vld [vmem:[%s14540_s3] sm:$0xff]   ;;  %6898 = vmatprep.mubr.bf16.mxu0 %v10262_v44  ;;  %9425 = vmatprep.subr.bf16.mxu1 %v10255_v55 }
 0x18c   : > { %v12304_v35 = vpop.f32.mrf.mxu1  ;;  %v3363_v19 = vpop.f32.mrf.mxu0 }
 0x18d   : > { %v3364_v1 = vadd.f32 %v3363_v19, %v12050_v48  ;;  %6895 = vmatpush2.bf16.msra.mxu0 %v10252_v5  ;;  %v10259_v48 = vld [vmem:[%s14538_s1 + $0x84] ss:$8 sps:$4 sm:$0xff]   ;;  %v10263_v19 = vld [vmem:[%s14538_s1 + $0x270] ss:$8 sps:$4 sm:$0xff]  }
 0x18e   : > { %v3365_v57 = vpop.f32.mrf.mxu0  ;;  %v3476_v32 = vpop.f32.mrf.mxu1  ;;  %6896 = vmatprep.subr.bf16.mxu0 %v10259_v48  ;;  %9426 = vmatpush3.bf16.msra.mxu1 %v10256_v33 }
 0x18f   : > { %v3366_v22 = vadd.f32 %v3365_v57, %v12054_v63  ;;  %v12314_v0 = vadd.f32 %v3476_v32, %v3364_v1  ;;  %v10257_v63 = vld [vmem:[%s14538_s1 + $0x80] ss:$8 sps:$4 sm:$0xff]  }
 0x190   : > { %v3367_v28 = vpop.f32.mrf.mxu0  ;;  %v3478_v53 = vpop.f32.mrf.mxu1 }
 0x191   : > { %v12322_v3 = vadd.f32 %v3367_v28, %v12059_v6  ;;  %v12324_v39 = vadd.f32 %v3478_v53, %v3366_v22  ;;  %6897 = vmatpush2.bf16.msra.mxu0 %v10257_v63  ;;  %v10260_v6 = vld [vmem:[%s11067_s26 + $0x480] ss:$72 sps:$4 sm:$0xff]   ;;  %v10268_v22 = vld [vmem:[%s14538_s1 + $0x174] ss:$8 sps:$4 sm:$0xff]   ;;  %v10271_v28 = vld [vmem:[%s14538_s1 + $0x264] ss:$8 sps:$4 sm:$0xff]  }
 0x192   : > { %v3369_v46 = vpop.f32.mrf.mxu0  ;;  %v12329_v14 = vpop.f32.mrf.mxu1  ;;  %7092 = vmatprep.subr.bf16.mxu0 %v10265_v62  ;;  %6979 = vmatprep.subr.bf16.mxu1 %v10268_v22  ;;  %v10278_v62 = vld [vmem:[%s14538_s1 + $0x250] ss:$8 sps:$4 sm:$0xff]  }
 0x193   : > { %v12331_v27 = vadd.f32 %v3369_v46, %v3257_v34  ;;  %v10269_v34 = vld [vmem:[%s14538_s1 + $0x260] ss:$8 sps:$4 sm:$0xff]  }
 0x194   : > { %v3373_v26 = vpop.f32.mrf.mxu0  ;;  %v12334_v16 = vpop.f32.mrf.mxu1  ;;  %6899 = vmatmul.mubr.bf16.vlgmr.msra.gmra.mxu0 %v10260_v6 }
 0x195   : > { %v3374_v59 = vadd.f32 %v3373_v26, %v12072_v20  ;;  %7093 = vmatpush1.bf16.msra.mxu0 %v10263_v19  ;;  %v10274_v26 = vld [vmem:[%s11067_s26 + $0x514] ss:$72 sps:$4 sm:$0xff]  }
 0x196   : > { %v3375_v30 = vpop.f32.mrf.mxu0  ;;  %v3486_v1 = vpop.f32.mrf.mxu1  ;;  %7094 = vmatprep.subr.bf16.mxu0 %v10271_v28  ;;  %6908 = vmatprep.mubr.bf16.mxu0 %v10274_v26 }
 0x197   : > { %v3376_v5 = vadd.f32 %v3375_v30, %v12079_v41  ;;  %v12351_v57 = vadd.f32 %v3486_v1, %v3374_v59  ;;  %v3267_v41 = vadd.f32 %v12095_v56, %v12085_v43  ;;  %v10272_v43 = vld [vmem:[%s11067_s26 + $0x510] ss:$72 sps:$4 sm:$0xff]  }
 0x198   : > { %v3377_v20 = vpop.f32.mrf.mxu0  ;;  %v3488_v32 = vpop.f32.mrf.mxu1 }
 0x199   : > { %v12362_v53 = vadd.f32 %v3377_v20, %v12087_v49  ;;  %v12364_v48 = vadd.f32 %v3488_v32, %v3376_v5  ;;  %7095 = vmatpush1.bf16.msra.mxu0 %v10269_v34  ;;  %v10280_v49 = vld [vmem:[%s14538_s1 + $0x254] ss:$8 sps:$4 sm:$0xff]   ;;  %v3277_v20 = vadd.f32 %v12129_v50, %v12119_v38  ;;  %v10287_v38 = vld [vmem:[%s11067_s26 + $0x5a0] ss:$72 sps:$4 sm:$0xff]  }
 0x19a   : > { %v3379_v63 = vpop.f32.mrf.mxu0  ;;  %v12369_v46 = vpop.f32.mrf.mxu1  ;;  %7096 = vmatprep.subr.bf16.mxu0 %v10280_v49 }
 0x19b   : > { %v12371_v44 = vadd.f32 %v3379_v63, %v3267_v41  ;;  %v10289_v63 = vld [vmem:[%s11067_s26 + $0x5a4] ss:$72 sps:$4 sm:$0xff]  }
 0x19c   : > { %v3383_v55 = vpop.f32.mrf.mxu0  ;;  %v12374_v6 = vpop.f32.mrf.mxu1  ;;  %6909 = vmatmul.mubr.bf16.gmra.mxu0 %v10272_v43  ;;  %v10293_v43 = vld [vmem:[%s14538_s1 + $0x230] ss:$8 sps:$4 sm:$0xff]  }
 0x19d   : > { %v3384_v56 = vadd.f32 %v3383_v55, %v12106_v13  ;;  %7097 = vmatpush1.bf16.msra.mxu0 %v10278_v62  ;;  %v10286_v13 = vld [vmem:[%s14538_s1 + $0x244] ss:$8 sps:$4 sm:$0xff]   ;;  %6918 = vmatprep.mubr.bf16.mxu0 %v10289_v63  ;;  %v10304_v63 = vld [vmem:[%s11067_s26 + $0x634] ss:$72 sps:$4 sm:$0xff]  }
 0x19e   : > { %v3385_v59 = vpop.f32.mrf.mxu0  ;;  %v3496_v33 = vpop.f32.mrf.mxu1  ;;  %7098 = vmatprep.subr.bf16.mxu0 %v10286_v13 }
 0x19f   : > { %v3386_v19 = vadd.f32 %v3385_v59, %v12113_v31  ;;  %v12385_v30 = vadd.f32 %v3496_v33, %v3384_v56  ;;  %v10284_v31 = vld [vmem:[%s14538_s1 + $0x240] ss:$8 sps:$4 sm:$0xff]  }
 0x1a0   : > { %v3387_v1 = vpop.f32.mrf.mxu0  ;;  %v3498_v5 = vpop.f32.mrf.mxu1 }
 0x1a1   : > { %v12393_v32 = vadd.f32 %v3387_v1, %v12121_v45  ;;  %v12395_v22 = vadd.f32 %v3498_v5, %v3386_v19  ;;  %7099 = vmatpush1.bf16.msra.mxu0 %v10284_v31  ;;  %v10295_v45 = vld [vmem:[%s14538_s1 + $0x234] ss:$8 sps:$4 sm:$0xff]   ;;  %v3287_v1 = vadd.f32 %v12163_v58, %v12153_v37  ;;  %v10302_v37 = vld [vmem:[%s11067_s26 + $0x630] ss:$72 sps:$4 sm:$0xff]  }
 0x1a2   : > { %v3389_v28 = vpop.f32.mrf.mxu0  ;;  %v12400_v41 = vpop.f32.mrf.mxu1  ;;  %7100 = vmatprep.subr.bf16.mxu0 %v10295_v45  ;;  %v10308_v45 = vld [vmem:[%s14538_s1 + $0x210] ss:$8 sps:$4 sm:$0xff]  }
 0x1a3   : > { %v12402_v34 = vadd.f32 %v3389_v28, %v3277_v20 }
 0x1a4   : > { %v3393_v26 = vpop.f32.mrf.mxu0  ;;  %v12405_v55 = vpop.f32.mrf.mxu1  ;;  %6919 = vmatmul.mubr.bf16.gmra.mxu0 %v10287_v38 }
 0x1a5   : > { %v3394_v50 = vadd.f32 %v3393_v26, %v12140_v11  ;;  %7101 = vmatpush1.bf16.msra.mxu0 %v10293_v43  ;;  %v10301_v11 = vld [vmem:[%s14538_s1 + $0x224] ss:$8 sps:$4 sm:$0xff]   ;;  %6928 = vmatprep.mubr.bf16.mxu0 %v10304_v63 }
 0x1a6   : > { %v3395_v49 = vpop.f32.mrf.mxu0  ;;  %v3506_v56 = vpop.f32.mrf.mxu1  ;;  %7102 = vmatprep.subr.bf16.mxu0 %v10301_v11 }
 0x1a7   : > { %v3396_v62 = vadd.f32 %v3395_v49, %v12147_v18  ;;  %v12416_v59 = vadd.f32 %v3506_v56, %v3394_v50  ;;  %v10299_v18 = vld [vmem:[%s14538_s1 + $0x220] ss:$8 sps:$4 sm:$0xff]  }
 0x1a8   : > { %v3397_v33 = vpop.f32.mrf.mxu0  ;;  %v3508_v19 = vpop.f32.mrf.mxu1 }
 0x1a9   : > { %v12424_v5 = vadd.f32 %v3397_v33, %v12155_v15  ;;  %v12426_v13 = vadd.f32 %v3508_v19, %v3396_v62  ;;  %7103 = vmatpush1.bf16.msra.mxu0 %v10299_v18  ;;  %v10310_v15 = vld [vmem:[%s14538_s1 + $0x214] ss:$8 sps:$4 sm:$0xff]   ;;  %v3297_v19 = vadd.f32 %v12199_v47, %v12189_v17  ;;  %v10317_v17 = vld [vmem:[%s11067_s26 + $0x6c0] ss:$72 sps:$4 sm:$0xff]  }
 0x1aa   : > { %v3399_v20 = vpop.f32.mrf.mxu0  ;;  %v12431_v31 = vpop.f32.mrf.mxu1  ;;  %7104 = vmatprep.subr.bf16.mxu0 %v10310_v15 }
 0x1ab   : > { %v12433_v28 = vadd.f32 %v3399_v20, %v3287_v1 }
 0x1ac   : > { %v3403_v26 = vpop.f32.mrf.mxu0  ;;  %v12436_v38 = vpop.f32.mrf.mxu1  ;;  %6929 = vmatmul.mubr.bf16.gmra.mxu0 %v10302_v37 }
 0x1ad   : > { %v3404_v58 = vadd.f32 %v3403_v26, %v12176_v10  ;;  %7105 = vmatpush1.bf16.msra.mxu0 %v10308_v45  ;;  %v10316_v10 = vld [vmem:[%s14538_s1 + $0x204] ss:$8 sps:$4 sm:$0xff]  }
 0x1ae   : > { %v3405_v50 = vpop.f32.mrf.mxu0  ;;  %v3516_v43 = vpop.f32.mrf.mxu1  ;;  %7106 = vmatprep.subr.bf16.mxu0 %v10316_v10  ;;  %v10319_v26 = vld [vmem:[%s11067_s26 + $0x6c4] ss:$72 sps:$4 sm:$0xff]   ;;  %v3307_v10 = vadd.f32 %v12235_v24, %v12225_v23  ;;  %v10332_v23 = vld [vmem:[%s11067_s26 + $0x750] ss:$72 sps:$4 sm:$0xff]  }
 0x1af   : > { %v3406_v49 = vadd.f32 %v3405_v50, %v12184_v9  ;;  %v12447_v56 = vadd.f32 %v3516_v43, %v3404_v58  ;;  %v10314_v9 = vld [vmem:[%s14538_s1 + $0x200] ss:$8 sps:$4 sm:$0xff]   ;;  %6938 = vmatprep.mubr.bf16.mxu0 %v10319_v26  ;;  %v10323_v58 = vld [vmem:[%s14538_s1 + $0x2f0] ss:$8 sps:$4 sm:$0xff]  }
 0x1b0   : > { %v3407_v62 = vpop.f32.mrf.mxu0  ;;  %v3518_v33 = vpop.f32.mrf.mxu1 }
 0x1b1   : > { %v12455_v11 = vadd.f32 %v3407_v62, %v12191_v51  ;;  %v12457_v1 = vadd.f32 %v3518_v33, %v3406_v49  ;;  %7107 = vmatpush1.bf16.msra.mxu0 %v10314_v9  ;;  %v10325_v51 = vld [vmem:[%s14538_s1 + $0x2f4] ss:$8 sps:$4 sm:$0xff]  }
 0x1b2   : > { %v3409_v18 = vpop.f32.mrf.mxu0  ;;  %v12462_v20 = vpop.f32.mrf.mxu1  ;;  %7108 = vmatprep.subr.bf16.mxu0 %v10325_v51 }
 0x1b3   : > { %v12464_v63 = vadd.f32 %v3409_v18, %v3297_v19 }
 0x1b4   : > { %v3413_v37 = vpop.f32.mrf.mxu0  ;;  %v12467_v15 = vpop.f32.mrf.mxu1  ;;  %6939 = vmatmul.mubr.bf16.gmra.mxu0 %v10317_v17  ;;  %v10334_v17 = vld [vmem:[%s11067_s26 + $0x754] ss:$72 sps:$4 sm:$0xff]  }
 0x1b5   : > { %v3414_v47 = vadd.f32 %v3413_v37, %v12212_v54  ;;  %7109 = vmatpush2.bf16.msra.mxu0 %v10323_v58  ;;  %v10331_v54 = vld [vmem:[%s14538_s1 + $0x2e4] ss:$8 sps:$4 sm:$0xff]   ;;  %6948 = vmatprep.mubr.bf16.mxu0 %v10334_v17  ;;  %v10338_v58 = vld [vmem:[%s14538_s1 + $0x2d0] ss:$8 sps:$4 sm:$0xff]  }
 0x1b6   : > { %v3415_v45 = vpop.f32.mrf.mxu0  ;;  %v3526_v50 = vpop.f32.mrf.mxu1  ;;  %7110 = vmatprep.subr.bf16.mxu0 %v10331_v54 }
 0x1b7   : > { %v3416_v43 = vadd.f32 %v3415_v45, %v12220_v7  ;;  %v12478_v49 = vadd.f32 %v3526_v50, %v3414_v47  ;;  %v10329_v7 = vld [vmem:[%s14538_s1 + $0x2e0] ss:$8 sps:$4 sm:$0xff]  }
 0x1b8   : > { %v3417_v62 = vpop.f32.mrf.mxu0  ;;  %v3528_v33 = vpop.f32.mrf.mxu1 }
 0x1b9   : > { %v12486_v19 = vadd.f32 %v3417_v62, %v12227_v61  ;;  %v12488_v9 = vadd.f32 %v3528_v33, %v3416_v43  ;;  %7111 = vmatpush2.bf16.msra.mxu0 %v10329_v7  ;;  %v10340_v61 = vld [vmem:[%s14538_s1 + $0x2d4] ss:$8 sps:$4 sm:$0xff]  }
 0x1ba   : > { %v3419_v18 = vpop.f32.mrf.mxu0  ;;  %v12493_v26 = vpop.f32.mrf.mxu1  ;;  %7112 = vmatprep.subr.bf16.mxu0 %v10340_v61  ;;  %v10349_v61 = vld [vmem:[%s11067_s26 + $0x7e4] ss:$72 sps:$4 sm:$0xff]  }
 0x1bb   : > { %14549 = vst [vmem:[#allocation3_spill] sm:$0xff] %v12486_v19  ;;  %14550 = vst [vmem:[#allocation4_spill] sm:$0xff] %v12493_v26  ;;  %v12495_v37 = vadd.f32 %v3419_v18, %v3307_v10  ;;  %v3317_v10 = vadd.f32 %v12270_v25, %v12260_v52  ;;  %v10347_v52 = vld [vmem:[%s11067_s26 + $0x7e0] ss:$72 sps:$4 sm:$0xff]  }
 0x1bc   : > { %v3423_v51 = vpop.f32.mrf.mxu0  ;;  %v12498_v47 = vpop.f32.mrf.mxu1  ;;  %6949 = vmatmul.mubr.bf16.gmra.mxu0 %v10332_v23 }
 0x1bd   : > { %14551 = vst [vmem:[#allocation5_spill] sm:$0xff] %v12495_v37  ;;  %14552 = vst [vmem:[#allocation6_spill] sm:$0xff] %v12498_v47  ;;  %v3424_v24 = vadd.f32 %v3423_v51, %v12248_v21  ;;  %7113 = vmatpush2.bf16.msra.mxu0 %v10338_v58  ;;  %v10346_v21 = vld [vmem:[%s14538_s1 + $0x2c4] ss:$8 sps:$4 sm:$0xff]   ;;  %6958 = vmatprep.mubr.bf16.mxu0 %v10349_v61  ;;  %v10437_v47 = vld [vmem:[%s14538_s1 + $0x410] ss:$8 sps:$4 sm:$0xff]  }
 0x1be   : > { %v3425_v45 = vpop.f32.mrf.mxu0  ;;  %v3536_v50 = vpop.f32.mrf.mxu1  ;;  %7114 = vmatprep.subr.bf16.mxu0 %v10346_v21 }
 0x1bf   : > { %v3426_v43 = vadd.f32 %v3425_v45, %v12255_v12  ;;  %v12509_v62 = vadd.f32 %v3536_v50, %v3424_v24  ;;  %v10344_v12 = vld [vmem:[%s14538_s1 + $0x2c0] ss:$8 sps:$4 sm:$0xff]   ;;  %v10353_v45 = vld [vmem:[%s14538_s1 + $0x2b0] ss:$8 sps:$4 sm:$0xff]  }
 0x1c0   : > { %v3427_v33 = vpop.f32.mrf.mxu0  ;;  %v3538_v54 = vpop.f32.mrf.mxu1 }
 0x1c1   : > { %v12517_v7 = vadd.f32 %v3427_v33, %v12262_v42  ;;  %v12519_v18 = vadd.f32 %v3538_v54, %v3426_v43  ;;  %7115 = vmatpush2.bf16.msra.mxu0 %v10344_v12  ;;  %v10355_v42 = vld [vmem:[%s14538_s1 + $0x2b4] ss:$8 sps:$4 sm:$0xff]   ;;  %v3327_v12 = vadd.f32 %v12304_v35, %v12294_v8  ;;  %v10362_v8 = vld [vmem:[%s11067_s26 + $0x870] ss:$72 sps:$4 sm:$0xff]  }
 0x1c2   : > { %v3429_v17 = vpop.f32.mrf.mxu0  ;;  %v12524_v51 = vpop.f32.mrf.mxu1  ;;  %7116 = vmatprep.subr.bf16.mxu0 %v10355_v42 }
 0x1c3   : > { %14553 = vst [vmem:[#allocation7_spill] sm:$0xff] %v12517_v7  ;;  %14554 = vst [vmem:[#allocation8_spill] sm:$0xff] %v12524_v51  ;;  %v12526_v23 = vadd.f32 %v3429_v17, %v3317_v10 }
 0x1c4   : > { %v3433_v24 = vpop.f32.mrf.mxu0  ;;  %v12529_v58 = vpop.f32.mrf.mxu1  ;;  %6959 = vmatmul.mubr.bf16.gmra.mxu0 %v10347_v52 }
 0x1c5   : > { %14555 = vst [vmem:[#allocation9_spill] sm:$0xff] %v12526_v23  ;;  %14556 = vst [vmem:[#allocation10_spill] sm:$0xff] %v12529_v58  ;;  %v3434_v25 = vadd.f32 %v3433_v24, %v12282_v2  ;;  %7117 = vmatpush2.bf16.msra.mxu0 %v10353_v45  ;;  %v10361_v2 = vld [vmem:[%s14538_s1 + $0x2a4] ss:$8 sps:$4 sm:$0xff]   ;;  %v10419_v58 = vld [vmem:[%s14538_s1 + $0x430] ss:$8 sps:$4 sm:$0xff]  }
 0x1c6   : > { %v3435_v50 = vpop.f32.mrf.mxu0  ;;  %v3546_v43 = vpop.f32.mrf.mxu1  ;;  %7118 = vmatprep.subr.bf16.mxu0 %v10361_v2 }
 0x1c7   : > { %v3436_v33 = vadd.f32 %v3435_v50, %v12289_v60  ;;  %v12540_v54 = vadd.f32 %v3546_v43, %v3434_v25  ;;  %v10359_v60 = vld [vmem:[%s14538_s1 + $0x2a0] ss:$8 sps:$4 sm:$0xff]   ;;  %v10364_v25 = vld [vmem:[%s11067_s26 + $0x874] ss:$72 sps:$4 sm:$0xff]   ;;  %v10368_v43 = vld [vmem:[%s14538_s1 + $0x290] ss:$8 sps:$4 sm:$0xff]  }
 0x1c8   : > { %v3437_v21 = vpop.f32.mrf.mxu0  ;;  %v3548_v10 = vpop.f32.mrf.mxu1  ;;  %6968 = vmatprep.mubr.bf16.mxu0 %v10364_v25 }
 0x1c9   : > { %v12548_v17 = vadd.f32 %v3437_v21, %v12296_v4  ;;  %v12550_v61 = vadd.f32 %v3548_v10, %v3436_v33  ;;  %7119 = vmatpush2.bf16.msra.mxu0 %v10359_v60  ;;  %v10370_v4 = vld [vmem:[%s14538_s1 + $0x294] ss:$8 sps:$4 sm:$0xff]   ;;  %v10374_v60 = vld [vmem:[%s14538_s1 + $0x280] ss:$8 sps:$4 sm:$0xff]  }
 0x1ca   : > { %v3439_v24 = vpop.f32.mrf.mxu0  ;;  %v12555_v52 = vpop.f32.mrf.mxu1  ;;  %7120 = vmatprep.subr.bf16.mxu0 %v10370_v4  ;;  %v10385_v4 = vld [vmem:[%s14538_s1 + $0x474] ss:$8 sps:$4 sm:$0xff]  }
 0x1cb   : > { %14557 = vst [vmem:[#allocation11_spill] sm:$0xff] %v12548_v17  ;;  %14558 = vst [vmem:[#allocation12_spill] sm:$0xff] %v12555_v52  ;;  %v12557_v42 = vadd.f32 %v3439_v24, %v3327_v12 }
 0x1cc   : > { %v12560_v45 = vpop.f32.mrf.mxu1  ;;  %v3589_v50 = vpop.f32.mrf.mxu0  ;;  %6969 = vmatmul.mubr.bf16.gmra.mxu0 %v10362_v8  ;;  %v10380_v8 = vld [vmem:[%s11067_s26 + $0x490] ss:$72 sps:$4 sm:$0xff]  }
 0x1cd   : > { %14559 = vst [vmem:[#allocation13_spill] sm:$0xff] %v12557_v42  ;;  %14560 = vst [vmem:[#allocation14_spill] sm:$0xff] %v12560_v45  ;;  %v12567_v35 = vadd.f32 %v3589_v50, %v12314_v0  ;;  %7121 = vmatpush2.bf16.msra.mxu0 %v10368_v43  ;;  %v10376_v0 = vld [vmem:[%s14538_s1 + $0x284] ss:$8 sps:$4 sm:$0xff]   ;;  %v10401_v45 = vld [vmem:[%s14538_s1 + $0x450] ss:$8 sps:$4 sm:$0xff]  }
 0x1ce   : > { %v3591_v33 = vpop.f32.mrf.mxu0  ;;  %v12572_v21 = vpop.f32.mrf.mxu1  ;;  %7122 = vmatprep.subr.bf16.mxu0 %v10376_v0 }
 0x1cf   : > { %v12575_v10 = vadd.f32 %v3591_v33, %v12324_v39  ;;  %v10382_v39 = vld [vmem:[%s11067_s26 + $0x494] ss:$72 sps:$4 sm:$0xff]   ;;  %v10383_v33 = vld [vmem:[%s14538_s1 + $0x470] ss:$8 sps:$4 sm:$0xff]  }
 0x1d0   : > { %v12577_v2 = vpop.f32.mrf.mxu0  ;;  %v12579_v12 = vpop.f32.mrf.mxu1  ;;  %7124 = vmatprep.mubr.bf16.mxu0 %v10382_v39  ;;  %v10392_v39 = vld [vmem:[%s14538_s1 + $0x460] ss:$8 sps:$4 sm:$0xff]  }
 0x1d1   : > { %7123 = vmatpush2.bf16.msra.mxu0 %v10374_v60 }
 0x1d2   : > { %v12587_v24 = vpop.f32.mrf.mxu0  ;;  %v12589_v25 = vpop.f32.mrf.mxu1  ;;  %7318 = vmatprep.subr.bf16.mxu0 %v10385_v4  ;;  %v10395_v4 = vld [vmem:[%s11067_s26 + $0x520] ss:$72 sps:$4 sm:$0xff]  }
 0x1d4   : > { %v3599_v50 = vpop.f32.mrf.mxu0  ;;  %v12602_v40 = vpop.f32.mrf.mxu1  ;;  %7125 = vmatmul.mubr.bf16.vlgmr.msra.gmra.mxu0 %v10380_v8  ;;  %v10403_v8 = vld [vmem:[%s14538_s1 + $0x454] ss:$8 sps:$4 sm:$0xff]  }
 0x1d5   : > { %v12597_v43 = vadd.f32 %v3599_v50, %v12351_v57  ;;  %7319 = vmatpush1.bf16.msra.mxu0 %v10383_v33  ;;  %v10394_v57 = vld [vmem:[%s14538_s1 + $0x464] ss:$8 sps:$4 sm:$0xff]  }
 0x1d6   : > { %v3601_v0 = vpop.f32.mrf.mxu0  ;;  %v12615_v50 = vpop.f32.mrf.mxu1  ;;  %7320 = vmatprep.subr.bf16.mxu0 %v10394_v57 }
 0x1d7   : > { %v12605_v60 = vadd.f32 %v3601_v0, %v12364_v48  ;;  %v10397_v48 = vld [vmem:[%s11067_s26 + $0x524] ss:$72 sps:$4 sm:$0xff]  }
 0x1d8   : > { %v12607_v36 = vpop.f32.mrf.mxu0  ;;  %7134 = vmatprep.mubr.bf16.mxu0 %v10397_v48  ;;  %v12630_v42 = vpop.f32.mrf.mxu1  ;;  %v10410_v48 = vld [vmem:[%s14538_s1 + $0x440] ss:$8 sps:$4 sm:$0xff]  }
 0x1d9   : > { %7321 = vmatpush1.bf16.msra.mxu0 %v10392_v39 }
 0x1da   : > { %v12617_v29 = vpop.f32.mrf.mxu0  ;;  %7322 = vmatprep.subr.bf16.mxu0 %v10403_v8  ;;  %v10413_v8 = vld [vmem:[%s11067_s26 + $0x5b0] ss:$72 sps:$4 sm:$0xff]  }
 0x1dc   : > { %v3609_v0 = vpop.f32.mrf.mxu0  ;;  %7135 = vmatmul.mubr.bf16.gmra.mxu0 %v10395_v4 }
 0x1dd   : > { %v12625_v33 = vadd.f32 %v3609_v0, %v12385_v30  ;;  %7323 = vmatpush1.bf16.msra.mxu0 %v10401_v45  ;;  %v10412_v30 = vld [vmem:[%s14538_s1 + $0x444] ss:$8 sps:$4 sm:$0xff]   ;;  %v12643_v0 = vpop.f32.mrf.mxu1  ;;  %v10421_v45 = vld [vmem:[%s14538_s1 + $0x434] ss:$8 sps:$4 sm:$0xff]  }
 0x1de   : > { %v3611_v57 = vpop.f32.mrf.mxu0  ;;  %7324 = vmatprep.subr.bf16.mxu0 %v10412_v30 }
 0x1df   : > { %v12633_v39 = vadd.f32 %v3611_v57, %v12395_v22  ;;  %v10415_v22 = vld [vmem:[%s11067_s26 + $0x5b4] ss:$72 sps:$4 sm:$0xff]   ;;  %v12658_v23 = vpop.f32.mrf.mxu1 }
 0x1e0   : > { %v12635_v52 = vpop.f32.mrf.mxu0  ;;  %7144 = vmatprep.mubr.bf16.mxu0 %v10415_v22  ;;  %v10428_v22 = vld [vmem:[%s14538_s1 + $0x420] ss:$8 sps:$4 sm:$0xff]  }
 0x1e1   : > { %7325 = vmatpush1.bf16.msra.mxu0 %v10410_v48 }
 0x1e2   : > { %v12645_v17 = vpop.f32.mrf.mxu0  ;;  %7326 = vmatprep.subr.bf16.mxu0 %v10421_v45  ;;  %v10431_v45 = vld [vmem:[%s11067_s26 + $0x640] ss:$72 sps:$4 sm:$0xff]  }
 0x1e4   : > { %v3619_v57 = vpop.f32.mrf.mxu0  ;;  %7145 = vmatmul.mubr.bf16.gmra.mxu0 %v10413_v8 }
 0x1e5   : > { %v12653_v4 = vadd.f32 %v3619_v57, %v12416_v59  ;;  %7327 = vmatpush1.bf16.msra.mxu0 %v10419_v58  ;;  %v10430_v59 = vld [vmem:[%s14538_s1 + $0x424] ss:$8 sps:$4 sm:$0xff]   ;;  %v12671_v57 = vpop.f32.mrf.mxu1  ;;  %v10439_v58 = vld [vmem:[%s14538_s1 + $0x414] ss:$8 sps:$4 sm:$0xff]  }
 0x1e6   : > { %v3621_v30 = vpop.f32.mrf.mxu0  ;;  %7328 = vmatprep.subr.bf16.mxu0 %v10430_v59 }
 0x1e7   : > { %v12661_v48 = vadd.f32 %v3621_v30, %v12426_v13  ;;  %v10433_v13 = vld [vmem:[%s11067_s26 + $0x644] ss:$72 sps:$4 sm:$0xff]   ;;  %v12686_v37 = vpop.f32.mrf.mxu1 }
 0x1e8   : > { %v12663_v51 = vpop.f32.mrf.mxu0  ;;  %7154 = vmatprep.mubr.bf16.mxu0 %v10433_v13  ;;  %v10446_v13 = vld [vmem:[%s14538_s1 + $0x400] ss:$8 sps:$4 sm:$0xff]  }
 0x1e9   : > { %7329 = vmatpush1.bf16.msra.mxu0 %v10428_v22 }
 0x1ea   : > { %v12673_v7 = vpop.f32.mrf.mxu0  ;;  %7330 = vmatprep.subr.bf16.mxu0 %v10439_v58  ;;  %v10449_v58 = vld [vmem:[%s11067_s26 + $0x6d0] ss:$72 sps:$4 sm:$0xff]  }
 0x1ec   : > { %v3629_v30 = vpop.f32.mrf.mxu0  ;;  %7155 = vmatmul.mubr.bf16.gmra.mxu0 %v10431_v45 }
 0x1ed   : > { %v12681_v8 = vadd.f32 %v3629_v30, %v12447_v56  ;;  %7331 = vmatpush1.bf16.msra.mxu0 %v10437_v47  ;;  %v10448_v56 = vld [vmem:[%s14538_s1 + $0x404] ss:$8 sps:$4 sm:$0xff]   ;;  %v12699_v30 = vpop.f32.mrf.mxu1  ;;  %v10457_v47 = vld [vmem:[%s14538_s1 + $0x4f4] ss:$8 sps:$4 sm:$0xff]  }
 0x1ee   : > { %v3631_v59 = vpop.f32.mrf.mxu0  ;;  %7332 = vmatprep.subr.bf16.mxu0 %v10448_v56 }
 0x1ef   : > { %14561 = vst [vmem:[#allocation15_spill] sm:$0xff] %v12681_v8  ;;  %v12689_v22 = vadd.f32 %v3631_v59, %v12457_v1  ;;  %v10451_v1 = vld [vmem:[%s11067_s26 + $0x6d4] ss:$72 sps:$4 sm:$0xff]  }
 0x1f0   : > { %v12691_v26 = vpop.f32.mrf.mxu0  ;;  %7164 = vmatprep.mubr.bf16.mxu0 %v10451_v1  ;;  %v10464_v1 = vld [vmem:[%s14538_s1 + $0x4e0] ss:$8 sps:$4 sm:$0xff]  }
 0x1f1   : > { %14562 = vst [vmem:[#allocation16_spill] sm:$0xff] %v12689_v22  ;;  %7333 = vmatpush1.bf16.msra.mxu0 %v10446_v13  ;;  %v10455_v22 = vld [vmem:[%s14538_s1 + $0x4f0] ss:$8 sps:$4 sm:$0xff]  }
 0x1f2   : > { %v12701_v19 = vpop.f32.mrf.mxu0  ;;  %7334 = vmatprep.subr.bf16.mxu0 %v10457_v47  ;;  %v10467_v47 = vld [vmem:[%s11067_s26 + $0x760] ss:$72 sps:$4 sm:$0xff]  }
 0x1f3   : > { %14563 = vst [vmem:[#allocation17_spill] sm:$0xff] %v12701_v19  ;;  %v12714_v19 = vpop.f32.mrf.mxu1 }
 0x1f4   : > { %v3639_v59 = vpop.f32.mrf.mxu0  ;;  %7165 = vmatmul.mubr.bf16.gmra.mxu0 %v10449_v58 }
 0x1f5   : > { %v12709_v45 = vadd.f32 %v3639_v59, %v12478_v49  ;;  %7335 = vmatpush2.bf16.msra.mxu0 %v10455_v22  ;;  %v10466_v49 = vld [vmem:[%s14538_s1 + $0x4e4] ss:$8 sps:$4 sm:$0xff]   ;;  %v12727_v59 = vpop.f32.mrf.mxu1  ;;  %v10475_v22 = vld [vmem:[%s14538_s1 + $0x4d4] ss:$8 sps:$4 sm:$0xff]  }
 0x1f6   : > { %v3641_v56 = vpop.f32.mrf.mxu0  ;;  %7336 = vmatprep.subr.bf16.mxu0 %v10466_v49 }
 0x1f7   : > { %14564 = vst [vmem:[#allocation18_spill] sm:$0xff] %v12709_v45  ;;  %v12717_v13 = vadd.f32 %v3641_v56, %v12488_v9  ;;  %v10469_v9 = vld [vmem:[%s11067_s26 + $0x764] ss:$72 sps:$4 sm:$0xff]  }
 0x1f8   : > { %v12719_v8 = vpop.f32.mrf.mxu0  ;;  %7174 = vmatprep.mubr.bf16.mxu0 %v10469_v9  ;;  %v10482_v9 = vld [vmem:[%s14538_s1 + $0x4c0] ss:$8 sps:$4 sm:$0xff]  }
 0x1f9   : > { %14565 = vst [vmem:[#allocation19_spill] sm:$0xff] %v12717_v13  ;;  %14566 = vst [vmem:[#allocation20_spill] sm:$0xff] %v12719_v8  ;;  %7337 = vmatpush2.bf16.msra.mxu0 %v10464_v1  ;;  %v10473_v13 = vld [vmem:[%s14538_s1 + $0x4d0] ss:$8 sps:$4 sm:$0xff]  }
 0x1fa   : > { %v12729_v45 = vpop.f32.mrf.mxu0  ;;  %7338 = vmatprep.subr.bf16.mxu0 %v10475_v22  ;;  %v10485_v22 = vld [vmem:[%s11067_s26 + $0x7f0] ss:$72 sps:$4 sm:$0xff]  }
 0x1fb   : > { %14567 = vst [vmem:[#allocation21_spill] sm:$0xff] %v12729_v45  ;;  %v12742_v45 = vpop.f32.mrf.mxu1 }
 0x1fc   : > { %v3649_v56 = vpop.f32.mrf.mxu0  ;;  %7175 = vmatmul.mubr.bf16.gmra.mxu0 %v10467_v47 }
 0x1fd   : > { %v12737_v58 = vadd.f32 %v3649_v56, %v12509_v62  ;;  %7339 = vmatpush2.bf16.msra.mxu0 %v10473_v13  ;;  %v10484_v62 = vld [vmem:[%s14538_s1 + $0x4c4] ss:$8 sps:$4 sm:$0xff]   ;;  %v12755_v56 = vpop.f32.mrf.mxu1  ;;  %v10493_v13 = vld [vmem:[%s14538_s1 + $0x4b4] ss:$8 sps:$4 sm:$0xff]  }
 0x1fe   : > { %v3651_v49 = vpop.f32.mrf.mxu0  ;;  %7340 = vmatprep.subr.bf16.mxu0 %v10484_v62 }
 0x1ff   : > { %14568 = vst [vmem:[#allocation22_spill] sm:$0xff] %v12737_v58  ;;  %v12745_v1 = vadd.f32 %v3651_v49, %v12519_v18  ;;  %v10487_v18 = vld [vmem:[%s11067_s26 + $0x7f4] ss:$72 sps:$4 sm:$0xff]  }
 0x200   : > { %v12747_v8 = vpop.f32.mrf.mxu0  ;;  %7184 = vmatprep.mubr.bf16.mxu0 %v10487_v18  ;;  %v3481_v18 = vadd.f32 %v12329_v14, %v12322_v3  ;;  %v10511_v3 = vld [vmem:[%s14538_s1 + $0x494] ss:$8 sps:$4 sm:$0xff]   ;;  %v3703_v14 = vadd.f32 %v12572_v21, %v12567_v35  ;;  %v10520_v21 = vld [vmem:[%s14538_s1 + $0x484] ss:$8 sps:$4 sm:$0xff]  }
 0x201   : > { %14569 = vst [vmem:[#allocation23_spill] sm:$0xff] %v12745_v1  ;;  %14570 = vst [vmem:[#allocation24_spill] sm:$0xff] %v12747_v8  ;;  %7341 = vmatpush2.bf16.msra.mxu0 %v10482_v9  ;;  %v10491_v1 = vld [vmem:[%s14538_s1 + $0x4b0] ss:$8 sps:$4 sm:$0xff]   ;;  %v12770_v8 = vpop.f32.mrf.mxu1 }
 0x202   : > { %v12757_v58 = vpop.f32.mrf.mxu0  ;;  %7342 = vmatprep.subr.bf16.mxu0 %v10493_v13 }
 0x203   : > { %14571 = vst [vmem:[#allocation25_spill] sm:$0xff] %v12757_v58 }
 0x204   : > { %v3659_v49 = vpop.f32.mrf.mxu0  ;;  %7185 = vmatmul.mubr.bf16.gmra.mxu0 %v10485_v22  ;;  %v10503_v22 = vld [vmem:[%s11067_s26 + $0x880] ss:$72 sps:$4 sm:$0xff]  }
 0x205   : > { %v12765_v47 = vadd.f32 %v3659_v49, %v12540_v54  ;;  %7343 = vmatpush2.bf16.msra.mxu0 %v10491_v1  ;;  %v10502_v54 = vld [vmem:[%s14538_s1 + $0x4a4] ss:$8 sps:$4 sm:$0xff]   ;;  %v10500_v49 = vld [vmem:[%s14538_s1 + $0x4a0] ss:$8 sps:$4 sm:$0xff]   ;;  %v3594_v1 = vadd.f32 %v12577_v2, %v3481_v18 }
 0x206   : > { %v3661_v62 = vpop.f32.mrf.mxu0  ;;  %7344 = vmatprep.subr.bf16.mxu0 %v10502_v54  ;;  %v3705_v54 = vadd.f32 %v12579_v12, %v12575_v10  ;;  %v10518_v12 = vld [vmem:[%s14538_s1 + $0x480] ss:$8 sps:$4 sm:$0xff]  }
 0x207   : > { %14572 = vst [vmem:[#allocation26_spill] sm:$0xff] %v12765_v47  ;;  %v12773_v9 = vadd.f32 %v3661_v62, %v12550_v61  ;;  %v12785_v47 = vpop.f32.mrf.mxu1  ;;  %v3483_v61 = vadd.f32 %v12334_v16, %v12331_v27  ;;  %v10505_v62 = vld [vmem:[%s11067_s26 + $0x884] ss:$72 sps:$4 sm:$0xff]   ;;  %v10509_v27 = vld [vmem:[%s14538_s1 + $0x490] ss:$8 sps:$4 sm:$0xff]   ;;  %v3707_v18 = vadd.f32 %v12589_v25, %v3594_v1  ;;  %v3493_v25 = vadd.f32 %v12374_v6, %v12371_v44 }
 0x208   : > { %v12775_v58 = vpop.f32.mrf.mxu0  ;;  %7194 = vmatprep.mubr.bf16.mxu0 %v10505_v62  ;;  %v10524_v44 = vld [vmem:[%s11067_s26 + $0x4a0] ss:$72 sps:$4 sm:$0xff]   ;;  %v10526_v6 = vld [vmem:[%s11067_s26 + $0x4a4] ss:$72 sps:$4 sm:$0xff]  }
 0x209   : > { %14573 = vst [vmem:[#allocation27_spill] sm:$0xff] %v12773_v9  ;;  %14574 = vst [vmem:[#allocation28_spill] sm:$0xff] %v12775_v58  ;;  %7345 = vmatpush2.bf16.msra.mxu0 %v10500_v49  ;;  %v3596_v58 = vadd.f32 %v12587_v24, %v3483_v61  ;;  %v12803_v16 = vpop.f32.mrf.mxu1  ;;  %v3491_v24 = vadd.f32 %v12369_v46, %v12362_v53 }
 0x20a   : > { %v12787_v13 = vpop.f32.mrf.mxu0  ;;  %7346 = vmatprep.subr.bf16.mxu0 %v10511_v3 }
 0x20b   : > { %v3709_v61 = vadd.f32 %v12602_v40, %v3596_v58  ;;  %v3604_v53 = vadd.f32 %v12607_v36, %v3491_v24  ;;  %v10529_v36 = vld [vmem:[%s14538_s1 + $0x674] ss:$8 sps:$4 sm:$0xff]   ;;  %v10266_v24 = vld [vmem:[%s14538_s1 + $0x170] ss:$8 sps:$4 sm:$0xff]  }
 0x20c   : > { %v3815_v9 = vpop.f32.mrf.mxu0  ;;  %7195 = vmatmul.mubr.bf16.gmra.mxu0 %v10503_v22  ;;  %v3713_v22 = vadd.f32 %v12615_v50, %v12597_v43  ;;  %v10527_v43 = vld [vmem:[%s14538_s1 + $0x670] ss:$8 sps:$4 sm:$0xff]  }
 0x20d   : > { %v3816_v49 = vadd.f32 %v3815_v9, %v3703_v14  ;;  %7347 = vmatpush2.bf16.msra.mxu0 %v10509_v27  ;;  %v12820_v9 = vpop.f32.mrf.mxu1  ;;  %v3606_v14 = vadd.f32 %v12617_v29, %v3493_v25  ;;  %7350 = vmatprep.mubr.bf16.mxu0 %v10526_v6  ;;  %v10275_v25 = vld [vmem:[%s14538_s1 + $0x160] ss:$8 sps:$4 sm:$0xff]  }
 0x20e   : > { %v3817_v2 = vpop.f32.mrf.mxu0  ;;  %7348 = vmatprep.subr.bf16.mxu0 %v10520_v21 }
 0x20f   : > { %v3818_v62 = vadd.f32 %v3817_v2, %v3705_v54  ;;  %v3894_v46 = vmax.f32 %v3816_v49, 0.0  ;;  %v12839_v50 = vpop.f32.mrf.mxu1  ;;  %v3715_v49 = vadd.f32 %v12630_v42, %v12605_v60  ;;  %v10538_v42 = vld [vmem:[%s14538_s1 + $0x664] ss:$8 sps:$4 sm:$0xff]   ;;  %v3501_v60 = vadd.f32 %v12400_v41, %v12393_v32 }
 0x210   : > { %v3819_v35 = vpop.f32.mrf.mxu0 }
 0x211   : > { %v3820_v10 = vadd.f32 %v3819_v35, %v3707_v18  ;;  %7349 = vmatpush2.bf16.msra.mxu0 %v10518_v12  ;;  %v3895_v27 = vmax.f32 %v3818_v62, 0.0  ;;  %v3717_v35 = vadd.f32 %v12643_v0, %v3604_v53  ;;  %v10277_v62 = vld [vmem:[%s14538_s1 + $0x164] ss:$8 sps:$4 sm:$0xff]   ;;  %v3719_v0 = vadd.f32 %v12658_v23, %v3606_v14 }
 0x212   : > { %v3821_v1 = vpop.f32.mrf.mxu0  ;;  %7544 = vmatprep.subr.bf16.mxu0 %v10529_v36  ;;  %v3503_v53 = vadd.f32 %v12405_v55, %v12402_v34  ;;  %v3614_v41 = vadd.f32 %v12635_v52, %v3501_v60  ;;  %v10283_v34 = vld [vmem:[%s14538_s1 + $0x154] ss:$8 sps:$4 sm:$0xff]  }
 0x213   : > { %v3896_v40 = vmax.f32 %v3820_v10, 0.0  ;;  %v3822_v58 = vadd.f32 %v3821_v1, %v3709_v61  ;;  %v10536_v1 = vld [vmem:[%s14538_s1 + $0x660] ss:$8 sps:$4 sm:$0xff]   ;;  %v10547_v55 = vld [vmem:[%s14538_s1 + $0x654] ss:$8 sps:$4 sm:$0xff]  }
 0x214   : > { %v3825_v3 = vpop.f32.mrf.mxu0  ;;  %7351 = vmatmul.mubr.bf16.vlgmr.msra.gmra.mxu0 %v10524_v44  ;;  %v3723_v44 = vadd.f32 %v12671_v57, %v12625_v33  ;;  %v3616_v52 = vadd.f32 %v12645_v17, %v3503_v53  ;;  %v10545_v33 = vld [vmem:[%s14538_s1 + $0x650] ss:$8 sps:$4 sm:$0xff]   ;;  %v3725_v57 = vadd.f32 %v12686_v37, %v12633_v39  ;;  %v10292_v37 = vld [vmem:[%s14538_s1 + $0x144] ss:$8 sps:$4 sm:$0xff]  }
 0x215   : > { %v3926_v2 = vpack.c.bf16 %v3896_v40, %v3894_v46  ;;  %v3897_v54 = vmax.f32 %v3822_v58, 0.0  ;;  %v3826_v21 = vadd.f32 %v3825_v3, %v3713_v22  ;;  %7545 = vmatpush1.bf16.msra.mxu0 %v10527_v43  ;;  %v12865_v46 = vpop.f32.mrf.mxu1  ;;  %v10539_v22 = vld [vmem:[%s11067_s26 + $0x530] ss:$72 sps:$4 sm:$0xff]   ;;  %v10541_v3 = vld [vmem:[%s11067_s26 + $0x534] ss:$72 sps:$4 sm:$0xff]   ;;  %v3727_v43 = vadd.f32 %v12699_v30, %v3614_v41 }
 0x216   : > { %v3827_v18 = vpop.f32.mrf.mxu0  ;;  %7546 = vmatprep.subr.bf16.mxu0 %v10538_v42  ;;  %7360 = vmatprep.mubr.bf16.mxu0 %v10541_v3  ;;  %v10556_v39 = vld [vmem:[%s14538_s1 + $0x644] ss:$8 sps:$4 sm:$0xff]   ;;  %v3511_v30 = vadd.f32 %v12431_v31, %v12424_v5  ;;  %v3513_v42 = vadd.f32 %v12436_v38, %v12433_v28  ;;  %v10298_v28 = vld [vmem:[%s14538_s1 + $0x134] ss:$8 sps:$4 sm:$0xff]  }
 0x217   : > { %9320 = vst [vmem:[%s12828_s8] sm:$0xff] %v3926_v2   ;;  %v4006_v29 = vpack.c.bf16 %v3897_v54, %v3895_v27  ;;  %v3828_v10 = vadd.f32 %v3827_v18, %v3715_v49  ;;  %v3898_v23 = vmax.f32 %v3826_v21, 0.0  ;;  %v10281_v49 = vld [vmem:[%s14538_s1 + $0x150] ss:$8 sps:$4 sm:$0xff]   ;;  %v3729_v21 = vadd.f32 %v12714_v19, %v3616_v52  ;;  %v10565_v38 = vld [vmem:[%s14538_s1 + $0x634] ss:$8 sps:$4 sm:$0xff]  }
 0x218   : > { %v3829_v61 = vpop.f32.mrf.mxu0  ;;  %v3624_v31 = vadd.f32 %v12663_v51, %v3511_v30  ;;  %v3626_v51 = vadd.f32 %v12673_v7, %v3513_v42 }
 0x219   : > { %v3830_v12 = vadd.f32 %v3829_v61, %v3717_v35  ;;  %4181 = vmatprep.mubr.bf16.mxu1 %v4006_v29  ;;  %7547 = vmatpush1.bf16.msra.mxu0 %v10536_v1  ;;  %v3899_v36 = vmax.f32 %v3828_v10, 0.0  ;;  %v10290_v61 = vld [vmem:[%s14538_s1 + $0x140] ss:$8 sps:$4 sm:$0xff]   ;;  %v3733_v1 = vadd.f32 %v12727_v59, %v12653_v4  ;;  %v10563_v4 = vld [vmem:[%s14538_s1 + $0x630] ss:$8 sps:$4 sm:$0xff]   ;;  %v3735_v59 = vadd.f32 %v12742_v45, %v12661_v48 }
 0x21a   : > { %v3831_v32 = vpop.f32.mrf.mxu0  ;;  %4182 = vmatmul.mubr.bf16.vlgmr.msra.gmra.mxu1 %v3926_v2  ;;  %v12884_v2 = vpop.f32.mrf.mxu1  ;;  %7548 = vmatprep.subr.bf16.mxu0 %v10547_v55  ;;  %v10307_v48 = vld [vmem:[%s14538_s1 + $0x124] ss:$8 sps:$4 sm:$0xff]  }
 0x21b   : > { %v3900_v40 = vmax.f32 %v3830_v12, 0.0  ;;  %v3832_v58 = vadd.f32 %v3831_v32, %v3719_v0  ;;  %6980 = vmatpush1.bf16.msra.mxu1 %v10266_v24  ;;  %v10557_v12 = vld [vmem:[%s11067_s26 + $0x5c0] ss:$72 sps:$4 sm:$0xff]   ;;  %v10574_v45 = vld [vmem:[%s14538_s1 + $0x624] ss:$8 sps:$4 sm:$0xff]  }
 0x21c   : > { %v3835_v6 = vpop.f32.mrf.mxu0  ;;  %6981 = vmatprep.subr.bf16.mxu1 %v10277_v62  ;;  %7361 = vmatmul.mubr.bf16.gmra.mxu0 %v10539_v22  ;;  %v10554_v62 = vld [vmem:[%s14538_s1 + $0x640] ss:$8 sps:$4 sm:$0xff]   ;;  %v12908_v60 = vpop.f32.mrf.mxu1  ;;  %v3737_v22 = vadd.f32 %v12755_v56, %v3624_v31  ;;  %v3521_v56 = vadd.f32 %v12462_v20, %v12455_v11 }
 0x21d   : > { %v3927_v14 = vpack.c.bf16 %v3900_v40, %v3898_v23  ;;  %v3901_v27 = vmax.f32 %v3832_v58, 0.0  ;;  %v3836_v18 = vadd.f32 %v3835_v6, %v3723_v44  ;;  %7549 = vmatpush1.bf16.msra.mxu0 %v10545_v33  ;;  %v10296_v44 = vld [vmem:[%s14538_s1 + $0x130] ss:$8 sps:$4 sm:$0xff]   ;;  %v10305_v11 = vld [vmem:[%s14538_s1 + $0x120] ss:$8 sps:$4 sm:$0xff]  }
 0x21e   : > { %v3837_v54 = vpop.f32.mrf.mxu0  ;;  %7550 = vmatprep.subr.bf16.mxu0 %v10556_v39  ;;  %v12927_v40 = vpop.f32.mrf.mxu1  ;;  %v3634_v20 = vadd.f32 %v12691_v26, %v3521_v56  ;;  %v10583_v26 = vld [vmem:[%s14538_s1 + $0x614] ss:$8 sps:$4 sm:$0xff]  }
 0x21f   : > { %9396 = vst [vmem:[%s12828_s8 + $0x8] sm:$0xff] %v3927_v14   ;;  %6982 = vmatpush1.bf16.msra.mxu1 %v10275_v25  ;;  %v4007_v17 = vpack.c.bf16 %v3901_v27, %v3899_v36  ;;  %v3838_v29 = vadd.f32 %v3837_v54, %v3725_v57  ;;  %v3902_v19 = vmax.f32 %v3836_v18, 0.0  ;;  %v10559_v25 = vld [vmem:[%s11067_s26 + $0x5c4] ss:$72 sps:$4 sm:$0xff]   ;;  %v10572_v36 = vld [vmem:[%s14538_s1 + $0x620] ss:$8 sps:$4 sm:$0xff]  }
 0x220   : > { %v3839_v35 = vpop.f32.mrf.mxu0  ;;  %6983 = vmatprep.subr.bf16.mxu1 %v10283_v34  ;;  %7370 = vmatprep.mubr.bf16.mxu0 %v10559_v25  ;;  %v3739_v34 = vadd.f32 %v12770_v8, %v3626_v51  ;;  %v12948_v27 = vpop.f32.mrf.mxu1  ;;  %v10577_v18 = vld [vmem:[%s11067_s26 + $0x654] ss:$72 sps:$4 sm:$0xff]   ;;  %v3747_v42 = vadd.f32 %v12820_v9, %v3634_v20  ;;  %v10592_v9 = vld [vmem:[%s14538_s1 + $0x604] ss:$8 sps:$4 sm:$0xff]  }
 0x221   : > { %v3840_v24 = vadd.f32 %v3839_v35, %v3727_v43  ;;  %4189 = vmatprep.mubr.bf16.mxu1 %v4007_v17  ;;  %7551 = vmatpush1.bf16.msra.mxu0 %v10554_v62  ;;  %v3903_v32 = vmax.f32 %v3838_v29, 0.0  ;;  %v10575_v43 = vld [vmem:[%s11067_s26 + $0x650] ss:$72 sps:$4 sm:$0xff]   ;;  %v14575_v17 = vld [vmem:[#allocation15_spill] sm:$0xff] }
 0x222   : > { %v3841_v5 = vpop.f32.mrf.mxu0  ;;  %4190 = vmatmul.mubr.bf16.gmra.mxu1 %v3927_v14  ;;  %7552 = vmatprep.subr.bf16.mxu0 %v10565_v38  ;;  %v3523_v14 = vadd.f32 %v12467_v15, %v12464_v63  ;;  %v3743_v63 = vadd.f32 %v12785_v47, %v14575_v17  ;;  %v14576_v35 = vld [vmem:[#allocation17_spill] sm:$0xff]  ;;  %v14577_v29 = vld [vmem:[#allocation16_spill] sm:$0xff]  ;;  %v10590_v38 = vld [vmem:[%s14538_s1 + $0x600] ss:$8 sps:$4 sm:$0xff]  }
 0x223   : > { %v3904_v0 = vmax.f32 %v3840_v24, 0.0  ;;  %v3842_v10 = vadd.f32 %v3841_v5, %v3729_v21  ;;  %6984 = vmatpush1.bf16.msra.mxu1 %v10281_v49  ;;  %v10313_v49 = vld [vmem:[%s14538_s1 + $0x114] ss:$8 sps:$4 sm:$0xff]   ;;  %v10581_v47 = vld [vmem:[%s14538_s1 + $0x610] ss:$8 sps:$4 sm:$0xff]   ;;  %v3745_v24 = vadd.f32 %v12803_v16, %v14577_v29  ;;  %v14585_v20 = vld [vmem:[#allocation19_spill] sm:$0xff] }
 0x224   : > { %v3845_v53 = vpop.f32.mrf.mxu0  ;;  %6985 = vmatprep.subr.bf16.mxu1 %v10292_v37  ;;  %7371 = vmatmul.mubr.bf16.gmra.mxu0 %v10557_v12  ;;  %v3636_v37 = vadd.f32 %v14576_v35, %v3523_v14  ;;  %v10322_v16 = vld [vmem:[%s14538_s1 + $0x104] ss:$8 sps:$4 sm:$0xff]   ;;  %v14579_v12 = vld [vmem:[#allocation4_spill] sm:$0xff]  ;;  %v14580_v51 = vld [vmem:[#allocation5_spill] sm:$0xff] }
 0x225   : > { %v3928_v41 = vpack.c.bf16 %v3904_v0, %v3902_v19  ;;  %v3905_v23 = vmax.f32 %v3842_v10, 0.0  ;;  %v3846_v3 = vadd.f32 %v3845_v53, %v3733_v1  ;;  %7553 = vmatpush1.bf16.msra.mxu0 %v10563_v4  ;;  %7380 = vmatprep.mubr.bf16.mxu0 %v10577_v18  ;;  %v10311_v19 = vld [vmem:[%s14538_s1 + $0x110] ss:$8 sps:$4 sm:$0xff]   ;;  %v14578_v10 = vld [vmem:[#allocation3_spill] sm:$0xff]  ;;  %v14589_v29 = vld [vmem:[#allocation10_spill] sm:$0xff] }
 0x226   : > { %v3847_v58 = vpop.f32.mrf.mxu0  ;;  %7554 = vmatprep.subr.bf16.mxu0 %v10574_v45  ;;  %v3531_v25 = vadd.f32 %v14579_v12, %v14578_v10  ;;  %v3749_v1 = vadd.f32 %v12839_v50, %v3636_v37  ;;  %v10320_v50 = vld [vmem:[%s14538_s1 + $0x100] ss:$8 sps:$4 sm:$0xff]   ;;  %v10613_v10 = vld [vmem:[%s11067_s26 + $0x774] ss:$72 sps:$4 sm:$0xff]  }
 0x227   : > { %9397 = vst [vmem:[%s12828_s8 + $0x10] sm:$0xff] %v3928_v41   ;;  %6986 = vmatpush1.bf16.msra.mxu1 %v10290_v61  ;;  %v4008_v7 = vpack.c.bf16 %v3905_v23, %v3903_v32  ;;  %v3848_v55 = vadd.f32 %v3847_v58, %v3735_v59  ;;  %v3906_v8 = vmax.f32 %v3846_v3, 0.0  ;;  %v12970_v61 = vpop.f32.mrf.mxu1  ;;  %v14581_v32 = vld [vmem:[#allocation6_spill] sm:$0xff]  ;;  %v14582_v59 = vld [vmem:[#allocation20_spill] sm:$0xff] }
 0x228   : > { %v3849_v6 = vpop.f32.mrf.mxu0  ;;  %6987 = vmatprep.subr.bf16.mxu1 %v10298_v28  ;;  %v3644_v58 = vadd.f32 %v14582_v59, %v3531_v25  ;;  %v14591_v12 = vld [vmem:[#allocation22_spill] sm:$0xff] }
 0x229   : > { %v3850_v52 = vadd.f32 %v3849_v6, %v3737_v22  ;;  %4197 = vmatprep.mubr.bf16.mxu1 %v4008_v7  ;;  %7555 = vmatpush1.bf16.msra.mxu0 %v10572_v36  ;;  %v3907_v39 = vmax.f32 %v3848_v55, 0.0  ;;  %v12991_v23 = vpop.f32.mrf.mxu1  ;;  %v10595_v6 = vld [vmem:[%s11067_s26 + $0x6e4] ss:$72 sps:$4 sm:$0xff]   ;;  %v10601_v55 = vld [vmem:[%s14538_s1 + $0x6f4] ss:$8 sps:$4 sm:$0xff]   ;;  %v3763_v25 = vadd.f32 %v12948_v27, %v14591_v12 }
 0x22a   : > { %v3851_v33 = vpop.f32.mrf.mxu0  ;;  %4198 = vmatmul.mubr.bf16.gmra.mxu1 %v3928_v41  ;;  %7556 = vmatprep.subr.bf16.mxu0 %v10583_v26  ;;  %v3533_v41 = vadd.f32 %v14581_v32, %v14580_v51  ;;  %v14587_v26 = vld [vmem:[#allocation8_spill] sm:$0xff] }
 0x22b   : > { %v3908_v57 = vmax.f32 %v3850_v52, 0.0  ;;  %v3852_v54 = vadd.f32 %v3851_v33, %v3739_v34  ;;  %6988 = vmatpush1.bf16.msra.mxu1 %v10296_v44  ;;  %v10593_v44 = vld [vmem:[%s11067_s26 + $0x6e0] ss:$72 sps:$4 sm:$0xff]   ;;  %v10328_v34 = vld [vmem:[%s14538_s1 + $0x1f4] ss:$8 sps:$4 sm:$0xff]  }
 0x22c   : > { %v3855_v15 = vpop.f32.mrf.mxu0  ;;  %6989 = vmatprep.subr.bf16.mxu1 %v10307_v48  ;;  %7381 = vmatmul.mubr.bf16.gmra.mxu0 %v10575_v43  ;;  %v14583_v48 = vld [vmem:[#allocation18_spill] sm:$0xff]  ;;  %v14584_v52 = vld [vmem:[#allocation21_spill] sm:$0xff]  ;;  %v3757_v43 = vadd.f32 %v12908_v60, %v3644_v58 }
 0x22d   : > { %v3929_v30 = vpack.c.bf16 %v3908_v57, %v3906_v8  ;;  %v3909_v21 = vmax.f32 %v3852_v54, 0.0  ;;  %v3856_v5 = vadd.f32 %v3855_v15, %v3743_v63  ;;  %7557 = vmatpush1.bf16.msra.mxu0 %v10581_v47  ;;  %v3753_v45 = vadd.f32 %v12865_v46, %v14583_v48  ;;  %7390 = vmatprep.mubr.bf16.mxu0 %v10595_v6  ;;  %v10599_v46 = vld [vmem:[%s14538_s1 + $0x6f0] ss:$8 sps:$4 sm:$0xff]   ;;  %v13013_v57 = vpop.f32.mrf.mxu1  ;;  %v10610_v60 = vld [vmem:[%s14538_s1 + $0x6e4] ss:$8 sps:$4 sm:$0xff]  }
 0x22e   : > { %v3857_v62 = vpop.f32.mrf.mxu0  ;;  %7558 = vmatprep.subr.bf16.mxu0 %v10592_v9  ;;  %v3646_v36 = vadd.f32 %v14584_v52, %v3533_v41  ;;  %v3755_v8 = vadd.f32 %v12884_v2, %v14585_v20  ;;  %v10326_v63 = vld [vmem:[%s14538_s1 + $0x1f0] ss:$8 sps:$4 sm:$0xff]   ;;  %v10337_v2 = vld [vmem:[%s14538_s1 + $0x1e4] ss:$8 sps:$4 sm:$0xff]  }
 0x22f   : > { %9398 = vst [vmem:[%s12828_s8 + $0x18] sm:$0xff] %v3929_v30   ;;  %6990 = vmatpush1.bf16.msra.mxu1 %v10305_v11  ;;  %v4009_v31 = vpack.c.bf16 %v3909_v21, %v3907_v39  ;;  %v3858_v53 = vadd.f32 %v3857_v62, %v3745_v24  ;;  %v3910_v22 = vmax.f32 %v3856_v5, 0.0  ;;  %v10608_v21 = vld [vmem:[%s14538_s1 + $0x6e0] ss:$8 sps:$4 sm:$0xff]   ;;  %v14588_v47 = vld [vmem:[#allocation9_spill] sm:$0xff]  ;;  %v3772_v62 = vpop.f32.mrf.mxu1 }
 0x230   : > { %v3859_v0 = vpop.f32.mrf.mxu0  ;;  %6991 = vmatprep.subr.bf16.mxu1 %v10313_v49  ;;  %v14586_v49 = vld [vmem:[#allocation7_spill] sm:$0xff]  ;;  %v3759_v37 = vadd.f32 %v12927_v40, %v3646_v36  ;;  %v3543_v24 = vadd.f32 %v14589_v29, %v14588_v47  ;;  %v14590_v40 = vld [vmem:[#allocation24_spill] sm:$0xff] }
 0x231   : > { %v3860_v28 = vadd.f32 %v3859_v0, %v3747_v42  ;;  %4205 = vmatprep.mubr.bf16.mxu1 %v4009_v31  ;;  %7559 = vmatpush1.bf16.msra.mxu0 %v10590_v38  ;;  %v3911_v14 = vmax.f32 %v3858_v53, 0.0  ;;  %v3541_v35 = vadd.f32 %v14587_v26, %v14586_v49  ;;  %v10335_v5 = vld [vmem:[%s14538_s1 + $0x1e0] ss:$8 sps:$4 sm:$0xff]   ;;  %v10611_v9 = vld [vmem:[%s11067_s26 + $0x770] ss:$72 sps:$4 sm:$0xff]   ;;  %v3774_v58 = vpop.f32.mrf.mxu1 }
 0x232   : > { %v3861_v4 = vpop.f32.mrf.mxu0  ;;  %4206 = vmatmul.mubr.bf16.gmra.mxu1 %v3929_v30  ;;  %7560 = vmatprep.subr.bf16.mxu0 %v10601_v55  ;;  %v10343_v53 = vld [vmem:[%s14538_s1 + $0x1d4] ss:$8 sps:$4 sm:$0xff]   ;;  %v10617_v27 = vld [vmem:[%s14538_s1 + $0x6d0] ss:$8 sps:$4 sm:$0xff]  }
 0x233   : > { %v3912_v3 = vmax.f32 %v3860_v28, 0.0  ;;  %v3862_v7 = vadd.f32 %v3861_v4, %v3749_v1  ;;  %6992 = vmatpush1.bf16.msra.mxu1 %v10311_v19  ;;  %v3654_v31 = vadd.f32 %v14590_v40, %v3541_v35  ;;  %v10619_v28 = vld [vmem:[%s14538_s1 + $0x6d4] ss:$8 sps:$4 sm:$0xff]   ;;  %v10341_v6 = vld [vmem:[%s14538_s1 + $0x1d0] ss:$8 sps:$4 sm:$0xff]   ;;  %v3776_v20 = vpop.f32.mrf.mxu1 }
 0x234   : > { %v3865_v56 = vpop.f32.mrf.mxu0  ;;  %6993 = vmatprep.subr.bf16.mxu1 %v10322_v16  ;;  %7391 = vmatmul.mubr.bf16.gmra.mxu0 %v10593_v44  ;;  %v14592_v38 = vld [vmem:[#allocation25_spill] sm:$0xff] }
 0x235   : > { %v3930_v33 = vpack.c.bf16 %v3912_v3, %v3910_v22  ;;  %v3913_v11 = vmax.f32 %v3862_v7, 0.0  ;;  %v3866_v18 = vadd.f32 %v3865_v56, %v3753_v45  ;;  %7561 = vmatpush2.bf16.msra.mxu0 %v10599_v46  ;;  %v3656_v51 = vadd.f32 %v14592_v38, %v3543_v24  ;;  %7400 = vmatprep.mubr.bf16.mxu0 %v10613_v10  ;;  %v14594_v45 = vld [vmem:[#allocation11_spill] sm:$0xff]  ;;  %v14595_v56 = vld [vmem:[#allocation12_spill] sm:$0xff] }
 0x236   : > { %v3867_v54 = vpop.f32.mrf.mxu0  ;;  %7562 = vmatprep.subr.bf16.mxu0 %v10610_v60  ;;  %v3767_v3 = vadd.f32 %v12991_v23, %v3654_v31  ;;  %v10628_v23 = vld [vmem:[%s14538_s1 + $0x6c4] ss:$8 sps:$4 sm:$0xff]   ;;  %v10358_v35 = vld [vmem:[%s14538_s1 + $0x1b4] ss:$8 sps:$4 sm:$0xff]   ;;  %v10635_v29 = vld [vmem:[%s14538_s1 + $0x6b0] ss:$8 sps:$4 sm:$0xff]  }
 0x237   : > { %9399 = vst [vmem:[%s12828_s8 + $0x20] sm:$0xff] %v3930_v33   ;;  %6994 = vmatpush1.bf16.msra.mxu1 %v10320_v50  ;;  %v4010_v17 = vpack.c.bf16 %v3913_v11, %v3911_v14  ;;  %v3868_v39 = vadd.f32 %v3867_v54, %v3755_v8  ;;  %v3914_v19 = vmax.f32 %v3866_v18, 0.0  ;;  %v14593_v50 = vld [vmem:[#allocation23_spill] sm:$0xff]  ;;  %v3769_v55 = vadd.f32 %v13013_v57, %v3656_v51  ;;  %v14597_v11 = vld [vmem:[#allocation14_spill] sm:$0xff]  ;;  %v14598_v57 = vld [vmem:[#allocation28_spill] sm:$0xff] }
 0x238   : > { %v3869_v15 = vpop.f32.mrf.mxu0  ;;  %6995 = vmatprep.subr.bf16.mxu1 %v10328_v34  ;;  %v3765_v59 = vadd.f32 %v12970_v61, %v14593_v50  ;;  %v10352_v61 = vld [vmem:[%s14538_s1 + $0x1c4] ss:$8 sps:$4 sm:$0xff]   ;;  %v3551_v34 = vadd.f32 %v14595_v56, %v14594_v45  ;;  %v10626_v14 = vld [vmem:[%s14538_s1 + $0x6c0] ss:$8 sps:$4 sm:$0xff]   ;;  %v10655_v50 = vld [vmem:[%s14538_s1 + $0x694] ss:$8 sps:$4 sm:$0xff]  }
 0x239   : > { %v3870_v30 = vadd.f32 %v3869_v15, %v3757_v43  ;;  %4213 = vmatprep.mubr.bf16.mxu1 %v4010_v17  ;;  %7563 = vmatpush2.bf16.msra.mxu0 %v10608_v21  ;;  %v3915_v32 = vmax.f32 %v3868_v39, 0.0  ;;  %v10350_v54 = vld [vmem:[%s14538_s1 + $0x1c0] ss:$8 sps:$4 sm:$0xff]   ;;  %v10670_v56 = vld [vmem:[%s11067_s26 + $0x4b4] ss:$72 sps:$4 sm:$0xff]  }
 0x23a   : > { %v3871_v42 = vpop.f32.mrf.mxu0  ;;  %4214 = vmatmul.mubr.bf16.gmra.mxu1 %v3930_v33  ;;  %7564 = vmatprep.subr.bf16.mxu0 %v10619_v28  ;;  %v14596_v33 = vld [vmem:[#allocation13_spill] sm:$0xff]  ;;  %v3664_v43 = vadd.f32 %v14598_v57, %v3551_v34  ;;  %v10629_v15 = vld [vmem:[%s11067_s26 + $0x800] ss:$72 sps:$4 sm:$0xff]  }
 0x23b   : > { %v3916_v0 = vmax.f32 %v3870_v30, 0.0  ;;  %v3872_v16 = vadd.f32 %v3871_v42, %v3759_v37  ;;  %6996 = vmatpush2.bf16.msra.mxu1 %v10326_v63  ;;  %v3553_v46 = vadd.f32 %v14597_v11, %v14596_v33  ;;  %v14599_v60 = vld [vmem:[#allocation26_spill] sm:$0xff]  ;;  %v10637_v37 = vld [vmem:[%s14538_s1 + $0x6b4] ss:$8 sps:$4 sm:$0xff]   ;;  %v14600_v24 = vld [vmem:[#allocation27_spill] sm:$0xff]  ;;  %v3778_v42 = vpop.f32.mrf.mxu1 }
 0x23c   : > { %v3875_v1 = vpop.f32.mrf.mxu0  ;;  %6997 = vmatprep.subr.bf16.mxu1 %v10337_v2  ;;  %7401 = vmatmul.mubr.bf16.gmra.mxu0 %v10611_v9  ;;  %v10631_v2 = vld [vmem:[%s11067_s26 + $0x804] ss:$72 sps:$4 sm:$0xff]   ;;  %v3773_v49 = vadd.f32 %v3772_v62, %v14599_v60  ;;  %v3775_v62 = vadd.f32 %v3774_v58, %v14600_v24  ;;  %v3777_v40 = vadd.f32 %v3776_v20, %v3664_v43  ;;  %v10365_v28 = vld [vmem:[%s14538_s1 + $0x1a0] ss:$8 sps:$4 sm:$0xff]   ;;  %v10391_v34 = vld [vmem:[%s14538_s1 + $0x374] ss:$8 sps:$4 sm:$0xff]  }
 0x23d   : > { %v3931_v41 = vpack.c.bf16 %v3916_v0, %v3914_v19  ;;  %v3917_v4 = vmax.f32 %v3872_v16, 0.0  ;;  %v3876_v7 = vadd.f32 %v3875_v1, %v3763_v25  ;;  %7565 = vmatpush2.bf16.msra.mxu0 %v10617_v27  ;;  %v3666_v39 = vadd.f32 %v12787_v13, %v3553_v46  ;;  %7410 = vmatprep.mubr.bf16.mxu0 %v10631_v2  ;;  %v10356_v13 = vld [vmem:[%s14538_s1 + $0x1b0] ss:$8 sps:$4 sm:$0xff]   ;;  %v10367_v16 = vld [vmem:[%s14538_s1 + $0x1a4] ss:$8 sps:$4 sm:$0xff]  }
 0x23e   : > { %v3877_v22 = vpop.f32.mrf.mxu0  ;;  %7566 = vmatprep.subr.bf16.mxu0 %v10628_v23  ;;  %v10646_v9 = vld [vmem:[%s14538_s1 + $0x6a4] ss:$8 sps:$4 sm:$0xff]   ;;  %v10644_v1 = vld [vmem:[%s14538_s1 + $0x6a0] ss:$8 sps:$4 sm:$0xff]   ;;  %v10373_v27 = vld [vmem:[%s14538_s1 + $0x194] ss:$8 sps:$4 sm:$0xff]  }
 0x23f   : > { %9400 = vst [vmem:[%s12828_s8 + $0x28] sm:$0xff] %v3931_v41   ;;  %6998 = vmatpush2.bf16.msra.mxu1 %v10335_v5  ;;  %v4011_v44 = vpack.c.bf16 %v3917_v4, %v3915_v32  ;;  %v3878_v52 = vadd.f32 %v3877_v22, %v3765_v59  ;;  %v3918_v18 = vmax.f32 %v3876_v7, 0.0  ;;  %v3779_v10 = vadd.f32 %v3778_v42, %v3666_v39  ;;  %v10649_v4 = vld [vmem:[%s11067_s26 + $0x894] ss:$72 sps:$4 sm:$0xff]   ;;  %v10662_v23 = vld [vmem:[%s14538_s1 + $0x680] ss:$8 sps:$4 sm:$0xff]  }
 0x240   : > { %v3879_v48 = vpop.f32.mrf.mxu0  ;;  %6999 = vmatprep.subr.bf16.mxu1 %v10343_v53  ;;  %v10377_v45 = vld [vmem:[%s14538_s1 + $0x180] ss:$8 sps:$4 sm:$0xff]   ;;  %v10389_v11 = vld [vmem:[%s14538_s1 + $0x370] ss:$8 sps:$4 sm:$0xff]   ;;  %v10406_v46 = vld [vmem:[%s11067_s26 + $0x51c] ss:$72 sps:$4 sm:$0xff]  }
 0x241   : > { %v3880_v36 = vadd.f32 %v3879_v48, %v3767_v3  ;;  %4221 = vmatprep.mubr.bf16.mxu1 %v4011_v44  ;;  %7567 = vmatpush2.bf16.msra.mxu0 %v10626_v14  ;;  %v3919_v30 = vmax.f32 %v3878_v52, 0.0  ;;  %v10653_v3 = vld [vmem:[%s14538_s1 + $0x690] ss:$8 sps:$4 sm:$0xff]   ;;  %v10379_v48 = vld [vmem:[%s14538_s1 + $0x184] ss:$8 sps:$4 sm:$0xff]  }
 0x242   : > { %v3881_v8 = vpop.f32.mrf.mxu0  ;;  %4222 = vmatmul.mubr.bf16.gmra.mxu1 %v3931_v41  ;;  %7568 = vmatprep.subr.bf16.mxu0 %v10637_v37  ;;  %v10647_v41 = vld [vmem:[%s11067_s26 + $0x890] ss:$72 sps:$4 sm:$0xff]   ;;  %v10673_v52 = vld [vmem:[%s14538_s1 + $0x874] ss:$8 sps:$4 sm:$0xff]   ;;  %v10400_v20 = vld [vmem:[%s14538_s1 + $0x364] ss:$8 sps:$4 sm:$0xff]  }
 0x243   : > { %v3920_v17 = vmax.f32 %v3880_v36, 0.0  ;;  %v3882_v63 = vadd.f32 %v3881_v8, %v3769_v55  ;;  %7000 = vmatpush2.bf16.msra.mxu1 %v10341_v6  ;;  %v10371_v44 = vld [vmem:[%s14538_s1 + $0x190] ss:$8 sps:$4 sm:$0xff]   ;;  %v10388_v6 = vld [vmem:[%s11067_s26 + $0x48c] ss:$72 sps:$4 sm:$0xff]  }
 0x244   : > { %v3885_v26 = vpop.f32.mrf.mxu0  ;;  %7001 = vmatprep.subr.bf16.mxu1 %v10352_v61  ;;  %7411 = vmatmul.mubr.bf16.gmra.mxu0 %v10629_v15  ;;  %v10664_v61 = vld [vmem:[%s14538_s1 + $0x684] ss:$8 sps:$4 sm:$0xff]   ;;  %v10668_v55 = vld [vmem:[%s11067_s26 + $0x4b0] ss:$72 sps:$4 sm:$0xff]   ;;  %v10680_v57 = vld [vmem:[%s14538_s1 + $0x860] ss:$8 sps:$4 sm:$0xff]  }
 0x245   : > { %v3932_v21 = vpack.c.bf16 %v3920_v17, %v3918_v18  ;;  %v3921_v47 = vmax.f32 %v3882_v63, 0.0  ;;  %v3886_v31 = vadd.f32 %v3885_v26, %v3773_v49  ;;  %7569 = vmatpush2.bf16.msra.mxu0 %v10635_v29  ;;  %7420 = vmatprep.mubr.bf16.mxu0 %v10649_v4  ;;  %v10671_v36 = vld [vmem:[%s14538_s1 + $0x870] ss:$8 sps:$4 sm:$0xff]   ;;  %v10398_v18 = vld [vmem:[%s14538_s1 + $0x360] ss:$8 sps:$4 sm:$0xff]  }
 0x246   : > { %v3887_v5 = vpop.f32.mrf.mxu0  ;;  %7570 = vmatprep.subr.bf16.mxu0 %v10646_v9  ;;  %v10386_v14 = vld [vmem:[%s11067_s26 + $0x488] ss:$72 sps:$4 sm:$0xff]   ;;  %v10685_v17 = vld [vmem:[%s11067_s26 + $0x544] ss:$72 sps:$4 sm:$0xff]   ;;  %v10409_v63 = vld [vmem:[%s14538_s1 + $0x354] ss:$8 sps:$4 sm:$0xff]  }
 0x247   : > { %9401 = vst [vmem:[%s12828_s8 + $0x30] sm:$0xff] %v3932_v21   ;;  %7002 = vmatpush2.bf16.msra.mxu1 %v10350_v54  ;;  %v4012_v19 = vpack.c.bf16 %v3921_v47, %v3919_v30  ;;  %v3888_v12 = vadd.f32 %v3887_v5, %v3775_v62  ;;  %v3922_v38 = vmax.f32 %v3886_v31, 0.0  ;;  %v10682_v54 = vld [vmem:[%s14538_s1 + $0x864] ss:$8 sps:$4 sm:$0xff]   ;;  %v10683_v2 = vld [vmem:[%s11067_s26 + $0x540] ss:$72 sps:$4 sm:$0xff]  }
 0x248   : > { %v3889_v0 = vpop.f32.mrf.mxu0  ;;  %7003 = vmatprep.subr.bf16.mxu1 %v10358_v35  ;;  %v10691_v60 = vld [vmem:[%s14538_s1 + $0x854] ss:$8 sps:$4 sm:$0xff]   ;;  %v10689_v49 = vld [vmem:[%s14538_s1 + $0x850] ss:$8 sps:$4 sm:$0xff]   ;;  %v10418_v30 = vld [vmem:[%s14538_s1 + $0x344] ss:$8 sps:$4 sm:$0xff]  }
 0x249   : > { %v3890_v25 = vadd.f32 %v3889_v0, %v3777_v40  ;;  %4229 = vmatprep.mubr.bf16.mxu1 %v4012_v19  ;;  %7571 = vmatpush2.bf16.msra.mxu0 %v10644_v1  ;;  %v3923_v59 = vmax.f32 %v3888_v12, 0.0  ;;  %v10404_v26 = vld [vmem:[%s11067_s26 + $0x518] ss:$72 sps:$4 sm:$0xff]   ;;  %v10424_v39 = vld [vmem:[%s11067_s26 + $0x5ac] ss:$72 sps:$4 sm:$0xff]  }
 0x24a   : > { %v3891_v53 = vpop.f32.mrf.mxu0  ;;  %4230 = vmatmul.mubr.bf16.gmra.mxu1 %v3932_v21  ;;  %7572 = vmatprep.subr.bf16.mxu0 %v10655_v50  ;;  %v10407_v37 = vld [vmem:[%s14538_s1 + $0x350] ss:$8 sps:$4 sm:$0xff]   ;;  %v10700_v47 = vld [vmem:[%s14538_s1 + $0x844] ss:$8 sps:$4 sm:$0xff]   ;;  %v10698_v29 = vld [vmem:[%s14538_s1 + $0x840] ss:$8 sps:$4 sm:$0xff]  }
 0x24b   : > { %v3924_v51 = vmax.f32 %v3890_v25, 0.0  ;;  %v3892_v32 = vadd.f32 %v3891_v53, %v3779_v10  ;;  %7004 = vmatpush2.bf16.msra.mxu1 %v10356_v13  ;;  %v10416_v62 = vld [vmem:[%s14538_s1 + $0x340] ss:$8 sps:$4 sm:$0xff]   ;;  %v10703_v42 = vld [vmem:[%s11067_s26 + $0x5d4] ss:$72 sps:$4 sm:$0xff]  }
 0x24c   : > { %7005 = vmatprep.subr.bf16.mxu1 %v10367_v16  ;;  %7421 = vmatmul.mubr.bf16.gmra.mxu0 %v10647_v41  ;;  %v10427_v5 = vld [vmem:[%s14538_s1 + $0x334] ss:$8 sps:$4 sm:$0xff]   ;;  %v10701_v31 = vld [vmem:[%s11067_s26 + $0x5d0] ss:$72 sps:$4 sm:$0xff]   ;;  %v10436_v12 = vld [vmem:[%s14538_s1 + $0x324] ss:$8 sps:$4 sm:$0xff]  }
 0x24d   : > { %v3933_v58 = vpack.c.bf16 %v3924_v51, %v3922_v38  ;;  %v3925_v22 = vmax.f32 %v3892_v32, 0.0  ;;  %7573 = vmatpush2.bf16.msra.mxu0 %v10653_v3  ;;  %7576 = vmatprep.mubr.bf16.mxu0 %v10670_v56  ;;  %v10709_v19 = vld [vmem:[%s14538_s1 + $0x834] ss:$8 sps:$4 sm:$0xff]   ;;  %v10707_v13 = vld [vmem:[%s14538_s1 + $0x830] ss:$8 sps:$4 sm:$0xff]  }
 0x24e   : > { %7574 = vmatprep.subr.bf16.mxu0 %v10664_v61  ;;  %v10422_v0 = vld [vmem:[%s11067_s26 + $0x5a8] ss:$72 sps:$4 sm:$0xff]   ;;  %v10442_v10 = vld [vmem:[%s11067_s26 + $0x63c] ss:$72 sps:$4 sm:$0xff]   ;;  %v10460_v3 = vld [vmem:[%s11067_s26 + $0x6cc] ss:$72 sps:$4 sm:$0xff]  }
 0x24f   : > { %9402 = vst [vmem:[%s12828_s8 + $0x38] sm:$0xff] %v3933_v58   ;;  %7006 = vmatpush2.bf16.msra.mxu1 %v10365_v28  ;;  %v4013_v7 = vpack.c.bf16 %v3925_v22, %v3923_v59  ;;  %v10425_v9 = vld [vmem:[%s14538_s1 + $0x330] ss:$8 sps:$4 sm:$0xff]   ;;  %v10718_v1 = vld [vmem:[%s14538_s1 + $0x824] ss:$8 sps:$4 sm:$0xff]  }
 0x250   : > { %7007 = vmatprep.subr.bf16.mxu1 %v10373_v27  ;;  %v10716_v53 = vld [vmem:[%s14538_s1 + $0x820] ss:$8 sps:$4 sm:$0xff]   ;;  %v10721_v51 = vld [vmem:[%s11067_s26 + $0x664] ss:$72 sps:$4 sm:$0xff]   ;;  %v10445_v32 = vld [vmem:[%s14538_s1 + $0x314] ss:$8 sps:$4 sm:$0xff]  }
 0x251   : > { %4237 = vmatprep.mubr.bf16.mxu1 %v4013_v7  ;;  %7575 = vmatpush2.bf16.msra.mxu0 %v10662_v23  ;;  %v10434_v38 = vld [vmem:[%s14538_s1 + $0x320] ss:$8 sps:$4 sm:$0xff]   ;;  %v10727_v27 = vld [vmem:[%s14538_s1 + $0x814] ss:$8 sps:$4 sm:$0xff]   ;;  %v10725_v50 = vld [vmem:[%s14538_s1 + $0x810] ss:$8 sps:$4 sm:$0xff]  }
 0x252   : > { %4238 = vmatmul.mubr.bf16.gmra.mxu1 %v3933_v58  ;;  %7770 = vmatprep.subr.bf16.mxu0 %v10673_v52  ;;  %v10719_v4 = vld [vmem:[%s11067_s26 + $0x660] ss:$72 sps:$4 sm:$0xff]   ;;  %v10443_v22 = vld [vmem:[%s14538_s1 + $0x310] ss:$8 sps:$4 sm:$0xff]   ;;  %v10454_v7 = vld [vmem:[%s14538_s1 + $0x304] ss:$8 sps:$4 sm:$0xff]  }
 0x253   : > { %7008 = vmatpush2.bf16.msra.mxu1 %v10371_v44  ;;  %7011 = vmatprep.mubr.bf16.mxu1 %v10388_v6  ;;  %v10440_v59 = vld [vmem:[%s11067_s26 + $0x638] ss:$72 sps:$4 sm:$0xff]   ;;  %v10736_v6 = vld [vmem:[%s14538_s1 + $0x804] ss:$8 sps:$4 sm:$0xff]   ;;  %v10463_v56 = vld [vmem:[%s14538_s1 + $0x3f4] ss:$8 sps:$4 sm:$0xff]  }
 0x254   : > { %7009 = vmatprep.subr.bf16.mxu1 %v10379_v48  ;;  %v13147_v33 = vpop.f32.mrf.mxu0  ;;  %7577 = vmatmul.mubr.bf16.vlgmr.msra.gmra.mxu0 %v10668_v55  ;;  %v10734_v48 = vld [vmem:[%s14538_s1 + $0x800] ss:$8 sps:$4 sm:$0xff]   ;;  %v10737_v55 = vld [vmem:[%s11067_s26 + $0x6f0] ss:$72 sps:$4 sm:$0xff]   ;;  %v10745_v52 = vld [vmem:[%s14538_s1 + $0x8f4] ss:$8 sps:$4 sm:$0xff]  }
 0x255   : > { %7771 = vmatpush1.bf16.msra.mxu0 %v10671_v36  ;;  %7586 = vmatprep.mubr.bf16.mxu0 %v10685_v17  ;;  %v10452_v23 = vld [vmem:[%s14538_s1 + $0x300] ss:$8 sps:$4 sm:$0xff]   ;;  %v10743_v36 = vld [vmem:[%s14538_s1 + $0x8f0] ss:$8 sps:$4 sm:$0xff]  }
 0x256   : > { %v13156_v8 = vpop.f32.mrf.mxu0  ;;  %7772 = vmatprep.subr.bf16.mxu0 %v10682_v54  ;;  %v10472_v54 = vld [vmem:[%s14538_s1 + $0x3e4] ss:$8 sps:$4 sm:$0xff]   ;;  %v10752_v17 = vld [vmem:[%s14538_s1 + $0x8e0] ss:$8 sps:$4 sm:$0xff]  }
 0x257   : > { %7010 = vmatpush2.bf16.msra.mxu1 %v10377_v45  ;;  %v10739_v45 = vld [vmem:[%s11067_s26 + $0x6f4] ss:$72 sps:$4 sm:$0xff]  }
 0x258   : > { %7205 = vmatprep.subr.bf16.mxu1 %v10391_v34  ;;  %v13164_v43 = vpop.f32.mrf.mxu0 }
 0x259   : > { %7773 = vmatpush1.bf16.msra.mxu0 %v10680_v57 }
 0x25a   : > { %7012 = vmatmul.mubr.bf16.vlgmr.msra.gmra.mxu1 %v10386_v14  ;;  %v13173_v15 = vpop.f32.mrf.mxu0  ;;  %7774 = vmatprep.subr.bf16.mxu0 %v10691_v60  ;;  %v10458_v14 = vld [vmem:[%s11067_s26 + $0x6c8] ss:$72 sps:$4 sm:$0xff]   ;;  %v10757_v60 = vld [vmem:[%s11067_s26 + $0x784] ss:$72 sps:$4 sm:$0xff]  }
 0x25b   : > { %7206 = vmatpush1.bf16.msra.mxu1 %v10389_v11  ;;  %7021 = vmatprep.mubr.bf16.mxu1 %v10406_v46  ;;  %v10461_v46 = vld [vmem:[%s14538_s1 + $0x3f0] ss:$8 sps:$4 sm:$0xff]  }
 0x25c   : > { %7207 = vmatprep.subr.bf16.mxu1 %v10400_v20  ;;  %v13183_v35 = vpop.f32.mrf.mxu0  ;;  %7587 = vmatmul.mubr.bf16.gmra.mxu0 %v10683_v2  ;;  %v10478_v20 = vld [vmem:[%s11067_s26 + $0x75c] ss:$72 sps:$4 sm:$0xff]   ;;  %v10470_v2 = vld [vmem:[%s14538_s1 + $0x3e0] ss:$8 sps:$4 sm:$0xff]  }
 0x25d   : > { %7775 = vmatpush1.bf16.msra.mxu0 %v10689_v49  ;;  %7596 = vmatprep.mubr.bf16.mxu0 %v10703_v42  ;;  %v10481_v49 = vld [vmem:[%s14538_s1 + $0x3d4] ss:$8 sps:$4 sm:$0xff]  }
 0x25e   : > { %v13192_v21 = vpop.f32.mrf.mxu0  ;;  %7776 = vmatprep.subr.bf16.mxu0 %v10700_v47  ;;  %v10476_v47 = vld [vmem:[%s11067_s26 + $0x758] ss:$72 sps:$4 sm:$0xff]   ;;  %v10496_v42 = vld [vmem:[%s11067_s26 + $0x7ec] ss:$72 sps:$4 sm:$0xff]  }
 0x25f   : > { %7208 = vmatpush1.bf16.msra.mxu1 %v10398_v18  ;;  %v10754_v18 = vld [vmem:[%s14538_s1 + $0x8e4] ss:$8 sps:$4 sm:$0xff]  }
 0x260   : > { %7209 = vmatprep.subr.bf16.mxu1 %v10409_v63  ;;  %v13200_v24 = vpop.f32.mrf.mxu0 }
 0x261   : > { %7777 = vmatpush1.bf16.msra.mxu0 %v10698_v29 }
 0x262   : > { %7022 = vmatmul.mubr.bf16.gmra.mxu1 %v10404_v26  ;;  %v13209_v40 = vpop.f32.mrf.mxu0  ;;  %7778 = vmatprep.subr.bf16.mxu0 %v10709_v19  ;;  %v10772_v19 = vld [vmem:[%s14538_s1 + $0x8c4] ss:$8 sps:$4 sm:$0xff]  }
 0x263   : > { %7210 = vmatpush1.bf16.msra.mxu1 %v10407_v37  ;;  %7031 = vmatprep.mubr.bf16.mxu1 %v10424_v39  ;;  %v10755_v37 = vld [vmem:[%s11067_s26 + $0x780] ss:$72 sps:$4 sm:$0xff]   ;;  %v10763_v39 = vld [vmem:[%s14538_s1 + $0x8d4] ss:$8 sps:$4 sm:$0xff]  }
 0x264   : > { %7211 = vmatprep.subr.bf16.mxu1 %v10418_v30  ;;  %v13219_v16 = vpop.f32.mrf.mxu0  ;;  %7597 = vmatmul.mubr.bf16.gmra.mxu0 %v10701_v31  ;;  %v10761_v30 = vld [vmem:[%s14538_s1 + $0x8d0] ss:$8 sps:$4 sm:$0xff]  }
 0x265   : > { %7779 = vmatpush1.bf16.msra.mxu0 %v10707_v13  ;;  %7606 = vmatprep.mubr.bf16.mxu0 %v10721_v51  ;;  %v10770_v13 = vld [vmem:[%s14538_s1 + $0x8c0] ss:$8 sps:$4 sm:$0xff]   ;;  %v10779_v51 = vld [vmem:[%s14538_s1 + $0x8b0] ss:$8 sps:$4 sm:$0xff]  }
 0x266   : > { %v13228_v25 = vpop.f32.mrf.mxu0  ;;  %7780 = vmatprep.subr.bf16.mxu0 %v10718_v1 }
 0x267   : > { %7212 = vmatpush1.bf16.msra.mxu1 %v10416_v62  ;;  %v10479_v62 = vld [vmem:[%s14538_s1 + $0x3d0] ss:$8 sps:$4 sm:$0xff]  }
 0x268   : > { %7213 = vmatprep.subr.bf16.mxu1 %v10427_v5  ;;  %v13236_v28 = vpop.f32.mrf.mxu0  ;;  %v10490_v5 = vld [vmem:[%s14538_s1 + $0x3c4] ss:$8 sps:$4 sm:$0xff]  }
 0x269   : > { %7781 = vmatpush1.bf16.msra.mxu0 %v10716_v53  ;;  %v10773_v53 = vld [vmem:[%s11067_s26 + $0x810] ss:$72 sps:$4 sm:$0xff]  }
 0x26a   : > { %7032 = vmatmul.mubr.bf16.gmra.mxu1 %v10422_v0  ;;  %v13245_v41 = vpop.f32.mrf.mxu0  ;;  %7782 = vmatprep.subr.bf16.mxu0 %v10727_v27  ;;  %v10497_v27 = vld [vmem:[%s14538_s1 + $0x3b0] ss:$8 sps:$4 sm:$0xff]  }
 0x26b   : > { %7214 = vmatpush1.bf16.msra.mxu1 %v10425_v9  ;;  %7041 = vmatprep.mubr.bf16.mxu1 %v10442_v10  ;;  %v10488_v9 = vld [vmem:[%s14538_s1 + $0x3c0] ss:$8 sps:$4 sm:$0xff]   ;;  %v10775_v10 = vld [vmem:[%s11067_s26 + $0x814] ss:$72 sps:$4 sm:$0xff]  }
 0x26c   : > { %7215 = vmatprep.subr.bf16.mxu1 %v10436_v12  ;;  %v13255_v58 = vpop.f32.mrf.mxu0  ;;  %7607 = vmatmul.mubr.bf16.gmra.mxu0 %v10719_v4  ;;  %v10499_v12 = vld [vmem:[%s14538_s1 + $0x3b4] ss:$8 sps:$4 sm:$0xff]  }
 0x26d   : > { %7783 = vmatpush1.bf16.msra.mxu0 %v10725_v50  ;;  %7616 = vmatprep.mubr.bf16.mxu0 %v10739_v45  ;;  %v10514_v50 = vld [vmem:[%s11067_s26 + $0x87c] ss:$72 sps:$4 sm:$0xff]  }
 0x26e   : > { %v13264_v44 = vpop.f32.mrf.mxu0  ;;  %7784 = vmatprep.subr.bf16.mxu0 %v10736_v6  ;;  %v10517_v45 = vld [vmem:[%s14538_s1 + $0x394] ss:$8 sps:$4 sm:$0xff]  }
 0x26f   : > { %7216 = vmatpush1.bf16.msra.mxu1 %v10434_v38  ;;  %v10781_v38 = vld [vmem:[%s14538_s1 + $0x8b4] ss:$8 sps:$4 sm:$0xff]  }
 0x270   : > { %7217 = vmatprep.subr.bf16.mxu1 %v10445_v32  ;;  %v13272_v61 = vpop.f32.mrf.mxu0  ;;  %v10494_v32 = vld [vmem:[%s11067_s26 + $0x7e8] ss:$72 sps:$4 sm:$0xff]  }
 0x271   : > { %7785 = vmatpush1.bf16.msra.mxu0 %v10734_v48  ;;  %v10506_v48 = vld [vmem:[%s14538_s1 + $0x3a0] ss:$8 sps:$4 sm:$0xff]  }
 0x272   : > { %7042 = vmatmul.mubr.bf16.gmra.mxu1 %v10440_v59  ;;  %v13281_v34 = vpop.f32.mrf.mxu0  ;;  %7786 = vmatprep.subr.bf16.mxu0 %v10745_v52  ;;  %v10508_v59 = vld [vmem:[%s14538_s1 + $0x3a4] ss:$8 sps:$4 sm:$0xff]   ;;  %v10799_v52 = vld [vmem:[%s14538_s1 + $0x894] ss:$8 sps:$4 sm:$0xff]  }
 0x273   : > { %7218 = vmatpush1.bf16.msra.mxu1 %v10443_v22  ;;  %7051 = vmatprep.mubr.bf16.mxu1 %v10460_v3  ;;  %v10790_v3 = vld [vmem:[%s14538_s1 + $0x8a4] ss:$8 sps:$4 sm:$0xff]  }
 0x274   : > { %7219 = vmatprep.subr.bf16.mxu1 %v10454_v7  ;;  %v13291_v11 = vpop.f32.mrf.mxu0  ;;  %7617 = vmatmul.mubr.bf16.gmra.mxu0 %v10737_v55  ;;  %v10788_v7 = vld [vmem:[%s14538_s1 + $0x8a0] ss:$8 sps:$4 sm:$0xff]  }
 0x275   : > { %7787 = vmatpush2.bf16.msra.mxu0 %v10743_v36  ;;  %7626 = vmatprep.mubr.bf16.mxu0 %v10757_v60  ;;  %v10791_v55 = vld [vmem:[%s11067_s26 + $0x8a0] ss:$72 sps:$4 sm:$0xff]   ;;  %v10797_v36 = vld [vmem:[%s14538_s1 + $0x890] ss:$8 sps:$4 sm:$0xff]  }
 0x276   : > { %v13300_v57 = vpop.f32.mrf.mxu0  ;;  %7788 = vmatprep.subr.bf16.mxu0 %v10754_v18  ;;  %v10523_v18 = vld [vmem:[%s14538_s1 + $0x384] ss:$8 sps:$4 sm:$0xff]   ;;  %v10806_v60 = vld [vmem:[%s14538_s1 + $0x880] ss:$8 sps:$4 sm:$0xff]  }
 0x277   : > { %7220 = vmatpush1.bf16.msra.mxu1 %v10452_v23  ;;  %v10793_v23 = vld [vmem:[%s11067_s26 + $0x8a4] ss:$72 sps:$4 sm:$0xff]  }
 0x278   : > { %7221 = vmatprep.subr.bf16.mxu1 %v10463_v56  ;;  %v13308_v63 = vpop.f32.mrf.mxu0 }
 0x279   : > { %7789 = vmatpush2.bf16.msra.mxu0 %v10752_v17 }
 0x27a   : > { %7052 = vmatmul.mubr.bf16.gmra.mxu1 %v10458_v14  ;;  %v13317_v26 = vpop.f32.mrf.mxu0  ;;  %7790 = vmatprep.subr.bf16.mxu0 %v10763_v39  ;;  %v10512_v14 = vld [vmem:[%s11067_s26 + $0x878] ss:$72 sps:$4 sm:$0xff]   ;;  %v10814_v39 = vld [vmem:[%s11067_s26 + $0x4c4] ss:$72 sps:$4 sm:$0xff]  }
 0x27b   : > { %7222 = vmatpush2.bf16.msra.mxu1 %v10461_v46  ;;  %7061 = vmatprep.mubr.bf16.mxu1 %v10478_v20  ;;  %v10515_v20 = vld [vmem:[%s14538_s1 + $0x390] ss:$8 sps:$4 sm:$0xff]  }
 0x27c   : > { %7223 = vmatprep.subr.bf16.mxu1 %v10472_v54  ;;  %v13327_v29 = vpop.f32.mrf.mxu0  ;;  %7627 = vmatmul.mubr.bf16.gmra.mxu0 %v10755_v37  ;;  %v10532_v54 = vld [vmem:[%s11067_s26 + $0x49c] ss:$72 sps:$4 sm:$0xff]   ;;  %v10521_v37 = vld [vmem:[%s14538_s1 + $0x380] ss:$8 sps:$4 sm:$0xff]  }
 0x27d   : > { %7791 = vmatpush2.bf16.msra.mxu0 %v10761_v30  ;;  %7636 = vmatprep.mubr.bf16.mxu0 %v10775_v10  ;;  %v10535_v30 = vld [vmem:[%s14538_s1 + $0x574] ss:$8 sps:$4 sm:$0xff]  }
 0x27e   : > { %v13336_v31 = vpop.f32.mrf.mxu0  ;;  %7792 = vmatprep.subr.bf16.mxu0 %v10772_v19  ;;  %v10550_v19 = vld [vmem:[%s11067_s26 + $0x52c] ss:$72 sps:$4 sm:$0xff]  }
 0x27f   : > { %7224 = vmatpush2.bf16.msra.mxu1 %v10470_v2  ;;  %v10808_v2 = vld [vmem:[%s14538_s1 + $0x884] ss:$8 sps:$4 sm:$0xff]  }
 0x280   : > { %7225 = vmatprep.subr.bf16.mxu1 %v10481_v49  ;;  %v13344_v0 = vpop.f32.mrf.mxu0 }
 0x281   : > { %7793 = vmatpush2.bf16.msra.mxu0 %v10770_v13 }
 0x282   : > { %7062 = vmatmul.mubr.bf16.gmra.mxu1 %v10476_v47  ;;  %v13353_v1 = vpop.f32.mrf.mxu0  ;;  %7794 = vmatprep.subr.bf16.mxu0 %v10781_v38  ;;  %v10820_v38 = vld [vmem:[%s11067_s26 + $0x554] ss:$72 sps:$4 sm:$0xff]  }
 0x283   : > { %7226 = vmatpush2.bf16.msra.mxu1 %v10479_v62  ;;  %7071 = vmatprep.mubr.bf16.mxu1 %v10496_v42  ;;  %v10812_v62 = vld [vmem:[%s11067_s26 + $0x4c0] ss:$72 sps:$4 sm:$0xff]  }
 0x284   : > { %7227 = vmatprep.subr.bf16.mxu1 %v10490_v5  ;;  %v13363_v4 = vpop.f32.mrf.mxu0  ;;  %7637 = vmatmul.mubr.bf16.gmra.mxu0 %v10773_v53  ;;  %v10530_v42 = vld [vmem:[%s11067_s26 + $0x498] ss:$72 sps:$4 sm:$0xff]  }
 0x285   : > { %7795 = vmatpush2.bf16.msra.mxu0 %v10779_v51  ;;  %7646 = vmatprep.mubr.bf16.mxu0 %v10793_v23  ;;  %v10533_v5 = vld [vmem:[%s14538_s1 + $0x570] ss:$8 sps:$4 sm:$0xff]   ;;  %v10553_v51 = vld [vmem:[%s14538_s1 + $0x554] ss:$8 sps:$4 sm:$0xff]  }
 0x286   : > { %v13372_v22 = vpop.f32.mrf.mxu0  ;;  %7796 = vmatprep.subr.bf16.mxu0 %v10790_v3  ;;  %v10568_v3 = vld [vmem:[%s11067_s26 + $0x5bc] ss:$72 sps:$4 sm:$0xff]  }
 0x287   : > { %7228 = vmatpush2.bf16.msra.mxu1 %v10488_v9  ;;  %v10544_v9 = vld [vmem:[%s14538_s1 + $0x564] ss:$8 sps:$4 sm:$0xff]  }
 0x288   : > { %7229 = vmatprep.subr.bf16.mxu1 %v10499_v12  ;;  %v13380_v6 = vpop.f32.mrf.mxu0  ;;  %v10542_v12 = vld [vmem:[%s14538_s1 + $0x560] ss:$8 sps:$4 sm:$0xff]  }
 0x289   : > { %7797 = vmatpush2.bf16.msra.mxu0 %v10788_v7 }
 0x28a   : > { %7072 = vmatmul.mubr.bf16.gmra.mxu1 %v10494_v32  ;;  %v13389_v56 = vpop.f32.mrf.mxu0  ;;  %7798 = vmatprep.subr.bf16.mxu0 %v10799_v52  ;;  %v10818_v32 = vld [vmem:[%s11067_s26 + $0x550] ss:$72 sps:$4 sm:$0xff]   ;;  %v10826_v52 = vld [vmem:[%s11067_s26 + $0x5e4] ss:$72 sps:$4 sm:$0xff]  }
 0x28b   : > { %7230 = vmatpush2.bf16.msra.mxu1 %v10497_v27  ;;  %7081 = vmatprep.mubr.bf16.mxu1 %v10514_v50  ;;  %14601 = vst [vmem:[#allocation15_spill] sm:$0xff] %v13389_v56  ;;  %v10548_v50 = vld [vmem:[%s11067_s26 + $0x528] ss:$72 sps:$4 sm:$0xff]  }
 0x28c   : > { %7231 = vmatprep.subr.bf16.mxu1 %v10508_v59  ;;  %v13399_v46 = vpop.f32.mrf.mxu0  ;;  %7647 = vmatmul.mubr.bf16.gmra.mxu0 %v10791_v55  ;;  %v10551_v59 = vld [vmem:[%s14538_s1 + $0x550] ss:$8 sps:$4 sm:$0xff]  }
 0x28d   : > { %7799 = vmatpush2.bf16.msra.mxu0 %v10797_v36  ;;  %7802 = vmatprep.mubr.bf16.mxu0 %v10814_v39  ;;  %v10571_v36 = vld [vmem:[%s14538_s1 + $0x534] ss:$8 sps:$4 sm:$0xff]  }
 0x28e   : > { %v13408_v17 = vpop.f32.mrf.mxu0  ;;  %7800 = vmatprep.subr.bf16.mxu0 %v10808_v2  ;;  %v10586_v2 = vld [vmem:[%s11067_s26 + $0x64c] ss:$72 sps:$4 sm:$0xff]  }
 0x28f   : > { %7232 = vmatpush2.bf16.msra.mxu1 %v10506_v48  ;;  %v10562_v48 = vld [vmem:[%s14538_s1 + $0x544] ss:$8 sps:$4 sm:$0xff]  }
 0x290   : > { %7233 = vmatprep.subr.bf16.mxu1 %v10517_v45  ;;  %v13416_v49 = vpop.f32.mrf.mxu0  ;;  %v10560_v45 = vld [vmem:[%s14538_s1 + $0x540] ss:$8 sps:$4 sm:$0xff]  }
 0x291   : > { %7801 = vmatpush2.bf16.msra.mxu0 %v10806_v60 }
 0x292   : > { %7082 = vmatmul.mubr.bf16.gmra.mxu1 %v10512_v14  ;;  %v13425_v47 = vpop.f32.mrf.mxu0  ;;  %v10824_v14 = vld [vmem:[%s11067_s26 + $0x5e0] ss:$72 sps:$4 sm:$0xff]  }
 0x293   : > { %7234 = vmatpush2.bf16.msra.mxu1 %v10515_v20  ;;  %7237 = vmatprep.mubr.bf16.mxu1 %v10532_v54  ;;  %14602 = vst [vmem:[#allocation17_spill] sm:$0xff] %v13425_v47  ;;  %v10566_v54 = vld [vmem:[%s11067_s26 + $0x5b8] ss:$72 sps:$4 sm:$0xff]   ;;  %v10656_v47 = vld [vmem:[%s11067_s26 + $0x888] ss:$72 sps:$4 sm:$0xff]  }
 0x294   : > { %7235 = vmatprep.subr.bf16.mxu1 %v10523_v18  ;;  %v13433_v13 = vpop.f32.mrf.mxu0  ;;  %7803 = vmatmul.mubr.bf16.vlgmr.msra.gmra.mxu0 %v10812_v62  ;;  %v10569_v18 = vld [vmem:[%s14538_s1 + $0x530] ss:$8 sps:$4 sm:$0xff]  }
 0x295   : > { %7812 = vmatprep.mubr.bf16.mxu0 %v10820_v38  ;;  %v10587_v38 = vld [vmem:[%s14538_s1 + $0x510] ss:$8 sps:$4 sm:$0xff]  }
 0x296   : > { %v13438_v10 = vpop.f32.mrf.mxu0 }
 0x297   : > { %7236 = vmatpush2.bf16.msra.mxu1 %v10521_v37  ;;  %v10580_v37 = vld [vmem:[%s14538_s1 + $0x524] ss:$8 sps:$4 sm:$0xff]  }
 0x298   : > { %7431 = vmatprep.subr.bf16.mxu1 %v10535_v30  ;;  %v13443_v53 = vpop.f32.mrf.mxu0  ;;  %v10578_v30 = vld [vmem:[%s14538_s1 + $0x520] ss:$8 sps:$4 sm:$0xff]  }
 0x29a   : > { %7238 = vmatmul.mubr.bf16.vlgmr.msra.gmra.mxu1 %v10530_v42  ;;  %v13450_v27 = vpop.f32.mrf.mxu0  ;;  %v10832_v42 = vld [vmem:[%s11067_s26 + $0x674] ss:$72 sps:$4 sm:$0xff]  }
 0x29b   : > { %7432 = vmatpush1.bf16.msra.mxu1 %v10533_v5  ;;  %7247 = vmatprep.mubr.bf16.mxu1 %v10550_v19  ;;  %14603 = vst [vmem:[#allocation16_spill] sm:$0xff] %v13450_v27  ;;  %v10589_v5 = vld [vmem:[%s14538_s1 + $0x514] ss:$8 sps:$4 sm:$0xff]   ;;  %v10830_v19 = vld [vmem:[%s11067_s26 + $0x670] ss:$72 sps:$4 sm:$0xff]  }
 0x29c   : > { %7433 = vmatprep.subr.bf16.mxu1 %v10544_v9  ;;  %v13457_v7 = vpop.f32.mrf.mxu0  ;;  %7813 = vmatmul.mubr.bf16.gmra.mxu0 %v10818_v32 }
 0x29d   : > { %7822 = vmatprep.mubr.bf16.mxu0 %v10826_v52  ;;  %v10607_v52 = vld [vmem:[%s14538_s1 + $0x5f4] ss:$8 sps:$4 sm:$0xff]  }
 0x29e   : > { %v13462_v23 = vpop.f32.mrf.mxu0 }
 0x29f   : > { %7434 = vmatpush1.bf16.msra.mxu1 %v10542_v12  ;;  %v10584_v12 = vld [vmem:[%s11067_s26 + $0x648] ss:$72 sps:$4 sm:$0xff]  }
 0x2a0   : > { %7435 = vmatprep.subr.bf16.mxu1 %v10553_v51  ;;  %v13467_v55 = vpop.f32.mrf.mxu0  ;;  %v10604_v51 = vld [vmem:[%s11067_s26 + $0x6dc] ss:$72 sps:$4 sm:$0xff]  }
 0x2a2   : > { %7248 = vmatmul.mubr.bf16.gmra.mxu1 %v10548_v50  ;;  %v13474_v20 = vpop.f32.mrf.mxu0  ;;  %v10598_v50 = vld [vmem:[%s14538_s1 + $0x504] ss:$8 sps:$4 sm:$0xff]  }
 0x2a3   : > { %7436 = vmatpush1.bf16.msra.mxu1 %v10551_v59  ;;  %7257 = vmatprep.mubr.bf16.mxu1 %v10568_v3  ;;  %14604 = vst [vmem:[#allocation3_spill] sm:$0xff] %v13474_v20  ;;  %v10596_v3 = vld [vmem:[%s14538_s1 + $0x500] ss:$8 sps:$4 sm:$0xff]   ;;  %v10856_v20 = vld [vmem:[%s11067_s26 + $0x8b4] ss:$72 sps:$4 sm:$0xff]  }
 0x2a4   : > { %7437 = vmatprep.subr.bf16.mxu1 %v10562_v48  ;;  %v13481_v60 = vpop.f32.mrf.mxu0  ;;  %7823 = vmatmul.mubr.bf16.gmra.mxu0 %v10824_v14 }
 0x2a5   : > { %7832 = vmatprep.mubr.bf16.mxu0 %v10832_v42 }
 0x2a6   : > { %v13486_v39 = vpop.f32.mrf.mxu0 }
 0x2a7   : > { %7438 = vmatpush1.bf16.msra.mxu1 %v10560_v45  ;;  %v10838_v45 = vld [vmem:[%s11067_s26 + $0x704] ss:$72 sps:$4 sm:$0xff]  }
 0x2a8   : > { %7439 = vmatprep.subr.bf16.mxu1 %v10571_v36  ;;  %v13491_v62 = vpop.f32.mrf.mxu0  ;;  %v10836_v36 = vld [vmem:[%s11067_s26 + $0x700] ss:$72 sps:$4 sm:$0xff]  }
 0x2aa   : > { %7258 = vmatmul.mubr.bf16.gmra.mxu1 %v10566_v54  ;;  %v13498_v9 = vpop.f32.mrf.mxu0  ;;  %v10602_v54 = vld [vmem:[%s11067_s26 + $0x6d8] ss:$72 sps:$4 sm:$0xff]  }
 0x2ab   : > { %7440 = vmatpush1.bf16.msra.mxu1 %v10569_v18  ;;  %7267 = vmatprep.mubr.bf16.mxu1 %v10586_v2  ;;  %14605 = vst [vmem:[#allocation4_spill] sm:$0xff] %v13498_v9  ;;  %v10605_v18 = vld [vmem:[%s14538_s1 + $0x5f0] ss:$8 sps:$4 sm:$0xff]   ;;  %v10622_v2 = vld [vmem:[%s11067_s26 + $0x76c] ss:$72 sps:$4 sm:$0xff]  }
 0x2ac   : > { %7441 = vmatprep.subr.bf16.mxu1 %v10580_v37  ;;  %v13505_v32 = vpop.f32.mrf.mxu0  ;;  %7833 = vmatmul.mubr.bf16.gmra.mxu0 %v10830_v19 }
 0x2ad   : > { %7842 = vmatprep.mubr.bf16.mxu0 %v10838_v45  ;;  %v10623_v45 = vld [vmem:[%s14538_s1 + $0x5d0] ss:$8 sps:$4 sm:$0xff]  }
 0x2ae   : > { %v13510_v59 = vpop.f32.mrf.mxu0 }
 0x2af   : > { %7442 = vmatpush1.bf16.msra.mxu1 %v10578_v30  ;;  %v10616_v30 = vld [vmem:[%s14538_s1 + $0x5e4] ss:$8 sps:$4 sm:$0xff]  }
 0x2b0   : > { %7443 = vmatprep.subr.bf16.mxu1 %v10589_v5  ;;  %v13515_v48 = vpop.f32.mrf.mxu0  ;;  %v10614_v5 = vld [vmem:[%s14538_s1 + $0x5e0] ss:$8 sps:$4 sm:$0xff]  }
 0x2b2   : > { %7268 = vmatmul.mubr.bf16.gmra.mxu1 %v10584_v12  ;;  %v13522_v14 = vpop.f32.mrf.mxu0  ;;  %v10844_v12 = vld [vmem:[%s11067_s26 + $0x794] ss:$72 sps:$4 sm:$0xff]  }
 0x2b3   : > { %7444 = vmatpush1.bf16.msra.mxu1 %v10587_v38  ;;  %7277 = vmatprep.mubr.bf16.mxu1 %v10604_v51  ;;  %14606 = vst [vmem:[#allocation5_spill] sm:$0xff] %v13522_v14  ;;  %v10625_v38 = vld [vmem:[%s14538_s1 + $0x5d4] ss:$8 sps:$4 sm:$0xff]   ;;  %v10842_v51 = vld [vmem:[%s11067_s26 + $0x790] ss:$72 sps:$4 sm:$0xff]  }
 0x2b4   : > { %7445 = vmatprep.subr.bf16.mxu1 %v10598_v50  ;;  %v13529_v37 = vpop.f32.mrf.mxu0  ;;  %7843 = vmatmul.mubr.bf16.gmra.mxu0 %v10836_v36 }
 0x2b5   : > { %7852 = vmatprep.mubr.bf16.mxu0 %v10844_v12  ;;  %v10643_v12 = vld [vmem:[%s14538_s1 + $0x5b4] ss:$8 sps:$4 sm:$0xff]  }
 0x2b6   : > { %v13534_v42 = vpop.f32.mrf.mxu0 }
 0x2b7   : > { %7446 = vmatpush1.bf16.msra.mxu1 %v10596_v3  ;;  %v10620_v3 = vld [vmem:[%s11067_s26 + $0x768] ss:$72 sps:$4 sm:$0xff]  }
 0x2b8   : > { %7447 = vmatprep.subr.bf16.mxu1 %v10607_v52  ;;  %v13539_v19 = vpop.f32.mrf.mxu0  ;;  %v10640_v52 = vld [vmem:[%s11067_s26 + $0x7fc] ss:$72 sps:$4 sm:$0xff]  }
 0x2ba   : > { %7278 = vmatmul.mubr.bf16.gmra.mxu1 %v10602_v54  ;;  %v13546_v50 = vpop.f32.mrf.mxu0  ;;  %v10634_v54 = vld [vmem:[%s14538_s1 + $0x5c4] ss:$8 sps:$4 sm:$0xff]  }
 0x2bb   : > { %7448 = vmatpush2.bf16.msra.mxu1 %v10605_v18  ;;  %7287 = vmatprep.mubr.bf16.mxu1 %v10622_v2  ;;  %v10632_v2 = vld [vmem:[%s14538_s1 + $0x5c0] ss:$8 sps:$4 sm:$0xff]  }
 0x2bc   : > { %7449 = vmatprep.subr.bf16.mxu1 %v10616_v30  ;;  %v13553_v36 = vpop.f32.mrf.mxu0  ;;  %7853 = vmatmul.mubr.bf16.gmra.mxu0 %v10842_v51 }
 0x2bd   : > { %14607 = vst [vmem:[#allocation6_spill] sm:$0xff] %v13553_v36 }
 0x2be   : > { %v13558_v18 = vpop.f32.mrf.mxu0 }
 0x2bf   : > { %7450 = vmatpush2.bf16.msra.mxu1 %v10614_v5  ;;  %14608 = vst [vmem:[#allocation20_spill] sm:$0xff] %v13558_v18  ;;  %v10850_v5 = vld [vmem:[%s11067_s26 + $0x824] ss:$72 sps:$4 sm:$0xff]  }
 0x2c0   : > { %7451 = vmatprep.subr.bf16.mxu1 %v10625_v38  ;;  %v13563_v30 = vpop.f32.mrf.mxu0  ;;  %v10848_v38 = vld [vmem:[%s11067_s26 + $0x820] ss:$72 sps:$4 sm:$0xff]   ;;  %7862 = vmatprep.mubr.bf16.mxu0 %v10850_v5 }
 0x2c1   : > { %14609 = vst [vmem:[#allocation18_spill] sm:$0xff] %v13563_v30 }
 0x2c2   : > { %7288 = vmatmul.mubr.bf16.gmra.mxu1 %v10620_v3  ;;  %v13570_v51 = vpop.f32.mrf.mxu0  ;;  %v10638_v3 = vld [vmem:[%s11067_s26 + $0x7f8] ss:$72 sps:$4 sm:$0xff]  }
 0x2c3   : > { %7452 = vmatpush2.bf16.msra.mxu1 %v10623_v45  ;;  %7297 = vmatprep.mubr.bf16.mxu1 %v10640_v52  ;;  %14610 = vst [vmem:[#allocation21_spill] sm:$0xff] %v13570_v51  ;;  %v10641_v45 = vld [vmem:[%s14538_s1 + $0x5b0] ss:$8 sps:$4 sm:$0xff]   ;;  %v10658_v52 = vld [vmem:[%s11067_s26 + $0x88c] ss:$72 sps:$4 sm:$0xff]  }
 0x2c4   : > { %7453 = vmatprep.subr.bf16.mxu1 %v10634_v54  ;;  %v13577_v14 = vpop.f32.mrf.mxu0  ;;  %7863 = vmatmul.mubr.bf16.gmra.mxu0 %v10848_v38  ;;  %v10652_v54 = vld [vmem:[%s14538_s1 + $0x5a4] ss:$8 sps:$4 sm:$0xff]   ;;  %v10854_v38 = vld [vmem:[%s11067_s26 + $0x8b0] ss:$72 sps:$4 sm:$0xff]  }
 0x2c5   : > { %14611 = vst [vmem:[#allocation19_spill] sm:$0xff] %v13577_v14  ;;  %7872 = vmatprep.mubr.bf16.mxu0 %v10856_v20  ;;  %v10665_v20 = vld [vmem:[%s14538_s1 + $0x580] ss:$8 sps:$4 sm:$0xff]  }
 0x2c6   : > { %v13582_v9 = vpop.f32.mrf.mxu0 }
 0x2c7   : > { %7454 = vmatpush2.bf16.msra.mxu1 %v10632_v2  ;;  %14612 = vst [vmem:[#allocation7_spill] sm:$0xff] %v13582_v9  ;;  %v10650_v2 = vld [vmem:[%s14538_s1 + $0x5a0] ss:$8 sps:$4 sm:$0xff]   ;;  %v10712_v9 = vld [vmem:[%s11067_s26 + $0x5cc] ss:$72 sps:$4 sm:$0xff]  }
 0x2c8   : > { %7455 = vmatprep.subr.bf16.mxu1 %v10643_v12  ;;  %v13587_v5 = vpop.f32.mrf.mxu0  ;;  %v10661_v12 = vld [vmem:[%s14538_s1 + $0x594] ss:$8 sps:$4 sm:$0xff]  }
 0x2c9   : > { %14613 = vst [vmem:[#allocation8_spill] sm:$0xff] %v13587_v5 }
 0x2ca   : > { %7298 = vmatmul.mubr.bf16.gmra.mxu1 %v10638_v3  ;;  %v13594_v27 = vpop.f32.mrf.mxu0  ;;  %v10659_v3 = vld [vmem:[%s14538_s1 + $0x590] ss:$8 sps:$4 sm:$0xff]  }
 0x2cb   : > { %7456 = vmatpush2.bf16.msra.mxu1 %v10641_v45  ;;  %7307 = vmatprep.mubr.bf16.mxu1 %v10658_v52  ;;  %14614 = vst [vmem:[#allocation9_spill] sm:$0xff] %v13594_v27  ;;  %v10676_v45 = vld [vmem:[%s11067_s26 + $0x4ac] ss:$72 sps:$4 sm:$0xff]  }
 0x2cc   : > { %7457 = vmatprep.subr.bf16.mxu1 %v10652_v54  ;;  %v13601_v52 = vpop.f32.mrf.mxu0  ;;  %7873 = vmatmul.mubr.bf16.gmra.mxu0 %v10854_v38  ;;  %v10667_v54 = vld [vmem:[%s14538_s1 + $0x584] ss:$8 sps:$4 sm:$0xff]  }
 0x2cd   : > { %14615 = vst [vmem:[#allocation10_spill] sm:$0xff] %v13601_v52  ;;  %v10674_v52 = vld [vmem:[%s11067_s26 + $0x4a8] ss:$72 sps:$4 sm:$0xff]  }
 0x2ce   : > { %v13606_v5 = vpop.f32.mrf.mxu0 }
 0x2cf   : > { %7458 = vmatpush2.bf16.msra.mxu1 %v10650_v2  ;;  %14616 = vst [vmem:[#allocation24_spill] sm:$0xff] %v13606_v5 }
 0x2d0   : > { %7459 = vmatprep.subr.bf16.mxu1 %v10661_v12  ;;  %v13611_v2 = vpop.f32.mrf.mxu0  ;;  %v10679_v12 = vld [vmem:[%s14538_s1 + $0x774] ss:$8 sps:$4 sm:$0xff]  }
 0x2d1   : > { %14617 = vst [vmem:[#allocation22_spill] sm:$0xff] %v13611_v2 }
 0x2d2   : > { %7308 = vmatmul.mubr.bf16.gmra.mxu1 %v10656_v47  ;;  %v13616_v38 = vpop.f32.mrf.mxu0  ;;  %v10677_v47 = vld [vmem:[%s14538_s1 + $0x770] ss:$8 sps:$4 sm:$0xff]  }
 0x2d3   : > { %7460 = vmatpush2.bf16.msra.mxu1 %v10659_v3  ;;  %7463 = vmatprep.mubr.bf16.mxu1 %v10676_v45  ;;  %14618 = vst [vmem:[#allocation25_spill] sm:$0xff] %v13616_v38  ;;  %v10694_v3 = vld [vmem:[%s11067_s26 + $0x53c] ss:$72 sps:$4 sm:$0xff]  }
 0x2d4   : > { %7461 = vmatprep.subr.bf16.mxu1 %v10667_v54  ;;  %v13623_v5 = vpop.f32.mrf.mxu0  ;;  %v10688_v45 = vld [vmem:[%s14538_s1 + $0x764] ss:$8 sps:$4 sm:$0xff]  }
 0x2d5   : > { %14619 = vst [vmem:[#allocation23_spill] sm:$0xff] %v13623_v5 }
 0x2d6   : > { %v13628_v54 = vpop.f32.mrf.mxu0 }
 0x2d7   : > { %7462 = vmatpush2.bf16.msra.mxu1 %v10665_v20  ;;  %14620 = vst [vmem:[#allocation11_spill] sm:$0xff] %v13628_v54  ;;  %v10686_v20 = vld [vmem:[%s14538_s1 + $0x760] ss:$8 sps:$4 sm:$0xff]  }
 0x2d8   : > { %7657 = vmatprep.subr.bf16.mxu1 %v10679_v12  ;;  %v13634_v38 = vpop.f32.mrf.mxu0  ;;  %v13639_v12 = vld [vmem:[%s14541_s4] ss:$0 sm:$0xff] }
 0x2d9   : > { %14621 = vst [vmem:[#allocation12_spill] sm:$0xff] %v13634_v38  ;;  %v10692_v38 = vld [vmem:[%s11067_s26 + $0x538] ss:$72 sps:$4 sm:$0xff]  }
 0x2da   : > { %v9427_v2 = vpop.f32.mrf.mxu1  ;;  %7464 = vmatmul.mubr.bf16.vlgmr.msra.gmra.mxu1 %v10674_v52  ;;  %v10697_v52 = vld [vmem:[%s14538_s1 + $0x754] ss:$8 sps:$4 sm:$0xff]   ;;  %v13644_v54 = vpop.f32.mrf.mxu0 }
 0x2db   : > { %7658 = vmatpush1.bf16.msra.mxu1 %v10677_v47  ;;  %7473 = vmatprep.mubr.bf16.mxu1 %v10694_v3  ;;  %14622 = vst [vmem:[#allocation13_spill] sm:$0xff] %v13644_v54 }
 0x2dc   : > { %v9428_v5 = vpop.f32.mrf.mxu1  ;;  %7659 = vmatprep.subr.bf16.mxu1 %v10688_v45  ;;  %v10695_v45 = vld [vmem:[%s14538_s1 + $0x750] ss:$8 sps:$4 sm:$0xff]   ;;  %v13657_v14 = vpop.f32.mrf.mxu0 }
 0x2dd   : > { %v9429_v47 = vadd.f32 %v9428_v5, %v9427_v2  ;;  %14623 = vst [vmem:[#allocation14_spill] sm:$0xff] %v13657_v14  ;;  %v10706_v2 = vld [vmem:[%s14538_s1 + $0x744] ss:$8 sps:$4 sm:$0xff]   ;;  %v10704_v14 = vld [vmem:[%s14538_s1 + $0x740] ss:$8 sps:$4 sm:$0xff]  }
 0x2de   : > { %v9430_v3 = vpop.f32.mrf.mxu1  ;;  %v13663_v56 = vpop.f32.mrf.mxu0 }
 0x2df   : > { %v4184_v27 = vadd.f32 %v9429_v47, %v13639_v12  ;;  %7660 = vmatpush1.bf16.msra.mxu1 %v10686_v20  ;;  %14624 = vst [vmem:[#allocation28_spill] sm:$0xff] %v13663_v56 }
 0x2e0   : > { %v9431_v5 = vpop.f32.mrf.mxu1  ;;  %7661 = vmatprep.subr.bf16.mxu1 %v10697_v52  ;;  %v13669_v52 = vpop.f32.mrf.mxu0 }
 0x2e1   : > { %4246 = vst [vmem:[%s13649_s22] sm:$0xff] %v4184_v27  ;;  %v9432_v54 = vadd.f32 %v9431_v5, %v9430_v3  ;;  %14625 = vst [vmem:[#allocation26_spill] sm:$0xff] %v13669_v52  ;;  %v10715_v27 = vld [vmem:[%s14538_s1 + $0x734] ss:$8 sps:$4 sm:$0xff]  }
 0x2e2   : > { %v9433_v20 = vpop.f32.mrf.mxu1  ;;  %7474 = vmatmul.mubr.bf16.gmra.mxu1 %v10692_v38  ;;  %v13675_v3 = vpop.f32.mrf.mxu0  ;;  %v10730_v52 = vld [vmem:[%s11067_s26 + $0x65c] ss:$72 sps:$4 sm:$0xff]  }
 0x2e3   : > { %v4187_v47 = vadd.f32 %v9432_v54, %v13639_v12  ;;  %7662 = vmatpush1.bf16.msra.mxu1 %v10695_v45  ;;  %7483 = vmatprep.mubr.bf16.mxu1 %v10712_v9  ;;  %14626 = vst [vmem:[#allocation27_spill] sm:$0xff] %v13675_v3  ;;  %v10710_v45 = vld [vmem:[%s11067_s26 + $0x5c8] ss:$72 sps:$4 sm:$0xff]  }
 0x2e4   : > { %v9434_v51 = vpop.f32.mrf.mxu1  ;;  %7663 = vmatprep.subr.bf16.mxu1 %v10706_v2  ;;  %v10713_v9 = vld [vmem:[%s14538_s1 + $0x730] ss:$8 sps:$4 sm:$0xff]   ;;  %v13683_v56 = vpop.f32.mrf.mxu0  ;;  %v10722_v3 = vld [vmem:[%s14538_s1 + $0x720] ss:$8 sps:$4 sm:$0xff]  }
 0x2e5   : > { %4247 = vst [vmem:[%s13649_s22 + $0x8] sm:$0xff] %v4187_v47  ;;  %v9435_v38 = vadd.f32 %v9434_v51, %v9433_v20  ;;  %14627 = vst [vmem:[#allocation29_spill] sm:$0xff] %v13683_v56  ;;  %v10724_v51 = vld [vmem:[%s14538_s1 + $0x724] ss:$8 sps:$4 sm:$0xff]  }
 0x2e6   : > { %v9436_v54 = vpop.f32.mrf.mxu1  ;;  %v13689_v47 = vpop.f32.mrf.mxu0 }
 0x2e7   : > { %v4192_v5 = vadd.f32 %v9435_v38, %v13639_v12  ;;  %7664 = vmatpush1.bf16.msra.mxu1 %v10704_v14  ;;  %14628 = vst [vmem:[#allocation30_spill] sm:$0xff] %v13689_v47 }
 0x2e8   : > { %v9437_v2 = vpop.f32.mrf.mxu1  ;;  %7665 = vmatprep.subr.bf16.mxu1 %v10715_v27  ;;  %v13695_v27 = vpop.f32.mrf.mxu0 }
 0x2e9   : > { %4248 = vst [vmem:[%s13649_s22 + $0x10] sm:$0xff] %v4192_v5  ;;  %v9438_v20 = vadd.f32 %v9437_v2, %v9436_v54  ;;  %14629 = vst [vmem:[#allocation31_spill] sm:$0xff] %v13695_v27  ;;  %v10733_v54 = vld [vmem:[%s14538_s1 + $0x714] ss:$8 sps:$4 sm:$0xff]  }
 0x2ea   : > { %v9439_v14 = vpop.f32.mrf.mxu1  ;;  %7484 = vmatmul.mubr.bf16.gmra.mxu1 %v10710_v45  ;;  %v13701_v5 = vpop.f32.mrf.mxu0  ;;  %v10748_v27 = vld [vmem:[%s11067_s26 + $0x6ec] ss:$72 sps:$4 sm:$0xff]  }
 0x2eb   : > { %v4195_v38 = vadd.f32 %v9438_v20, %v13639_v12  ;;  %7666 = vmatpush1.bf16.msra.mxu1 %v10713_v9  ;;  %7493 = vmatprep.mubr.bf16.mxu1 %v10730_v52  ;;  %14630 = vst [vmem:[#allocation32_spill] sm:$0xff] %v13701_v5  ;;  %v10728_v9 = vld [vmem:[%s11067_s26 + $0x658] ss:$72 sps:$4 sm:$0xff]  }
 0x2ec   : > { %v9440_v56 = vpop.f32.mrf.mxu1  ;;  %7667 = vmatprep.subr.bf16.mxu1 %v10724_v51  ;;  %v10731_v52 = vld [vmem:[%s14538_s1 + $0x710] ss:$8 sps:$4 sm:$0xff]   ;;  %v13709_v47 = vpop.f32.mrf.mxu0  ;;  %v10740_v5 = vld [vmem:[%s14538_s1 + $0x700] ss:$8 sps:$4 sm:$0xff]  }
 0x2ed   : > { %4249 = vst [vmem:[%s13649_s22 + $0x18] sm:$0xff] %v4195_v38  ;;  %v9441_v45 = vadd.f32 %v9440_v56, %v9439_v14  ;;  %14631 = vst [vmem:[#allocation33_spill] sm:$0xff] %v13709_v47  ;;  %v10742_v56 = vld [vmem:[%s14538_s1 + $0x704] ss:$8 sps:$4 sm:$0xff]  }
 0x2ee   : > { %v9442_v2 = vpop.f32.mrf.mxu1  ;;  %v13715_v38 = vpop.f32.mrf.mxu0 }
 0x2ef   : > { %v4200_v20 = vadd.f32 %v9441_v45, %v13639_v12  ;;  %7668 = vmatpush1.bf16.msra.mxu1 %v10722_v3  ;;  %14632 = vst [vmem:[#allocation34_spill] sm:$0xff] %v13715_v38 }
 0x2f0   : > { %v9443_v51 = vpop.f32.mrf.mxu1  ;;  %7669 = vmatprep.subr.bf16.mxu1 %v10733_v54  ;;  %v13721_v54 = vpop.f32.mrf.mxu0 }
 0x2f1   : > { %4250 = vst [vmem:[%s13649_s22 + $0x20] sm:$0xff] %v4200_v20  ;;  %v9444_v14 = vadd.f32 %v9443_v51, %v9442_v2  ;;  %14633 = vst [vmem:[#allocation35_spill] sm:$0xff] %v13721_v54  ;;  %v10751_v2 = vld [vmem:[%s14538_s1 + $0x7f4] ss:$8 sps:$4 sm:$0xff]  }
 0x2f2   : > { %v9445_v3 = vpop.f32.mrf.mxu1  ;;  %7494 = vmatmul.mubr.bf16.gmra.mxu1 %v10728_v9  ;;  %v13727_v20 = vpop.f32.mrf.mxu0  ;;  %v10766_v54 = vld [vmem:[%s11067_s26 + $0x77c] ss:$72 sps:$4 sm:$0xff]  }
 0x2f3   : > { %v4203_v45 = vadd.f32 %v9444_v14, %v13639_v12  ;;  %7670 = vmatpush1.bf16.msra.mxu1 %v10731_v52  ;;  %7503 = vmatprep.mubr.bf16.mxu1 %v10748_v27  ;;  %14634 = vst [vmem:[#allocation36_spill] sm:$0xff] %v13727_v20  ;;  %v10746_v52 = vld [vmem:[%s11067_s26 + $0x6e8] ss:$72 sps:$4 sm:$0xff]  }
 0x2f4   : > { %v9446_v47 = vpop.f32.mrf.mxu1  ;;  %7671 = vmatprep.subr.bf16.mxu1 %v10742_v56  ;;  %v10749_v27 = vld [vmem:[%s14538_s1 + $0x7f0] ss:$8 sps:$4 sm:$0xff]   ;;  %v13735_v38 = vpop.f32.mrf.mxu0  ;;  %v10758_v20 = vld [vmem:[%s14538_s1 + $0x7e0] ss:$8 sps:$4 sm:$0xff]  }
 0x2f5   : > { %4251 = vst [vmem:[%s13649_s22 + $0x28] sm:$0xff] %v4203_v45  ;;  %v9447_v9 = vadd.f32 %v9446_v47, %v9445_v3  ;;  %14635 = vst [vmem:[#allocation37_spill] sm:$0xff] %v13735_v38  ;;  %v10760_v47 = vld [vmem:[%s14538_s1 + $0x7e4] ss:$8 sps:$4 sm:$0xff]  }
 0x2f6   : > { %v9448_v51 = vpop.f32.mrf.mxu1  ;;  %v13741_v45 = vpop.f32.mrf.mxu0 }
 0x2f7   : > { %v4208_v14 = vadd.f32 %v9447_v9, %v13639_v12  ;;  %7672 = vmatpush1.bf16.msra.mxu1 %v10740_v5  ;;  %14636 = vst [vmem:[#allocation38_spill] sm:$0xff] %v13741_v45 }
 0x2f8   : > { %v9449_v56 = vpop.f32.mrf.mxu1  ;;  %7673 = vmatprep.subr.bf16.mxu1 %v10751_v2  ;;  %v13747_v2 = vpop.f32.mrf.mxu0 }
 0x2f9   : > { %4252 = vst [vmem:[%s13649_s22 + $0x30] sm:$0xff] %v4208_v14  ;;  %v9450_v3 = vadd.f32 %v9449_v56, %v9448_v51  ;;  %14637 = vst [vmem:[#allocation39_spill] sm:$0xff] %v13747_v2  ;;  %v10769_v51 = vld [vmem:[%s14538_s1 + $0x7d4] ss:$8 sps:$4 sm:$0xff]  }
 0x2fa   : > { %v9451_v5 = vpop.f32.mrf.mxu1  ;;  %7504 = vmatmul.mubr.bf16.gmra.mxu1 %v10746_v52  ;;  %v13753_v14 = vpop.f32.mrf.mxu0  ;;  %v10784_v2 = vld [vmem:[%s11067_s26 + $0x80c] ss:$72 sps:$4 sm:$0xff]  }
 0x2fb   : > { %v4211_v9 = vadd.f32 %v9450_v3, %v13639_v12  ;;  %7674 = vmatpush2.bf16.msra.mxu1 %v10749_v27  ;;  %7513 = vmatprep.mubr.bf16.mxu1 %v10766_v54  ;;  %14638 = vst [vmem:[#allocation40_spill] sm:$0xff] %v13753_v14  ;;  %v10764_v27 = vld [vmem:[%s11067_s26 + $0x778] ss:$72 sps:$4 sm:$0xff]  }
 0x2fc   : > { %v9452_v38 = vpop.f32.mrf.mxu1  ;;  %7675 = vmatprep.subr.bf16.mxu1 %v10760_v47  ;;  %v10767_v54 = vld [vmem:[%s14538_s1 + $0x7d0] ss:$8 sps:$4 sm:$0xff]   ;;  %v13761_v45 = vpop.f32.mrf.mxu0  ;;  %v10776_v14 = vld [vmem:[%s14538_s1 + $0x7c0] ss:$8 sps:$4 sm:$0xff]  }
 0x2fd   : > { %4253 = vst [vmem:[%s13649_s22 + $0x38] sm:$0xff] %v4211_v9  ;;  %v9453_v52 = vadd.f32 %v9452_v38, %v9451_v5  ;;  %14639 = vst [vmem:[#allocation41_spill] sm:$0xff] %v13761_v45  ;;  %v10778_v38 = vld [vmem:[%s14538_s1 + $0x7c4] ss:$8 sps:$4 sm:$0xff]  }
 0x2fe   : > { %v9454_v56 = vpop.f32.mrf.mxu1  ;;  %v13767_v9 = vpop.f32.mrf.mxu0 }
 0x2ff   : > { %v4216_v3 = vadd.f32 %v9453_v52, %v13639_v12  ;;  %7676 = vmatpush2.bf16.msra.mxu1 %v10758_v20  ;;  %14640 = vst [vmem:[#allocation42_spill] sm:$0xff] %v13767_v9 }
 0x300   : > { %v9455_v47 = vpop.f32.mrf.mxu1  ;;  %7677 = vmatprep.subr.bf16.mxu1 %v10769_v51  ;;  %v13773_v51 = vpop.f32.mrf.mxu0 }
 0x301   : > { %4254 = vst [vmem:[%s13649_s22 + $0x40] sm:$0xff] %v4216_v3  ;;  %v9456_v5 = vadd.f32 %v9455_v47, %v9454_v56  ;;  %14641 = vst [vmem:[#allocation43_spill] sm:$0xff] %v13773_v51  ;;  %v10787_v56 = vld [vmem:[%s14538_s1 + $0x7b4] ss:$8 sps:$4 sm:$0xff]  }
 0x302   : > { %v9457_v20 = vpop.f32.mrf.mxu1  ;;  %7514 = vmatmul.mubr.bf16.gmra.mxu1 %v10764_v27  ;;  %v13779_v3 = vpop.f32.mrf.mxu0  ;;  %v10802_v51 = vld [vmem:[%s11067_s26 + $0x89c] ss:$72 sps:$4 sm:$0xff]  }
 0x303   : > { %v4219_v52 = vadd.f32 %v9456_v5, %v13639_v12  ;;  %7678 = vmatpush2.bf16.msra.mxu1 %v10767_v54  ;;  %7523 = vmatprep.mubr.bf16.mxu1 %v10784_v2  ;;  %14642 = vst [vmem:[#allocation44_spill] sm:$0xff] %v13779_v3  ;;  %v10782_v54 = vld [vmem:[%s11067_s26 + $0x808] ss:$72 sps:$4 sm:$0xff]  }
 0x304   : > { %v9458_v45 = vpop.f32.mrf.mxu1  ;;  %7679 = vmatprep.subr.bf16.mxu1 %v10778_v38  ;;  %v10785_v2 = vld [vmem:[%s14538_s1 + $0x7b0] ss:$8 sps:$4 sm:$0xff]   ;;  %v13787_v9 = vpop.f32.mrf.mxu0  ;;  %v10794_v3 = vld [vmem:[%s14538_s1 + $0x7a0] ss:$8 sps:$4 sm:$0xff]  }
 0x305   : > { %4255 = vst [vmem:[%s13649_s22 + $0x48] sm:$0xff] %v4219_v52  ;;  %v9459_v27 = vadd.f32 %v9458_v45, %v9457_v20  ;;  %14643 = vst [vmem:[#allocation45_spill] sm:$0xff] %v13787_v9  ;;  %v10796_v45 = vld [vmem:[%s14538_s1 + $0x7a4] ss:$8 sps:$4 sm:$0xff]  }
 0x306   : > { %v9460_v47 = vpop.f32.mrf.mxu1  ;;  %v13793_v52 = vpop.f32.mrf.mxu0 }
 0x307   : > { %v4224_v5 = vadd.f32 %v9459_v27, %v13639_v12  ;;  %7680 = vmatpush2.bf16.msra.mxu1 %v10776_v14  ;;  %14644 = vst [vmem:[#allocation46_spill] sm:$0xff] %v13793_v52 }
 0x308   : > { %v9461_v38 = vpop.f32.mrf.mxu1  ;;  %7681 = vmatprep.subr.bf16.mxu1 %v10787_v56  ;;  %v13799_v56 = vpop.f32.mrf.mxu0 }
 0x309   : > { %4256 = vst [vmem:[%s13649_s22 + $0x50] sm:$0xff] %v4224_v5  ;;  %v9462_v20 = vadd.f32 %v9461_v38, %v9460_v47  ;;  %14645 = vst [vmem:[#allocation47_spill] sm:$0xff] %v13799_v56  ;;  %v10805_v47 = vld [vmem:[%s14538_s1 + $0x794] ss:$8 sps:$4 sm:$0xff]  }
 0x30a   : > { %v9463_v14 = vpop.f32.mrf.mxu1  ;;  %7524 = vmatmul.mubr.bf16.gmra.mxu1 %v10782_v54  ;;  %v13805_v5 = vpop.f32.mrf.mxu0  ;;  %v10817_v56 = vld [vmem:[%s11067_s26 + $0x4bc] ss:$72 sps:$4 sm:$0xff]  }
 0x30b   : > { %v4227_v27 = vadd.f32 %v9462_v20, %v13639_v12  ;;  %7682 = vmatpush2.bf16.msra.mxu1 %v10785_v2  ;;  %7533 = vmatprep.mubr.bf16.mxu1 %v10802_v51  ;;  %14646 = vst [vmem:[#allocation48_spill] sm:$0xff] %v13805_v5  ;;  %v10800_v2 = vld [vmem:[%s11067_s26 + $0x898] ss:$72 sps:$4 sm:$0xff]  }
 0x30c   : > { %v9464_v9 = vpop.f32.mrf.mxu1  ;;  %7683 = vmatprep.subr.bf16.mxu1 %v10796_v45  ;;  %v10803_v51 = vld [vmem:[%s14538_s1 + $0x790] ss:$8 sps:$4 sm:$0xff]   ;;  %v13813_v52 = vpop.f32.mrf.mxu0 }
 0x30d   : > { %4257 = vst [vmem:[%s13649_s22 + $0x58] sm:$0xff] %v4227_v27  ;;  %v9465_v54 = vadd.f32 %v9464_v9, %v9463_v14  ;;  %14647 = vst [vmem:[#allocation49_spill] sm:$0xff] %v13813_v52  ;;  %v10811_v9 = vld [vmem:[%s14538_s1 + $0x784] ss:$8 sps:$4 sm:$0xff]  }
 0x30e   : > { %v9466_v38 = vpop.f32.mrf.mxu1 }
 0x30f   : > { %v4232_v20 = vadd.f32 %v9465_v54, %v13639_v12  ;;  %7684 = vmatpush2.bf16.msra.mxu1 %v10794_v3  ;;  %v4694_v3 = vld [vmem:[%s14539_s2] sm:$0x3]  ;;  %v13822_v54 = vpop.f32.mrf.mxu0 }
 0x310   : > { %v9467_v45 = vpop.f32.mrf.mxu1  ;;  %7685 = vmatprep.subr.bf16.mxu1 %v10805_v47  ;;  %14648 = vst [vmem:[#allocation50_spill] sm:$0xff] %v13822_v54  ;;  %v10809_v47 = vld [vmem:[%s14538_s1 + $0x780] ss:$8 sps:$4 sm:$0xff]  }
 0x311   : > { %4258 = vst [vmem:[%s13649_s22 + $0x60] sm:$0xff] %v4232_v20  ;;  %v9468_v14 = vadd.f32 %v9467_v45, %v9466_v38  ;;  %v14649_v38 = vld [vmem:[#allocation2_spill] sm:$0xff]  ;;  %v13834_v18 = vpop.f32.mrf.mxu0 }
 0x312   : > { %v9469_v27 = vpop.f32.mrf.mxu1  ;;  %7534 = vmatmul.mubr.bf16.gmra.mxu1 %v10800_v2  ;;  %v14650_v45 = vsub.s32 0, %v14649_v38  ;;  %v10815_v54 = vld [vmem:[%s11067_s26 + $0x4b8] ss:$72 sps:$4 sm:$0xff]   ;;  %14651 = vst [vmem:[#allocation2_spill] sm:$0xff] %v13834_v18 }
 0x313   : > { %v4235_v5 = vadd.f32 %v9468_v14, %v13639_v12  ;;  %7686 = vmatpush2.bf16.msra.mxu1 %v10803_v51  ;;  %7689 = vmatprep.mubr.bf16.mxu1 %v10817_v56  ;;  %v14652_v51 = vsub.s32 1, %v14649_v38  ;;  %v10823_v56 = vld [vmem:[%s11067_s26 + $0x54c] ss:$72 sps:$4 sm:$0xff]  }
 0x314   : > { %v9470_v20 = vpop.f32.mrf.mxu1  ;;  %7687 = vmatprep.subr.bf16.mxu1 %v10811_v9  ;;  %v13830_v52 = vrot.slane %v4694_v3, %v14650_v45 }
 0x315   : > { %4259 = vst [vmem:[%s13649_s22 + $0x68] sm:$0xff] %v4235_v5  ;;  %v9471_v2 = vadd.f32 %v9470_v20, %v9469_v27  ;;  %v13838_v14 = vrot.slane %v4694_v3, %v14652_v51  ;;  %v13845_v20 = vpop.f32.mrf.mxu0 }
 0x316   : > { %v9472_v30 = vpop.f32.mrf.mxu1  ;;  %v6901_v45 = vadd.f32 %v13147_v33, %v13830_v52  ;;  %14653 = vst [vmem:[#allocation51_spill] sm:$0xff] %v13845_v20  ;;  %v6905_v51 = vadd.f32 %v13164_v43, %v13830_v52  ;;  %v10835_v20 = vld [vmem:[%s11067_s26 + $0x66c] ss:$72 sps:$4 sm:$0xff]  }
 0x317   : > { %v4240_v36 = vadd.f32 %v9471_v2, %v13639_v12  ;;  %7688 = vmatpush2.bf16.msra.mxu1 %v10809_v47  ;;  %v6903_v3 = vadd.f32 %v13156_v8, %v13838_v14 }
 0x318   : > { %v9473_v9 = vpop.f32.mrf.mxu1 }
 0x319   : > { %4260 = vst [vmem:[%s13649_s22 + $0x70] sm:$0xff] %v4240_v36  ;;  %v9474_v5 = vadd.f32 %v9473_v9, %v9472_v30  ;;  %v10821_v30 = vld [vmem:[%s11067_s26 + $0x548] ss:$72 sps:$4 sm:$0xff]   ;;  %v6907_v9 = vadd.f32 %v13173_v15, %v13838_v14 }
 0x31a   : > { %v7013_v27 = vpop.f32.mrf.mxu1  ;;  %7690 = vmatmul.mubr.bf16.vlgmr.msra.gmra.mxu1 %v10815_v54  ;;  %v13858_v54 = vpop.f32.mrf.mxu0 }
 0x31b   : > { %v4243_v38 = vadd.f32 %v9474_v5, %v13639_v12  ;;  %v13850_v2 = vadd.f32 %v7013_v27, %v6901_v45  ;;  %7699 = vmatprep.mubr.bf16.mxu1 %v10823_v56  ;;  %v10829_v12 = vld [vmem:[%s11067_s26 + $0x5dc] ss:$72 sps:$4 sm:$0xff]   ;;  %v6911_v56 = vadd.f32 %v13183_v35, %v13830_v52 }
 0x31c   : > { %v7015_v47 = vpop.f32.mrf.mxu1  ;;  %v13869_v27 = vpop.f32.mrf.mxu0 }
 0x31d   : > { %4261 = vst [vmem:[%s13649_s22 + $0x78] sm:$0xff] %v4243_v38  ;;  %v13855_v33 = vadd.f32 %v7015_v47, %v6903_v3  ;;  %v6913_v3 = vadd.f32 %v13192_v21, %v13838_v14  ;;  %v6915_v47 = vadd.f32 %v13200_v24, %v13830_v52 }
 0x31e   : > { %v7017_v36 = vpop.f32.mrf.mxu1 }
 0x31f   : > { %v13862_v8 = vadd.f32 %v7017_v36, %v6905_v51  ;;  %v10827_v36 = vld [vmem:[%s11067_s26 + $0x5d8] ss:$72 sps:$4 sm:$0xff]  }
 0x320   : > { %v7019_v45 = vpop.f32.mrf.mxu1 }
 0x321   : > { %v13867_v43 = vadd.f32 %v7019_v45, %v6907_v9  ;;  %v13880_v9 = vpop.f32.mrf.mxu0 }
 0x322   : > { %v7023_v5 = vpop.f32.mrf.mxu1  ;;  %7700 = vmatmul.mubr.bf16.gmra.mxu1 %v10821_v30  ;;  %14655 = vst [vmem:[#allocation53_spill] sm:$0xff] %v13880_v9  ;;  %v6917_v30 = vadd.f32 %v13209_v40, %v13838_v14  ;;  %v10860_v40 = vld [vmem:[%s14540_s3 + $0x78] sm:$0xff]   ;;  %v6941_v9 = vadd.f32 %v13291_v11, %v13830_v52  ;;  %v10865_v11 = vld [vmem:[%s14540_s3 + $0x28] sm:$0xff]  }
 0x323   : > { %14654 = vst [vmem:[#allocation52_spill] sm:$0xff] %v13867_v43  ;;  %v13873_v38 = vadd.f32 %v7023_v5, %v6911_v56  ;;  %7709 = vmatprep.mubr.bf16.mxu1 %v10829_v12  ;;  %v6921_v12 = vadd.f32 %v13219_v16, %v13830_v52  ;;  %v13891_v5 = vpop.f32.mrf.mxu0  ;;  %v10861_v16 = vld [vmem:[%s14540_s3 + $0x38] sm:$0xff]   ;;  %9475 = vmatprep.subr.bf16.mxu1 %v10860_v40 }
 0x324   : > { %v7025_v15 = vpop.f32.mrf.mxu1  ;;  %14657 = vst [vmem:[#allocation55_spill] sm:$0xff] %v13891_v5  ;;  %9476 = vmatpush3.bf16.msra.mxu1 %v10861_v16  ;;  %v6931_v5 = vadd.f32 %v13255_v58, %v13830_v52  ;;  %v6933_v16 = vadd.f32 %v13264_v44, %v13838_v14  ;;  %v10863_v58 = vld [vmem:[%s14540_s3 + $0x30] sm:$0xff]   ;;  %v10839_v44 = vld [vmem:[%s11067_s26 + $0x6f8] ss:$72 sps:$4 sm:$0xff]  }
 0x325   : > { %v13877_v51 = vadd.f32 %v7025_v15, %v6913_v3  ;;  %v6923_v3 = vadd.f32 %v13228_v25, %v13838_v14  ;;  %v10833_v25 = vld [vmem:[%s11067_s26 + $0x668] ss:$72 sps:$4 sm:$0xff]  }
 0x326   : > { %v7027_v35 = vpop.f32.mrf.mxu1 }
 0x327   : > { %v13884_v45 = vadd.f32 %v7027_v35, %v6915_v47  ;;  %v6925_v35 = vadd.f32 %v13236_v28, %v13830_v52 }
 0x328   : > { %v7029_v21 = vpop.f32.mrf.mxu1 }
 0x329   : > { %v13889_v56 = vadd.f32 %v7029_v21, %v6917_v30  ;;  %v13908_v21 = vpop.f32.mrf.mxu0 }
 0x32a   : > { %v7033_v24 = vpop.f32.mrf.mxu1  ;;  %7710 = vmatmul.mubr.bf16.gmra.mxu1 %v10827_v36 }
 0x32b   : > { %14656 = vst [vmem:[#allocation54_spill] sm:$0xff] %v13889_v56  ;;  %v13895_v15 = vadd.f32 %v7033_v24, %v6921_v12  ;;  %7719 = vmatprep.mubr.bf16.mxu1 %v10835_v20  ;;  %v6927_v20 = vadd.f32 %v13245_v41, %v13838_v14  ;;  %v10841_v24 = vld [vmem:[%s11067_s26 + $0x6fc] ss:$72 sps:$4 sm:$0xff]   ;;  %v13919_v40 = vpop.f32.mrf.mxu0  ;;  %v10862_v41 = vld [vmem:[%s14540_s3 + $0x70] sm:$0xff]   ;;  %v6961_v56 = vadd.f32 %v13363_v4, %v13830_v52 }
 0x32c   : > { %v7035_v47 = vpop.f32.mrf.mxu1  ;;  %9477 = vmatprep.subr.bf16.mxu1 %v10862_v41  ;;  %v6965_v4 = vadd.f32 %v13380_v6, %v13830_v52  ;;  %v6973_v6 = vadd.f32 %v13408_v17, %v13838_v14 }
 0x32d   : > { %v13905_v36 = vadd.f32 %v7035_v47, %v6923_v3  ;;  %9478 = vmatpush3.bf16.msra.mxu1 %v10863_v58  ;;  %v6943_v58 = vadd.f32 %v13300_v57, %v13838_v14  ;;  %v10845_v57 = vld [vmem:[%s11067_s26 + $0x788] ss:$72 sps:$4 sm:$0xff]  }
 0x32e   : > { %v7037_v30 = vpop.f32.mrf.mxu1 }
 0x32f   : > { %v13912_v12 = vadd.f32 %v7037_v30, %v6925_v35  ;;  %v6935_v35 = vadd.f32 %v13272_v61, %v13830_v52 }
 0x330   : > { %v7039_v18 = vpop.f32.mrf.mxu1 }
 0x331   : > { %v13917_v28 = vadd.f32 %v7039_v18, %v6927_v20  ;;  %v6937_v20 = vadd.f32 %v13281_v34, %v13838_v14  ;;  %v10864_v34 = vld [vmem:[%s14540_s3 + $0x68] sm:$0xff]  }
 0x332   : > { %v7043_v3 = vpop.f32.mrf.mxu1  ;;  %7720 = vmatmul.mubr.bf16.gmra.mxu1 %v10833_v25  ;;  %9479 = vmatprep.subr.bf16.mxu1 %v10864_v34 }
 0x333   : > { %14658 = vst [vmem:[#allocation56_spill] sm:$0xff] %v13917_v28  ;;  %v13923_v47 = vadd.f32 %v7043_v3, %v6931_v5  ;;  %7729 = vmatprep.mubr.bf16.mxu1 %v10841_v24  ;;  %v13936_v5 = vpop.f32.mrf.mxu0  ;;  %v10847_v3 = vld [vmem:[%s11067_s26 + $0x78c] ss:$72 sps:$4 sm:$0xff]   ;;  %9480 = vmatpush3.bf16.msra.mxu1 %v10865_v11  ;;  %v10866_v11 = vld [vmem:[%s14540_s3 + $0x60] sm:$0xff]  }
 0x334   : > { %v7045_v18 = vpop.f32.mrf.mxu1  ;;  %14659 = vst [vmem:[#allocation57_spill] sm:$0xff] %v13936_v5  ;;  %9481 = vmatprep.subr.bf16.mxu1 %v10866_v11 }
 0x335   : > { %v13933_v30 = vadd.f32 %v7045_v18, %v6933_v16  ;;  %v13947_v41 = vpop.f32.mrf.mxu0 }
 0x336   : > { %v7047_v25 = vpop.f32.mrf.mxu1  ;;  %14661 = vst [vmem:[#allocation59_spill] sm:$0xff] %v13947_v41 }
 0x337   : > { %v13940_v24 = vadd.f32 %v7047_v25, %v6935_v35  ;;  %v6945_v35 = vadd.f32 %v13308_v63, %v13830_v52 }
 0x338   : > { %v7049_v28 = vpop.f32.mrf.mxu1 }
 0x339   : > { %v13945_v61 = vadd.f32 %v7049_v28, %v6937_v20 }
 0x33a   : > { %v7053_v16 = vpop.f32.mrf.mxu1  ;;  %7730 = vmatmul.mubr.bf16.gmra.mxu1 %v10839_v44 }
 0x33b   : > { %14660 = vst [vmem:[#allocation58_spill] sm:$0xff] %v13945_v61  ;;  %v13951_v18 = vadd.f32 %v7053_v16, %v6941_v9  ;;  %7739 = vmatprep.mubr.bf16.mxu1 %v10847_v3  ;;  %v13964_v9 = vpop.f32.mrf.mxu0  ;;  %v10853_v3 = vld [vmem:[%s11067_s26 + $0x81c] ss:$72 sps:$4 sm:$0xff]   ;;  %v6951_v61 = vadd.f32 %v13327_v29, %v13830_v52 }
 0x33c   : > { %v7055_v28 = vpop.f32.mrf.mxu1  ;;  %14662 = vst [vmem:[#allocation60_spill] sm:$0xff] %v13964_v9 }
 0x33d   : > { %v13961_v25 = vadd.f32 %v7055_v28, %v6943_v58  ;;  %v13973_v63 = vpop.f32.mrf.mxu0  ;;  %v6953_v58 = vadd.f32 %v13336_v31, %v13838_v14  ;;  %v10867_v28 = vld [vmem:[%s14540_s3 + $0x20] sm:$0xff]  }
 0x33e   : > { %v7057_v44 = vpop.f32.mrf.mxu1  ;;  %14663 = vst [vmem:[#allocation61_spill] sm:$0xff] %v13973_v63  ;;  %v10851_v31 = vld [vmem:[%s11067_s26 + $0x818] ss:$72 sps:$4 sm:$0xff]   ;;  %9482 = vmatpush3.bf16.msra.mxu1 %v10867_v28 }
 0x33f   : > { %v13966_v20 = vadd.f32 %v7057_v44, %v6945_v35  ;;  %v6955_v35 = vadd.f32 %v13344_v0, %v13830_v52  ;;  %v10868_v28 = vld [vmem:[%s14540_s3 + $0x58] sm:$0xff]  }
 0x340   : > { %v13969_v16 = vpop.f32.mrf.mxu1  ;;  %9483 = vmatprep.subr.bf16.mxu1 %v10868_v28  ;;  %v10870_v28 = vld [vmem:[%s14540_s3 + $0x50] sm:$0xff]  }
 0x342   : > { %v7063_v41 = vpop.f32.mrf.mxu1  ;;  %7740 = vmatmul.mubr.bf16.gmra.mxu1 %v10845_v57 }
 0x343   : > { %v13977_v34 = vadd.f32 %v7063_v41, %v6951_v61  ;;  %7749 = vmatprep.mubr.bf16.mxu1 %v10853_v3  ;;  %v13990_v61 = vpop.f32.mrf.mxu0  ;;  %v10859_v3 = vld [vmem:[%s11067_s26 + $0x8ac] ss:$72 sps:$4 sm:$0xff]  }
 0x344   : > { %v7065_v29 = vpop.f32.mrf.mxu1  ;;  %14664 = vst [vmem:[#allocation62_spill] sm:$0xff] %v13990_v61 }
 0x345   : > { %v13987_v44 = vadd.f32 %v7065_v29, %v6953_v58  ;;  %v13999_v0 = vpop.f32.mrf.mxu0  ;;  %v6963_v58 = vadd.f32 %v13372_v22, %v13838_v14  ;;  %v10869_v29 = vld [vmem:[%s14540_s3 + $0x18] sm:$0xff]   ;;  %v10857_v22 = vld [vmem:[%s11067_s26 + $0x8a8] ss:$72 sps:$4 sm:$0xff]  }
 0x346   : > { %v7067_v57 = vpop.f32.mrf.mxu1  ;;  %14665 = vst [vmem:[#allocation63_spill] sm:$0xff] %v13999_v0  ;;  %9484 = vmatpush3.bf16.msra.mxu1 %v10869_v29  ;;  %v6971_v0 = vadd.f32 %v13399_v46, %v13830_v52  ;;  %v10871_v29 = vld [vmem:[%s14540_s3 + $0x10] sm:$0xff]   ;;  %v6975_v46 = vadd.f32 %v13416_v49, %v13830_v52  ;;  %v7129_v49 = vadd.f32 %v13438_v10, %v13855_v33 }
 0x347   : > { %v13992_v41 = vadd.f32 %v7067_v57, %v6955_v35  ;;  %9485 = vmatprep.subr.bf16.mxu1 %v10870_v28  ;;  %v7131_v28 = vadd.f32 %v13443_v53, %v13862_v8  ;;  %v7137_v33 = vadd.f32 %v13457_v7, %v13873_v38  ;;  %v7141_v7 = vadd.f32 %v13467_v55, %v13884_v45  ;;  %v10875_v38 = vld [vmem:[%s14540_s3] sm:$0xff]  }
 0x348   : > { %v13995_v5 = vpop.f32.mrf.mxu1  ;;  %v7149_v45 = vadd.f32 %v13486_v39, %v13905_v36  ;;  %v7159_v36 = vadd.f32 %v13510_v59, %v13933_v30 }
 0x34a   : > { %v7073_v43 = vpop.f32.mrf.mxu1  ;;  %7750 = vmatmul.mubr.bf16.gmra.mxu1 %v10851_v31 }
 0x34b   : > { %v14003_v11 = vadd.f32 %v7073_v43, %v6961_v56  ;;  %7759 = vmatprep.mubr.bf16.mxu1 %v10859_v3  ;;  %v14016_v43 = vpop.f32.mrf.mxu0  ;;  %9486 = vmatpush3.bf16.msra.mxu1 %v10871_v29 }
 0x34c   : > { %v7075_v35 = vpop.f32.mrf.mxu1  ;;  %14666 = vst [vmem:[#allocation64_spill] sm:$0xff] %v14016_v43 }
 0x34d   : > { %v14013_v57 = vadd.f32 %v7075_v35, %v6963_v58  ;;  %v14024_v63 = vpop.f32.mrf.mxu0 }
 0x34e   : > { %v7077_v31 = vpop.f32.mrf.mxu1  ;;  %14667 = vst [vmem:[#allocation65_spill] sm:$0xff] %v14024_v63 }
 0x34f   : > { %v14018_v56 = vadd.f32 %v7077_v31, %v6965_v4 }
 0x350   : > { %v14020_v3 = vpop.f32.mrf.mxu1 }
 0x352   : > { %v7083_v61 = vpop.f32.mrf.mxu1  ;;  %7760 = vmatmul.mubr.bf16.gmra.mxu1 %v10857_v22  ;;  %v14040_v22 = vpop.f32.mrf.mxu0 }
 0x353   : > { %v14028_v58 = vadd.f32 %v7083_v61, %v6971_v0  ;;  %v7127_v0 = vadd.f32 %v13433_v13, %v13850_v2  ;;  %v10872_v13 = vld [vmem:[%s14540_s3 + $0x48] sm:$0xff]  }
 0x354   : > { %v7085_v35 = vpop.f32.mrf.mxu1  ;;  %v14048_v43 = vpop.f32.mrf.mxu0  ;;  %v10873_v2 = vld [vmem:[%s14540_s3 + $0x8] sm:$0xff]   ;;  %9487 = vmatprep.subr.bf16.mxu1 %v10872_v13 }
 0x355   : > { %v14038_v4 = vadd.f32 %v7085_v35, %v6973_v6  ;;  %9488 = vmatpush3.bf16.msra.mxu1 %v10873_v2 }
 0x356   : > { %v7087_v31 = vpop.f32.mrf.mxu1  ;;  %v14058_v35 = vpop.f32.mrf.mxu0 }
 0x357   : > { %v14042_v17 = vadd.f32 %v7087_v31, %v6975_v46  ;;  %v7139_v31 = vadd.f32 %v13462_v23, %v13877_v51  ;;  %v7147_v51 = vadd.f32 %v13481_v60, %v13895_v15  ;;  %v7157_v15 = vadd.f32 %v13505_v32, %v13923_v47 }
 0x358   : > { %v14044_v61 = vpop.f32.mrf.mxu1  ;;  %v14072_v8 = vpop.f32.mrf.mxu0  ;;  %v6947_v47 = vadd.f32 %v13317_v26, %v13838_v14 }
 0x35a   : > { %v7239_v63 = vpop.f32.mrf.mxu1 }
 0x35b   : > { %v14050_v9 = vadd.f32 %v7239_v63, %v7127_v0 }
 0x35c   : > { %v7241_v52 = vpop.f32.mrf.mxu1 }
 0x35d   : > { %v14054_v6 = vadd.f32 %v7241_v52, %v7129_v49  ;;  %v10874_v49 = vld [vmem:[%s14540_s3 + $0x40] sm:$0xff]  }
 0x35e   : > { %v7243_v29 = vpop.f32.mrf.mxu1  ;;  %9489 = vmatprep.subr.bf16.mxu1 %v10874_v49 }
 0x35f   : > { %v14060_v46 = vadd.f32 %v7243_v29, %v7131_v28  ;;  %v14088_v29 = vpop.f32.mrf.mxu0  ;;  %9490 = vmatpush3.bf16.msra.mxu1 %v10875_v38 }
 0x360   : > { %v14068_v10 = vpop.f32.mrf.mxu1  ;;  %14668 = vst [vmem:[#allocation66_spill] sm:$0xff] %v14088_v29 }
 0x362   : > { %v7249_v53 = vpop.f32.mrf.mxu1 }
 0x363   : > { %v14074_v63 = vadd.f32 %v7249_v53, %v7137_v33  ;;  %v14096_v33 = vpop.f32.mrf.mxu0 }
 0x364   : > { %v7251_v0 = vpop.f32.mrf.mxu1  ;;  %14669 = vst [vmem:[#allocation67_spill] sm:$0xff] %v14096_v33 }
 0x365   : > { %v14081_v52 = vadd.f32 %v7251_v0, %v7139_v31  ;;  %v7151_v0 = vadd.f32 %v13491_v62, %v13912_v12  ;;  %v7161_v12 = vadd.f32 %v13515_v48, %v13940_v24  ;;  %v7169_v48 = vadd.f32 %v13534_v42, %v13961_v25  ;;  %v14673_v42 = vld [vmem:[#allocation6_spill] sm:$0xff] }
 0x366   : > { %v7253_v28 = vpop.f32.mrf.mxu1  ;;  %v7177_v25 = vadd.f32 %v14673_v42, %v13977_v34 }
 0x367   : > { %v14090_v13 = vadd.f32 %v7253_v28, %v7141_v7  ;;  %v14106_v7 = vpop.f32.mrf.mxu0 }
 0x368   : > { %v14092_v23 = vpop.f32.mrf.mxu1 }
 0x36a   : > { %v7259_v2 = vpop.f32.mrf.mxu1 }
 0x36b   : > { %v14098_v55 = vadd.f32 %v7259_v2, %v7147_v51  ;;  %v14114_v51 = vpop.f32.mrf.mxu0 }
 0x36c   : > { %v7261_v53 = vpop.f32.mrf.mxu1 }
 0x36d   : > { %v14102_v31 = vadd.f32 %v7261_v53, %v7149_v45  ;;  %v14124_v53 = vpop.f32.mrf.mxu0 }
 0x36e   : > { %v7263_v49 = vpop.f32.mrf.mxu1  ;;  %14670 = vst [vmem:[#allocation68_spill] sm:$0xff] %v14124_v53 }
 0x36f   : > { %v14108_v38 = vadd.f32 %v7263_v49, %v7151_v0  ;;  %v7167_v49 = vadd.f32 %v13529_v37, %v13951_v18  ;;  %v14134_v30 = vpop.f32.mrf.mxu0 }
 0x370   : > { %v14110_v60 = vpop.f32.mrf.mxu1  ;;  %14671 = vst [vmem:[#allocation69_spill] sm:$0xff] %v14134_v30 }
 0x372   : > { %v7269_v28 = vpop.f32.mrf.mxu1 }
 0x373   : > { %v14116_v39 = vadd.f32 %v7269_v28, %v7157_v15  ;;  %v7060_v15 = vadd.f32 %v13969_v16, %v6947_v47  ;;  %v6957_v16 = vadd.f32 %v13353_v1, %v13838_v14  ;;  %v14675_v1 = vld [vmem:[#allocation18_spill] sm:$0xff] }
 0x374   : > { %v7271_v2 = vpop.f32.mrf.mxu1 }
 0x375   : > { %v14120_v62 = vadd.f32 %v7271_v2, %v7159_v36  ;;  %v7171_v2 = vadd.f32 %v13539_v19, %v13966_v20  ;;  %v7173_v18 = vadd.f32 %v13546_v50, %v7060_v15  ;;  %v7070_v19 = vadd.f32 %v13995_v5, %v6957_v16  ;;  %v14679_v5 = vld [vmem:[#allocation15_spill] sm:$0xff] }
 0x376   : > { %v7273_v45 = vpop.f32.mrf.mxu1  ;;  %v6967_v16 = vadd.f32 %v14679_v5, %v13838_v14 }
 0x377   : > { %v14126_v0 = vadd.f32 %v7273_v45, %v7161_v12  ;;  %v14145_v12 = vpop.f32.mrf.mxu0 }
 0x378   : > { %v14128_v32 = vpop.f32.mrf.mxu1 }
 0x37a   : > { %v7279_v59 = vpop.f32.mrf.mxu1 }
 0x37b   : > { %v14137_v28 = vadd.f32 %v7279_v59, %v7167_v49  ;;  %v14156_v59 = vpop.f32.mrf.mxu0 }
 0x37c   : > { %v7281_v24 = vpop.f32.mrf.mxu1 }
 0x37d   : > { %v14141_v36 = vadd.f32 %v7281_v24, %v7169_v48  ;;  %v14674_v48 = vld [vmem:[#allocation20_spill] sm:$0xff] }
 0x37e   : > { %v7283_v26 = vpop.f32.mrf.mxu1  ;;  %v7179_v24 = vadd.f32 %v14674_v48, %v13987_v44  ;;  %v14681_v44 = vld [vmem:[#allocation19_spill] sm:$0xff] }
 0x37f   : > { %v14147_v37 = vadd.f32 %v7283_v26, %v7171_v2  ;;  %v7181_v2 = vadd.f32 %v14675_v1, %v13992_v41  ;;  %v7080_v41 = vadd.f32 %v14020_v3, %v6967_v16  ;;  %v14683_v1 = vld [vmem:[#allocation7_spill] sm:$0xff]  ;;  %v14687_v3 = vld [vmem:[#allocation17_spill] sm:$0xff] }
 0x380   : > { %v7285_v45 = vpop.f32.mrf.mxu1  ;;  %v6977_v16 = vadd.f32 %v14687_v3, %v13838_v14  ;;  %v14691_v14 = vld [vmem:[#allocation22_spill] sm:$0xff]  ;;  %v14694_v3 = vld [vmem:[#allocation25_spill] sm:$0xff] }
 0x381   : > { %v14152_v47 = vadd.f32 %v7285_v45, %v7173_v18  ;;  %v14167_v18 = vpop.f32.mrf.mxu0  ;;  %v14678_v45 = vld [vmem:[#allocation21_spill] sm:$0xff] }
 0x382   : > { %v7289_v49 = vpop.f32.mrf.mxu1  ;;  %14676 = vst [vmem:[#allocation6_spill] sm:$0xff] %v14167_v18  ;;  %v7183_v42 = vadd.f32 %v14678_v45, %v7070_v19  ;;  %v14684_v45 = vld [vmem:[#allocation8_spill] sm:$0xff] }
 0x383   : > { %14672 = vst [vmem:[#allocation70_spill] sm:$0xff] %v14152_v47  ;;  %v14159_v20 = vadd.f32 %v7289_v49, %v7177_v25  ;;  %v7187_v49 = vadd.f32 %v14681_v44, %v14003_v11  ;;  %v14686_v44 = vld [vmem:[#allocation9_spill] sm:$0xff] }
 0x384   : > { %v7291_v50 = vpop.f32.mrf.mxu1 }
 0x385   : > { %v14163_v15 = vadd.f32 %v7291_v50, %v7179_v24  ;;  %v14178_v24 = vpop.f32.mrf.mxu0 }
 0x386   : > { %v7293_v26 = vpop.f32.mrf.mxu1  ;;  %14682 = vst [vmem:[#allocation21_spill] sm:$0xff] %v14178_v24  ;;  %v7193_v24 = vadd.f32 %v14686_v44, %v7080_v41 }
 0x387   : > { %v14169_v34 = vadd.f32 %v7293_v26, %v7181_v2  ;;  %v7189_v2 = vadd.f32 %v14683_v1, %v14013_v57  ;;  %v14189_v5 = vpop.f32.mrf.mxu0  ;;  %v14689_v57 = vld [vmem:[#allocation10_spill] sm:$0xff] }
 0x388   : > { %v7295_v30 = vpop.f32.mrf.mxu1 }
 0x389   : > { %14677 = vst [vmem:[#allocation20_spill] sm:$0xff] %v14169_v34  ;;  %v14174_v25 = vadd.f32 %v7295_v30, %v7183_v42  ;;  %v7191_v30 = vadd.f32 %v14684_v45, %v14018_v56  ;;  %v7090_v56 = vadd.f32 %v14044_v61, %v6977_v16  ;;  %v14690_v45 = vld [vmem:[#allocation24_spill] sm:$0xff]  ;;  %v14696_v16 = vld [vmem:[#allocation23_spill] sm:$0xff] }
 0x38a   : > { %v7299_v48 = vpop.f32.mrf.mxu1 }
 0x38b   : > { %14680 = vst [vmem:[#allocation18_spill] sm:$0xff] %v14174_v25  ;;  %v14181_v50 = vadd.f32 %v7299_v48, %v7187_v49  ;;  %v7197_v48 = vadd.f32 %v14689_v57, %v14028_v58  ;;  %v7203_v57 = vadd.f32 %v14694_v3, %v7090_v56  ;;  %v14699_v3 = vld [vmem:[#allocation14_spill] sm:$0xff] }
 0x38c   : > { %v7301_v19 = vpop.f32.mrf.mxu1 }
 0x38d   : > { %v14185_v26 = vadd.f32 %v7301_v19, %v7189_v2  ;;  %v14200_v2 = vpop.f32.mrf.mxu0 }
 0x38e   : > { %v7303_v42 = vpop.f32.mrf.mxu1 }
 0x38f   : > { %v14191_v11 = vadd.f32 %v7303_v42, %v7191_v30  ;;  %v7199_v30 = vadd.f32 %v14690_v45, %v14038_v4  ;;  %v14211_v44 = vpop.f32.mrf.mxu0 }
 0x390   : > { %v7305_v18 = vpop.f32.mrf.mxu1  ;;  %14692 = vst [vmem:[#allocation7_spill] sm:$0xff] %v14211_v44 }
 0x391   : > { %14685 = vst [vmem:[#allocation15_spill] sm:$0xff] %v14191_v11  ;;  %v14196_v49 = vadd.f32 %v7305_v18, %v7193_v24  ;;  %v7201_v18 = vadd.f32 %v14691_v14, %v14042_v17 }
 0x392   : > { %v7309_v1 = vpop.f32.mrf.mxu1 }
 0x393   : > { %14688 = vst [vmem:[#allocation19_spill] sm:$0xff] %v14196_v49  ;;  %v14203_v19 = vadd.f32 %v7309_v1, %v7197_v48  ;;  %v7353_v48 = vadd.f32 %v14696_v16, %v14050_v9  ;;  %v14220_v1 = vpop.f32.mrf.mxu0 }
 0x394   : > { %v7311_v41 = vpop.f32.mrf.mxu1  ;;  %14697 = vst [vmem:[#allocation17_spill] sm:$0xff] %v14220_v1 }
 0x395   : > { %v14207_v42 = vadd.f32 %v7311_v41, %v7199_v30  ;;  %v14698_v30 = vld [vmem:[#allocation11_spill] sm:$0xff]  ;;  %v14229_v56 = vpop.f32.mrf.mxu0 }
 0x396   : > { %v7313_v24 = vpop.f32.mrf.mxu1  ;;  %v7355_v17 = vadd.f32 %v14698_v30, %v14054_v6 }
 0x397   : > { %v14213_v58 = vadd.f32 %v7313_v24, %v7201_v18 }
 0x398   : > { %v7315_v49 = vpop.f32.mrf.mxu1 }
 0x399   : > { %14693 = vst [vmem:[#allocation8_spill] sm:$0xff] %v14213_v58  ;;  %v14216_v61 = vadd.f32 %v7315_v49, %v7203_v57  ;;  %v7363_v57 = vadd.f32 %v14699_v3, %v14074_v63  ;;  %v14701_v3 = vld [vmem:[#allocation29_spill] sm:$0xff] }
 0x39a   : > { %v7465_v4 = vpop.f32.mrf.mxu1 }
 0x39b   : > { %14695 = vst [vmem:[#allocation9_spill] sm:$0xff] %v14216_v61  ;;  %v7466_v45 = vadd.f32 %v7465_v4, %v7353_v48  ;;  %v14238_v48 = vpop.f32.mrf.mxu0  ;;  %v14700_v4 = vld [vmem:[#allocation28_spill] sm:$0xff] }
 0x39c   : > { %v7467_v41 = vpop.f32.mrf.mxu1 }
 0x39d   : > { %v7468_v14 = vadd.f32 %v7467_v41, %v7355_v17  ;;  %v14225_v18 = vadd.f32 %v13858_v54, %v7466_v45  ;;  %v7365_v54 = vadd.f32 %v14700_v4, %v14081_v52  ;;  %v14702_v4 = vld [vmem:[#allocation30_spill] sm:$0xff] }
 0x39e   : > { %v14227_v24 = vpop.f32.mrf.mxu1 }
 0x39f   : > { %v14232_v49 = vadd.f32 %v13869_v27, %v7468_v14  ;;  %v14247_v27 = vpop.f32.mrf.mxu0 }
 0x3a0   : > { %v14234_v9 = vpop.f32.mrf.mxu1 }
 0x3a1   : > { %v14256_v1 = vpop.f32.mrf.mxu0 }
 0x3a2   : > { %v7475_v16 = vpop.f32.mrf.mxu1 }
 0x3a3   : > { %v7476_v6 = vadd.f32 %v7475_v16, %v7363_v57  ;;  %v7373_v57 = vadd.f32 %v14701_v3, %v14098_v55  ;;  %v14705_v3 = vld [vmem:[#allocation33_spill] sm:$0xff] }
 0x3a4   : > { %v7477_v45 = vpop.f32.mrf.mxu1 }
 0x3a5   : > { %v7478_v30 = vadd.f32 %v7477_v45, %v7365_v54  ;;  %v14243_v17 = vadd.f32 %v13908_v21, %v7476_v6  ;;  %v7375_v21 = vadd.f32 %v14702_v4, %v14102_v31  ;;  %v14703_v45 = vld [vmem:[#allocation60_spill] sm:$0xff]  ;;  %v14706_v4 = vld [vmem:[#allocation34_spill] sm:$0xff] }
 0x3a6   : > { %v14245_v41 = vpop.f32.mrf.mxu1 }
 0x3a7   : > { %v14250_v14 = vadd.f32 %v13919_v40, %v7478_v30  ;;  %v14265_v40 = vpop.f32.mrf.mxu0  ;;  %v14704_v30 = vld [vmem:[#allocation61_spill] sm:$0xff] }
 0x3a8   : > { %v14252_v63 = vpop.f32.mrf.mxu1 }
 0x3a9   : > { %v14274_v11 = vpop.f32.mrf.mxu0 }
 0x3aa   : > { %v7485_v16 = vpop.f32.mrf.mxu1 }
 0x3ab   : > { %v7486_v52 = vadd.f32 %v7485_v16, %v7373_v57  ;;  %v7383_v57 = vadd.f32 %v14705_v3, %v14116_v39  ;;  %v14709_v3 = vld [vmem:[#allocation37_spill] sm:$0xff] }
 0x3ac   : > { %v7487_v6 = vpop.f32.mrf.mxu1 }
 0x3ad   : > { %v7488_v54 = vadd.f32 %v7487_v6, %v7375_v21  ;;  %v14261_v44 = vadd.f32 %v14703_v45, %v7486_v52  ;;  %v7385_v52 = vadd.f32 %v14706_v4, %v14120_v62  ;;  %v14707_v45 = vld [vmem:[#allocation64_spill] sm:$0xff]  ;;  %v14710_v4 = vld [vmem:[#allocation38_spill] sm:$0xff] }
 0x3ae   : > { %v14263_v61 = vpop.f32.mrf.mxu1 }
 0x3af   : > { %v14268_v58 = vadd.f32 %v14704_v30, %v7488_v54  ;;  %v14283_v54 = vpop.f32.mrf.mxu0  ;;  %v14708_v30 = vld [vmem:[#allocation65_spill] sm:$0xff] }
 0x3b0   : > { %v14270_v55 = vpop.f32.mrf.mxu1 }
 0x3b1   : > { %v14292_v34 = vpop.f32.mrf.mxu0 }
 0x3b2   : > { %v7495_v16 = vpop.f32.mrf.mxu1 }
 0x3b3   : > { %v7496_v31 = vadd.f32 %v7495_v16, %v7383_v57  ;;  %v7393_v57 = vadd.f32 %v14709_v3, %v14137_v28  ;;  %v14713_v3 = vld [vmem:[#allocation41_spill] sm:$0xff] }
 0x3b4   : > { %v7497_v21 = vpop.f32.mrf.mxu1 }
 0x3b5   : > { %v7498_v6 = vadd.f32 %v7497_v21, %v7385_v52  ;;  %v14279_v53 = vadd.f32 %v14707_v45, %v7496_v31  ;;  %v7395_v31 = vadd.f32 %v14710_v4, %v14141_v36  ;;  %v14714_v4 = vld [vmem:[#allocation42_spill] sm:$0xff] }
 0x3b6   : > { %v14281_v25 = vpop.f32.mrf.mxu1 }
 0x3b7   : > { %v14286_v33 = vadd.f32 %v14708_v30, %v7498_v6  ;;  %v14301_v6 = vpop.f32.mrf.mxu0 }
 0x3b8   : > { %v14288_v39 = vpop.f32.mrf.mxu1 }
 0x3b9   : > { %v14310_v47 = vpop.f32.mrf.mxu0 }
 0x3ba   : > { %v7505_v16 = vpop.f32.mrf.mxu1 }
 0x3bb   : > { %v7506_v62 = vadd.f32 %v7505_v16, %v7393_v57  ;;  %v7403_v57 = vadd.f32 %v14713_v3, %v14159_v20  ;;  %v14717_v3 = vld [vmem:[#allocation45_spill] sm:$0xff] }
 0x3bc   : > { %v7507_v52 = vpop.f32.mrf.mxu1 }
 0x3bd   : > { %v7508_v21 = vadd.f32 %v7507_v52, %v7395_v31  ;;  %v14297_v45 = vadd.f32 %v14058_v35, %v7506_v62  ;;  %v7405_v35 = vadd.f32 %v14714_v4, %v14163_v15  ;;  %v14718_v4 = vld [vmem:[#allocation46_spill] sm:$0xff] }
 0x3be   : > { %v14299_v29 = vpop.f32.mrf.mxu1 }
 0x3bf   : > { %14711 = vst [vmem:[#allocation10_spill] sm:$0xff] %v14297_v45  ;;  %v14304_v30 = vadd.f32 %v14072_v8, %v7508_v21  ;;  %v14319_v8 = vpop.f32.mrf.mxu0 }
 0x3c0   : > { %v14306_v28 = vpop.f32.mrf.mxu1 }
 0x3c1   : > { %14712 = vst [vmem:[#allocation24_spill] sm:$0xff] %v14304_v30  ;;  %v14328_v30 = vpop.f32.mrf.mxu0 }
 0x3c2   : > { %v7515_v16 = vpop.f32.mrf.mxu1 }
 0x3c3   : > { %v7516_v36 = vadd.f32 %v7515_v16, %v7403_v57  ;;  %v7413_v57 = vadd.f32 %v14717_v3, %v14181_v50  ;;  %v14723_v3 = vld [vmem:[#allocation49_spill] sm:$0xff] }
 0x3c4   : > { %v7517_v62 = vpop.f32.mrf.mxu1 }
 0x3c5   : > { %v7518_v31 = vadd.f32 %v7517_v62, %v7405_v35  ;;  %v14315_v52 = vadd.f32 %v14106_v7, %v7516_v36  ;;  %v7415_v7 = vadd.f32 %v14718_v4, %v14185_v26  ;;  %v14724_v26 = vld [vmem:[#allocation52_spill] sm:$0xff] }
 0x3c6   : > { %v14317_v45 = vpop.f32.mrf.mxu1  ;;  %v14725_v4 = vld [vmem:[#allocation16_spill] sm:$0xff] }
 0x3c7   : > { %14715 = vst [vmem:[#allocation22_spill] sm:$0xff] %v14315_v52  ;;  %v14322_v21 = vadd.f32 %v14114_v51, %v7518_v31  ;;  %v14337_v51 = vpop.f32.mrf.mxu0 }
 0x3c8   : > { %v14324_v20 = vpop.f32.mrf.mxu1 }
 0x3c9   : > { %14716 = vst [vmem:[#allocation25_spill] sm:$0xff] %v14322_v21  ;;  %v14346_v21 = vpop.f32.mrf.mxu0 }
 0x3ca   : > { %v7525_v16 = vpop.f32.mrf.mxu1 }
 0x3cb   : > { %v7526_v15 = vadd.f32 %v7525_v16, %v7413_v57  ;;  %v7423_v57 = vadd.f32 %v14723_v3, %v14203_v19  ;;  %v14358_v19 = vpop.f32.mrf.mxu0  ;;  %v14728_v3 = vld [vmem:[#allocation12_spill] sm:$0xff] }
 0x3cc   : > { %v7527_v36 = vpop.f32.mrf.mxu1 }
 0x3cd   : > { %v7528_v35 = vadd.f32 %v7527_v36, %v7415_v7  ;;  %v14333_v62 = vadd.f32 %v14145_v12, %v7526_v15  ;;  %v7133_v7 = vadd.f32 %v14725_v4, %v14724_v26  ;;  %v14726_v15 = vld [vmem:[#allocation50_spill] sm:$0xff]  ;;  %v14733_v4 = vld [vmem:[#allocation3_spill] sm:$0xff] }
 0x3ce   : > { %v14335_v52 = vpop.f32.mrf.mxu1  ;;  %v7425_v36 = vadd.f32 %v14726_v15, %v14207_v42 }
 0x3cf   : > { %14719 = vst [vmem:[#allocation23_spill] sm:$0xff] %v14333_v62  ;;  %14720 = vst [vmem:[#allocation11_spill] sm:$0xff] %v14335_v52  ;;  %v14340_v31 = vadd.f32 %v14156_v59, %v7528_v35  ;;  %v7246_v52 = vadd.f32 %v14068_v10, %v7133_v7 }
 0x3d0   : > { %v14342_v50 = vpop.f32.mrf.mxu1 }
 0x3d1   : > { %14721 = vst [vmem:[#allocation14_spill] sm:$0xff] %v14340_v31  ;;  %14722 = vst [vmem:[#allocation28_spill] sm:$0xff] %v14342_v50  ;;  %v7357_v50 = vadd.f32 %v14728_v3, %v14060_v46  ;;  %v14734_v3 = vld [vmem:[#allocation53_spill] sm:$0xff] }
 0x3d2   : > { %v7535_v16 = vpop.f32.mrf.mxu1 }
 0x3d3   : > { %v7536_v12 = vadd.f32 %v7535_v16, %v7423_v57  ;;  %v7470_v42 = vadd.f32 %v14227_v24, %v7357_v50  ;;  %v14731_v16 = vld [vmem:[#allocation13_spill] sm:$0xff]  ;;  %v14735_v24 = vld [vmem:[#allocation26_spill] sm:$0xff] }
 0x3d4   : > { %v7537_v62 = vpop.f32.mrf.mxu1  ;;  %v7359_v10 = vadd.f32 %v14731_v16, %v7246_v52  ;;  %v7367_v52 = vadd.f32 %v14735_v24, %v14090_v13  ;;  %v14739_v13 = vld [vmem:[#allocation4_spill] sm:$0xff] }
 0x3d5   : > { %v7538_v59 = vadd.f32 %v7537_v62, %v7425_v36  ;;  %v14354_v35 = vadd.f32 %v14189_v5, %v7536_v12  ;;  %v14732_v62 = vld [vmem:[#allocation54_spill] sm:$0xff]  ;;  %v14371_v12 = vpop.f32.mrf.mxu0 }
 0x3d6   : > { %v14356_v31 = vpop.f32.mrf.mxu1  ;;  %v7143_v5 = vadd.f32 %v14733_v4, %v14732_v62  ;;  %v7472_v15 = vadd.f32 %v14234_v9, %v7359_v10  ;;  %v14737_v10 = vld [vmem:[#allocation27_spill] sm:$0xff] }
 0x3d7   : > { %14727 = vst [vmem:[#allocation29_spill] sm:$0xff] %v14354_v35  ;;  %v14363_v26 = vadd.f32 %v14200_v2, %v7538_v59  ;;  %v14380_v16 = vpop.f32.mrf.mxu0  ;;  %v14736_v35 = vld [vmem:[#allocation55_spill] sm:$0xff] }
 0x3d8   : > { %v14365_v57 = vpop.f32.mrf.mxu1  ;;  %v7256_v46 = vadd.f32 %v14092_v23, %v7143_v5  ;;  %v7585_v9 = vadd.f32 %v14736_v35, %v7472_v15 }
 0x3d9   : > { %14729 = vst [vmem:[#allocation30_spill] sm:$0xff] %v14363_v26  ;;  %14730 = vst [vmem:[#allocation60_spill] sm:$0xff] %v14365_v57  ;;  %v7583_v26 = vadd.f32 %v14734_v3, %v7470_v42 }
 0x3da   : > { %v7691_v7 = vpop.f32.mrf.mxu1  ;;  %v7369_v23 = vadd.f32 %v14737_v10, %v7256_v46 }
 0x3db   : > { %v7692_v36 = vadd.f32 %v7691_v7, %v14225_v18  ;;  %v7480_v18 = vadd.f32 %v14245_v41, %v7367_v52 }
 0x3dc   : > { %v7693_v2 = vpop.f32.mrf.mxu1  ;;  %v7482_v24 = vadd.f32 %v14252_v63, %v7369_v23 }
 0x3dd   : > { %v7694_v59 = vadd.f32 %v7693_v2, %v14232_v49  ;;  %v7805_v62 = vadd.f32 %v14229_v56, %v7692_v36  ;;  %v14738_v2 = vld [vmem:[#allocation56_spill] sm:$0xff]  ;;  %v14391_v56 = vpop.f32.mrf.mxu0 }
 0x3de   : > { %v7695_v50 = vpop.f32.mrf.mxu1  ;;  %v7153_v3 = vadd.f32 %v14739_v13, %v14738_v2  ;;  %v14744_v2 = vld [vmem:[#allocation58_spill] sm:$0xff]  ;;  %v14745_v13 = vld [vmem:[#allocation5_spill] sm:$0xff] }
 0x3df   : > { %v7696_v4 = vadd.f32 %v7695_v50, %v7583_v26  ;;  %v7807_v49 = vadd.f32 %v14238_v48, %v7694_v59  ;;  %v7883_v35 = vmax.f32 %v7805_v62, 0.0  ;;  %v14400_v62 = vpop.f32.mrf.mxu0 }
 0x3e0   : > { %v7697_v5 = vpop.f32.mrf.mxu1  ;;  %v7266_v48 = vadd.f32 %v14110_v60, %v7153_v3  ;;  %v7163_v3 = vadd.f32 %v14745_v13, %v14744_v2 }
 0x3e1   : > { %v7809_v42 = vadd.f32 %v14247_v27, %v7696_v4  ;;  %v7698_v7 = vadd.f32 %v7697_v5, %v7585_v9  ;;  %v14740_v27 = vld [vmem:[#allocation57_spill] sm:$0xff]  ;;  %v7884_v59 = vmax.f32 %v7807_v49, 0.0  ;;  %v14741_v4 = vld [vmem:[#allocation31_spill] sm:$0xff]  ;;  %v14743_v5 = vld [vmem:[#allocation32_spill] sm:$0xff] }
 0x3e2   : > { %v7701_v57 = vpop.f32.mrf.mxu1  ;;  %v7593_v46 = vadd.f32 %v14740_v27, %v7480_v18  ;;  %v7377_v9 = vadd.f32 %v14741_v4, %v14108_v38  ;;  %v7379_v49 = vadd.f32 %v14743_v5, %v7266_v48  ;;  %v14746_v48 = vld [vmem:[#allocation62_spill] sm:$0xff] }
 0x3e3   : > { %v7885_v26 = vmax.f32 %v7809_v42, 0.0  ;;  %v7811_v41 = vadd.f32 %v14256_v1, %v7698_v7  ;;  %v7702_v15 = vadd.f32 %v7701_v57, %v14243_v17  ;;  %v14742_v57 = vld [vmem:[#allocation59_spill] sm:$0xff] }
 0x3e4   : > { %v7703_v36 = vpop.f32.mrf.mxu1  ;;  %v7595_v60 = vadd.f32 %v14742_v57, %v7482_v24  ;;  %v7490_v18 = vadd.f32 %v14263_v61, %v7377_v9  ;;  %v14412_v24 = vpop.f32.mrf.mxu0  ;;  %v14748_v9 = vld [vmem:[#allocation63_spill] sm:$0xff] }
 0x3e5   : > { %v7915_v52 = vpack.c.bf16 %v7885_v26, %v7883_v35  ;;  %v7886_v50 = vmax.f32 %v7811_v41, 0.0  ;;  %v7704_v63 = vadd.f32 %v7703_v36, %v14250_v14  ;;  %v7815_v1 = vadd.f32 %v14265_v40, %v7702_v15 }
 0x3e6   : > { %v7705_v10 = vpop.f32.mrf.mxu1  ;;  %v7492_v40 = vadd.f32 %v14270_v55, %v7379_v49  ;;  %v7603_v36 = vadd.f32 %v14746_v48, %v7490_v18  ;;  %v14421_v4 = vpop.f32.mrf.mxu0 }
 0x3e7   : > { %9403 = vst [vmem:[%s12828_s8 + $0x40] sm:$0xff] %v7915_v52   ;;  %v7706_v17 = vadd.f32 %v7705_v10, %v7593_v46  ;;  %v7995_v23 = vpack.c.bf16 %v7886_v50, %v7884_v59  ;;  %v7817_v14 = vadd.f32 %v14274_v11, %v7704_v63  ;;  %v7887_v61 = vmax.f32 %v7815_v1, 0.0 }
 0x3e8   : > { %v7707_v42 = vpop.f32.mrf.mxu1 }
 0x3e9   : > { %v7819_v7 = vadd.f32 %v14283_v54, %v7706_v17  ;;  %v7708_v38 = vadd.f32 %v7707_v42, %v7595_v60  ;;  %8170 = vmatprep.mubr.bf16.mxu1 %v7995_v23  ;;  %v7276_v54 = vadd.f32 %v14128_v32, %v7163_v3  ;;  %v7888_v27 = vmax.f32 %v7817_v14, 0.0  ;;  %v14749_v17 = vld [vmem:[#allocation36_spill] sm:$0xff] }
 0x3ea   : > { %v7711_v35 = vpop.f32.mrf.mxu1  ;;  %8171 = vmatmul.mubr.bf16.vlgmr.msra.gmra.mxu1 %v7915_v52  ;;  %v14747_v52 = vld [vmem:[#allocation35_spill] sm:$0xff]  ;;  %v7605_v32 = vadd.f32 %v14748_v9, %v7492_v40 }
 0x3eb   : > { %v7889_v26 = vmax.f32 %v7819_v7, 0.0  ;;  %v7821_v41 = vadd.f32 %v14292_v34, %v7708_v38  ;;  %v7712_v11 = vadd.f32 %v7711_v35, %v14261_v44  ;;  %v7387_v50 = vadd.f32 %v14747_v52, %v14126_v0 }
 0x3ec   : > { %v7713_v15 = vpop.f32.mrf.mxu1  ;;  %v7389_v57 = vadd.f32 %v14749_v17, %v7276_v54 }
 0x3ed   : > { %v7916_v46 = vpack.c.bf16 %v7889_v26, %v7887_v61  ;;  %v7890_v59 = vmax.f32 %v7821_v41, 0.0  ;;  %v7714_v55 = vadd.f32 %v7713_v15, %v14268_v58  ;;  %v7825_v34 = vadd.f32 %v14301_v6, %v7712_v11  ;;  %v14431_v6 = vpop.f32.mrf.mxu0  ;;  %v14751_v41 = vld [vmem:[#allocation70_spill] sm:$0xff]  ;;  %v14752_v11 = vld [vmem:[#allocation40_spill] sm:$0xff] }
 0x3ee   : > { %v7715_v63 = vpop.f32.mrf.mxu1  ;;  %v7500_v1 = vadd.f32 %v14281_v25, %v7387_v50  ;;  %v7502_v18 = vadd.f32 %v14288_v39, %v7389_v57  ;;  %v14750_v39 = vld [vmem:[#allocation39_spill] sm:$0xff]  ;;  %v7399_v54 = vadd.f32 %v14752_v11, %v14751_v41  ;;  %v14754_v50 = vld [vmem:[#allocation66_spill] sm:$0xff] }
 0x3ef   : > { %9404 = vst [vmem:[%s12828_s8 + $0x48] sm:$0xff] %v7916_v46   ;;  %v7716_v44 = vadd.f32 %v7715_v63, %v7603_v36  ;;  %v7996_v10 = vpack.c.bf16 %v7890_v59, %v7888_v27  ;;  %v7827_v58 = vadd.f32 %v14310_v47, %v7714_v55  ;;  %v7891_v49 = vmax.f32 %v7825_v34, 0.0  ;;  %v14439_v35 = vpop.f32.mrf.mxu0  ;;  %v14753_v59 = vld [vmem:[#allocation10_spill] sm:$0xff] }
 0x3f0   : > { %v7717_v60 = vpop.f32.mrf.mxu1  ;;  %v7613_v47 = vadd.f32 %v14040_v22, %v7500_v1  ;;  %v7397_v3 = vadd.f32 %v14750_v39, %v14147_v37  ;;  %v7512_v36 = vadd.f32 %v14306_v28, %v7399_v54  ;;  %v14757_v28 = vld [vmem:[#allocation43_spill] sm:$0xff] }
 0x3f1   : > { %v7829_v23 = vadd.f32 %v14319_v8, %v7716_v44  ;;  %v7718_v0 = vadd.f32 %v7717_v60, %v7605_v32  ;;  %8178 = vmatprep.mubr.bf16.mxu1 %v7996_v10  ;;  %v7892_v38 = vmax.f32 %v7827_v58, 0.0  ;;  %v14755_v44 = vld [vmem:[#allocation24_spill] sm:$0xff] }
 0x3f2   : > { %v7721_v5 = vpop.f32.mrf.mxu1  ;;  %8179 = vmatmul.mubr.bf16.gmra.mxu1 %v7916_v46  ;;  %v7510_v22 = vadd.f32 %v14299_v29, %v7397_v3  ;;  %v14756_v32 = vld [vmem:[#allocation20_spill] sm:$0xff] }
 0x3f3   : > { %v7893_v42 = vmax.f32 %v7829_v23, 0.0  ;;  %v7831_v25 = vadd.f32 %v14328_v30, %v7718_v0  ;;  %v7722_v14 = vadd.f32 %v7721_v5, %v14279_v53  ;;  %v7615_v53 = vadd.f32 %v14048_v43, %v7502_v18  ;;  %v14759_v18 = vld [vmem:[#allocation18_spill] sm:$0xff]  ;;  %v14760_v5 = vld [vmem:[#allocation44_spill] sm:$0xff] }
 0x3f4   : > { %v7723_v7 = vpop.f32.mrf.mxu1  ;;  %v7623_v63 = vadd.f32 %v14754_v50, %v7510_v22  ;;  %v7407_v10 = vadd.f32 %v14757_v28, %v14756_v32  ;;  %v14764_v22 = vld [vmem:[#allocation15_spill] sm:$0xff] }
 0x3f5   : > { %v7917_v8 = vpack.c.bf16 %v7893_v42, %v7891_v49  ;;  %v7894_v2 = vmax.f32 %v7831_v25, 0.0  ;;  %v7724_v13 = vadd.f32 %v7723_v7, %v14286_v33  ;;  %v7835_v61 = vadd.f32 %v14337_v51, %v7722_v14  ;;  %v7860_v51 = vpop.f32.mrf.mxu0  ;;  %v14771_v32 = vld [vmem:[#allocation23_spill] sm:$0xff] }
 0x3f6   : > { %v7725_v40 = vpop.f32.mrf.mxu1  ;;  %v7520_v0 = vadd.f32 %v14317_v45, %v7407_v10  ;;  %v7409_v49 = vadd.f32 %v14760_v5, %v14759_v18 }
 0x3f7   : > { %9405 = vst [vmem:[%s12828_s8 + $0x50] sm:$0xff] %v7917_v8   ;;  %v7726_v30 = vadd.f32 %v7725_v40, %v7613_v47  ;;  %v7997_v26 = vpack.c.bf16 %v7894_v2, %v7892_v38  ;;  %v7837_v33 = vadd.f32 %v14346_v21, %v7724_v13  ;;  %v7895_v43 = vmax.f32 %v7835_v61, 0.0  ;;  %v7864_v17 = vpop.f32.mrf.mxu0  ;;  %v14761_v13 = vld [vmem:[#allocation22_spill] sm:$0xff]  ;;  %v14762_v40 = vld [vmem:[#allocation68_spill] sm:$0xff] }
 0x3f8   : > { %v7727_v15 = vpop.f32.mrf.mxu1  ;;  %v7522_v47 = vadd.f32 %v14324_v20, %v7409_v49  ;;  %v7633_v61 = vadd.f32 %v14762_v40, %v7520_v0  ;;  %v14765_v20 = vld [vmem:[#allocation47_spill] sm:$0xff]  ;;  %v14775_v0 = vld [vmem:[#allocation2_spill] sm:$0xff]  ;;  %v14779_v40 = vld [vmem:[#allocation60_spill] sm:$0xff] }
 0x3f9   : > { %v7839_v37 = vadd.f32 %v14358_v19, %v7726_v30  ;;  %v7728_v48 = vadd.f32 %v7727_v15, %v7615_v53  ;;  %8186 = vmatprep.mubr.bf16.mxu1 %v7997_v26  ;;  %v7896_v21 = vmax.f32 %v7837_v33, 0.0  ;;  %v14763_v53 = vld [vmem:[#allocation25_spill] sm:$0xff]  ;;  %v7417_v41 = vadd.f32 %v14765_v20, %v14764_v22  ;;  %v14781_v20 = vld [vmem:[#allocation7_spill] sm:$0xff] }
 0x3fa   : > { %v7731_v27 = vpop.f32.mrf.mxu1  ;;  %8187 = vmatmul.mubr.bf16.gmra.mxu1 %v7917_v8 }
 0x3fb   : > { %v7897_v46 = vmax.f32 %v7839_v37, 0.0  ;;  %v7841_v29 = vadd.f32 %v14371_v12, %v7728_v48  ;;  %v7732_v55 = vadd.f32 %v7731_v27, %v14753_v59  ;;  %v14758_v12 = vld [vmem:[#allocation67_spill] sm:$0xff] }
 0x3fc   : > { %v7733_v52 = vpop.f32.mrf.mxu1  ;;  %v7625_v58 = vadd.f32 %v14758_v12, %v7512_v36  ;;  %v14767_v36 = vld [vmem:[#allocation11_spill] sm:$0xff] }
 0x3fd   : > { %v7918_v34 = vpack.c.bf16 %v7897_v46, %v7895_v43  ;;  %v7898_v19 = vmax.f32 %v7841_v29, 0.0  ;;  %v7734_v9 = vadd.f32 %v7733_v52, %v14755_v44  ;;  %v7845_v57 = vadd.f32 %v14380_v16, %v7732_v55  ;;  %v7866_v16 = vpop.f32.mrf.mxu0  ;;  %v14768_v43 = vld [vmem:[#allocation19_spill] sm:$0xff]  ;;  %v14769_v46 = vld [vmem:[#allocation48_spill] sm:$0xff] }
 0x3fe   : > { %v7735_v1 = vpop.f32.mrf.mxu1  ;;  %v7530_v27 = vadd.f32 %v14767_v36, %v7417_v41  ;;  %v7419_v29 = vadd.f32 %v14769_v46, %v14768_v43 }
 0x3ff   : > { %9406 = vst [vmem:[%s12828_s8 + $0x58] sm:$0xff] %v7918_v34   ;;  %v7736_v60 = vadd.f32 %v7735_v1, %v7623_v63  ;;  %v7998_v23 = vpack.c.bf16 %v7898_v19, %v7896_v21  ;;  %v7847_v25 = vadd.f32 %v14391_v56, %v7734_v9  ;;  %v7899_v8 = vmax.f32 %v7845_v57, 0.0  ;;  %v7868_v54 = vpop.f32.mrf.mxu0  ;;  %v14770_v63 = vld [vmem:[#allocation28_spill] sm:$0xff]  ;;  %v14772_v1 = vld [vmem:[#allocation6_spill] sm:$0xff] }
 0x400   : > { %v7737_v42 = vpop.f32.mrf.mxu1  ;;  %v7532_v21 = vadd.f32 %v14770_v63, %v7419_v29  ;;  %v7643_v57 = vadd.f32 %v14772_v1, %v7530_v27  ;;  %v14783_v27 = vld [vmem:[#allocation17_spill] sm:$0xff] }
 0x401   : > { %v7849_v14 = vadd.f32 %v14400_v62, %v7736_v60  ;;  %v7738_v7 = vadd.f32 %v7737_v42, %v7625_v58  ;;  %8194 = vmatprep.mubr.bf16.mxu1 %v7998_v23  ;;  %v7900_v56 = vmax.f32 %v7847_v25, 0.0  ;;  %v14774_v23 = vld [vmem:[#allocation8_spill] sm:$0xff] }
 0x402   : > { %v7741_v38 = vpop.f32.mrf.mxu1  ;;  %8195 = vmatmul.mubr.bf16.gmra.mxu1 %v7918_v34  ;;  %v7427_v18 = vadd.f32 %v14775_v0, %v14774_v23 }
 0x403   : > { %v7901_v2 = vmax.f32 %v7849_v14, 0.0  ;;  %v7851_v45 = vadd.f32 %v14412_v24, %v7738_v7  ;;  %v7742_v39 = vadd.f32 %v7741_v38, %v14761_v13  ;;  %v14766_v24 = vld [vmem:[#allocation69_spill] sm:$0xff] }
 0x404   : > { %v7743_v3 = vpop.f32.mrf.mxu1  ;;  %v7635_v37 = vadd.f32 %v14766_v24, %v7522_v47  ;;  %v14776_v14 = vld [vmem:[#allocation21_spill] sm:$0xff]  ;;  %v7540_v47 = vadd.f32 %v14356_v31, %v7427_v18 }
 0x405   : > { %v7919_v30 = vpack.c.bf16 %v7901_v2, %v7899_v8  ;;  %v7902_v62 = vmax.f32 %v7851_v45, 0.0  ;;  %v7744_v26 = vadd.f32 %v7743_v3, %v14763_v53  ;;  %v7855_v15 = vadd.f32 %v14421_v4, %v7742_v39  ;;  %v7870_v4 = vpop.f32.mrf.mxu0  ;;  %v14777_v38 = vld [vmem:[#allocation9_spill] sm:$0xff]  ;;  %v14778_v8 = vld [vmem:[#allocation51_spill] sm:$0xff] }
 0x406   : > { %v7745_v11 = vpop.f32.mrf.mxu1  ;;  %v7429_v2 = vadd.f32 %v14778_v8, %v14777_v38  ;;  %v7653_v41 = vadd.f32 %v14781_v20, %v7540_v47 }
 0x407   : > { %9407 = vst [vmem:[%s12828_s8 + $0x60] sm:$0xff] %v7919_v30   ;;  %v7746_v33 = vadd.f32 %v7745_v11, %v7633_v61  ;;  %v7999_v48 = vpack.c.bf16 %v7902_v62, %v7900_v56  ;;  %v7857_v55 = vadd.f32 %v14431_v6, %v7744_v26  ;;  %v7903_v19 = vmax.f32 %v7855_v15, 0.0  ;;  %v7874_v49 = vpop.f32.mrf.mxu0  ;;  %v14780_v26 = vld [vmem:[#allocation29_spill] sm:$0xff] }
 0x408   : > { %v7747_v59 = vpop.f32.mrf.mxu1  ;;  %v7542_v61 = vadd.f32 %v14779_v40, %v7429_v2 }
 0x409   : > { %v7859_v52 = vadd.f32 %v14439_v35, %v7746_v33  ;;  %v7748_v50 = vadd.f32 %v7747_v59, %v7635_v37  ;;  %8202 = vmatprep.mubr.bf16.mxu1 %v7999_v48  ;;  %v7904_v60 = vmax.f32 %v7857_v55, 0.0  ;;  %v14773_v35 = vld [vmem:[#allocation14_spill] sm:$0xff]  ;;  %v7876_v56 = vpop.f32.mrf.mxu0 }
 0x40a   : > { %v7751_v34 = vpop.f32.mrf.mxu1  ;;  %8203 = vmatmul.mubr.bf16.gmra.mxu1 %v7919_v30  ;;  %v7655_v43 = vadd.f32 %v14783_v27, %v7542_v61 }
 0x40b   : > { %v7905_v44 = vmax.f32 %v7859_v52, 0.0  ;;  %v7861_v9 = vadd.f32 %v7860_v51, %v7748_v50  ;;  %v7752_v28 = vadd.f32 %v7751_v34, %v14771_v32  ;;  %v7645_v51 = vadd.f32 %v14776_v14, %v7532_v21  ;;  %v7878_v24 = vpop.f32.mrf.mxu0 }
 0x40c   : > { %v7753_v10 = vpop.f32.mrf.mxu1 }
 0x40d   : > { %v7920_v6 = vpack.c.bf16 %v7905_v44, %v7903_v19  ;;  %v7906_v12 = vmax.f32 %v7861_v9, 0.0  ;;  %v7754_v58 = vadd.f32 %v7753_v10, %v14773_v35  ;;  %v7865_v42 = vadd.f32 %v7864_v17, %v7752_v28  ;;  %v7880_v50 = vpop.f32.mrf.mxu0  ;;  %v14500_v28 = vld [vmem:[%s14541_s4] ss:$0 sm:$0xff] }
 0x40e   : > { %v7755_v5 = vpop.f32.mrf.mxu1 }
 0x40f   : > { %9408 = vst [vmem:[%s12828_s8 + $0x68] sm:$0xff] %v7920_v6   ;;  %v7756_v25 = vadd.f32 %v7755_v5, %v7643_v57  ;;  %v8000_v7 = vpack.c.bf16 %v7906_v12, %v7904_v60  ;;  %v7867_v13 = vadd.f32 %v7866_v16, %v7754_v58  ;;  %v7907_v17 = vmax.f32 %v7865_v42, 0.0 }
 0x410   : > { %v7757_v45 = vpop.f32.mrf.mxu1 }
 0x411   : > { %v7869_v39 = vadd.f32 %v7868_v54, %v7756_v25  ;;  %v7758_v3 = vadd.f32 %v7757_v45, %v7645_v51  ;;  %8210 = vmatprep.mubr.bf16.mxu1 %v8000_v7  ;;  %v7908_v11 = vmax.f32 %v7867_v13, 0.0  ;;  %v14782_v54 = vld [vmem:[#allocation30_spill] sm:$0xff] }
 0x412   : > { %v7761_v30 = vpop.f32.mrf.mxu1  ;;  %8211 = vmatmul.mubr.bf16.gmra.mxu1 %v7920_v6 }
 0x413   : > { %v7909_v62 = vmax.f32 %v7869_v39, 0.0  ;;  %v7871_v53 = vadd.f32 %v7870_v4, %v7758_v3  ;;  %v7762_v22 = vadd.f32 %v7761_v30, %v14780_v26 }
 0x414   : > { %v7763_v31 = vpop.f32.mrf.mxu1 }
 0x415   : > { %v7921_v15 = vpack.c.bf16 %v7909_v62, %v7907_v17  ;;  %v7910_v16 = vmax.f32 %v7871_v53, 0.0  ;;  %v7764_v33 = vadd.f32 %v7763_v31, %v14782_v54  ;;  %v7875_v48 = vadd.f32 %v7874_v49, %v7762_v22 }
 0x416   : > { %v7765_v37 = vpop.f32.mrf.mxu1 }
 0x417   : > { %9409 = vst [vmem:[%s12828_s8 + $0x70] sm:$0xff] %v7921_v15   ;;  %v7766_v36 = vadd.f32 %v7765_v37, %v7653_v41  ;;  %v8001_v46 = vpack.c.bf16 %v7910_v16, %v7908_v11  ;;  %v7877_v59 = vadd.f32 %v7876_v56, %v7764_v33  ;;  %v7911_v63 = vmax.f32 %v7875_v48, 0.0 }
 0x418   : > { %v7767_v29 = vpop.f32.mrf.mxu1 }
 0x419   : > { %v7879_v55 = vadd.f32 %v7878_v24, %v7766_v36  ;;  %v7768_v52 = vadd.f32 %v7767_v29, %v7655_v43  ;;  %8218 = vmatprep.mubr.bf16.mxu1 %v8001_v46  ;;  %v7912_v4 = vmax.f32 %v7877_v59, 0.0 }
 0x41a   : > { %8219 = vmatmul.mubr.bf16.gmra.mxu1 %v7921_v15 }
 0x41b   : > { %v7913_v21 = vmax.f32 %v7879_v55, 0.0  ;;  %v7881_v34 = vadd.f32 %v7880_v50, %v7768_v52 }
 0x41d   : > { %v7922_v19 = vpack.c.bf16 %v7913_v21, %v7911_v63  ;;  %v7914_v44 = vmax.f32 %v7881_v34, 0.0 }
 0x41f   : > { %9410 = vst [vmem:[%s12828_s8 + $0x78] sm:$0xff] %v7922_v19   ;;  %v8002_v9 = vpack.c.bf16 %v7914_v44, %v7912_v4 }
 0x421   : > { %8226 = vmatprep.mubr.bf16.mxu1 %v8002_v9 }
 0x422   : > { %8227 = vmatmul.mubr.bf16.gmra.mxu1 %v7922_v19 }
 0x4aa   : > { %v9491_v32 = vpop.f32.mrf.mxu1 }
 0x4ac   : > { %v9492_v10 = vpop.f32.mrf.mxu1 }
 0x4ad   : > { %v9493_v1 = vadd.f32 %v9492_v10, %v9491_v32 }
 0x4ae   : > { %v9494_v57 = vpop.f32.mrf.mxu1 }
 0x4af   : > { %v8173_v60 = vadd.f32 %v9493_v1, %v14500_v28 }
 0x4b0   : > { %v9495_v6 = vpop.f32.mrf.mxu1 }
 0x4b1   : > { %8235 = vst [vmem:[%s13649_s22 + $0x80] sm:$0xff] %v8173_v60  ;;  %v9496_v12 = vadd.f32 %v9495_v6, %v9494_v57 }
 0x4b2   : > { %v9497_v35 = vpop.f32.mrf.mxu1 }
 0x4b3   : > { %v8176_v58 = vadd.f32 %v9496_v12, %v14500_v28 }
 0x4b4   : > { %v9498_v23 = vpop.f32.mrf.mxu1 }
 0x4b5   : > { %8236 = vst [vmem:[%s13649_s22 + $0x88] sm:$0xff] %v8176_v58  ;;  %v9499_v0 = vadd.f32 %v9498_v23, %v9497_v35 }
 0x4b6   : > { %v9500_v18 = vpop.f32.mrf.mxu1 }
 0x4b7   : > { %v8181_v5 = vadd.f32 %v9499_v0, %v14500_v28 }
 0x4b8   : > { %v9501_v49 = vpop.f32.mrf.mxu1 }
 0x4b9   : > { %8237 = vst [vmem:[%s13649_s22 + $0x90] sm:$0xff] %v8181_v5  ;;  %v9502_v42 = vadd.f32 %v9501_v49, %v9500_v18 }
 0x4ba   : > { %v9503_v25 = vpop.f32.mrf.mxu1 }
 0x4bb   : > { %v8184_v14 = vadd.f32 %v9502_v42, %v14500_v28 }
 0x4bc   : > { %v9504_v51 = vpop.f32.mrf.mxu1 }
 0x4bd   : > { %8238 = vst [vmem:[%s13649_s22 + $0x98] sm:$0xff] %v8184_v14  ;;  %v9505_v7 = vadd.f32 %v9504_v51, %v9503_v25 }
 0x4be   : > { %v9506_v47 = vpop.f32.mrf.mxu1 }
 0x4bf   : > { %v8189_v38 = vadd.f32 %v9505_v7, %v14500_v28 }
 0x4c0   : > { %v9507_v8 = vpop.f32.mrf.mxu1 }
 0x4c1   : > { %8239 = vst [vmem:[%s13649_s22 + $0xa0] sm:$0xff] %v8189_v38  ;;  %v9508_v2 = vadd.f32 %v9507_v8, %v9506_v47 }
 0x4c2   : > { %v9509_v45 = vpop.f32.mrf.mxu1 }
 0x4c3   : > { %v8192_v13 = vadd.f32 %v9508_v2, %v14500_v28 }
 0x4c4   : > { %v9510_v39 = vpop.f32.mrf.mxu1 }
 0x4c5   : > { %8240 = vst [vmem:[%s13649_s22 + $0xa8] sm:$0xff] %v8192_v13  ;;  %v9511_v3 = vadd.f32 %v9510_v39, %v9509_v45 }
 0x4c6   : > { %v9512_v40 = vpop.f32.mrf.mxu1 }
 0x4c7   : > { %v8197_v61 = vadd.f32 %v9511_v3, %v14500_v28 }
 0x4c8   : > { %v9513_v56 = vpop.f32.mrf.mxu1 }
 0x4c9   : > { %8241 = vst [vmem:[%s13649_s22 + $0xb0] sm:$0xff] %v8197_v61  ;;  %v9514_v30 = vadd.f32 %v9513_v56, %v9512_v40 }
 0x4ca   : > { %v9515_v17 = vpop.f32.mrf.mxu1 }
 0x4cb   : > { %v8200_v62 = vadd.f32 %v9514_v30, %v14500_v28 }
 0x4cc   : > { %v9516_v53 = vpop.f32.mrf.mxu1 }
 0x4cd   : > { %8242 = vst [vmem:[%s13649_s22 + $0xb8] sm:$0xff] %v8200_v62  ;;  %v9517_v26 = vadd.f32 %v9516_v53, %v9515_v17 }
 0x4ce   : > { %v9518_v22 = vpop.f32.mrf.mxu1 }
 0x4cf   : > { %v8205_v31 = vadd.f32 %v9517_v26, %v14500_v28 }
 0x4d0   : > { %v9519_v20 = vpop.f32.mrf.mxu1 }
 0x4d1   : > { %8243 = vst [vmem:[%s13649_s22 + $0xc0] sm:$0xff] %v8205_v31  ;;  %v9520_v41 = vadd.f32 %v9519_v20, %v9518_v22 }
 0x4d2   : > { %v9521_v11 = vpop.f32.mrf.mxu1 }
 0x4d3   : > { %v8208_v15 = vadd.f32 %v9520_v41, %v14500_v28 }
 0x4d4   : > { %v9522_v16 = vpop.f32.mrf.mxu1 }
 0x4d5   : > { %8244 = vst [vmem:[%s13649_s22 + $0xc8] sm:$0xff] %v8208_v15  ;;  %v9523_v54 = vadd.f32 %v9522_v16, %v9521_v11 }
 0x4d6   : > { %v9524_v33 = vpop.f32.mrf.mxu1 }
 0x4d7   : > { %v8213_v24 = vadd.f32 %v9523_v54, %v14500_v28 }
 0x4d8   : > { %v9525_v37 = vpop.f32.mrf.mxu1 }
 0x4d9   : > { %8245 = vst [vmem:[%s13649_s22 + $0xd0] sm:$0xff] %v8213_v24  ;;  %v9526_v48 = vadd.f32 %v9525_v37, %v9524_v33 }
 0x4da   : > { %v9527_v36 = vpop.f32.mrf.mxu1 }
 0x4db   : > { %v8216_v27 = vadd.f32 %v9526_v48, %v14500_v28 }
 0x4dc   : > { %v9528_v43 = vpop.f32.mrf.mxu1 }
 0x4dd   : > { %8246 = vst [vmem:[%s13649_s22 + $0xd8] sm:$0xff] %v8216_v27  ;;  %v9529_v46 = vadd.f32 %v9528_v43, %v9527_v36 }
 0x4de   : > { %v9530_v29 = vpop.f32.mrf.mxu1 }
 0x4df   : > { %v8221_v59 = vadd.f32 %v9529_v46, %v14500_v28 }
 0x4e0   : > { %v9531_v55 = vpop.f32.mrf.mxu1 }
 0x4e1   : > { %8247 = vst [vmem:[%s13649_s22 + $0xe0] sm:$0xff] %v8221_v59  ;;  %v9532_v52 = vadd.f32 %v9531_v55, %v9530_v29 }
 0x4e2   : > { %v9533_v50 = vpop.f32.mrf.mxu1 }
 0x4e3   : > { %v8224_v63 = vadd.f32 %v9532_v52, %v14500_v28 }
 0x4e4   : > { %v9534_v21 = vpop.f32.mrf.mxu1 }
 0x4e5   : > { %8248 = vst [vmem:[%s13649_s22 + $0xe8] sm:$0xff] %v8224_v63  ;;  %v9535_v34 = vadd.f32 %v9534_v21, %v9533_v50 }
 0x4e6   : > { %v9536_v4 = vpop.f32.mrf.mxu1 }
 0x4e7   : > { %v8229_v19 = vadd.f32 %v9535_v34, %v14500_v28 }
 0x4e8   : > { %v9537_v44 = vpop.f32.mrf.mxu1 }
 0x4e9   : > { %8249 = vst [vmem:[%s13649_s22 + $0xf0] sm:$0xff] %v8229_v19  ;;  %v9538_v9 = vadd.f32 %v9537_v44, %v9536_v4 }
 0x4eb   : > { %v8232_v32 = vadd.f32 %v9538_v9, %v14500_v28 }
 0x4ed   : > { %8250 = vst [vmem:[%s13649_s22 + $0xf8] sm:$0xff] %v8232_v32 }
 0x4ee PF: > { %s17_s21 = sadd.s32 1, %s10882_s21  }
 0x4ef   : > { %p14_p4 = scmp.ge.s32.totalorder %s17_s21, 4  }
 0x4f1   :  { %16 = sbr.rel (!%p14_p4) target bundleno = 1 (0x1), region = 82 }

// kernel: segformer_forward.5
= control target key start
LH: loop header
LB: loop body
LE: loop exit
PB: predicated region body
PF: predicated region fallthrough
CT: control target
= control target key end

     0   :  { %s4114_s18 = smov 0   ;;  %s5079_s0 = inlined_call_operand.vmem [shape: bf16[512,1152], index: 0, kind: input, shape index: {}]   ;;  %s5080_s1 = inlined_call_operand.vmem [shape: bf16[1152,128], index: 1, kind: input, shape index: {}]   ;;  %s5081_s2 = inlined_call_operand.vmem [shape: f32[1,128], index: 2, kind: input, shape index: {}]   ;;  %s5082_s3 = inlined_call_operand.vmem [shape: f32[128,128], index: 3, kind: input, shape index: {}]   ;;  %s5083_s4 = inlined_call_operand.vmem [shape: f32[128,128], index: 4, kind: input, shape index: {}]   ;;  %s5084_s5 = inlined_call_operand.vmem [shape: f32[512,128], index: 5, kind: output, shape index: {}]  }
   0x1 LB: > { %s2889_s19 = sadd.s32 4294967295, %s4079_s18   ;;  %p2893_p0 = scmp.ge.s32.totalorder %s4079_s18, 1  ;;  %s4079_s18 = sphi %s4114_s18, %s15_s18  }
   0x2   : > { %p189_p1 = scmp.lt.s32.totalorder %s4079_s18, 3 }
   0x4   : > { %p190_p2 = pnand %p2893_p0, %p189_p1 }
   0x6   : > { %193 = sbr.rel (%p190_p2) target bundleno = 1225 (0x4c9), region = 40 }
   0xb   : > { %v3789_v0 = vld [vmem:[%s5080_s1 + $0x78] sm:$0xff]   ;;  %v3793_v4 = vld [vmem:[%s5080_s1 + $0x70] sm:$0xff]   ;;  %v3797_v8 = vld [vmem:[%s5080_s1 + $0x68] sm:$0xff]   ;;  %s2894_s25 = sshll.u32 %s2889_s19, 5  ;;  %vm4083_vm0 = vmmov 0  }
   0xc   : > { %v3790_v1 = vld [vmem:[%s5080_s1 + $0x38] sm:$0xff]   ;;  %3118 = vmatprep.subr.bf16.mxu0 %v3789_v0  ;;  %v3794_v5 = vld [vmem:[%s5080_s1 + $0x30] sm:$0xff]   ;;  %v3798_v9 = vld [vmem:[%s5080_s1 + $0x28] sm:$0xff]   ;;  %p219_p3 = scmp.lt.s32.totalorder %s2894_s25, 63 }
   0xd   : > { %v3791_v2 = vld [vmem:[%s5080_s1 + $0xf8] sm:$0xff]   ;;  %3119 = vmatpush3.bf16.msra.mxu0 %v3790_v1  ;;  %v3795_v6 = vld [vmem:[%s5080_s1 + $0xf0] sm:$0xff]   ;;  %v3799_v10 = vld [vmem:[%s5080_s1 + $0xe8] sm:$0xff]  }
   0xe   : > { %v3792_v3 = vld [vmem:[%s5080_s1 + $0xb8] sm:$0xff]   ;;  %3230 = vmatprep.subr.bf16.mxu1 %v3791_v2  ;;  %3120 = vmatprep.subr.bf16.mxu0 %v3793_v4  ;;  %v3796_v7 = vld [vmem:[%s5080_s1 + $0xb0] sm:$0xff]   ;;  %v3800_v11 = vld [vmem:[%s5080_s1 + $0xa8] sm:$0xff]   ;;  %s5151_s25 = smov (!%p219_p3, %s2894_s25), 63 }
   0xf   : > { %3231 = vmatpush3.bf16.msra.mxu1 %v3792_v3  ;;  %v3801_v12 = vld [vmem:[%s5080_s1 + $0x60] sm:$0xff]   ;;  %v3805_v16 = vld [vmem:[%s5080_s1 + $0x58] sm:$0xff]   ;;  %v3809_v20 = vld [vmem:[%s5080_s1 + $0x50] sm:$0xff]   ;;  %s3777_s24 = smul.u32 36, %s5151_s25  ;;  %s2897_s6 = sshll.u32 %s5151_s25, 3 }
  0x10   : > { %3232 = vmatprep.subr.bf16.mxu1 %v3795_v6  ;;  %v3802_v13 = vld [vmem:[%s5080_s1 + $0x20] sm:$0xff]   ;;  %v3806_v17 = vld [vmem:[%s5080_s1 + $0x18] sm:$0xff]   ;;  %v3810_v21 = vld [vmem:[%s5080_s1 + $0x10] sm:$0xff]   ;;  %s5010_s19 = scalar_lea.vmem %s5084_s5, %s2897_s6 }
  0x11   : > { %3121 = vmatpush3.bf16.msra.mxu0 %v3794_v5  ;;  %v3803_v14 = vld [vmem:[%s5080_s1 + $0xe0] sm:$0xff]   ;;  %v3807_v18 = vld [vmem:[%s5080_s1 + $0xd8] sm:$0xff]   ;;  %v3811_v22 = vld [vmem:[%s5080_s1 + $0xd0] sm:$0xff]   ;;  %s4217_s10 = scalar_lea.vmem %s5079_s0, %s3777_s24 }
  0x12   : > { %3122 = vmatprep.subr.bf16.mxu0 %v3797_v8  ;;  %v3804_v15 = vld [vmem:[%s5080_s1 + $0xa0] sm:$0xff]   ;;  %v3808_v19 = vld [vmem:[%s5080_s1 + $0x98] sm:$0xff]   ;;  %v3812_v23 = vld [vmem:[%s5080_s1 + $0x90] sm:$0xff]  }
  0x13   : > { %3233 = vmatpush3.bf16.msra.mxu1 %v3796_v7  ;;  %v3813_v24 = vld [vmem:[%s5080_s1 + $0x48] sm:$0xff]   ;;  %v3817_v28 = vld [vmem:[%s5080_s1 + $0x40] sm:$0xff]   ;;  %v3830_v37 = vld [vmem:[%s4217_s10 + $0x54] ss:$36 sps:$4 sm:$0xff]  }
  0x14   : > { %3234 = vmatprep.subr.bf16.mxu1 %v3799_v10  ;;  %v3814_v25 = vld [vmem:[%s5080_s1 + $0x8] sm:$0xff]   ;;  %v3818_v29 = vld [vmem:[%s5080_s1] sm:$0xff]   ;;  %v3833_v39 = vld [vmem:[%s4217_s10 + $0x94] ss:$36 sps:$4 sm:$0xff]  }
  0x15   : > { %3123 = vmatpush3.bf16.msra.mxu0 %v3798_v9  ;;  %v3815_v26 = vld [vmem:[%s5080_s1 + $0xc8] sm:$0xff]   ;;  %v3819_v30 = vld [vmem:[%s5080_s1 + $0xc0] sm:$0xff]   ;;  %v3832_v40 = vld [vmem:[%s4217_s10 + $0x50] ss:$36 sps:$4 sm:$0xff]  }
  0x16   : > { %3124 = vmatprep.subr.bf16.mxu0 %v3801_v12  ;;  %v3816_v27 = vld [vmem:[%s5080_s1 + $0x88] sm:$0xff]   ;;  %v3820_v31 = vld [vmem:[%s4217_s10] ss:$36 sps:$4 sm:$0xff]   ;;  %v3835_v42 = vld [vmem:[%s4217_s10 + $0x90] ss:$36 sps:$4 sm:$0xff]  }
  0x17   : > { %3235 = vmatpush3.bf16.msra.mxu1 %v3800_v11  ;;  %v3822_v32 = vld [vmem:[%s4217_s10 + $0x4] ss:$36 sps:$4 sm:$0xff]   ;;  %v3826_v35 = vld [vmem:[%s4217_s10 + $0xc] ss:$36 sps:$4 sm:$0xff]   ;;  %v3836_v41 = vld [vmem:[%s4217_s10 + $0x9c] ss:$36 sps:$4 sm:$0xff]  }
  0x18   : > { %3236 = vmatprep.subr.bf16.mxu1 %v3803_v14  ;;  %v3823_v33 = vld [vmem:[%s5080_s1 + $0x80] sm:$0xff]   ;;  %1743 = vmatprep.mubr.bf16.mxu0 %v3822_v32  ;;  %v3824_v34 = vld [vmem:[%s4217_s10 + $0x8] ss:$36 sps:$4 sm:$0xff]   ;;  %v3838_v44 = vld [vmem:[%s4217_s10 + $0x98] ss:$36 sps:$4 sm:$0xff]  }
  0x19   : > { %3125 = vmatpush3.bf16.msra.mxu0 %v3802_v13  ;;  %v3827_v36 = vld [vmem:[%s4217_s10 + $0x4c] ss:$36 sps:$4 sm:$0xff]   ;;  %1904 = vmatprep.mubr.bf16.mxu1 %v3826_v35  ;;  %v3839_v43 = vld [vmem:[%s4217_s10 + $0xdc] ss:$36 sps:$4 sm:$0xff]   ;;  %v3842_v45 = vld [vmem:[%s4217_s10 + $0xe4] ss:$36 sps:$4 sm:$0xff]  }
  0x1a   : > { %3126 = vmatprep.subr.bf16.mxu0 %v3805_v16  ;;  %v3829_v38 = vld [vmem:[%s4217_s10 + $0x48] ss:$36 sps:$4 sm:$0xff]   ;;  %v3841_v46 = vld [vmem:[%s4217_s10 + $0xd8] ss:$36 sps:$4 sm:$0xff]   ;;  %v3844_v48 = vld [vmem:[%s4217_s10 + $0xe0] ss:$36 sps:$4 sm:$0xff]  }
  0x1b   : > { %3237 = vmatpush3.bf16.msra.mxu1 %v3804_v15  ;;  %v3845_v47 = vld [vmem:[%s4217_s10 + $0x124] ss:$36 sps:$4 sm:$0xff]   ;;  %v3848_v49 = vld [vmem:[%s4217_s10 + $0x12c] ss:$36 sps:$4 sm:$0xff]   ;;  %v3896_v53 = vld [vmem:[%s5080_s1 + $0x178] sm:$0xff]  }
  0x1c   : > { %3238 = vmatprep.subr.bf16.mxu1 %v3807_v18  ;;  %v3847_v50 = vld [vmem:[%s4217_s10 + $0x120] ss:$36 sps:$4 sm:$0xff]   ;;  %v3851_v51 = vld [vmem:[%s4217_s10 + $0x16c] ss:$36 sps:$4 sm:$0xff]   ;;  %v3854_v54 = vld [vmem:[%s4217_s10 + $0x174] ss:$36 sps:$4 sm:$0xff]  }
  0x1d   : > { %3127 = vmatpush3.bf16.msra.mxu0 %v3806_v17  ;;  %v3850_v52 = vld [vmem:[%s4217_s10 + $0x128] ss:$36 sps:$4 sm:$0xff]   ;;  %v3899_v55 = vld [vmem:[%s5080_s1 + $0x138] sm:$0xff]   ;;  %v3903_v60 = vld [vmem:[%s5080_s1 + $0x170] sm:$0xff]  }
  0x1e   : > { %3128 = vmatprep.subr.bf16.mxu0 %v3809_v20  ;;  %v3853_v56 = vld [vmem:[%s4217_s10 + $0x168] ss:$36 sps:$4 sm:$0xff]   ;;  %v3901_v57 = vld [vmem:[%s5080_s1 + $0x1f8] sm:$0xff]   ;;  %v3904_v61 = vld [vmem:[%s5080_s1 + $0x130] sm:$0xff]  }
  0x1f   : > { %3239 = vmatpush3.bf16.msra.mxu1 %v3808_v19  ;;  %v3857_v58 = vld [vmem:[%s4217_s10 + $0x1b4] ss:$36 sps:$4 sm:$0xff]   ;;  %v3860_v0 = vld [vmem:[%s4217_s10 + $0x1bc] ss:$36 sps:$4 sm:$0xff]   ;;  %v3910_v2 = vld [vmem:[%s5080_s1 + $0x168] sm:$0xff]  }
  0x20   : > { %3240 = vmatprep.subr.bf16.mxu1 %v3811_v22  ;;  %v3902_v59 = vld [vmem:[%s5080_s1 + $0x1b8] sm:$0xff]   ;;  %v3905_v62 = vld [vmem:[%s5080_s1 + $0x1f0] sm:$0xff]   ;;  %v3913_v4 = vld [vmem:[%s5080_s1 + $0x128] sm:$0xff]  }
  0x21   : > { %3129 = vmatpush3.bf16.msra.mxu0 %v3810_v21  ;;  %v3856_v63 = vld [vmem:[%s4217_s10 + $0x170] ss:$36 sps:$4 sm:$0xff]   ;;  %v3863_v5 = vld [vmem:[%s4217_s10 + $0x1fc] ss:$36 sps:$4 sm:$0xff]   ;;  %v3915_v7 = vld [vmem:[%s5080_s1 + $0x1e8] sm:$0xff]  }
  0x22   : > { %3130 = vmatprep.subr.bf16.mxu0 %v3813_v24  ;;  %v3908_v1 = vld [vmem:[%s5080_s1 + $0x1b0] sm:$0xff]   ;;  %v3862_v6 = vld [vmem:[%s4217_s10 + $0x1b8] ss:$36 sps:$4 sm:$0xff]   ;;  %v3866_v8 = vld [vmem:[%s4217_s10 + $0x204] ss:$36 sps:$4 sm:$0xff]  }
  0x23   : > { %3241 = vmatpush3.bf16.msra.mxu1 %v3812_v23  ;;  %v3859_v3 = vld [vmem:[%s4217_s10 + $0x1b0] ss:$36 sps:$4 sm:$0xff]   ;;  %v3916_v9 = vld [vmem:[%s5080_s1 + $0x1a8] sm:$0xff]   ;;  %v3917_v10 = vld [vmem:[%s5080_s1 + $0x160] sm:$0xff]  }
  0x24   : > { %3242 = vmatprep.subr.bf16.mxu1 %v3815_v26  ;;  %v3918_v11 = vld [vmem:[%s5080_s1 + $0x120] sm:$0xff]   ;;  %v3865_v13 = vld [vmem:[%s4217_s10 + $0x1f8] ss:$36 sps:$4 sm:$0xff]   ;;  %v3872_v18 = vld [vmem:[%s4217_s10 + $0x24c] ss:$36 sps:$4 sm:$0xff]  }
  0x25   : > { %3131 = vmatpush3.bf16.msra.mxu0 %v3814_v25  ;;  %v3919_v12 = vld [vmem:[%s5080_s1 + $0x1e0] sm:$0xff]   ;;  %v3924_v15 = vld [vmem:[%s5080_s1 + $0x158] sm:$0xff]   ;;  %v3931_v22 = vld [vmem:[%s5080_s1 + $0x150] sm:$0xff]  }
  0x26   : > { %3132 = vmatprep.subr.bf16.mxu0 %v3817_v28  ;;  %v3922_v14 = vld [vmem:[%s5080_s1 + $0x1a0] sm:$0xff]   ;;  %v3927_v19 = vld [vmem:[%s5080_s1 + $0x118] sm:$0xff]   ;;  %v3932_v24 = vld [vmem:[%s5080_s1 + $0x110] sm:$0xff]  }
  0x27   : > { %3243 = vmatpush3.bf16.msra.mxu1 %v3816_v27  ;;  %v3868_v16 = vld [vmem:[%s4217_s10 + $0x200] ss:$36 sps:$4 sm:$0xff]   ;;  %v3929_v20 = vld [vmem:[%s5080_s1 + $0x1d8] sm:$0xff]   ;;  %v3933_v25 = vld [vmem:[%s5080_s1 + $0x1d0] sm:$0xff]  }
  0x28   : > { %3244 = vmatprep.subr.bf16.mxu1 %v3819_v30  ;;  %v3869_v17 = vld [vmem:[%s4217_s10 + $0x244] ss:$36 sps:$4 sm:$0xff]   ;;  %v3930_v21 = vld [vmem:[%s5080_s1 + $0x198] sm:$0xff]   ;;  %v3875_v26 = vld [vmem:[%s4217_s10 + $0x28c] ss:$36 sps:$4 sm:$0xff]  }
  0x29   : > { %3133 = vmatpush3.bf16.msra.mxu0 %v3818_v29  ;;  %v3871_v23 = vld [vmem:[%s4217_s10 + $0x240] ss:$36 sps:$4 sm:$0xff]   ;;  %v3936_v27 = vld [vmem:[%s5080_s1 + $0x190] sm:$0xff]   ;;  %v3874_v28 = vld [vmem:[%s4217_s10 + $0x248] ss:$36 sps:$4 sm:$0xff]  }
  0x2a   : > { %3342 = vmatprep.subr.bf16.mxu0 %v3896_v53  ;;  %v3938_v29 = vld [vmem:[%s5080_s1 + $0x148] sm:$0xff]   ;;  %v3878_v30 = vld [vmem:[%s4217_s10 + $0x294] ss:$36 sps:$4 sm:$0xff]  }
  0x2b   : > { %3245 = vmatpush3.bf16.msra.mxu1 %v3823_v33  ;;  %v3877_v32 = vld [vmem:[%s4217_s10 + $0x288] ss:$36 sps:$4 sm:$0xff]   ;;  %v3911_v53 = vld [vmem:[%s4217_s10 + $0x3b4] ss:$36 sps:$4 sm:$0xff]  }
  0x2c   : > { %1744 = vmatmul.mubr.bf16.vlgmr.msra.gmra.mxu0 %v3820_v31  ;;  %3454 = vmatprep.subr.bf16.mxu1 %v3901_v57  ;;  %v3941_v31 = vld [vmem:[%s5080_s1 + $0x108] sm:$0xff]   ;;  %v3925_v57 = vld [vmem:[%s4217_s10 + $0x3fc] ss:$36 sps:$4 sm:$0xff]  }
  0x2d   : > { %1751 = vmatprep.mubr.bf16.mxu0 %v3827_v36  ;;  %3343 = vmatpush3.bf16.msra.mxu0 %v3899_v55  ;;  %v3943_v33 = vld [vmem:[%s5080_s1 + $0x1c8] sm:$0xff]   ;;  %v3945_v36 = vld [vmem:[%s5080_s1 + $0x140] sm:$0xff]   ;;  %v3920_v55 = vld [vmem:[%s4217_s10 + $0x3f4] ss:$36 sps:$4 sm:$0xff]  }
  0x2e   : > { %1905 = vmatmul.mubr.bf16.vlgmr.msra.gmra.mxu1 %v3824_v34  ;;  %3344 = vmatprep.subr.bf16.mxu0 %v3903_v60  ;;  %v3881_v34 = vld [vmem:[%s4217_s10 + $0x2d4] ss:$36 sps:$4 sm:$0xff]   ;;  %v3944_v35 = vld [vmem:[%s5080_s1 + $0x188] sm:$0xff]   ;;  %v3934_v60 = vld [vmem:[%s4217_s10 + $0x43c] ss:$36 sps:$4 sm:$0xff]  }
  0x2f   : > { %1912 = vmatprep.mubr.bf16.mxu1 %v3830_v37  ;;  %3455 = vmatpush3.bf16.msra.mxu1 %v3902_v59  ;;  %v3946_v37 = vld [vmem:[%s5080_s1 + $0x100] sm:$0xff]   ;;  %v3923_v59 = vld [vmem:[%s4217_s10 + $0x3f0] ss:$36 sps:$4 sm:$0xff]  }
  0x30   : > { %3456 = vmatprep.subr.bf16.mxu1 %v3905_v62  ;;  %v3939_v62 = vld [vmem:[%s4217_s10 + $0x444] ss:$36 sps:$4 sm:$0xff]  }
  0x31   : > { %3345 = vmatpush3.bf16.msra.mxu0 %v3904_v61  ;;  %v3928_v61 = vld [vmem:[%s4217_s10 + $0x3f8] ss:$36 sps:$4 sm:$0xff]  }
  0x32   : > { %3346 = vmatprep.subr.bf16.mxu0 %v3910_v2  ;;  %v3954_v2 = vld [vmem:[%s4217_s10 + $0x1c] ss:$36 sps:$4 sm:$0xff]  }
  0x33   : > { %3457 = vmatpush3.bf16.msra.mxu1 %v3908_v1  ;;  %v3942_v1 = vld [vmem:[%s4217_s10 + $0x440] ss:$36 sps:$4 sm:$0xff]  }
  0x34   : > { %1752 = vmatmul.mubr.bf16.gmra.mxu0 %v3829_v38  ;;  %3458 = vmatprep.subr.bf16.mxu1 %v3915_v7  ;;  %v3947_v38 = vld [vmem:[%s5080_s1 + $0x1c0] sm:$0xff]  }
  0x35   : > { %1759 = vmatprep.mubr.bf16.mxu0 %v3833_v39  ;;  %3347 = vmatpush3.bf16.msra.mxu0 %v3913_v4  ;;  %v3880_v39 = vld [vmem:[%s4217_s10 + $0x290] ss:$36 sps:$4 sm:$0xff]   ;;  %v3955_v4 = vld [vmem:[%s4217_s10 + $0x5c] ss:$36 sps:$4 sm:$0xff]   ;;  %v3958_v7 = vld [vmem:[%s4217_s10 + $0x64] ss:$36 sps:$4 sm:$0xff]  }
  0x36   : > { %1913 = vmatmul.mubr.bf16.gmra.mxu1 %v3832_v40  ;;  %3348 = vmatprep.subr.bf16.mxu0 %v3917_v10  ;;  %v3884_v40 = vld [vmem:[%s4217_s10 + $0x2dc] ss:$36 sps:$4 sm:$0xff]   ;;  %v3961_v10 = vld [vmem:[%s4217_s10 + $0xa4] ss:$36 sps:$4 sm:$0xff]  }
  0x37   : > { %1920 = vmatprep.mubr.bf16.mxu1 %v3836_v41  ;;  %3459 = vmatpush3.bf16.msra.mxu1 %v3916_v9  ;;  %v3951_v41 = vld [vmem:[%s5080_s1 + $0x180] sm:$0xff]   ;;  %v3957_v9 = vld [vmem:[%s4217_s10 + $0x58] ss:$36 sps:$4 sm:$0xff]  }
  0x38   : > { %3460 = vmatprep.subr.bf16.mxu1 %v3919_v12  ;;  %v3960_v12 = vld [vmem:[%s4217_s10 + $0x60] ss:$36 sps:$4 sm:$0xff]  }
  0x39   : > { %3349 = vmatpush3.bf16.msra.mxu0 %v3918_v11  ;;  %v4036_v11 = vld [vmem:[%s5080_s1 + $0x220] sm:$0xff]  }
  0x3a   : > { %3350 = vmatprep.subr.bf16.mxu0 %v3924_v15  ;;  %v3963_v15 = vld [vmem:[%s4217_s10 + $0xa0] ss:$36 sps:$4 sm:$0xff]  }
  0x3b   : > { %3461 = vmatpush3.bf16.msra.mxu1 %v3922_v14  ;;  %v4040_v14 = vld [vmem:[%s5080_s1 + $0x218] sm:$0xff]  }
  0x3c   : > { %1760 = vmatmul.mubr.bf16.gmra.mxu0 %v3835_v42  ;;  %3462 = vmatprep.subr.bf16.mxu1 %v3929_v20  ;;  %v3883_v42 = vld [vmem:[%s4217_s10 + $0x2d0] ss:$36 sps:$4 sm:$0xff]   ;;  %v4048_v20 = vld [vmem:[%s5080_s1 + $0x208] sm:$0xff]  }
  0x3d   : > { %1767 = vmatprep.mubr.bf16.mxu0 %v3839_v43  ;;  %3351 = vmatpush3.bf16.msra.mxu0 %v3927_v19  ;;  %v3887_v43 = vld [vmem:[%s4217_s10 + $0x31c] ss:$36 sps:$4 sm:$0xff]   ;;  %v3970_v19 = vld [vmem:[%s4217_s10 + $0xf4] ss:$36 sps:$4 sm:$0xff]  }
  0x3e   : > { %1921 = vmatmul.mubr.bf16.gmra.mxu1 %v3838_v44  ;;  %3352 = vmatprep.subr.bf16.mxu0 %v3931_v22  ;;  %v3886_v44 = vld [vmem:[%s4217_s10 + $0x2d8] ss:$36 sps:$4 sm:$0xff]  }
  0x3f   : > { %1928 = vmatprep.mubr.bf16.mxu1 %v3842_v45  ;;  %3463 = vmatpush3.bf16.msra.mxu1 %v3930_v21  ;;  %v3890_v45 = vld [vmem:[%s4217_s10 + $0x324] ss:$36 sps:$4 sm:$0xff]   ;;  %v3973_v22 = vld [vmem:[%s4217_s10 + $0x134] ss:$36 sps:$4 sm:$0xff]  }
  0x40   : > { %3464 = vmatprep.subr.bf16.mxu1 %v3933_v25  ;;  %v3969_v21 = vld [vmem:[%s4217_s10 + $0xe8] ss:$36 sps:$4 sm:$0xff]   ;;  %v3976_v25 = vld [vmem:[%s4217_s10 + $0x13c] ss:$36 sps:$4 sm:$0xff]  }
  0x41   : > { %3353 = vmatpush3.bf16.msra.mxu0 %v3932_v24  ;;  %v3972_v24 = vld [vmem:[%s4217_s10 + $0xf0] ss:$36 sps:$4 sm:$0xff]  }
  0x42   : > { %3354 = vmatprep.subr.bf16.mxu0 %v3938_v29  ;;  %v3982_v29 = vld [vmem:[%s4217_s10 + $0x184] ss:$36 sps:$4 sm:$0xff]  }
  0x43   : > { %3465 = vmatpush3.bf16.msra.mxu1 %v3936_v27  ;;  %v3979_v27 = vld [vmem:[%s4217_s10 + $0x17c] ss:$36 sps:$4 sm:$0xff]  }
  0x44   : > { %1768 = vmatmul.mubr.bf16.gmra.mxu0 %v3841_v46  ;;  %3466 = vmatprep.subr.bf16.mxu1 %v3943_v33  ;;  %v3889_v46 = vld [vmem:[%s4217_s10 + $0x318] ss:$36 sps:$4 sm:$0xff]   ;;  %v3988_v33 = vld [vmem:[%s4217_s10 + $0x1cc] ss:$36 sps:$4 sm:$0xff]  }
  0x45   : > { %1775 = vmatprep.mubr.bf16.mxu0 %v3845_v47  ;;  %3355 = vmatpush3.bf16.msra.mxu0 %v3941_v31  ;;  %v3893_v47 = vld [vmem:[%s4217_s10 + $0x364] ss:$36 sps:$4 sm:$0xff]  }
  0x46   : > { %1929 = vmatmul.mubr.bf16.gmra.mxu1 %v3844_v48  ;;  %3356 = vmatprep.subr.bf16.mxu0 %v3945_v36  ;;  %v3892_v48 = vld [vmem:[%s4217_s10 + $0x320] ss:$36 sps:$4 sm:$0xff]   ;;  %v3990_v36 = vld [vmem:[%s4217_s10 + $0x1c8] ss:$36 sps:$4 sm:$0xff]  }
  0x47   : > { %1936 = vmatprep.mubr.bf16.mxu1 %v3848_v49  ;;  %3467 = vmatpush3.bf16.msra.mxu1 %v3944_v35  ;;  %v3897_v49 = vld [vmem:[%s4217_s10 + $0x36c] ss:$36 sps:$4 sm:$0xff]   ;;  %v3985_v31 = vld [vmem:[%s4217_s10 + $0x1c4] ss:$36 sps:$4 sm:$0xff]  }
  0x48   : > { %3468 = vmatprep.subr.bf16.mxu1 %v3947_v38  ;;  %v3991_v35 = vld [vmem:[%s4217_s10 + $0x20c] ss:$36 sps:$4 sm:$0xff]  }
  0x49   : > { %3357 = vmatpush3.bf16.msra.mxu0 %v3946_v37  ;;  %v3994_v37 = vld [vmem:[%s4217_s10 + $0x214] ss:$36 sps:$4 sm:$0xff]   ;;  %v3993_v38 = vld [vmem:[%s4217_s10 + $0x208] ss:$36 sps:$4 sm:$0xff]  }
  0x4b   : > { %3469 = vmatpush3.bf16.msra.mxu1 %v3951_v41  ;;  %v4000_v41 = vld [vmem:[%s4217_s10 + $0x25c] ss:$36 sps:$4 sm:$0xff]  }
  0x4c   : > { %1776 = vmatmul.mubr.bf16.gmra.mxu0 %v3847_v50  ;;  %v3895_v50 = vld [vmem:[%s4217_s10 + $0x360] ss:$36 sps:$4 sm:$0xff]  }
  0x4d   : > { %1783 = vmatprep.mubr.bf16.mxu0 %v3851_v51  ;;  %v3906_v51 = vld [vmem:[%s4217_s10 + $0x3ac] ss:$36 sps:$4 sm:$0xff]  }
  0x4e   : > { %1937 = vmatmul.mubr.bf16.gmra.mxu1 %v3850_v52  ;;  %v3900_v52 = vld [vmem:[%s4217_s10 + $0x368] ss:$36 sps:$4 sm:$0xff]  }
  0x4f   : > { %1944 = vmatprep.mubr.bf16.mxu1 %v3854_v54  ;;  %v3909_v54 = vld [vmem:[%s4217_s10 + $0x3a8] ss:$36 sps:$4 sm:$0xff]  }
  0x54   : > { %1784 = vmatmul.mubr.bf16.gmra.mxu0 %v3853_v56  ;;  %v3914_v56 = vld [vmem:[%s4217_s10 + $0x3b0] ss:$36 sps:$4 sm:$0xff]  }
  0x55   : > { %1791 = vmatprep.mubr.bf16.mxu0 %v3857_v58  ;;  %v4024_v58 = vld [vmem:[%s5080_s1 + $0x238] sm:$0xff]  }
  0x56   : > { %1945 = vmatmul.mubr.bf16.gmra.mxu1 %v3856_v63  ;;  %3659 = vmatprep.subr.bf16.mxu0 %v4024_v58  ;;  %v3937_v63 = vld [vmem:[%s4217_s10 + $0x438] ss:$36 sps:$4 sm:$0xff]  }
  0x57   : > { %1952 = vmatprep.mubr.bf16.mxu1 %v3860_v0  ;;  %v3950_v0 = vld [vmem:[%s4217_s10 + $0x14] ss:$36 sps:$4 sm:$0xff]  }
  0x5c   : > { %1792 = vmatmul.mubr.bf16.gmra.mxu0 %v3859_v3  ;;  %v3948_v3 = vld [vmem:[%s4217_s10 + $0x10] ss:$36 sps:$4 sm:$0xff]  }
  0x5d   : > { %1799 = vmatprep.mubr.bf16.mxu0 %v3863_v5  ;;  %v3952_v5 = vld [vmem:[%s4217_s10 + $0x18] ss:$36 sps:$4 sm:$0xff]  }
  0x5e   : > { %1953 = vmatmul.mubr.bf16.gmra.mxu1 %v3862_v6  ;;  %v4028_v6 = vld [vmem:[%s5080_s1 + $0x230] sm:$0xff]  }
  0x5f   : > { %1960 = vmatprep.mubr.bf16.mxu1 %v3866_v8  ;;  %v4032_v8 = vld [vmem:[%s5080_s1 + $0x228] sm:$0xff]  }
  0x64   : > { %1800 = vmatmul.mubr.bf16.gmra.mxu0 %v3865_v13  ;;  %v3964_v13 = vld [vmem:[%s4217_s10 + $0xac] ss:$36 sps:$4 sm:$0xff]  }
  0x65   : > { %1807 = vmatprep.mubr.bf16.mxu0 %v3869_v17  ;;  %v4044_v17 = vld [vmem:[%s5080_s1 + $0x210] sm:$0xff]  }
  0x66   : > { %1961 = vmatmul.mubr.bf16.gmra.mxu1 %v3868_v16  ;;  %v3967_v16 = vld [vmem:[%s4217_s10 + $0xec] ss:$36 sps:$4 sm:$0xff]  }
  0x67   : > { %1968 = vmatprep.mubr.bf16.mxu1 %v3872_v18  ;;  %v3966_v18 = vld [vmem:[%s4217_s10 + $0xa8] ss:$36 sps:$4 sm:$0xff]  }
  0x6c   : > { %1808 = vmatmul.mubr.bf16.gmra.mxu0 %v3871_v23  ;;  %v4052_v23 = vld [vmem:[%s5080_s1 + $0x200] sm:$0xff]  }
  0x6d   : > { %1815 = vmatprep.mubr.bf16.mxu0 %v3875_v26  ;;  %v3975_v26 = vld [vmem:[%s4217_s10 + $0x130] ss:$36 sps:$4 sm:$0xff]  }
  0x6e   : > { %1969 = vmatmul.mubr.bf16.gmra.mxu1 %v3874_v28  ;;  %v3978_v28 = vld [vmem:[%s4217_s10 + $0x138] ss:$36 sps:$4 sm:$0xff]  }
  0x6f   : > { %1976 = vmatprep.mubr.bf16.mxu1 %v3878_v30  ;;  %v3981_v30 = vld [vmem:[%s4217_s10 + $0x178] ss:$36 sps:$4 sm:$0xff]  }
  0x74   : > { %1816 = vmatmul.mubr.bf16.gmra.mxu0 %v3877_v32  ;;  %v3984_v32 = vld [vmem:[%s4217_s10 + $0x180] ss:$36 sps:$4 sm:$0xff]  }
  0x75   : > { %1823 = vmatprep.mubr.bf16.mxu0 %v3881_v34  ;;  %v3987_v34 = vld [vmem:[%s4217_s10 + $0x1c0] ss:$36 sps:$4 sm:$0xff]  }
  0x76   : > { %1977 = vmatmul.mubr.bf16.gmra.mxu1 %v3880_v39  ;;  %v3997_v39 = vld [vmem:[%s4217_s10 + $0x254] ss:$36 sps:$4 sm:$0xff]  }
  0x77   : > { %1984 = vmatprep.mubr.bf16.mxu1 %v3884_v40  ;;  %v3996_v40 = vld [vmem:[%s4217_s10 + $0x210] ss:$36 sps:$4 sm:$0xff]  }
  0x7c   : > { %1824 = vmatmul.mubr.bf16.gmra.mxu0 %v3883_v42  ;;  %v3999_v42 = vld [vmem:[%s4217_s10 + $0x250] ss:$36 sps:$4 sm:$0xff]  }
  0x7d   : > { %1831 = vmatprep.mubr.bf16.mxu0 %v3887_v43  ;;  %v4003_v43 = vld [vmem:[%s4217_s10 + $0x29c] ss:$36 sps:$4 sm:$0xff]  }
  0x7e   : > { %1985 = vmatmul.mubr.bf16.gmra.mxu1 %v3886_v44  ;;  %v4002_v44 = vld [vmem:[%s4217_s10 + $0x258] ss:$36 sps:$4 sm:$0xff]  }
  0x7f   : > { %1992 = vmatprep.mubr.bf16.mxu1 %v3890_v45 }
  0x84   : > { %1832 = vmatmul.mubr.bf16.gmra.mxu0 %v3889_v46  ;;  %v4006_v46 = vld [vmem:[%s4217_s10 + $0x2a4] ss:$36 sps:$4 sm:$0xff]  }
  0x85   : > { %1839 = vmatprep.mubr.bf16.mxu0 %v3893_v47  ;;  %v4453_v47 = vld [vmem:[%s5081_s2] ss:$0 sm:$0xff] }
  0x86   : > { %1993 = vmatmul.mubr.bf16.gmra.mxu1 %v3892_v48 }
  0x87   : > { %2000 = vmatprep.mubr.bf16.mxu1 %v3897_v49 }
  0x8c   : > { %1840 = vmatmul.mubr.bf16.gmra.mxu0 %v3895_v50 }
  0x8d   : > { %1847 = vmatprep.mubr.bf16.mxu0 %v3906_v51 }
  0x8e   : > { %2001 = vmatmul.mubr.bf16.gmra.mxu1 %v3900_v52  ;;  %v4005_v52 = vld [vmem:[%s4217_s10 + $0x298] ss:$36 sps:$4 sm:$0xff]  }
  0x8f   : > { %2008 = vmatprep.mubr.bf16.mxu1 %v3911_v53 }
  0x94   : > { %1848 = vmatmul.mubr.bf16.gmra.mxu0 %v3909_v54 }
  0x95   : > { %1855 = vmatprep.mubr.bf16.mxu0 %v3920_v55  ;;  %v4009_v55 = vld [vmem:[%s4217_s10 + $0x2e4] ss:$36 sps:$4 sm:$0xff]  }
  0x96   : > { %2009 = vmatmul.mubr.bf16.gmra.mxu1 %v3914_v56 }
  0x97   : > { %2016 = vmatprep.mubr.bf16.mxu1 %v3925_v57 }
  0x9c   : > { %1856 = vmatmul.mubr.bf16.gmra.mxu0 %v3923_v59 }
  0x9d   : > { %1863 = vmatprep.mubr.bf16.mxu0 %v3934_v60  ;;  %v4008_v60 = vld [vmem:[%s4217_s10 + $0x2a0] ss:$36 sps:$4 sm:$0xff]  }
  0x9e   : > { %2017 = vmatmul.mubr.bf16.gmra.mxu1 %v3928_v61 }
  0x9f   : > { %2024 = vmatprep.mubr.bf16.mxu1 %v3939_v62 }
  0xa4   : > { %1864 = vmatmul.mubr.bf16.gmra.mxu0 %v3937_v63  ;;  %v4012_v63 = vld [vmem:[%s4217_s10 + $0x2ec] ss:$36 sps:$4 sm:$0xff]  }
  0xa5   : > { %2065 = vmatprep.mubr.bf16.mxu0 %v3950_v0 }
  0xa6   : > { %2025 = vmatmul.mubr.bf16.gmra.mxu1 %v3942_v1 }
  0xa7   : > { %2226 = vmatprep.mubr.bf16.mxu1 %v3954_v2 }
  0xac   : > { %2066 = vmatmul.mubr.bf16.vlgmr.msra.gmra.mxu0 %v3948_v3 }
  0xad   : > { %2073 = vmatprep.mubr.bf16.mxu0 %v3955_v4  ;;  %3660 = vmatpush3.bf16.msra.mxu0 %v4024_v58 }
  0xae   : > { %3661 = vmatprep.subr.bf16.mxu0 %v4028_v6  ;;  %2227 = vmatmul.mubr.bf16.vlgmr.msra.gmra.mxu1 %v3952_v5 }
  0xaf   : > { %2234 = vmatprep.mubr.bf16.mxu1 %v3958_v7 }
  0xb1   : > { %3662 = vmatpush3.bf16.msra.mxu0 %v4028_v6 }
  0xb2   : > { %3663 = vmatprep.subr.bf16.mxu0 %v4032_v8 }
  0xb4   : > { %2074 = vmatmul.mubr.bf16.gmra.mxu0 %v3957_v9 }
  0xb5   : > { %2081 = vmatprep.mubr.bf16.mxu0 %v3961_v10  ;;  %3664 = vmatpush3.bf16.msra.mxu0 %v4032_v8  ;;  %v4011_v8 = vld [vmem:[%s4217_s10 + $0x2e0] ss:$36 sps:$4 sm:$0xff]  }
  0xb6   : > { %3665 = vmatprep.subr.bf16.mxu0 %v4036_v11  ;;  %2235 = vmatmul.mubr.bf16.gmra.mxu1 %v3960_v12 }
  0xb7   : > { %2242 = vmatprep.mubr.bf16.mxu1 %v3964_v13 }
  0xb9   : > { %3666 = vmatpush3.bf16.msra.mxu0 %v4036_v11  ;;  %v4015_v11 = vld [vmem:[%s4217_s10 + $0x32c] ss:$36 sps:$4 sm:$0xff]  }
  0xba   : > { %3667 = vmatprep.subr.bf16.mxu0 %v4040_v14 }
  0xbc   : > { %2082 = vmatmul.mubr.bf16.gmra.mxu0 %v3963_v15 }
  0xbd   : > { %2089 = vmatprep.mubr.bf16.mxu0 %v3967_v16  ;;  %3668 = vmatpush3.bf16.msra.mxu0 %v4040_v14  ;;  %v4014_v16 = vld [vmem:[%s4217_s10 + $0x2e8] ss:$36 sps:$4 sm:$0xff]  }
  0xbe   : > { %3669 = vmatprep.subr.bf16.mxu0 %v4044_v17  ;;  %2243 = vmatmul.mubr.bf16.gmra.mxu1 %v3966_v18 }
  0xbf   : > { %2250 = vmatprep.mubr.bf16.mxu1 %v3970_v19  ;;  %v4018_v19 = vld [vmem:[%s4217_s10 + $0x334] ss:$36 sps:$4 sm:$0xff]  }
  0xc1   : > { %3670 = vmatpush3.bf16.msra.mxu0 %v4044_v17 }
  0xc2   : > { %3671 = vmatprep.subr.bf16.mxu0 %v4048_v20 }
  0xc4   : > { %2090 = vmatmul.mubr.bf16.gmra.mxu0 %v3969_v21 }
  0xc5   : > { %2097 = vmatprep.mubr.bf16.mxu0 %v3973_v22  ;;  %3672 = vmatpush3.bf16.msra.mxu0 %v4048_v20 }
  0xc6   : > { %3673 = vmatprep.subr.bf16.mxu0 %v4052_v23  ;;  %2251 = vmatmul.mubr.bf16.gmra.mxu1 %v3972_v24 }
  0xc7   : > { %2258 = vmatprep.mubr.bf16.mxu1 %v3976_v25 }
  0xc9   : > { %3674 = vmatpush3.bf16.msra.mxu0 %v4052_v23 }
  0xcc   : > { %2098 = vmatmul.mubr.bf16.gmra.mxu0 %v3975_v26 }
  0xcd   : > { %2105 = vmatprep.mubr.bf16.mxu0 %v3979_v27 }
  0xce   : > { %2259 = vmatmul.mubr.bf16.gmra.mxu1 %v3978_v28  ;;  %v4017_v28 = vld [vmem:[%s4217_s10 + $0x328] ss:$36 sps:$4 sm:$0xff]  }
  0xcf   : > { %2266 = vmatprep.mubr.bf16.mxu1 %v3982_v29 }
  0xd4   : > { %2106 = vmatmul.mubr.bf16.gmra.mxu0 %v3981_v30 }
  0xd5   : > { %2113 = vmatprep.mubr.bf16.mxu0 %v3985_v31  ;;  %v4023_v31 = vld [vmem:[%s4217_s10 + $0x374] ss:$36 sps:$4 sm:$0xff]  }
  0xd6   : > { %2267 = vmatmul.mubr.bf16.gmra.mxu1 %v3984_v32 }
  0xd7   : > { %2274 = vmatprep.mubr.bf16.mxu1 %v3988_v33 }
  0xdc   : > { %2114 = vmatmul.mubr.bf16.gmra.mxu0 %v3987_v34 }
  0xdd   : > { %2121 = vmatprep.mubr.bf16.mxu0 %v3991_v35 }
  0xde   : > { %2275 = vmatmul.mubr.bf16.gmra.mxu1 %v3990_v36  ;;  %v4020_v36 = vld [vmem:[%s4217_s10 + $0x330] ss:$36 sps:$4 sm:$0xff]  }
  0xdf   : > { %2282 = vmatprep.mubr.bf16.mxu1 %v3994_v37 }
  0xe4   : > { %2122 = vmatmul.mubr.bf16.gmra.mxu0 %v3993_v38 }
  0xe5   : > { %2129 = vmatprep.mubr.bf16.mxu0 %v3997_v39  ;;  %v4027_v39 = vld [vmem:[%s4217_s10 + $0x37c] ss:$36 sps:$4 sm:$0xff]  }
  0xe6   : > { %2283 = vmatmul.mubr.bf16.gmra.mxu1 %v3996_v40 }
  0xe7   : > { %2290 = vmatprep.mubr.bf16.mxu1 %v4000_v41 }
  0xec   : > { %v3134_v45 = vpop.f32.mrf.mxu0  ;;  %2130 = vmatmul.mubr.bf16.gmra.mxu0 %v3999_v42 }
  0xed   : > { %2137 = vmatprep.mubr.bf16.mxu0 %v4003_v43 }
  0xee   : > { %v3135_v48 = vpop.f32.mrf.mxu0  ;;  %v3246_v50 = vpop.f32.mrf.mxu1  ;;  %2291 = vmatmul.mubr.bf16.gmra.mxu1 %v4002_v44 }
  0xef   : > { %v3136_v49 = vadd.f32 %v3135_v48, %v3134_v45  ;;  %2298 = vmatprep.mubr.bf16.mxu1 %v4006_v46 }
  0xf0   : > { %v3137_v51 = vpop.f32.mrf.mxu0  ;;  %v3247_v54 = vpop.f32.mrf.mxu1 }
  0xf1   : > { %v1746_v53 = vadd.f32 %v3136_v49, %v4453_v47  ;;  %v3248_v56 = vadd.f32 %v3247_v54, %v3246_v50  ;;  %v4021_v49 = vld [vmem:[%s4217_s10 + $0x370] ss:$36 sps:$4 sm:$0xff]  }
  0xf2   : > { %v3138_v57 = vpop.f32.mrf.mxu0  ;;  %v3249_v59 = vpop.f32.mrf.mxu1 }
  0xf3   : > { %v3139_v58 = vadd.f32 %v3138_v57, %v3137_v51  ;;  %v4459_v61 = vadd.f32 %v3248_v56, %v1746_v53  ;;  %v4025_v57 = vld [vmem:[%s4217_s10 + $0x378] ss:$36 sps:$4 sm:$0xff]  }
  0xf4   : > { %v3140_v62 = vpop.f32.mrf.mxu0  ;;  %2138 = vmatmul.mubr.bf16.gmra.mxu0 %v4005_v52  ;;  %v3250_v1 = vpop.f32.mrf.mxu1  ;;  %v4031_v52 = vld [vmem:[%s4217_s10 + $0x3bc] ss:$36 sps:$4 sm:$0xff]  }
  0xf5   : > { %v1749_v0 = vadd.f32 %v3139_v58, %v4453_v47  ;;  %2145 = vmatprep.mubr.bf16.mxu0 %v4009_v55  ;;  %v3251_v2 = vadd.f32 %v3250_v1, %v3249_v59 }
  0xf6   : > { %v3141_v3 = vpop.f32.mrf.mxu0  ;;  %v3252_v5 = vpop.f32.mrf.mxu1  ;;  %2299 = vmatmul.mubr.bf16.gmra.mxu1 %v4008_v60  ;;  %v4035_v60 = vld [vmem:[%s4217_s10 + $0x3c4] ss:$36 sps:$4 sm:$0xff]  }
  0xf7   : > { %v3142_v4 = vadd.f32 %v3141_v3, %v3140_v62  ;;  %v4463_v6 = vadd.f32 %v3251_v2, %v1749_v0  ;;  %2306 = vmatprep.mubr.bf16.mxu1 %v4012_v63 }
  0xf8   : > { %v3143_v7 = vpop.f32.mrf.mxu0  ;;  %v3253_v10 = vpop.f32.mrf.mxu1 }
  0xf9   : > { %v1754_v9 = vadd.f32 %v3142_v4, %v4453_v47  ;;  %v3254_v12 = vadd.f32 %v3253_v10, %v3252_v5  ;;  %v4039_v10 = vld [vmem:[%s4217_s10 + $0x404] ss:$36 sps:$4 sm:$0xff]  }
  0xfa   : > { %v3144_v13 = vpop.f32.mrf.mxu0  ;;  %v3255_v15 = vpop.f32.mrf.mxu1 }
  0xfb   : > { %v3145_v14 = vadd.f32 %v3144_v13, %v3143_v7  ;;  %v4469_v17 = vadd.f32 %v3254_v12, %v1754_v9  ;;  %v4029_v7 = vld [vmem:[%s4217_s10 + $0x3b8] ss:$36 sps:$4 sm:$0xff]  }
  0xfc   : > { %v3146_v18 = vpop.f32.mrf.mxu0  ;;  %2146 = vmatmul.mubr.bf16.gmra.mxu0 %v4011_v8  ;;  %v3256_v21 = vpop.f32.mrf.mxu1 }
  0xfd   : > { %v1757_v20 = vadd.f32 %v3145_v14, %v4453_v47  ;;  %2153 = vmatprep.mubr.bf16.mxu0 %v4015_v11  ;;  %v3257_v22 = vadd.f32 %v3256_v21, %v3255_v15  ;;  %v4033_v15 = vld [vmem:[%s4217_s10 + $0x3c0] ss:$36 sps:$4 sm:$0xff]  }
  0xfe   : > { %v3147_v23 = vpop.f32.mrf.mxu0  ;;  %v3258_v25 = vpop.f32.mrf.mxu1  ;;  %2307 = vmatmul.mubr.bf16.gmra.mxu1 %v4014_v16 }
  0xff   : > { %v3148_v24 = vadd.f32 %v3147_v23, %v3146_v18  ;;  %v4473_v26 = vadd.f32 %v3257_v22, %v1757_v20  ;;  %2314 = vmatprep.mubr.bf16.mxu1 %v4018_v19  ;;  %v4043_v19 = vld [vmem:[%s4217_s10 + $0x40c] ss:$36 sps:$4 sm:$0xff]  }
 0x100   : > { %v3149_v27 = vpop.f32.mrf.mxu0  ;;  %v3259_v30 = vpop.f32.mrf.mxu1 }
 0x101   : > { %v1762_v29 = vadd.f32 %v3148_v24, %v4453_v47  ;;  %v3260_v32 = vadd.f32 %v3259_v30, %v3258_v25 }
 0x102   : > { %v3150_v33 = vpop.f32.mrf.mxu0  ;;  %v3261_v35 = vpop.f32.mrf.mxu1 }
 0x103   : > { %v3151_v34 = vadd.f32 %v3150_v33, %v3149_v27  ;;  %v4479_v37 = vadd.f32 %v3260_v32, %v1762_v29  ;;  %v4037_v29 = vld [vmem:[%s4217_s10 + $0x400] ss:$36 sps:$4 sm:$0xff]   ;;  %v4047_v32 = vld [vmem:[%s4217_s10 + $0x44c] ss:$36 sps:$4 sm:$0xff]  }
 0x104   : > { %v3152_v38 = vpop.f32.mrf.mxu0  ;;  %2154 = vmatmul.mubr.bf16.gmra.mxu0 %v4017_v28  ;;  %v3262_v41 = vpop.f32.mrf.mxu1 }
 0x105   : > { %v1765_v40 = vadd.f32 %v3151_v34, %v4453_v47  ;;  %2161 = vmatprep.mubr.bf16.mxu0 %v4023_v31  ;;  %v3263_v42 = vadd.f32 %v3262_v41, %v3261_v35  ;;  %v4051_v41 = vld [vmem:[%s4217_s10 + $0x454] ss:$36 sps:$4 sm:$0xff]  }
 0x106   : > { %v3153_v43 = vpop.f32.mrf.mxu0  ;;  %v3264_v45 = vpop.f32.mrf.mxu1  ;;  %2315 = vmatmul.mubr.bf16.gmra.mxu1 %v4020_v36 }
 0x107   : > { %v3154_v44 = vadd.f32 %v3153_v43, %v3152_v38  ;;  %v4483_v46 = vadd.f32 %v3263_v42, %v1765_v40  ;;  %2322 = vmatprep.mubr.bf16.mxu1 %v4027_v39  ;;  %v4041_v38 = vld [vmem:[%s4217_s10 + $0x408] ss:$36 sps:$4 sm:$0xff]  }
 0x108   : > { %v3155_v48 = vpop.f32.mrf.mxu0  ;;  %v3265_v51 = vpop.f32.mrf.mxu1 }
 0x109   : > { %v1770_v50 = vadd.f32 %v3154_v44, %v4453_v47  ;;  %v3266_v53 = vadd.f32 %v3265_v51, %v3264_v45 }
 0x10a   : > { %v3156_v54 = vpop.f32.mrf.mxu0  ;;  %v3267_v56 = vpop.f32.mrf.mxu1 }
 0x10b   : > { %v3157_v55 = vadd.f32 %v3156_v54, %v3155_v48  ;;  %v4489_v58 = vadd.f32 %v3266_v53, %v1770_v50 }
 0x10c   : > { %v3158_v59 = vpop.f32.mrf.mxu0  ;;  %2162 = vmatmul.mubr.bf16.gmra.mxu0 %v4021_v49  ;;  %v3268_v63 = vpop.f32.mrf.mxu1 }
 0x10d   : > { %v1773_v62 = vadd.f32 %v3157_v55, %v4453_v47  ;;  %2169 = vmatprep.mubr.bf16.mxu0 %v4031_v52  ;;  %v3269_v0 = vadd.f32 %v3268_v63, %v3267_v56  ;;  %v4045_v52 = vld [vmem:[%s4217_s10 + $0x448] ss:$36 sps:$4 sm:$0xff]   ;;  %v4053_v55 = vld [vmem:[%s4217_s10 + $0x20] ss:$36 sps:$4 sm:$0xff]  }
 0x10e   : > { %v3159_v1 = vpop.f32.mrf.mxu0  ;;  %v3270_v3 = vpop.f32.mrf.mxu1  ;;  %2323 = vmatmul.mubr.bf16.gmra.mxu1 %v4025_v57 }
 0x10f   : > { %v3160_v2 = vadd.f32 %v3159_v1, %v3158_v59  ;;  %v4493_v4 = vadd.f32 %v3269_v0, %v1773_v62  ;;  %2330 = vmatprep.mubr.bf16.mxu1 %v4035_v60  ;;  %v4049_v62 = vld [vmem:[%s4217_s10 + $0x450] ss:$36 sps:$4 sm:$0xff]  }
 0x110   : > { %v3161_v5 = vpop.f32.mrf.mxu0  ;;  %v3271_v9 = vpop.f32.mrf.mxu1 }
 0x111   : > { %v1778_v8 = vadd.f32 %v3160_v2, %v4453_v47  ;;  %v3272_v11 = vadd.f32 %v3271_v9, %v3270_v3 }
 0x112   : > { %v3162_v12 = vpop.f32.mrf.mxu0  ;;  %v3273_v14 = vpop.f32.mrf.mxu1 }
 0x113   : > { %v3163_v13 = vadd.f32 %v3162_v12, %v3161_v5  ;;  %v4499_v16 = vadd.f32 %v3272_v11, %v1778_v8  ;;  %v4054_v11 = vld [vmem:[%s4217_s10 + $0x68] ss:$36 sps:$4 sm:$0xff]  }
 0x114   : > { %v3164_v18 = vpop.f32.mrf.mxu0  ;;  %2170 = vmatmul.mubr.bf16.gmra.mxu0 %v4029_v7  ;;  %v3274_v21 = vpop.f32.mrf.mxu1 }
 0x115   : > { %v1781_v20 = vadd.f32 %v3163_v13, %v4453_v47  ;;  %2177 = vmatprep.mubr.bf16.mxu0 %v4039_v10  ;;  %v3275_v22 = vadd.f32 %v3274_v21, %v3273_v14  ;;  %v4055_v14 = vld [vmem:[%s4217_s10 + $0xb0] ss:$36 sps:$4 sm:$0xff]  }
 0x116   : > { %v3165_v23 = vpop.f32.mrf.mxu0  ;;  %v3276_v25 = vpop.f32.mrf.mxu1  ;;  %2331 = vmatmul.mubr.bf16.gmra.mxu1 %v4033_v15 }
 0x117   : > { %v3166_v24 = vadd.f32 %v3165_v23, %v3164_v18  ;;  %v4503_v27 = vadd.f32 %v3275_v22, %v1781_v20  ;;  %2338 = vmatprep.mubr.bf16.mxu1 %v4043_v19 }
 0x118   : > { %v3167_v28 = vpop.f32.mrf.mxu0  ;;  %v3277_v31 = vpop.f32.mrf.mxu1 }
 0x119   : > { %v1786_v30 = vadd.f32 %v3166_v24, %v4453_v47  ;;  %v3278_v33 = vadd.f32 %v3277_v31, %v3276_v25 }
 0x11a   : > { %v3168_v34 = vpop.f32.mrf.mxu0  ;;  %v3279_v36 = vpop.f32.mrf.mxu1 }
 0x11b   : > { %v3169_v35 = vadd.f32 %v3168_v34, %v3167_v28  ;;  %v4509_v39 = vadd.f32 %v3278_v33, %v1786_v30  ;;  %v4056_v33 = vld [vmem:[%s4217_s10 + $0xf8] ss:$36 sps:$4 sm:$0xff]  }
 0x11c   : > { %v3170_v40 = vpop.f32.mrf.mxu0  ;;  %2178 = vmatmul.mubr.bf16.gmra.mxu0 %v4037_v29  ;;  %v3280_v43 = vpop.f32.mrf.mxu1 }
 0x11d   : > { %v1789_v42 = vadd.f32 %v3169_v35, %v4453_v47  ;;  %2185 = vmatprep.mubr.bf16.mxu0 %v4047_v32  ;;  %v3281_v44 = vadd.f32 %v3280_v43, %v3279_v36  ;;  %v4057_v36 = vld [vmem:[%s4217_s10 + $0x140] ss:$36 sps:$4 sm:$0xff]  }
 0x11e   : > { %v3171_v45 = vpop.f32.mrf.mxu0  ;;  %v3282_v49 = vpop.f32.mrf.mxu1  ;;  %2339 = vmatmul.mubr.bf16.gmra.mxu1 %v4041_v38 }
 0x11f   : > { %v3172_v48 = vadd.f32 %v3171_v45, %v3170_v40  ;;  %v4513_v50 = vadd.f32 %v3281_v44, %v1789_v42  ;;  %2346 = vmatprep.mubr.bf16.mxu1 %v4051_v41 }
 0x120   : > { %v3173_v51 = vpop.f32.mrf.mxu0  ;;  %v3283_v54 = vpop.f32.mrf.mxu1 }
 0x121   : > { %v1794_v53 = vadd.f32 %v3172_v48, %v4453_v47  ;;  %v3284_v56 = vadd.f32 %v3283_v54, %v3282_v49 }
 0x122   : > { %v3174_v57 = vpop.f32.mrf.mxu0  ;;  %v3285_v60 = vpop.f32.mrf.mxu1 }
 0x123   : > { %v3175_v59 = vadd.f32 %v3174_v57, %v3173_v51  ;;  %v4519_v63 = vadd.f32 %v3284_v56, %v1794_v53  ;;  %v4058_v56 = vld [vmem:[%s4217_s10 + $0x188] ss:$36 sps:$4 sm:$0xff]  }
 0x124   : > { %v3176_v0 = vpop.f32.mrf.mxu0  ;;  %2186 = vmatmul.mubr.bf16.gmra.mxu0 %v4045_v52  ;;  %v3286_v2 = vpop.f32.mrf.mxu1 }
 0x125   : > { %v1797_v1 = vadd.f32 %v3175_v59, %v4453_v47  ;;  %3675 = vmatprep.mubr.bf16.mxu0 %v4053_v55  ;;  %v3287_v3 = vadd.f32 %v3286_v2, %v3285_v60  ;;  %v4059_v60 = vld [vmem:[%s4217_s10 + $0x1d0] ss:$36 sps:$4 sm:$0xff]  }
 0x126   : > { %v3177_v5 = vpop.f32.mrf.mxu0  ;;  %v3288_v8 = vpop.f32.mrf.mxu1  ;;  %2347 = vmatmul.mubr.bf16.gmra.mxu1 %v4049_v62 }
 0x127   : > { %v3178_v7 = vadd.f32 %v3177_v5, %v3176_v0  ;;  %v4522_v9 = vadd.f32 %v3287_v3, %v1797_v1 }
 0x128   : > { %v3179_v10 = vpop.f32.mrf.mxu0  ;;  %v3289_v13 = vpop.f32.mrf.mxu1 }
 0x129   : > { %v1802_v12 = vadd.f32 %v3178_v7, %v4453_v47  ;;  %v3290_v15 = vadd.f32 %v3289_v13, %v3288_v8 }
 0x12a   : > { %v3180_v18 = vpop.f32.mrf.mxu0  ;;  %v3291_v20 = vpop.f32.mrf.mxu1 }
 0x12b   : > { %v3181_v19 = vadd.f32 %v3180_v18, %v3179_v10  ;;  %v4527_v21 = vadd.f32 %v3290_v15, %v1802_v12  ;;  %v4060_v18 = vld [vmem:[%s4217_s10 + $0x218] ss:$36 sps:$4 sm:$0xff]  }
 0x12c   : > { %v3182_v22 = vpop.f32.mrf.mxu0  ;;  %3676 = vmatmul.mubr.bf16.vlgmr.msra.gmra.mxu0 %v4054_v11  ;;  %v3292_v24 = vpop.f32.mrf.mxu1 }
 0x12d   : > { %v1805_v23 = vadd.f32 %v3181_v19, %v4453_v47  ;;  %3679 = vmatprep.mubr.bf16.mxu0 %v4055_v14  ;;  %v3293_v25 = vadd.f32 %v3292_v24, %v3291_v20 }
 0x12e   : > { %v3183_v28 = vpop.f32.mrf.mxu0  ;;  %v3294_v30 = vpop.f32.mrf.mxu1 }
 0x12f   : > { %v3184_v29 = vadd.f32 %v3183_v28, %v3182_v22  ;;  %v4530_v31 = vadd.f32 %v3293_v25, %v1805_v23  ;;  %v4061_v22 = vld [vmem:[%s4217_s10 + $0x260] ss:$36 sps:$4 sm:$0xff]  }
 0x130   : > { %v3185_v32 = vpop.f32.mrf.mxu0  ;;  %v3295_v35 = vpop.f32.mrf.mxu1 }
 0x131   : > { %v1810_v34 = vadd.f32 %v3184_v29, %v4453_v47  ;;  %v3296_v38 = vadd.f32 %v3295_v35, %v3294_v30 }
 0x132   : > { %v3186_v40 = vpop.f32.mrf.mxu0  ;;  %v3297_v42 = vpop.f32.mrf.mxu1 }
 0x133   : > { %v3187_v41 = vadd.f32 %v3186_v40, %v3185_v32  ;;  %v4535_v43 = vadd.f32 %v3296_v38, %v1810_v34 }
 0x134   : > { %v3188_v44 = vpop.f32.mrf.mxu0  ;;  %3680 = vmatmul.mubr.bf16.gmra.mxu0 %v4056_v33  ;;  %v3298_v48 = vpop.f32.mrf.mxu1 }
 0x135   : > { %v1813_v45 = vadd.f32 %v3187_v41, %v4453_v47  ;;  %3683 = vmatprep.mubr.bf16.mxu0 %v4057_v36  ;;  %v3299_v49 = vadd.f32 %v3298_v48, %v3297_v42  ;;  %v4062_v42 = vld [vmem:[%s4217_s10 + $0x2a8] ss:$36 sps:$4 sm:$0xff]   ;;  %v4063_v48 = vld [vmem:[%s4217_s10 + $0x2f0] ss:$36 sps:$4 sm:$0xff]  }
 0x136   : > { %v3189_v51 = vpop.f32.mrf.mxu0  ;;  %v3300_v53 = vpop.f32.mrf.mxu1 }
 0x137   : > { %v3190_v52 = vadd.f32 %v3189_v51, %v3188_v44  ;;  %v4538_v54 = vadd.f32 %v3299_v49, %v1813_v45 }
 0x138   : > { %v3191_v55 = vpop.f32.mrf.mxu0  ;;  %v3301_v59 = vpop.f32.mrf.mxu1 }
 0x139   : > { %v1818_v57 = vadd.f32 %v3190_v52, %v4453_v47  ;;  %v3302_v62 = vadd.f32 %v3301_v59, %v3300_v53 }
 0x13a   : > { %v3192_v0 = vpop.f32.mrf.mxu0  ;;  %v3303_v2 = vpop.f32.mrf.mxu1 }
 0x13b   : > { %v3193_v1 = vadd.f32 %v3192_v0, %v3191_v55  ;;  %v4543_v3 = vadd.f32 %v3302_v62, %v1818_v57 }
 0x13c   : > { %v3194_v5 = vpop.f32.mrf.mxu0  ;;  %3684 = vmatmul.mubr.bf16.gmra.mxu0 %v4058_v56  ;;  %v3304_v8 = vpop.f32.mrf.mxu1 }
 0x13d   : > { %v1821_v7 = vadd.f32 %v3193_v1, %v4453_v47  ;;  %3687 = vmatprep.mubr.bf16.mxu0 %v4059_v60  ;;  %v3305_v10 = vadd.f32 %v3304_v8, %v3303_v2 }
 0x13e   : > { %v3195_v11 = vpop.f32.mrf.mxu0  ;;  %v3306_v13 = vpop.f32.mrf.mxu1 }
 0x13f   : > { %v3196_v12 = vadd.f32 %v3195_v11, %v3194_v5  ;;  %v4546_v14 = vadd.f32 %v3305_v10, %v1821_v7  ;;  %v4064_v7 = vld [vmem:[%s4217_s10 + $0x338] ss:$36 sps:$4 sm:$0xff]   ;;  %v4065_v11 = vld [vmem:[%s4217_s10 + $0x380] ss:$36 sps:$4 sm:$0xff]  }
 0x140   : > { %v3197_v15 = vpop.f32.mrf.mxu0  ;;  %v3307_v20 = vpop.f32.mrf.mxu1 }
 0x141   : > { %v1826_v19 = vadd.f32 %v3196_v12, %v4453_v47  ;;  %v3308_v23 = vadd.f32 %v3307_v20, %v3306_v13 }
 0x142   : > { %v3198_v24 = vpop.f32.mrf.mxu0  ;;  %v3309_v28 = vpop.f32.mrf.mxu1 }
 0x143   : > { %v3199_v25 = vadd.f32 %v3198_v24, %v3197_v15  ;;  %v4551_v29 = vadd.f32 %v3308_v23, %v1826_v19 }
 0x144   : > { %v3200_v30 = vpop.f32.mrf.mxu0  ;;  %3688 = vmatmul.mubr.bf16.gmra.mxu0 %v4060_v18  ;;  %v3310_v33 = vpop.f32.mrf.mxu1 }
 0x145   : > { %v1829_v32 = vadd.f32 %v3199_v25, %v4453_v47  ;;  %3691 = vmatprep.mubr.bf16.mxu0 %v4061_v22  ;;  %v3311_v34 = vadd.f32 %v3310_v33, %v3309_v28 }
 0x146   : > { %v3201_v35 = vpop.f32.mrf.mxu0  ;;  %v3312_v38 = vpop.f32.mrf.mxu1 }
 0x147   : > { %v3202_v36 = vadd.f32 %v3201_v35, %v3200_v30  ;;  %v4554_v40 = vadd.f32 %v3311_v34, %v1829_v32  ;;  %v4066_v34 = vld [vmem:[%s4217_s10 + $0x3c8] ss:$36 sps:$4 sm:$0xff]  }
 0x148   : > { %v3203_v41 = vpop.f32.mrf.mxu0  ;;  %v3313_v45 = vpop.f32.mrf.mxu1 }
 0x149   : > { %v1834_v44 = vadd.f32 %v3202_v36, %v4453_v47  ;;  %v3314_v49 = vadd.f32 %v3313_v45, %v3312_v38  ;;  %v4067_v38 = vld [vmem:[%s4217_s10 + $0x410] ss:$36 sps:$4 sm:$0xff]  }
 0x14a   : > { %v3204_v51 = vpop.f32.mrf.mxu0  ;;  %v3315_v53 = vpop.f32.mrf.mxu1 }
 0x14b   : > { %v3205_v52 = vadd.f32 %v3204_v51, %v3203_v41  ;;  %v4559_v55 = vadd.f32 %v3314_v49, %v1834_v44 }
 0x14c   : > { %v3206_v56 = vpop.f32.mrf.mxu0  ;;  %3692 = vmatmul.mubr.bf16.gmra.mxu0 %v4062_v42  ;;  %v3316_v59 = vpop.f32.mrf.mxu1 }
 0x14d   : > { %v1837_v57 = vadd.f32 %v3205_v52, %v4453_v47  ;;  %3695 = vmatprep.mubr.bf16.mxu0 %v4063_v48  ;;  %v3317_v60 = vadd.f32 %v3316_v59, %v3315_v53 }
 0x14e   : > { %v3207_v62 = vpop.f32.mrf.mxu0  ;;  %v3318_v1 = vpop.f32.mrf.mxu1 }
 0x14f   : > { %v3208_v0 = vadd.f32 %v3207_v62, %v3206_v56  ;;  %v4562_v2 = vadd.f32 %v3317_v60, %v1837_v57 }
 0x150   : > { %v3209_v5 = vpop.f32.mrf.mxu0  ;;  %v3319_v10 = vpop.f32.mrf.mxu1 }
 0x151   : > { %v1842_v8 = vadd.f32 %v3208_v0, %v4453_v47  ;;  %v3320_v12 = vadd.f32 %v3319_v10, %v3318_v1  ;;  %v4068_v0 = vld [vmem:[%s4217_s10 + $0x458] ss:$36 sps:$4 sm:$0xff]  }
 0x152   : > { %v3210_v13 = vpop.f32.mrf.mxu0  ;;  %v3321_v18 = vpop.f32.mrf.mxu1 }
 0x153   : > { %v3211_v15 = vadd.f32 %v3210_v13, %v3209_v5  ;;  %v4567_v19 = vadd.f32 %v3320_v12, %v1842_v8 }
 0x154   : > { %v3212_v20 = vpop.f32.mrf.mxu0  ;;  %3696 = vmatmul.mubr.bf16.gmra.mxu0 %v4064_v7  ;;  %v3322_v23 = vpop.f32.mrf.mxu1 }
 0x155   : > { %v1845_v22 = vadd.f32 %v3211_v15, %v4453_v47  ;;  %3699 = vmatprep.mubr.bf16.mxu0 %v4065_v11  ;;  %v3323_v24 = vadd.f32 %v3322_v23, %v3321_v18 }
 0x156   : > { %v3213_v25 = vpop.f32.mrf.mxu0  ;;  %v3324_v30 = vpop.f32.mrf.mxu1 }
 0x157   : > { %v3214_v28 = vadd.f32 %v3213_v25, %v3212_v20  ;;  %v4570_v32 = vadd.f32 %v3323_v24, %v1845_v22 }
 0x158   : > { %v3215_v33 = vpop.f32.mrf.mxu0  ;;  %v3325_v36 = vpop.f32.mrf.mxu1 }
 0x159   : > { %v1850_v35 = vadd.f32 %v3214_v28, %v4453_v47  ;;  %v3326_v41 = vadd.f32 %v3325_v36, %v3324_v30 }
 0x15a   : > { %v3216_v42 = vpop.f32.mrf.mxu0  ;;  %v3327_v45 = vpop.f32.mrf.mxu1 }
 0x15b   : > { %v3217_v44 = vadd.f32 %v3216_v42, %v3215_v33  ;;  %v4575_v48 = vadd.f32 %v3326_v41, %v1850_v35 }
 0x15c   : > { %v3218_v49 = vpop.f32.mrf.mxu0  ;;  %3700 = vmatmul.mubr.bf16.gmra.mxu0 %v4066_v34  ;;  %v3328_v52 = vpop.f32.mrf.mxu1 }
 0x15d   : > { %v1853_v51 = vadd.f32 %v3217_v44, %v4453_v47  ;;  %3703 = vmatprep.mubr.bf16.mxu0 %v4067_v38  ;;  %v3329_v53 = vadd.f32 %v3328_v52, %v3327_v45 }
 0x15e   : > { %v3219_v56 = vpop.f32.mrf.mxu0  ;;  %v3330_v59 = vpop.f32.mrf.mxu1 }
 0x15f   : > { %v3220_v57 = vadd.f32 %v3219_v56, %v3218_v49  ;;  %v4578_v60 = vadd.f32 %v3329_v53, %v1853_v51 }
 0x160   : > { %v3221_v62 = vpop.f32.mrf.mxu0  ;;  %v3331_v5 = vpop.f32.mrf.mxu1 }
 0x161   : > { %v1858_v1 = vadd.f32 %v3220_v57, %v4453_v47  ;;  %v3332_v7 = vadd.f32 %v3331_v5, %v3330_v59 }
 0x162   : > { %v3222_v8 = vpop.f32.mrf.mxu0  ;;  %v3333_v11 = vpop.f32.mrf.mxu1 }
 0x163   : > { %v3223_v10 = vadd.f32 %v3222_v8, %v3221_v62  ;;  %v4582_v12 = vadd.f32 %v3332_v7, %v1858_v1 }
 0x164   : > { %v3224_v13 = vpop.f32.mrf.mxu0  ;;  %3704 = vmatmul.mubr.bf16.gmra.mxu0 %v4068_v0  ;;  %v3334_v18 = vpop.f32.mrf.mxu1 }
 0x165   : > { %v1861_v15 = vadd.f32 %v3223_v10, %v4453_v47  ;;  %v3335_v20 = vadd.f32 %v3334_v18, %v3333_v11 }
 0x166   : > { %v3225_v22 = vpop.f32.mrf.mxu0  ;;  %v3336_v24 = vpop.f32.mrf.mxu1 }
 0x167   : > { %v3226_v23 = vadd.f32 %v3225_v22, %v3224_v13  ;;  %v4585_v25 = vadd.f32 %v3335_v20, %v1861_v15 }
 0x168   : > { %v3227_v28 = vpop.f32.mrf.mxu0  ;;  %v3337_v33 = vpop.f32.mrf.mxu1 }
 0x169   : > { %v1866_v30 = vadd.f32 %v3226_v23, %v4453_v47  ;;  %v3338_v34 = vadd.f32 %v3337_v33, %v3336_v24 }
 0x16a   : > { %v3228_v35 = vpop.f32.mrf.mxu0  ;;  %v3339_v38 = vpop.f32.mrf.mxu1 }
 0x16b   : > { %v3229_v36 = vadd.f32 %v3228_v35, %v3227_v28  ;;  %v4588_v41 = vadd.f32 %v3338_v34, %v1866_v30 }
 0x16c   : > { %v3358_v42 = vpop.f32.mrf.mxu0  ;;  %v3340_v45 = vpop.f32.mrf.mxu1 }
 0x16d   : > { %v1869_v44 = vadd.f32 %v3229_v36, %v4453_v47  ;;  %v3341_v49 = vadd.f32 %v3340_v45, %v3339_v38 }
 0x16e   : > { %v3359_v51 = vpop.f32.mrf.mxu0  ;;  %v3470_v53 = vpop.f32.mrf.mxu1 }
 0x16f   : > { %v3360_v52 = vadd.f32 %v3359_v51, %v3358_v42  ;;  %v4591_v56 = vadd.f32 %v3341_v49, %v1869_v44 }
 0x170   : > { %v3361_v57 = vpop.f32.mrf.mxu0  ;;  %v3471_v62 = vpop.f32.mrf.mxu1 }
 0x171   : > { %v2068_v59 = vadd.f32 %v3360_v52, %v4459_v61  ;;  %v3472_v0 = vadd.f32 %v3471_v62, %v3470_v53 }
 0x172   : > { %v3362_v1 = vpop.f32.mrf.mxu0  ;;  %v3473_v7 = vpop.f32.mrf.mxu1 }
 0x173   : > { %v3363_v5 = vadd.f32 %v3362_v1, %v3361_v57  ;;  %v4594_v10 = vadd.f32 %v3472_v0, %v2068_v59 }
 0x174   : > { %v3364_v8 = vpop.f32.mrf.mxu0  ;;  %v3474_v11 = vpop.f32.mrf.mxu1 }
 0x175   : > { %v2071_v47 = vadd.f32 %v3363_v5, %v4463_v6  ;;  %v3475_v13 = vadd.f32 %v3474_v11, %v3473_v7 }
 0x176   : > { %v3365_v15 = vpop.f32.mrf.mxu0  ;;  %v3476_v20 = vpop.f32.mrf.mxu1 }
 0x177   : > { %v3366_v18 = vadd.f32 %v3365_v15, %v3364_v8  ;;  %v4597_v23 = vadd.f32 %v3475_v13, %v2071_v47 }
 0x178   : > { %v3367_v22 = vpop.f32.mrf.mxu0  ;;  %v3477_v24 = vpop.f32.mrf.mxu1 }
 0x179   : > { %v2076_v61 = vadd.f32 %v3366_v18, %v4469_v17  ;;  %v3478_v28 = vadd.f32 %v3477_v24, %v3476_v20 }
 0x17a   : > { %v3368_v30 = vpop.f32.mrf.mxu0  ;;  %v3479_v34 = vpop.f32.mrf.mxu1 }
 0x17b   : > { %v3369_v33 = vadd.f32 %v3368_v30, %v3367_v22  ;;  %v4600_v36 = vadd.f32 %v3478_v28, %v2076_v61 }
 0x17c   : > { %v3370_v35 = vpop.f32.mrf.mxu0  ;;  %v3480_v38 = vpop.f32.mrf.mxu1 }
 0x17d   : > { %v2079_v6 = vadd.f32 %v3369_v33, %v4473_v26  ;;  %v3481_v42 = vadd.f32 %v3480_v38, %v3479_v34 }
 0x17e   : > { %v3371_v44 = vpop.f32.mrf.mxu0  ;;  %v3482_v49 = vpop.f32.mrf.mxu1 }
 0x17f   : > { %v3372_v45 = vadd.f32 %v3371_v44, %v3370_v35  ;;  %v4603_v52 = vadd.f32 %v3481_v42, %v2079_v6 }
 0x180   : > { %v3373_v51 = vpop.f32.mrf.mxu0  ;;  %v3483_v53 = vpop.f32.mrf.mxu1 }
 0x181   : > { %v2084_v17 = vadd.f32 %v3372_v45, %v4479_v37  ;;  %v3484_v57 = vadd.f32 %v3483_v53, %v3482_v49 }
 0x182   : > { %v3374_v59 = vpop.f32.mrf.mxu0  ;;  %v3485_v0 = vpop.f32.mrf.mxu1 }
 0x183   : > { %v3375_v62 = vadd.f32 %v3374_v59, %v3373_v51  ;;  %v4606_v5 = vadd.f32 %v3484_v57, %v2084_v17 }
 0x184   : > { %v3376_v1 = vpop.f32.mrf.mxu0  ;;  %v3486_v7 = vpop.f32.mrf.mxu1 }
 0x185   : > { %v2087_v26 = vadd.f32 %v3375_v62, %v4483_v46  ;;  %v3487_v8 = vadd.f32 %v3486_v7, %v3485_v0 }
 0x186   : > { %v3377_v47 = vpop.f32.mrf.mxu0  ;;  %v3488_v13 = vpop.f32.mrf.mxu1 }
 0x187   : > { %v3378_v11 = vadd.f32 %v3377_v47, %v3376_v1  ;;  %v4609_v18 = vadd.f32 %v3487_v8, %v2087_v26 }
 0x188   : > { %v3379_v15 = vpop.f32.mrf.mxu0  ;;  %v3489_v20 = vpop.f32.mrf.mxu1 }
 0x189   : > { %v2092_v37 = vadd.f32 %v3378_v11, %v4489_v58  ;;  %v3490_v22 = vadd.f32 %v3489_v20, %v3488_v13 }
 0x18a   : > { %v3380_v61 = vpop.f32.mrf.mxu0  ;;  %v3491_v28 = vpop.f32.mrf.mxu1 }
 0x18b   : > { %v3381_v24 = vadd.f32 %v3380_v61, %v3379_v15  ;;  %v4612_v33 = vadd.f32 %v3490_v22, %v2092_v37 }
 0x18c   : > { %v3382_v30 = vpop.f32.mrf.mxu0  ;;  %v3492_v34 = vpop.f32.mrf.mxu1 }
 0x18d   : > { %v2095_v46 = vadd.f32 %v3381_v24, %v4493_v4  ;;  %v3493_v35 = vadd.f32 %v3492_v34, %v3491_v28 }
 0x18e   : > { %v3383_v6 = vpop.f32.mrf.mxu0  ;;  %v3494_v42 = vpop.f32.mrf.mxu1 }
 0x18f   : > { %v3384_v38 = vadd.f32 %v3383_v6, %v3382_v30  ;;  %v4615_v45 = vadd.f32 %v3493_v35, %v2095_v46 }
 0x190   : > { %v3385_v44 = vpop.f32.mrf.mxu0  ;;  %v3495_v49 = vpop.f32.mrf.mxu1 }
 0x191   : > { %v2100_v58 = vadd.f32 %v3384_v38, %v4499_v16  ;;  %v3496_v51 = vadd.f32 %v3495_v49, %v3494_v42 }
 0x192   : > { %v3386_v17 = vpop.f32.mrf.mxu0  ;;  %v3497_v57 = vpop.f32.mrf.mxu1 }
 0x193   : > { %v3387_v53 = vadd.f32 %v3386_v17, %v3385_v44  ;;  %v4618_v62 = vadd.f32 %v3496_v51, %v2100_v58 }
 0x194   : > { %v3388_v59 = vpop.f32.mrf.mxu0  ;;  %v3498_v0 = vpop.f32.mrf.mxu1 }
 0x195   : > { %5096 = vst [vmem:[#allocation2_spill] sm:$0xff] %v4618_v62  ;;  %v2103_v4 = vadd.f32 %v3387_v53, %v4503_v27  ;;  %v3499_v1 = vadd.f32 %v3498_v0, %v3497_v57 }
 0x196   : > { %v3389_v26 = vpop.f32.mrf.mxu0  ;;  %v3500_v8 = vpop.f32.mrf.mxu1 }
 0x197   : > { %v3390_v7 = vadd.f32 %v3389_v26, %v3388_v59  ;;  %v4621_v11 = vadd.f32 %v3499_v1, %v2103_v4 }
 0x198   : > { %v3391_v47 = vpop.f32.mrf.mxu0  ;;  %v3501_v13 = vpop.f32.mrf.mxu1 }
 0x199   : > { %v2108_v16 = vadd.f32 %v3390_v7, %v4509_v39  ;;  %v3502_v15 = vadd.f32 %v3501_v13, %v3500_v8 }
 0x19a   : > { %v3392_v37 = vpop.f32.mrf.mxu0  ;;  %v3503_v22 = vpop.f32.mrf.mxu1 }
 0x19b   : > { %v3393_v20 = vadd.f32 %v3392_v37, %v3391_v47  ;;  %v4624_v24 = vadd.f32 %v3502_v15, %v2108_v16 }
 0x19c   : > { %v3394_v61 = vpop.f32.mrf.mxu0  ;;  %v3504_v28 = vpop.f32.mrf.mxu1 }
 0x19d   : > { %v2111_v27 = vadd.f32 %v3393_v20, %v4513_v50  ;;  %v3505_v30 = vadd.f32 %v3504_v28, %v3503_v22 }
 0x19e   : > { %v3395_v46 = vpop.f32.mrf.mxu0  ;;  %v3506_v35 = vpop.f32.mrf.mxu1 }
 0x19f   : > { %v3396_v34 = vadd.f32 %v3395_v46, %v3394_v61  ;;  %v4627_v38 = vadd.f32 %v3505_v30, %v2111_v27 }
 0x1a0   : > { %v3397_v6 = vpop.f32.mrf.mxu0  ;;  %v3507_v42 = vpop.f32.mrf.mxu1 }
 0x1a1   : > { %v2116_v39 = vadd.f32 %v3396_v34, %v4519_v63  ;;  %v3508_v44 = vadd.f32 %v3507_v42, %v3506_v35 }
 0x1a2   : > { %v3398_v58 = vpop.f32.mrf.mxu0  ;;  %v3509_v51 = vpop.f32.mrf.mxu1 }
 0x1a3   : > { %v3399_v49 = vadd.f32 %v3398_v58, %v3397_v6  ;;  %v4630_v53 = vadd.f32 %v3508_v44, %v2116_v39 }
 0x1a4   : > { %v3400_v17 = vpop.f32.mrf.mxu0  ;;  %v3510_v57 = vpop.f32.mrf.mxu1 }
 0x1a5   : > { %v2119_v50 = vadd.f32 %v3399_v49, %v4522_v9  ;;  %v3511_v59 = vadd.f32 %v3510_v57, %v3509_v51 }
 0x1a6   : > { %v3401_v4 = vpop.f32.mrf.mxu0  ;;  %v3512_v1 = vpop.f32.mrf.mxu1 }
 0x1a7   : > { %v3402_v0 = vadd.f32 %v3401_v4, %v3400_v17  ;;  %v4633_v7 = vadd.f32 %v3511_v59, %v2119_v50 }
 0x1a8   : > { %v3403_v26 = vpop.f32.mrf.mxu0  ;;  %v3513_v8 = vpop.f32.mrf.mxu1 }
 0x1a9   : > { %v2124_v63 = vadd.f32 %v3402_v0, %v4527_v21  ;;  %v3514_v47 = vadd.f32 %v3513_v8, %v3512_v1 }
 0x1aa   : > { %v3404_v16 = vpop.f32.mrf.mxu0  ;;  %v3515_v15 = vpop.f32.mrf.mxu1 }
 0x1ab   : > { %v3405_v13 = vadd.f32 %v3404_v16, %v3403_v26  ;;  %v4636_v20 = vadd.f32 %v3514_v47, %v2124_v63 }
 0x1ac   : > { %v3406_v37 = vpop.f32.mrf.mxu0  ;;  %v3516_v22 = vpop.f32.mrf.mxu1 }
 0x1ad   : > { %v2127_v9 = vadd.f32 %v3405_v13, %v4530_v31  ;;  %v3517_v61 = vadd.f32 %v3516_v22, %v3515_v15 }
 0x1ae   : > { %v3407_v27 = vpop.f32.mrf.mxu0  ;;  %v3518_v30 = vpop.f32.mrf.mxu1 }
 0x1af   : > { %v3408_v28 = vadd.f32 %v3407_v27, %v3406_v37  ;;  %v4639_v34 = vadd.f32 %v3517_v61, %v2127_v9 }
 0x1b0   : > { %v3409_v46 = vpop.f32.mrf.mxu0  ;;  %v3519_v35 = vpop.f32.mrf.mxu1 }
 0x1b1   : > { %v2132_v21 = vadd.f32 %v3408_v28, %v4535_v43  ;;  %v3520_v6 = vadd.f32 %v3519_v35, %v3518_v30 }
 0x1b2   : > { %v3410_v39 = vpop.f32.mrf.mxu0  ;;  %v3521_v44 = vpop.f32.mrf.mxu1 }
 0x1b3   : > { %v3411_v42 = vadd.f32 %v3410_v39, %v3409_v46  ;;  %v4642_v49 = vadd.f32 %v3520_v6, %v2132_v21 }
 0x1b4   : > { %v3412_v58 = vpop.f32.mrf.mxu0  ;;  %v3522_v51 = vpop.f32.mrf.mxu1 }
 0x1b5   : > { %5097 = vst [vmem:[#allocation3_spill] sm:$0xff] %v4642_v49  ;;  %v2135_v31 = vadd.f32 %v3411_v42, %v4538_v54  ;;  %v3523_v17 = vadd.f32 %v3522_v51, %v3521_v44 }
 0x1b6   : > { %v3413_v50 = vpop.f32.mrf.mxu0  ;;  %v3524_v59 = vpop.f32.mrf.mxu1 }
 0x1b7   : > { %v3414_v57 = vadd.f32 %v3413_v50, %v3412_v58  ;;  %v4645_v0 = vadd.f32 %v3523_v17, %v2135_v31  ;;  %v5087_v50 = vmov 0.00390625  }
 0x1b8   : > { %v3415_v4 = vpop.f32.mrf.mxu0  ;;  %v3525_v1 = vpop.f32.mrf.mxu1  ;;  %2580 = vmatprep.mubr.f32.mxu1 %v5087_v50 }
 0x1b9   : > { %5098 = vst [vmem:[#allocation4_spill] sm:$0xff] %v4645_v0  ;;  %v2140_v43 = vadd.f32 %v3414_v57, %v4543_v3  ;;  %v3526_v26 = vadd.f32 %v3525_v1, %v3524_v59  ;;  %v5085_v59 = vmov 0.0  }
 0x1ba   : > { %v3416_v63 = vpop.f32.mrf.mxu0  ;;  %v3527_v47 = vpop.f32.mrf.mxu1  ;;  %3742 = vmatprep.subr.mxu0 %v5085_v59 }
 0x1bb   : > { %v3417_v8 = vadd.f32 %v3416_v63, %v3415_v4  ;;  %v4648_v13 = vadd.f32 %v3526_v26, %v2140_v43 }
 0x1bc   : > { %v3418_v16 = vpop.f32.mrf.mxu0  ;;  %v3528_v15 = vpop.f32.mrf.mxu1 }
 0x1bd   : > { %5099 = vst [vmem:[#allocation5_spill] sm:$0xff] %v4648_v13  ;;  %v2143_v54 = vadd.f32 %v3417_v8, %v4546_v14  ;;  %v3529_v37 = vadd.f32 %v3528_v15, %v3527_v47 }
 0x1be   : > { %v3419_v9 = vpop.f32.mrf.mxu0  ;;  %v3530_v61 = vpop.f32.mrf.mxu1 }
 0x1bf   : > { %v3420_v22 = vadd.f32 %v3419_v9, %v3418_v16  ;;  %v4651_v28 = vadd.f32 %v3529_v37, %v2143_v54 }
 0x1c0   : > { %v3421_v27 = vpop.f32.mrf.mxu0  ;;  %v3531_v30 = vpop.f32.mrf.mxu1 }
 0x1c1   : > { %5100 = vst [vmem:[#allocation6_spill] sm:$0xff] %v4651_v28  ;;  %v2148_v3 = vadd.f32 %v3420_v22, %v4551_v29  ;;  %v3532_v46 = vadd.f32 %v3531_v30, %v3530_v61 }
 0x1c2   : > { %v3422_v21 = vpop.f32.mrf.mxu0  ;;  %v4663_v29 = vpop.f32.mrf.mxu1 }
 0x1c3   : > { %v3423_v35 = vadd.f32 %v3422_v21, %v3421_v27  ;;  %v4654_v39 = vadd.f32 %v3532_v46, %v2148_v3 }
 0x1c4   : > { %v3424_v6 = vpop.f32.mrf.mxu0  ;;  %v4669_v1 = vpop.f32.mrf.mxu1 }
 0x1c5   : > { %5101 = vst [vmem:[#allocation7_spill] sm:$0xff] %v4654_v39  ;;  %v4657_v42 = vadd.f32 %v3423_v35, %v4554_v40 }
 0x1c6   : > { %v3425_v14 = vpop.f32.mrf.mxu0  ;;  %v4674_v47 = vpop.f32.mrf.mxu1 }
 0x1c7   : > { %5102 = vst [vmem:[#allocation8_spill] sm:$0xff] %v4657_v42  ;;  %v3426_v44 = vadd.f32 %v3425_v14, %v3424_v6 }
 0x1c8   : > { %v3427_v58 = vpop.f32.mrf.mxu0 }
 0x1c9   : > { %v4660_v31 = vadd.f32 %v3426_v44, %v4559_v55 }
 0x1ca   : > { %v3428_v51 = vpop.f32.mrf.mxu0 }
 0x1cb   : > { %5103 = vst [vmem:[#allocation9_spill] sm:$0xff] %v4660_v31  ;;  %v3429_v17 = vadd.f32 %v3428_v51, %v3427_v58 }
 0x1cc   : > { %v3430_v57 = vpop.f32.mrf.mxu0 }
 0x1cd   : > { %v4667_v40 = vadd.f32 %v3429_v17, %v4562_v2  ;;  %v4679_v2 = vpop.f32.mrf.mxu1 }
 0x1ce   : > { %v3431_v4 = vpop.f32.mrf.mxu0 }
 0x1cf   : > { %5104 = vst [vmem:[#allocation10_spill] sm:$0xff] %v4667_v40  ;;  %v3432_v43 = vadd.f32 %v3431_v4, %v3430_v57 }
 0x1d0   : > { %v3433_v55 = vpop.f32.mrf.mxu0 }
 0x1d1   : > { %v4672_v26 = vadd.f32 %v3432_v43, %v4567_v19  ;;  %v4684_v19 = vpop.f32.mrf.mxu1 }
 0x1d2   : > { %v3434_v63 = vpop.f32.mrf.mxu0 }
 0x1d3   : > { %v3435_v8 = vadd.f32 %v3434_v63, %v3433_v55 }
 0x1d4   : > { %v3436_v16 = vpop.f32.mrf.mxu0 }
 0x1d5   : > { %v4677_v54 = vadd.f32 %v3435_v8, %v4570_v32  ;;  %v4689_v32 = vpop.f32.mrf.mxu1 }
 0x1d6   : > { %v3437_v15 = vpop.f32.mrf.mxu0 }
 0x1d7   : > { %v3438_v37 = vadd.f32 %v3437_v15, %v3436_v16 }
 0x1d8   : > { %v3439_v9 = vpop.f32.mrf.mxu0 }
 0x1d9   : > { %v4682_v22 = vadd.f32 %v3438_v37, %v4575_v48  ;;  %v4694_v48 = vpop.f32.mrf.mxu1 }
 0x1da   : > { %v3440_v61 = vpop.f32.mrf.mxu0 }
 0x1db   : > { %v3441_v27 = vadd.f32 %v3440_v61, %v3439_v9 }
 0x1dc   : > { %v3442_v3 = vpop.f32.mrf.mxu0 }
 0x1dd   : > { %v4687_v30 = vadd.f32 %v3441_v27, %v4578_v60  ;;  %v4699_v60 = vpop.f32.mrf.mxu1 }
 0x1de   : > { %v3443_v46 = vpop.f32.mrf.mxu0 }
 0x1df   : > { %v3444_v21 = vadd.f32 %v3443_v46, %v3442_v3  ;;  %v4702_v63 = vpop.f32.mrf.mxu1 }
 0x1e0   : > { %v3445_v35 = vpop.f32.mrf.mxu0 }
 0x1e1   : > { %v4692_v6 = vadd.f32 %v3444_v21, %v4582_v12 }
 0x1e2   : > { %v3446_v14 = vpop.f32.mrf.mxu0 }
 0x1e3   : > { %v3447_v44 = vadd.f32 %v3446_v14, %v3445_v35 }
 0x1e4   : > { %v3448_v58 = vpop.f32.mrf.mxu0 }
 0x1e5   : > { %v4697_v51 = vadd.f32 %v3447_v44, %v4585_v25  ;;  %v4710_v25 = vpop.f32.mrf.mxu1 }
 0x1e6   : > { %v3449_v17 = vpop.f32.mrf.mxu0 }
 0x1e7   : > { %v3450_v57 = vadd.f32 %v3449_v17, %v3448_v58  ;;  %v3548_v27 = vpop.f32.mrf.mxu1 }
 0x1e8   : > { %v3451_v4 = vpop.f32.mrf.mxu0 }
 0x1e9   : > { %v2188_v43 = vadd.f32 %v3450_v57, %v4588_v41 }
 0x1ea   : > { %v3452_v55 = vpop.f32.mrf.mxu0 }
 0x1eb   : > { %v3453_v28 = vadd.f32 %v3452_v55, %v3451_v4 }
 0x1ec   : > { %v3677_v12 = vpop.f32.mrf.mxu0 }
 0x1ed   : > { %v4705_v8 = vadd.f32 %v3677_v12, %v4600_v36 }
 0x1ee   : > { %v2389_v16 = vpop.f32.mrf.mxu0 }
 0x1ef   : > { %5105 = vst [vmem:[#allocation11_spill] sm:$0xff] %v4705_v8  ;;  %v4708_v15 = vadd.f32 %v2389_v16, %v4594_v10  ;;  %v3549_v10 = vpop.f32.mrf.mxu1 }
 0x1f0   : > { %v3678_v37 = vpop.f32.mrf.mxu0 }
 0x1f1   : > { %5106 = vst [vmem:[#allocation12_spill] sm:$0xff] %v4708_v15  ;;  %v4713_v9 = vadd.f32 %v3678_v37, %v4603_v52 }
 0x1f2   : > { %v2392_v61 = vpop.f32.mrf.mxu0 }
 0x1f3   : > { %5107 = vst [vmem:[#allocation13_spill] sm:$0xff] %v4713_v9  ;;  %v4716_v41 = vadd.f32 %v2392_v61, %v4597_v23  ;;  %v3551_v23 = vpop.f32.mrf.mxu1 }
 0x1f4   : > { %v3681_v3 = vpop.f32.mrf.mxu0 }
 0x1f5   : > { %5108 = vst [vmem:[#allocation14_spill] sm:$0xff] %v4716_v41  ;;  %v4719_v46 = vadd.f32 %v3681_v3, %v4612_v33  ;;  %v3552_v33 = vpop.f32.mrf.mxu1 }
 0x1f6   : > { %v2405_v36 = vpop.f32.mrf.mxu0  ;;  %v3553_v55 = vadd.f32 %v3552_v33, %v3551_v23 }
 0x1f7   : > { %5109 = vst [vmem:[#allocation15_spill] sm:$0xff] %v4719_v46  ;;  %v4722_v21 = vadd.f32 %v2405_v36, %v4606_v5  ;;  %v3554_v5 = vpop.f32.mrf.mxu1 }
 0x1f8   : > { %v3682_v35 = vpop.f32.mrf.mxu0 }
 0x1f9   : > { %5110 = vst [vmem:[#allocation16_spill] sm:$0xff] %v4722_v21  ;;  %v4725_v14 = vadd.f32 %v3682_v35, %v4615_v45  ;;  %v3555_v61 = vpop.f32.mrf.mxu1 }
 0x1fa   : > { %v2408_v52 = vpop.f32.mrf.mxu0 }
 0x1fb   : > { %5111 = vst [vmem:[#allocation17_spill] sm:$0xff] %v4725_v14  ;;  %v4728_v44 = vadd.f32 %v2408_v52, %v4609_v18  ;;  %v3557_v36 = vpop.f32.mrf.mxu1 }
 0x1fc   : > { %v4730_v58 = vpop.f32.mrf.mxu0 }
 0x1fd   : > { %5112 = vst [vmem:[#allocation18_spill] sm:$0xff] %v4728_v44  ;;  %v3558_v52 = vpop.f32.mrf.mxu1 }
 0x1fe   : > { %v4732_v17 = vpop.f32.mrf.mxu0 }
 0x1ff   : > { %5113 = vst [vmem:[#allocation19_spill] sm:$0xff] %v4732_v17  ;;  %v3560_v15 = vpop.f32.mrf.mxu1  ;;  %v3556_v17 = vadd.f32 %v3555_v61, %v3554_v5  ;;  %v5138_v5 = vld [vmem:[#allocation5_spill] sm:$0xff] }
 0x200   : > { %v3686_v57 = vpop.f32.mrf.mxu0  ;;  %v5140_v61 = vld [vmem:[#allocation13_spill] sm:$0xff] }
 0x201   : > { %v3561_v8 = vpop.f32.mrf.mxu1 }
 0x202   : > { %v4734_v12 = vpop.f32.mrf.mxu0  ;;  %v3562_v14 = vadd.f32 %v3561_v8, %v3560_v15 }
 0x203   : > { %v3563_v13 = vpop.f32.mrf.mxu1 }
 0x204   : > { %v3689_v16 = vpop.f32.mrf.mxu0 }
 0x206   : > { %v2437_v37 = vpop.f32.mrf.mxu0 }
 0x208   : > { %v3690_v3 = vpop.f32.mrf.mxu0 }
 0x20a   : > { %v2440_v45 = vpop.f32.mrf.mxu0 }
 0x20c   : > { %v4736_v35 = vpop.f32.mrf.mxu0 }
 0x20d   : > { %5114 = vst [vmem:[#allocation20_spill] sm:$0xff] %v4736_v35 }
 0x20e   : > { %v4738_v18 = vpop.f32.mrf.mxu0 }
 0x20f   : > { %5115 = vst [vmem:[#allocation21_spill] sm:$0xff] %v4738_v18  ;;  %v3564_v18 = vpop.f32.mrf.mxu1 }
 0x210   : > { %v4740_v59 = vpop.f32.mrf.mxu0 }
 0x211   : > { %5116 = vst [vmem:[#allocation22_spill] sm:$0xff] %v4740_v59  ;;  %v2191_v59 = vadd.f32 %v3453_v28, %v4591_v56  ;;  %v3550_v28 = vadd.f32 %v3549_v10, %v3548_v27  ;;  %v5129_v27 = vld [vmem:[#allocation17_spill] sm:$0xff]  ;;  %v5131_v10 = vld [vmem:[#allocation15_spill] sm:$0xff] }
 0x212   : > { %v4742_v50 = vpop.f32.mrf.mxu0 }
 0x213   : > { %5117 = vst [vmem:[#allocation23_spill] sm:$0xff] %v4742_v50  ;;  %v3565_v50 = vadd.f32 %v3564_v18, %v3563_v13  ;;  %v4763_v13 = vadd.f32 %v3689_v16, %v4636_v20  ;;  %v2336_v20 = vadd.f32 %v3553_v55, %v4687_v30  ;;  %v4791_v30 = vadd.f32 %v3686_v57, %v4627_v38  ;;  %v5144_v18 = vld [vmem:[#allocation3_spill] sm:$0xff]  ;;  %v5146_v55 = vld [vmem:[#allocation14_spill] sm:$0xff] }
 0x214   : > { %v4744_v41 = vpop.f32.mrf.mxu0  ;;  %v3538_v38 = vadd.f32 %v4679_v2, %v4674_v47  ;;  %v5125_v2 = vld [vmem:[#allocation9_spill] sm:$0xff]  ;;  %v5139_v16 = vld [vmem:[#allocation20_spill] sm:$0xff] }
 0x215   : > { %5118 = vst [vmem:[#allocation24_spill] sm:$0xff] %v4744_v41  ;;  %v3559_v41 = vadd.f32 %v3558_v52, %v3557_v36 }
 0x216   : > { %v4746_v49 = vpop.f32.mrf.mxu0  ;;  %v5145_v52 = vld [vmem:[#allocation21_spill] sm:$0xff] }
 0x217   : > { %5119 = vst [vmem:[#allocation25_spill] sm:$0xff] %v4746_v49  ;;  %v2352_v49 = vadd.f32 %v3565_v50, %v2191_v59  ;;  %v2344_v56 = vadd.f32 %v3559_v41, %v4697_v51  ;;  %v4781_v59 = vadd.f32 %v2437_v37, %v4630_v53  ;;  %v3541_v53 = vadd.f32 %v4689_v32, %v4684_v19  ;;  %v5122_v19 = vld [vmem:[#allocation10_spill] sm:$0xff] }
 0x218   : > { %v4748_v0 = vpop.f32.mrf.mxu0  ;;  %v5136_v33 = vld [vmem:[#allocation22_spill] sm:$0xff]  ;;  %v4858_v37 = vadd.f32 %v5139_v16, %v5138_v5  ;;  %v2680_v5 = vld [vmem:[%s5083_s4 + $0x38] sm:$0xff]  ;;  %v2679_v16 = vld [vmem:[%s5083_s4 + $0x30] sm:$0xff] }
 0x219   : > { %5120 = vst [vmem:[#allocation26_spill] sm:$0xff] %v4748_v0  ;;  %v2349_v0 = vadd.f32 %v3562_v14, %v2188_v43  ;;  %v2320_v32 = vadd.f32 %v3541_v53, %v5122_v19  ;;  %v5132_v14 = vld [vmem:[#allocation7_spill] sm:$0xff]  ;;  %v2597_v53 = vld [vmem:[%s5082_s3 + $0x58] sm:$0xff]  ;;  %v2592_v19 = vld [vmem:[%s5082_s3 + $0x30] sm:$0xff] }
 0x21a   : > { %v4750_v9 = vpop.f32.mrf.mxu0 }
 0x21b   : > { %5121 = vst [vmem:[#allocation27_spill] sm:$0xff] %v4750_v9  ;;  %v4756_v9 = vadd.f32 %v3690_v3, %v4639_v34  ;;  %v4771_v34 = vadd.f32 %v2440_v45, %v4633_v7  ;;  %v3544_v7 = vadd.f32 %v4699_v60, %v4694_v48  ;;  %v5141_v3 = vld [vmem:[#allocation4_spill] sm:$0xff]  ;;  %v5142_v45 = vld [vmem:[#allocation23_spill] sm:$0xff] }
 0x21c   : > { %v3701_v21 = vpop.f32.mrf.mxu0  ;;  %v4864_v36 = vadd.f32 %v5142_v45, %v5141_v3  ;;  %v2678_v3 = vld [vmem:[%s5083_s4 + $0x28] sm:$0xff]  ;;  %v2677_v45 = vld [vmem:[%s5083_s4 + $0x20] sm:$0xff] }
 0x21d   : > { %v2325_v48 = vadd.f32 %v3544_v7, %v4672_v26  ;;  %v5123_v26 = vld [vmem:[#allocation2_spill] sm:$0xff]  ;;  %v2599_v7 = vld [vmem:[%s5082_s3 + $0x68] sm:$0xff] }
 0x21e   : > { %v2485_v35 = vpop.f32.mrf.mxu0 }
 0x220   : > { %v3702_v44 = vpop.f32.mrf.mxu0  ;;  %v5126_v8 = vld [vmem:[#allocation26_spill] sm:$0xff] }
 0x221   : > { %v4787_v51 = vadd.f32 %v3702_v44, %v2336_v20  ;;  %v4829_v15 = vadd.f32 %v5126_v8, %v2320_v32  ;;  %v5133_v44 = vld [vmem:[#allocation25_spill] sm:$0xff]  ;;  %v2600_v20 = vld [vmem:[%s5082_s3 + $0x70] sm:$0xff]  ;;  %v2591_v32 = vld [vmem:[%s5082_s3 + $0x28] sm:$0xff] }
 0x222   : > { %v2488_v39 = vpop.f32.mrf.mxu0  ;;  %v4846_v23 = vadd.f32 %v5133_v44, %v5132_v14  ;;  %v2586_v8 = vld [vmem:[%s5082_s3] sm:$0xff]  ;;  %v2684_v14 = vld [vmem:[%s5083_s4 + $0x58] sm:$0xff]  ;;  %v2683_v44 = vld [vmem:[%s5083_s4 + $0x50] sm:$0xff] }
 0x224   : > { %v3705_v46 = vpop.f32.mrf.mxu0 }
 0x225   : > { %v4758_v40 = vadd.f32 %v3705_v46, %v2349_v0  ;;  %v3547_v0 = vadd.f32 %v4710_v25, %v4702_v63  ;;  %v4819_v63 = vadd.f32 %v2485_v35, %v2325_v48  ;;  %v5128_v25 = vld [vmem:[#allocation8_spill] sm:$0xff]  ;;  %v5130_v46 = vld [vmem:[#allocation27_spill] sm:$0xff]  ;;  %v2594_v48 = vld [vmem:[%s5082_s3 + $0x40] sm:$0xff] }
 0x226   : > { %v2501_v42 = vpop.f32.mrf.mxu0  ;;  %v5143_v35 = vld [vmem:[#allocation11_spill] sm:$0xff] }
 0x227   : > { %v2328_v43 = vadd.f32 %v3547_v0, %v4677_v54  ;;  %v4813_v54 = vadd.f32 %v4734_v12, %v4621_v11  ;;  %v2317_v11 = vadd.f32 %v3538_v38, %v5125_v2  ;;  %v5137_v12 = vld [vmem:[#allocation16_spill] sm:$0xff]  ;;  %v5149_v0 = vmov 0.0   ;;  %v2595_v38 = vld [vmem:[%s5082_s3 + $0x48] sm:$0xff] }
 0x228   : > { %v3706_v31 = vpop.f32.mrf.mxu0  ;;  %v2588_v2 = vld [vmem:[%s5082_s3 + $0x10] sm:$0xff]  ;;  %3774 = vmatprep.mubr.msk.f32.mxu0 %vm4083_vm0, %v5149_v0 }
 0x229   : > { %v4753_v62 = vadd.f32 %v3706_v31, %v2352_v49  ;;  %v2341_v49 = vadd.f32 %v3556_v17, %v4692_v6  ;;  %v2333_v6 = vadd.f32 %v3550_v28, %v4682_v22  ;;  %v4802_v22 = vadd.f32 %v4730_v58, %v4624_v24  ;;  %v5134_v58 = vld [vmem:[#allocation18_spill] sm:$0xff]  ;;  %v5147_v28 = vld [vmem:[#allocation12_spill] sm:$0xff] }
 0x22a   : > { %v2504_v4 = vpop.f32.mrf.mxu0  ;;  %v4808_v60 = vadd.f32 %v2488_v39, %v2328_v43  ;;  %v3535_v24 = vadd.f32 %v4669_v1, %v4663_v29  ;;  %v5124_v39 = vld [vmem:[#allocation19_spill] sm:$0xff]  ;;  %v5127_v29 = vld [vmem:[#allocation24_spill] sm:$0xff]  ;;  %v5135_v17 = vld [vmem:[#allocation6_spill] sm:$0xff] }
 0x22b   : > { %3590 = vmatprep.subr.mxu1 %v4753_v62  ;;  %v4767_v31 = vadd.f32 %v2504_v4, %v2344_v56  ;;  %v4777_v50 = vadd.f32 %v2501_v42, %v2341_v49  ;;  %v4796_v42 = vadd.f32 %v3701_v21, %v2333_v6  ;;  %v4824_v47 = vadd.f32 %v5124_v39, %v5123_v26  ;;  %v2601_v56 = vld [vmem:[%s5082_s3 + $0x78] sm:$0xff]  ;;  %v2598_v6 = vld [vmem:[%s5082_s3 + $0x60] sm:$0xff]  ;;  %v2596_v43 = vld [vmem:[%s5082_s3 + $0x50] sm:$0xff] }
 0x22c   : > { %3591 = vmatpush3.msra.mxu1 %v4756_v9  ;;  %v4834_v1 = vadd.f32 %v5127_v29, %v2317_v11  ;;  %v2312_v41 = vadd.f32 %v3535_v24, %v5128_v25  ;;  %v4852_v57 = vadd.f32 %v5136_v33, %v5135_v17  ;;  %v4870_v4 = vadd.f32 %v5145_v52, %v5144_v18  ;;  %v2593_v24 = vld [vmem:[%s5082_s3 + $0x38] sm:$0xff]  ;;  %v2590_v26 = vld [vmem:[%s5082_s3 + $0x20] sm:$0xff]  ;;  %v2587_v11 = vld [vmem:[%s5082_s3 + $0x8] sm:$0xff] }
 0x22d   : > { %3592 = vmatprep.subr.mxu1 %v4758_v40  ;;  %v5148_v49 = vmov 0.00390625   ;;  %v2589_v39 = vld [vmem:[%s5082_s3 + $0x18] sm:$0xff]  ;;  %v2687_v25 = vld [vmem:[%s5083_s4 + $0x70] sm:$0xff]  ;;  %v2682_v17 = vld [vmem:[%s5083_s4 + $0x48] sm:$0xff] }
 0x22e   : > { %3593 = vmatpush3.msra.mxu1 %v4763_v13  ;;  %v4840_v21 = vadd.f32 %v5130_v46, %v2312_v41  ;;  %v2688_v29 = vld [vmem:[%s5083_s4 + $0x78] sm:$0xff]  ;;  %v2686_v41 = vld [vmem:[%s5083_s4 + $0x68] sm:$0xff]  ;;  %v2685_v46 = vld [vmem:[%s5083_s4 + $0x60] sm:$0xff] }
 0x22f   : > { %3594 = vmatprep.subr.mxu1 %v4767_v31  ;;  %3743 = vmatpush3.msra.mxu0 %v2688_v29  ;;  %v2681_v33 = vld [vmem:[%s5083_s4 + $0x40] sm:$0xff]  ;;  %v2676_v18 = vld [vmem:[%s5083_s4 + $0x18] sm:$0xff]  ;;  %v2675_v52 = vld [vmem:[%s5083_s4 + $0x10] sm:$0xff] }
 0x230   : > { %3595 = vmatpush3.msra.mxu1 %v4771_v34  ;;  %3744 = vmatprep.subr.mxu0 %v5149_v0 }
 0x231   : > { %3596 = vmatprep.subr.mxu1 %v4777_v50  ;;  %3745 = vmatpush3.msra.mxu0 %v2687_v25 }
 0x232   : > { %3597 = vmatpush3.msra.mxu1 %v4781_v59  ;;  %3746 = vmatprep.subr.mxu0 %v5149_v0 }
 0x233   : > { %3598 = vmatprep.subr.mxu1 %v4787_v51  ;;  %3747 = vmatpush3.msra.mxu0 %v2686_v41 }
 0x234   : > { %3599 = vmatpush3.msra.mxu1 %v4791_v30  ;;  %3748 = vmatprep.subr.mxu0 %v5149_v0 }
 0x235   : > { %3600 = vmatprep.subr.mxu1 %v4796_v42  ;;  %3749 = vmatpush3.msra.mxu0 %v2685_v46 }
 0x236   : > { %3601 = vmatpush3.msra.mxu1 %v4802_v22  ;;  %3750 = vmatprep.subr.mxu0 %v5149_v0 }
 0x237   : > { %3602 = vmatprep.subr.mxu1 %v4808_v60  ;;  %3751 = vmatpush3.msra.mxu0 %v2684_v14 }
 0x238   : > { %3603 = vmatpush3.msra.mxu1 %v4813_v54  ;;  %3752 = vmatprep.subr.mxu0 %v5149_v0 }
 0x239   : > { %3604 = vmatprep.subr.mxu1 %v4819_v63  ;;  %3753 = vmatpush3.msra.mxu0 %v2683_v44 }
 0x23a   : > { %3605 = vmatpush3.msra.mxu1 %v4824_v47  ;;  %3754 = vmatprep.subr.mxu0 %v5149_v0 }
 0x23b   : > { %3606 = vmatprep.subr.mxu1 %v4829_v15  ;;  %3755 = vmatpush3.msra.mxu0 %v2682_v17 }
 0x23c   : > { %3607 = vmatpush3.msra.mxu1 %v5129_v27  ;;  %3756 = vmatprep.subr.mxu0 %v5149_v0 }
 0x23d   : > { %3608 = vmatprep.subr.mxu1 %v4834_v1  ;;  %3757 = vmatpush3.msra.mxu0 %v2681_v33 }
 0x23e   : > { %3609 = vmatpush3.msra.mxu1 %v5131_v10  ;;  %3758 = vmatprep.subr.mxu0 %v5149_v0 }
 0x23f   : > { %3610 = vmatprep.subr.mxu1 %v4840_v21  ;;  %3759 = vmatpush3.msra.mxu0 %v2680_v5 }
 0x240   : > { %3611 = vmatpush3.msra.mxu1 %v5134_v58  ;;  %3760 = vmatprep.subr.mxu0 %v5149_v0 }
 0x241   : > { %3612 = vmatprep.subr.mxu1 %v4846_v23  ;;  %3761 = vmatpush3.msra.mxu0 %v2679_v16 }
 0x242   : > { %3613 = vmatpush3.msra.mxu1 %v5137_v12  ;;  %3762 = vmatprep.subr.mxu0 %v5149_v0 }
 0x243   : > { %3614 = vmatprep.subr.mxu1 %v4852_v57  ;;  %3763 = vmatpush3.msra.mxu0 %v2678_v3 }
 0x244   : > { %3615 = vmatpush3.msra.mxu1 %v5140_v61  ;;  %3764 = vmatprep.subr.mxu0 %v5149_v0 }
 0x245   : > { %3616 = vmatprep.subr.mxu1 %v4858_v37  ;;  %3765 = vmatpush3.msra.mxu0 %v2677_v45 }
 0x246   : > { %3617 = vmatpush3.msra.mxu1 %v5143_v35  ;;  %3766 = vmatprep.subr.mxu0 %v5149_v0 }
 0x247   : > { %3618 = vmatprep.subr.mxu1 %v4864_v36  ;;  %3767 = vmatpush3.msra.mxu0 %v2676_v18 }
 0x248   : > { %3619 = vmatpush3.msra.mxu1 %v5146_v55  ;;  %3768 = vmatprep.subr.mxu0 %v5149_v0 }
 0x249   : > { %3620 = vmatprep.subr.mxu1 %v4870_v4  ;;  %3769 = vmatpush3.msra.mxu0 %v2675_v52 }
 0x24a   : > { %3621 = vmatpush3.msra.mxu1 %v5147_v28  ;;  %3770 = vmatprep.subr.mxu0 %v5149_v0 }
 0x24b   : > { %2581 = vmatmul.mubr.f32.vlgmr.msra.gmra.mxu1 %v5148_v49  ;;  %3707 = vmatprep.subr.mxu1 %v5149_v0 }
 0x24c   : > { %3708 = vmatpush3.msra.mxu1 %v2601_v56  ;;  %3739 = vmatprep.mubr.msk.f32.mxu1 %vm4083_vm0, %v5149_v0 }
 0x24d   : > { %3709 = vmatprep.subr.mxu1 %v5149_v0 }
 0x24e   : > { %3710 = vmatpush3.msra.mxu1 %v2600_v20 }
 0x24f   : > { %3711 = vmatprep.subr.mxu1 %v5149_v0 }
 0x250   : > { %3712 = vmatpush3.msra.mxu1 %v2599_v7  ;;  %v2674_v7 = vld [vmem:[%s5083_s4 + $0x8] sm:$0xff] }
 0x251   : > { %3713 = vmatprep.subr.mxu1 %v5149_v0  ;;  %3771 = vmatpush3.msra.mxu0 %v2674_v7 }
 0x252   : > { %3714 = vmatpush3.msra.mxu1 %v2598_v6  ;;  %v2673_v6 = vld [vmem:[%s5083_s4] sm:$0xff]  ;;  %3772 = vmatprep.subr.mxu0 %v5149_v0 }
 0x253   : > { %3715 = vmatprep.subr.mxu1 %v5149_v0  ;;  %3773 = vmatpush3.msra.mxu0 %v2673_v6 }
 0x254   : > { %3716 = vmatpush3.msra.mxu1 %v2597_v53 }
 0x255   : > { %3717 = vmatprep.subr.mxu1 %v5149_v0 }
 0x256   : > { %3718 = vmatpush3.msra.mxu1 %v2596_v43 }
 0x257   : > { %3719 = vmatprep.subr.mxu1 %v5149_v0 }
 0x258   : > { %3720 = vmatpush3.msra.mxu1 %v2595_v38 }
 0x259   : > { %3721 = vmatprep.subr.mxu1 %v5149_v0 }
 0x25a   : > { %3722 = vmatpush3.msra.mxu1 %v2594_v48 }
 0x25b   : > { %3723 = vmatprep.subr.mxu1 %v5149_v0 }
 0x25c   : > { %3724 = vmatpush3.msra.mxu1 %v2593_v24 }
 0x25d   : > { %3725 = vmatprep.subr.mxu1 %v5149_v0 }
 0x25e   : > { %3726 = vmatpush3.msra.mxu1 %v2592_v19 }
 0x25f   : > { %3727 = vmatprep.subr.mxu1 %v5149_v0 }
 0x260   : > { %3728 = vmatpush3.msra.mxu1 %v2591_v32 }
 0x261   : > { %3729 = vmatprep.subr.mxu1 %v5149_v0 }
 0x262   : > { %3730 = vmatpush3.msra.mxu1 %v2590_v26 }
 0x263   : > { %3731 = vmatprep.subr.mxu1 %v5149_v0 }
 0x264   : > { %3732 = vmatpush3.msra.mxu1 %v2589_v39  ;;  %v2765_v39 = vlaneseq }
 0x265   : > { %3733 = vmatprep.subr.mxu1 %v5149_v0 }
 0x266   : > { %3734 = vmatpush3.msra.mxu1 %v2588_v2  ;;  %v2766_v2 = vshrl.u32 %v2765_v39, 7 }
 0x267   : > { %3735 = vmatprep.subr.mxu1 %v5149_v0 }
 0x268   : > { %3736 = vmatpush3.msra.mxu1 %v2587_v11  ;;  %v2767_v11 = vsub.s32 0, %v2766_v2 }
 0x269   : > { %3737 = vmatprep.subr.mxu1 %v5149_v0 }
 0x26a   : > { %3738 = vmatpush3.msra.mxu1 %v2586_v8 }
 0x30b   : > { %v3622_v56 = vpop.f32.mrf.mxu1 }
 0x30d   : > { %v3623_v49 = vpop.f32.mrf.mxu1 }
 0x30e   : > { %v3624_v20 = vadd.f32 %v3623_v49, %v3622_v56 }
 0x310   : > { %3740 = vmatmul.mubr.f32.vlgmr.msra.gmra.mxu1 %v3624_v20 }
 0x3d0   : > { %v2668_v53 = vpop.f32.mrf.mxu1 }
 0x3d1   : > { %v2672_v43 = vmax.f32 %v2668_v53, 0.0 }
 0x3d2   : > { %v3741_v38 = vpop.f32.mrf.mxu1 }
 0x3d3   : > { %3775 = vmatmul.mubr.f32.vlgmr.msra.gmra.mxu0 %v2672_v43 }
 0x493   : > { %v2755_v48 = vpop.f32.mrf.mxu0 }
 0x494   : > { %v3115_v24 = vmul.f32 -1.442695, %v2755_v48 }
 0x495   : > { %v3776_v19 = vpop.f32.mrf.mxu0 }
 0x496   : > { %4069 = vpow2.f32 %v3115_v24 }
 0x4a3   : > { %v4070_v32 = vpop.eup %4069 }
 0x4a4   : > { %v2762_v26 = vadd.f32 1.0, %v4070_v32 }
 0x4a6   : > { %4071 = vrcp.f32 %v2762_v26 }
 0x4b3   : > { %v4072_v8 = vpop.eup %4071 }
 0x4b4   : > { %v2768_v29 = vrot.slane %v4072_v8, %v2767_v11 }
 0x4b6   : > { %v2769_v0 = vmul.f32 %v2768_v29, %v5147_v28  ;;  %v2770_v25 = vmul.f32 %v2768_v29, %v5146_v55  ;;  %v2771_v41 = vmul.f32 %v2768_v29, %v5143_v35  ;;  %v2772_v46 = vmul.f32 %v2768_v29, %v5140_v61 }
 0x4b7   : > { %v2773_v14 = vmul.f32 %v2768_v29, %v5137_v12  ;;  %v2774_v44 = vmul.f32 %v2768_v29, %v5134_v58  ;;  %v2775_v17 = vmul.f32 %v2768_v29, %v5131_v10  ;;  %v2776_v33 = vmul.f32 %v2768_v29, %v5129_v27 }
 0x4b8   : > { %v2777_v28 = vmul.f32 %v2768_v29, %v4824_v47  ;;  %v2778_v55 = vmul.f32 %v2768_v29, %v4813_v54  ;;  %v2779_v35 = vmul.f32 %v2768_v29, %v4802_v22  ;;  %v2780_v61 = vmul.f32 %v2768_v29, %v4791_v30  ;;  %2801 = vst [vmem:[%s5010_s19] sm:$0xff] %v2769_v0 }
 0x4b9   : > { %2802 = vst [vmem:[%s5010_s19 + $0x8] sm:$0xff] %v2770_v25  ;;  %2803 = vst [vmem:[%s5010_s19 + $0x10] sm:$0xff] %v2771_v41  ;;  %v2781_v10 = vmul.f32 %v2768_v29, %v4781_v59  ;;  %v2782_v27 = vmul.f32 %v2768_v29, %v4771_v34  ;;  %v2783_v47 = vmul.f32 %v2768_v29, %v4763_v13 }
 0x4ba   : > { %2804 = vst [vmem:[%s5010_s19 + $0x18] sm:$0xff] %v2772_v46  ;;  %v2784_v54 = vmul.f32 %v2768_v29, %v4756_v9  ;;  %2805 = vst [vmem:[%s5010_s19 + $0x20] sm:$0xff] %v2773_v14  ;;  %v2785_v30 = vmul.f32 %v2768_v29, %v4870_v4  ;;  %v2786_v22 = vmul.f32 %v2768_v29, %v4864_v36 }
 0x4bb   : > { %2806 = vst [vmem:[%s5010_s19 + $0x28] sm:$0xff] %v2774_v44  ;;  %2807 = vst [vmem:[%s5010_s19 + $0x30] sm:$0xff] %v2775_v17  ;;  %v2787_v59 = vmul.f32 %v2768_v29, %v4858_v37  ;;  %v2788_v34 = vmul.f32 %v2768_v29, %v4852_v57  ;;  %v2789_v9 = vmul.f32 %v2768_v29, %v4846_v23 }
 0x4bc   : > { %2808 = vst [vmem:[%s5010_s19 + $0x38] sm:$0xff] %v2776_v33  ;;  %2809 = vst [vmem:[%s5010_s19 + $0x40] sm:$0xff] %v2777_v28  ;;  %v2790_v13 = vmul.f32 %v2768_v29, %v4840_v21  ;;  %v2791_v58 = vmul.f32 %v2768_v29, %v4834_v1  ;;  %v2792_v12 = vmul.f32 %v2768_v29, %v4829_v15 }
 0x4bd   : > { %2810 = vst [vmem:[%s5010_s19 + $0x48] sm:$0xff] %v2778_v55  ;;  %2811 = vst [vmem:[%s5010_s19 + $0x50] sm:$0xff] %v2779_v35  ;;  %v2793_v57 = vmul.f32 %v2768_v29, %v4819_v63  ;;  %v2794_v37 = vmul.f32 %v2768_v29, %v4808_v60  ;;  %v2795_v21 = vmul.f32 %v2768_v29, %v4796_v42 }
 0x4be   : > { %2812 = vst [vmem:[%s5010_s19 + $0x58] sm:$0xff] %v2780_v61  ;;  %2813 = vst [vmem:[%s5010_s19 + $0x60] sm:$0xff] %v2781_v10  ;;  %v2796_v1 = vmul.f32 %v2768_v29, %v4787_v51  ;;  %v2797_v63 = vmul.f32 %v2768_v29, %v4777_v50  ;;  %v2798_v15 = vmul.f32 %v2768_v29, %v4767_v31 }
 0x4bf   : > { %2814 = vst [vmem:[%s5010_s19 + $0x68] sm:$0xff] %v2782_v27  ;;  %2815 = vst [vmem:[%s5010_s19 + $0x70] sm:$0xff] %v2783_v47  ;;  %v2799_v60 = vmul.f32 %v2768_v29, %v4758_v40  ;;  %v2800_v42 = vmul.f32 %v2768_v29, %v4753_v62 }
 0x4c0   : > { %2816 = vst [vmem:[%s5010_s19 + $0x78] sm:$0xff] %v2784_v54  ;;  %2817 = vst [vmem:[%s5010_s19 + $0x80] sm:$0xff] %v2785_v30 }
 0x4c1   : > { %2818 = vst [vmem:[%s5010_s19 + $0x88] sm:$0xff] %v2786_v22  ;;  %2819 = vst [vmem:[%s5010_s19 + $0x90] sm:$0xff] %v2787_v59 }
 0x4c2   : > { %2820 = vst [vmem:[%s5010_s19 + $0x98] sm:$0xff] %v2788_v34  ;;  %2821 = vst [vmem:[%s5010_s19 + $0xa0] sm:$0xff] %v2789_v9 }
 0x4c3   : > { %2822 = vst [vmem:[%s5010_s19 + $0xa8] sm:$0xff] %v2790_v13  ;;  %2823 = vst [vmem:[%s5010_s19 + $0xb0] sm:$0xff] %v2791_v58 }
 0x4c4   : > { %2824 = vst [vmem:[%s5010_s19 + $0xb8] sm:$0xff] %v2792_v12  ;;  %2825 = vst [vmem:[%s5010_s19 + $0xc0] sm:$0xff] %v2793_v57 }
 0x4c5   : > { %2826 = vst [vmem:[%s5010_s19 + $0xc8] sm:$0xff] %v2794_v37  ;;  %2827 = vst [vmem:[%s5010_s19 + $0xd0] sm:$0xff] %v2795_v21 }
 0x4c6   : > { %2828 = vst [vmem:[%s5010_s19 + $0xd8] sm:$0xff] %v2796_v1  ;;  %2829 = vst [vmem:[%s5010_s19 + $0xe0] sm:$0xff] %v2797_v63 }
 0x4c7   : > { %2830 = vst [vmem:[%s5010_s19 + $0xe8] sm:$0xff] %v2798_v15  ;;  %2831 = vst [vmem:[%s5010_s19 + $0xf0] sm:$0xff] %v2799_v60 }
 0x4c8   : > { %2832 = vst [vmem:[%s5010_s19 + $0xf8] sm:$0xff] %v2800_v42 }
 0x4c9 PF: > { %s15_s18 = sadd.s32 1, %s4079_s18  }
 0x4ca   : > { %p12_p4 = scmp.ge.s32.totalorder %s15_s18, 4  }
 0x4cc   :  { %14 = sbr.rel (!%p12_p4) target bundleno = 1 (0x1), region = 70 }

</bundles_post_ra>
